<compile_context>
chip_gen: v6e
topology: v6e:2x2x1
jax: 0.10.0
libtpu: 0.0.40
codegen_flags: <defaults>
</compile_context>

<pallas_src>
import functools

import jax
import jax.numpy as jnp
from jax.experimental import pallas as pl
from jax.experimental.pallas import tpu as pltpu


# ----------------------------------------------------------------------------
# Fused GCN-frontend Pallas kernel (BN0 folded + 3 Graph_Conv_Blocks)
# ----------------------------------------------------------------------------
def _gcn_block_body(x_f32, x_bf16, refs, hpad_ref, NV, M, K, cout,
                    identity_res):
    """One Graph_Conv_Block on the whole stacked batch (rows ordered (t,n,v)).

    refs (identity residual):  gcn_w (K,Cin,Cout) bf16, at_cat (M,K*M) bf16,
                               bn1s (1,Cout), sh1_full (M,Cout) f32,
                               tcn_w (5,Cout,Cout) bf16, bn2s, bn2b (1,Cout)
    refs (conv residual): ... + res_w (Cin,Cout) bf16, res_b (1,Cout) f32
    """
    if identity_res:
        gcn_w, at_cat, bn1s, sh1_full, tcn_w, bn2s, bn2b = refs
        res = x_f32
    else:
        (gcn_w, at_cat, bn1s, sh1_full, tcn_w, bn2s, bn2b,
         res_w, res_b) = refs
        res = jnp.dot(x_bf16, res_w[...],
                      preferred_element_type=jnp.float32) + res_b[...]

    # Spatial 1x1 conv + aggregation over the K partitions fused into one wide
    # MXU matmul:  agg = [at_0 | at_1 | at_2] @ [y_0; y_1; y_2].
    ys = [jnp.dot(x_bf16, gcn_w[k],
                  preferred_element_type=jnp.float32).astype(jnp.bfloat16)
          for k in range(K)]
    ystack = jnp.concatenate(ys, axis=0)                     # (K*M, Cout) bf16
    agg = jnp.dot(at_cat[...], ystack,
                  preferred_element_type=jnp.float32)        # (M, Cout) f32

    # BN1 (eval).  The gcn conv bias is pre-folded through the aggregation
    # operator into the per-row shift sh1_full.
    h = jnp.maximum(agg * bn1s[...] + sh1_full[...], 0.0)

    # Temporal (5,1) conv, pad 2 along time: rows are (t, n, v) so a time
    # shift of dt is a uniform row shift of dt*NV on the padded scratch.
    # Pad rows were zeroed once at kernel entry and are never written again.
    hpad_ref[pl.ds(2 * NV, M), :] = h.astype(jnp.bfloat16)
    acc = jnp.dot(hpad_ref[pl.ds(0, M), :], tcn_w[0],
                  preferred_element_type=jnp.float32)
    for dt in range(1, 5):
        acc = acc + jnp.dot(hpad_ref[pl.ds(dt * NV, M), :], tcn_w[dt],
                            preferred_element_type=jnp.float32)

    # BN2 (conv bias folded into shift) + residual + ReLU (dropout = eval id).
    return jnp.maximum(acc * bn2s[...] + bn2b[...] + res, 0.0)


def _gcn_frontend_kernel(M, NV, K, cout, nrefs_per_block, *args):
    x_ref = args[0]
    blocks = []
    i = 1
    for nb in nrefs_per_block:
        blocks.append(args[i:i + nb])
        i += nb
    o_ref = args[i]
    hpad_ref = args[i + 1]

    # Zero ONLY the temporal pad rows, once (they are never overwritten).
    zpad = jnp.zeros((2 * NV, cout), jnp.bfloat16)
    hpad_ref[pl.ds(0, 2 * NV), :] = zpad
    hpad_ref[pl.ds(2 * NV + M, 2 * NV), :] = zpad

    xv = x_ref[...]
    x_bf16 = xv.astype(jnp.bfloat16)
    h1 = _gcn_block_body(xv, x_bf16, blocks[0], hpad_ref, NV, M, K, cout,
                         identity_res=False)
    h2 = _gcn_block_body(h1, h1.astype(jnp.bfloat16), blocks[1], hpad_ref,
                         NV, M, K, cout, identity_res=True)
    h3 = _gcn_block_body(h2, h2.astype(jnp.bfloat16), blocks[2], hpad_ref,
                         NV, M, K, cout, identity_res=True)
    o_ref[...] = h3


def gcn_frontend(x_rows, block_ops, NV, M, K, cout):
    """x_rows: (T*N*V, Cin) rows ordered (t,n,v).  Returns (T*N*V, Cout)."""
    nrefs = tuple(len(ops) for ops in block_ops)
    all_ops = [op for ops in block_ops for op in ops]

    in_specs = [pl.BlockSpec(x_rows.shape, lambda i: (0, 0))]
    for op in all_ops:
        in_specs.append(
            pl.BlockSpec(op.shape, lambda i, _nd=op.ndim: (0,) * _nd))

    kernel = functools.partial(_gcn_frontend_kernel, M, NV, K, cout, nrefs)
    return pl.pallas_call(
        kernel,
        out_shape=jax.ShapeDtypeStruct((M, cout), jnp.float32),
        grid=(1,),
        in_specs=in_specs,
        out_specs=pl.BlockSpec((M, cout), lambda i: (0, 0)),
        scratch_shapes=[pltpu.VMEM((M + 4 * NV, cout), jnp.bfloat16)],
        compiler_params=pltpu.CompilerParams(
            dimension_semantics=("arbitrary",)),
    )(x_rows, *all_ops)


# ----------------------------------------------------------------------------
# Fused 3-head Seq2Seq Pallas kernel (2-layer GRU encoder + AR decoder)
# ----------------------------------------------------------------------------
def _seq2seq_kernel(T, B, G, H, pred_len,
                    feat_ref, lastpos_ref,
                    ewi0, ebi0, ewh0, ebh0, ewi1, ebi1, ewh1, ebh1,
                    dwi0, dbi0, dwh0, dbh0, dwi1, dbi1, dwh1, dbh1,
                    o_ref):
    """All three heads at once.  Gates packed along lanes: column index is
    gate*G + head*H + j (gate order r, z, n as in PyTorch GRU).  Hidden state
    is (B, G) head-major.  G = num_heads * H."""

    def cell(gi, gh, h):
        r = jax.nn.sigmoid(gi[:, :G] + gh[:, :G])
        z = jax.nn.sigmoid(gi[:, G:2 * G] + gh[:, G:2 * G])
        n = jnp.tanh(gi[:, 2 * G:] + r * gh[:, 2 * G:])   # b_hn inside r*(.)
        return (1.0 - z) * n + z * h

    # Hoist all (tiny) weight loads out of the unrolled time loops.
    wh0, bh0 = ewh0[...], ebh0[...]
    wi1, bi1, wh1, bh1 = ewi1[...], ebi1[...], ewh1[...], ebh1[...]
    vi0, ci0, vh0, ch0 = dwi0[...], dbi0[...], dwh0[...], dbh0[...]
    vi1, ci1, vh1, ch1 = dwi1[...], dbi1[...], dwh1[...], dbh1[...]

    # Encoder layer-0 input projection for ALL time steps in one matmul.
    gi0_all = jnp.dot(feat_ref[...], ewi0[...],
                      preferred_element_type=jnp.float32) + ebi0[...]

    h0 = jnp.zeros((B, G), jnp.float32)
    h1 = jnp.zeros((B, G), jnp.float32)
    for t in range(T):
        gi = gi0_all[t * B:(t + 1) * B, :]
        h0 = cell(gi, jnp.dot(h0, wh0,
                              preferred_element_type=jnp.float32) + bh0, h0)
        gi1 = jnp.dot(h0, wi1, preferred_element_type=jnp.float32) + bi1
        h1 = cell(gi1, jnp.dot(h1, wh1,
                               preferred_element_type=jnp.float32) + bh1, h1)

    # Decoder: autoregressive, teacher_forcing_ratio = 0 (no teacher input).
    x_in = lastpos_ref[...]                       # (B, G) head-major
    d0, d1 = h0, h1
    for s in range(pred_len):
        gi = jnp.dot(x_in, vi0, preferred_element_type=jnp.float32) + ci0
        d0 = cell(gi, jnp.dot(d0, vh0,
                              preferred_element_type=jnp.float32) + ch0, d0)
        gi1 = jnp.dot(d0, vi1, preferred_element_type=jnp.float32) + ci1
        d1 = cell(gi1, jnp.dot(d1, vh1,
                               preferred_element_type=jnp.float32) + ch1, d1)
        x_in = d1 + x_in                          # now_out per head
        # Mean over the 3 heads (car/human/bike) for this step.
        o_ref[pl.ds(s * B, B), :] = (x_in[:, 0:H] + x_in[:, H:2 * H]
                                     + x_in[:, 2 * H:3 * H]) * (1.0 / 3.0)


def seq2seq_heads(feat_rows, last_pos6, ops, T, B, G, H, pred_len):
    in_specs = [pl.BlockSpec(feat_rows.shape, lambda i: (0, 0)),
                pl.BlockSpec(last_pos6.shape, lambda i: (0, 0))]
    for op in ops:
        in_specs.append(pl.BlockSpec(op.shape, lambda i: (0, 0)))
    kernel = functools.partial(_seq2seq_kernel, T, B, G, H, pred_len)
    return pl.pallas_call(
        kernel,
        out_shape=jax.ShapeDtypeStruct((pred_len * B, H), jnp.float32),
        grid=(1,),
        in_specs=in_specs,
        out_specs=pl.BlockSpec((pred_len * B, H), lambda i: (0, 0)),
        compiler_params=pltpu.CompilerParams(
            dimension_semantics=("arbitrary",)),
    )(feat_rows, last_pos6, *ops)


# ----------------------------------------------------------------------------
# Parameter initialization (deterministic, synthetic)
# ----------------------------------------------------------------------------
def _normal(key, shape, scale=0.1):
    return scale * jax.random.normal(key, shape, dtype=jnp.float32)


def init_bn(key, c):
    k1, k2, k3, k4 = jax.random.split(key, 4)
    return {"gamma": 1.0 + _normal(k1, (c,)),
            "beta": _normal(k2, (c,)),
            "mean": _normal(k3, (c,)),
            "var": 1.0 + 0.1 * jnp.abs(jax.random.normal(k4, (c,)))}


def bn_scale_shift(p, eps=1e-5):
    scale = p["gamma"] / jnp.sqrt(p["var"] + eps)
    shift = p["beta"] - p["mean"] * scale
    return scale, shift


def init_block(key, cin, cout, K, residual_conv):
    ks = jax.random.split(key, 9)
    p = {"gcn_w": _normal(ks[0], (K * cout, cin)),   # Conv2d(cin, K*cout, 1)
         "gcn_b": _normal(ks[1], (K * cout,)),
         "bn1": init_bn(ks[2], cout),
         "tcn_w": _normal(ks[3], (cout, cout, 5)),   # Conv2d(cout, cout, (5,1))
         "tcn_b": _normal(ks[4], (cout,)),
         "bn2": init_bn(ks[5], cout)}
    if residual_conv:
        p["res_w"] = _normal(ks[6], (cout, cin))     # Conv2d(cin, cout, 1)
        p["res_b"] = _normal(ks[7], (cout,))
        p["res_bn"] = init_bn(ks[8], cout)
    return p


def init_gru_layer(key, in_size, hidden):
    k = jax.random.split(key, 4)
    return {"w_ih": _normal(k[0], (3 * hidden, in_size)),
            "w_hh": _normal(k[1], (3 * hidden, hidden)),
            "b_ih": _normal(k[2], (3 * hidden,)),
            "b_hh": _normal(k[3], (3 * hidden,))}


def init_seq2seq(key, input_size=64, hidden=2):
    k = jax.random.split(key, 4)
    return {"enc": [init_gru_layer(k[0], input_size, hidden),
                    init_gru_layer(k[1], hidden, hidden)],
            "dec": [init_gru_layer(k[2], hidden, hidden),
                    init_gru_layer(k[3], hidden, hidden)]}


def init_params(key, c_in, K, V):
    ks = jax.random.split(key, 7)
    return {"bn0": init_bn(ks[0], c_in),
            "block1": init_block(ks[1], c_in, 64, K, residual_conv=True),
            "block2": init_block(ks[2], 64, 64, K, residual_conv=False),
            "block3": init_block(ks[3], 64, 64, K, residual_conv=False),
            # torch.ones(A.shape) edge-importance weights; element 0 pairs with
            # the BatchNorm layer in the reference and is intentionally unused.
            "edge_imp": [jnp.ones((K, V, V), jnp.float32) for _ in range(4)],
            "car": init_seq2seq(ks[4]),
            "human": init_seq2seq(ks[5]),
            "bike": init_seq2seq(ks[6])}


# ----------------------------------------------------------------------------
# Frontend operand preparation (BN folding, bf16 casts, fused operators)
# ----------------------------------------------------------------------------
def _time_block_diag(a_kvw, TN):
    """(K, V, V) -> (K, TN*V, TN*V): kron(I_TN, A_k^T)."""
    K, V, _ = a_kvw.shape
    eye = jnp.eye(TN, dtype=a_kvw.dtype)
    m = a_kvw.transpose(0, 2, 1)                              # m[k,w,v]=a[k,v,w]
    return jnp.einsum('ts,kab->ktasb', eye, m).reshape(K, TN * V, TN * V)


def prep_block_ops(p, A_eff, TN, V, K, cout, residual_identity,
                   in_scale=None, in_shift=None):
    """Kernel operands for one Graph_Conv_Block (optionally folds an input-side
    BatchNorm into the 1x1-conv and residual-conv weights)."""
    cin = p["gcn_w"].shape[1]
    M = TN * V
    W = p["gcn_w"].reshape(K, cout, cin).transpose(0, 2, 1)   # (K, cin, cout)
    b = p["gcn_b"].reshape(K, cout)
    if in_scale is not None:
        b = b + jnp.einsum('c,kcd->kd', in_shift, W)
        W = W * in_scale[None, :, None]

    s1, sh1 = bn_scale_shift(p["bn1"])
    s2, sh2 = bn_scale_shift(p["bn2"])
    sh2 = sh2 + p["tcn_b"] * s2                               # fold conv bias

    # kron(I_TN, A_k^T) operators concatenated along columns (k-major).
    at = _time_block_diag(A_eff, TN)                          # (K, M, M)
    at_cat = at.transpose(1, 0, 2).reshape(M, K * M)          # (M, K*M)

    # Fold the gcn conv bias through the aggregation into a per-row BN1 shift.
    colsum = jnp.sum(A_eff, axis=1)                           # (K, V)
    bias_vc = jnp.einsum('kw,kc->wc', colsum, b)              # (V, cout)
    sh1_full = jnp.tile(bias_vc, (TN, 1)) * s1[None, :] + sh1[None, :]

    ops = [W.astype(jnp.bfloat16),
           at_cat.astype(jnp.bfloat16),
           s1.reshape(1, cout),
           sh1_full,                                          # (M, cout) f32
           p["tcn_w"].transpose(2, 1, 0).astype(jnp.bfloat16),  # (5, ci, co)
           s2.reshape(1, cout), sh2.reshape(1, cout)]

    if not residual_identity:
        rs, rsh = bn_scale_shift(p["res_bn"])
        Wr = p["res_w"].T * rs[None, :]                       # (cin, cout)
        br = p["res_b"] * rs + rsh
        if in_scale is not None:
            br = br + in_shift @ Wr
            Wr = Wr * in_scale[:, None]
        ops += [Wr.astype(jnp.bfloat16), br.reshape(1, cout)]
    return ops


# ----------------------------------------------------------------------------
# Seq2Seq operand preparation: pack the 3 heads gate-major along lanes
# ----------------------------------------------------------------------------
def prep_seq2seq_ops(head_params, hidden=2):
    Hn = len(head_params)
    H = hidden
    G = Hn * H

    def dense(ws):      # ws[h]: (3H, in) -> (in, 3G)
        cols = [ws[h][g * H + j, :]
                for g in range(3) for h in range(Hn) for j in range(H)]
        return jnp.stack(cols, axis=1)

    def bias(bs):       # bs[h]: (3H,) -> (1, 3G)
        vals = [bs[h][g * H + j]
                for g in range(3) for h in range(Hn) for j in range(H)]
        return jnp.stack(vals).reshape(1, 3 * G)

    def blockdiag(ws):  # ws[h]: (3H, H) acting on head-h's block of (B, G)
        out = jnp.zeros((G, 3 * G), jnp.float32)
        for g in range(3):
            for h in range(Hn):
                blk = ws[h][g * H:(g + 1) * H, :].T           # (H, H)
                out = out.at[h * H:(h + 1) * H,
                             g * G + h * H:g * G + (h + 1) * H].set(blk)
        return out

    ops = []
    l0 = [hp["enc"][0] for hp in head_params]                 # dense 64 -> H
    ops += [dense([p["w_ih"] for p in l0]), bias([p["b_ih"] for p in l0]),
            blockdiag([p["w_hh"] for p in l0]), bias([p["b_hh"] for p in l0])]
    for sel, idx in (("enc", 1), ("dec", 0), ("dec", 1)):
        l = [hp[sel][idx] for hp in head_params]
        ops += [blockdiag([p["w_ih"] for p in l]),
                bias([p["b_ih"] for p in l]),
                blockdiag([p["w_hh"] for p in l]),
                bias([p["b_hh"] for p in l])]
    return ops


# ----------------------------------------------------------------------------
# Model forward
# ----------------------------------------------------------------------------
def model_forward(params, pra_x, pra_A, pred_length):
    """pra_x: (N, C, T, V); pra_A: (K, V, V).  Returns (N, 2, pred_length, V)."""
    N, C, T, V = pra_x.shape
    K = pra_A.shape[0]
    cout = 64
    NV = N * V
    M = T * NV

    # Rows ordered (t, n, v), channel-last: (T*N*V, C).
    x_rows = jnp.transpose(pra_x, (2, 0, 3, 1)).reshape(M, C)

    # st_gcn_networks[0] = BatchNorm2d(in_channels) (eval) is folded into
    # block1's 1x1-conv and residual-conv weights — no separate kernel launch.
    s0, sh0 = bn_scale_shift(params["bn0"])
    b1 = prep_block_ops(params["block1"], pra_A + params["edge_imp"][1],
                        T * N, V, K, cout, residual_identity=False,
                        in_scale=s0, in_shift=sh0)
    b2 = prep_block_ops(params["block2"], pra_A + params["edge_imp"][2],
                        T * N, V, K, cout, residual_identity=True)
    b3 = prep_block_ops(params["block3"], pra_A + params["edge_imp"][3],
                        T * N, V, K, cout, residual_identity=True)

    # One fused pallas_call for the whole GCN frontend.  Output rows stay in
    # (t, n, v) order: exactly what the seq2seq kernel consumes (per-timestep
    # contiguous row blocks), so no XLA transpose is needed in between.
    feat_rows = gcn_frontend(x_rows, (b1, b2, b3), NV, M, K, cout)

    # last_location = pra_x[:, :2, -1, :] as (N*V, 2), duplicated head-major.
    last_pos = jnp.transpose(pra_x[:, :2, -1, :], (0, 2, 1)).reshape(NV, 2)
    last_pos6 = jnp.tile(last_pos, (1, 3))

    # TODO(synk): torch.save(graph_conv_feature, ...) side effect is skipped.

    # One Pallas kernel for all three GRU heads (encoder + AR decoder).
    s2s_ops = prep_seq2seq_ops([params["car"], params["human"],
                                params["bike"]])
    pred_rows = seq2seq_heads(feat_rows, last_pos6, s2s_ops,
                              T, NV, 6, 2, pred_length)       # (Tp*NV, 2)

    # Rows (step, n, v) -> reshape_from_lstm layout (N, 2, Tp, V).
    return jnp.transpose(pred_rows.reshape(pred_length, N, V, 2),
                         (1, 3, 0, 2))


# ----------------------------------------------------------------------------
if __name__ == "__main__":
    N, C_in, T, V = 2, 4, 8, 8         # batch, channels, time steps, nodes
    max_hop = 2
    K = max_hop + 1                    # spatial kernel size
    pred_length = 6

    key = jax.random.PRNGKey(0)
    kx, ka, kp = jax.random.split(key, 3)
    pra_x = jax.random.normal(kx, (N, C_in, T, V), dtype=jnp.float32)
    pra_A = 0.1 * jax.random.normal(ka, (K, V, V), dtype=jnp.float32)
    params = init_params(kp, C_in, K, V)

    fwd = jax.jit(functools.partial(model_forward, pred_length=pred_length))
    out = fwd(params, pra_x, pra_A)
    out = jax.block_until_ready(out)
    assert out.shape == (N, 2, pred_length, V), out.shape
    assert bool(jnp.all(jnp.isfinite(out)))
    print("KERNEL_OK")
</pallas_src>

<mosaic_0001>
module attributes {stable_mosaic.version = 11 : i64} {
  func.func @_gcn_frontend_kernel(%arg0: i32, %arg1: memref<128x4xf32, #tpu.memory_space<vmem>>, %arg2: memref<3x4x64xbf16, #tpu.memory_space<vmem>>, %arg3: memref<128x384xbf16, #tpu.memory_space<vmem>>, %arg4: memref<1x64xf32, #tpu.memory_space<vmem>>, %arg5: memref<128x64xf32, #tpu.memory_space<vmem>>, %arg6: memref<5x64x64xbf16, #tpu.memory_space<vmem>>, %arg7: memref<1x64xf32, #tpu.memory_space<vmem>>, %arg8: memref<1x64xf32, #tpu.memory_space<vmem>>, %arg9: memref<4x64xbf16, #tpu.memory_space<vmem>>, %arg10: memref<1x64xf32, #tpu.memory_space<vmem>>, %arg11: memref<3x64x64xbf16, #tpu.memory_space<vmem>>, %arg12: memref<128x384xbf16, #tpu.memory_space<vmem>>, %arg13: memref<1x64xf32, #tpu.memory_space<vmem>>, %arg14: memref<128x64xf32, #tpu.memory_space<vmem>>, %arg15: memref<5x64x64xbf16, #tpu.memory_space<vmem>>, %arg16: memref<1x64xf32, #tpu.memory_space<vmem>>, %arg17: memref<1x64xf32, #tpu.memory_space<vmem>>, %arg18: memref<3x64x64xbf16, #tpu.memory_space<vmem>>, %arg19: memref<128x384xbf16, #tpu.memory_space<vmem>>, %arg20: memref<1x64xf32, #tpu.memory_space<vmem>>, %arg21: memref<128x64xf32, #tpu.memory_space<vmem>>, %arg22: memref<5x64x64xbf16, #tpu.memory_space<vmem>>, %arg23: memref<1x64xf32, #tpu.memory_space<vmem>>, %arg24: memref<1x64xf32, #tpu.memory_space<vmem>>, %arg25: memref<128x64xf32, #tpu.memory_space<vmem>>, %arg26: memref<192x64xbf16, #tpu.memory_space<vmem>>) attributes {dimension_semantics = [#tpu.dimension_semantics<arbitrary>], iteration_bounds = array<i64: 1>, scalar_prefetch = 0 : i64, scratch_operands = 1 : i64, tpu.core_type = #tpu.core_type<tc>, window_params = [{pipeline_mode = #tpu.pipeline_mode<synchronous>, transform_indices = @transform_0, window_bounds = array<i64: 128, 4>}, {pipeline_mode = #tpu.pipeline_mode<synchronous>, transform_indices = @transform_1, window_bounds = array<i64: 3, 4, 64>}, {pipeline_mode = #tpu.pipeline_mode<synchronous>, transform_indices = @transform_2, window_bounds = array<i64: 128, 384>}, {pipeline_mode = #tpu.pipeline_mode<synchronous>, transform_indices = @transform_3, window_bounds = array<i64: 1, 64>}, {pipeline_mode = #tpu.pipeline_mode<synchronous>, transform_indices = @transform_4, window_bounds = array<i64: 128, 64>}, {pipeline_mode = #tpu.pipeline_mode<synchronous>, transform_indices = @transform_5, window_bounds = array<i64: 5, 64, 64>}, {pipeline_mode = #tpu.pipeline_mode<synchronous>, transform_indices = @transform_6, window_bounds = array<i64: 1, 64>}, {pipeline_mode = #tpu.pipeline_mode<synchronous>, transform_indices = @transform_7, window_bounds = array<i64: 1, 64>}, {pipeline_mode = #tpu.pipeline_mode<synchronous>, transform_indices = @transform_8, window_bounds = array<i64: 4, 64>}, {pipeline_mode = #tpu.pipeline_mode<synchronous>, transform_indices = @transform_9, window_bounds = array<i64: 1, 64>}, {pipeline_mode = #tpu.pipeline_mode<synchronous>, transform_indices = @transform_10, window_bounds = array<i64: 3, 64, 64>}, {pipeline_mode = #tpu.pipeline_mode<synchronous>, transform_indices = @transform_11, window_bounds = array<i64: 128, 384>}, {pipeline_mode = #tpu.pipeline_mode<synchronous>, transform_indices = @transform_12, window_bounds = array<i64: 1, 64>}, {pipeline_mode = #tpu.pipeline_mode<synchronous>, transform_indices = @transform_13, window_bounds = array<i64: 128, 64>}, {pipeline_mode = #tpu.pipeline_mode<synchronous>, transform_indices = @transform_14, window_bounds = array<i64: 5, 64, 64>}, {pipeline_mode = #tpu.pipeline_mode<synchronous>, transform_indices = @transform_15, window_bounds = array<i64: 1, 64>}, {pipeline_mode = #tpu.pipeline_mode<synchronous>, transform_indices = @transform_16, window_bounds = array<i64: 1, 64>}, {pipeline_mode = #tpu.pipeline_mode<synchronous>, transform_indices = @transform_17, window_bounds = array<i64: 3, 64, 64>}, {pipeline_mode = #tpu.pipeline_mode<synchronous>, transform_indices = @transform_18, window_bounds = array<i64: 128, 384>}, {pipeline_mode = #tpu.pipeline_mode<synchronous>, transform_indices = @transform_19, window_bounds = array<i64: 1, 64>}, {pipeline_mode = #tpu.pipeline_mode<synchronous>, transform_indices = @transform_20, window_bounds = array<i64: 128, 64>}, {pipeline_mode = #tpu.pipeline_mode<synchronous>, transform_indices = @transform_21, window_bounds = array<i64: 5, 64, 64>}, {pipeline_mode = #tpu.pipeline_mode<synchronous>, transform_indices = @transform_22, window_bounds = array<i64: 1, 64>}, {pipeline_mode = #tpu.pipeline_mode<synchronous>, transform_indices = @transform_23, window_bounds = array<i64: 1, 64>}, {pipeline_mode = #tpu.pipeline_mode<synchronous>, transform_indices = @transform_24, window_bounds = array<i64: 128, 64>}]} {
    %cst = arith.constant 0.000000e+00 : bf16
    %0 = vector.broadcast %cst : bf16 to vector<32x64xbf16>
    %c0 = arith.constant 0 : index
    %c0_0 = arith.constant 0 : index
    %1 = vector.load %arg26[%c0, %c0_0] : memref<192x64xbf16, #tpu.memory_space<vmem>>, vector<32x64xbf16>
    tpu.vector_store %arg26[%c0, %c0_0], %0 {strides = array<i32>} : memref<192x64xbf16, #tpu.memory_space<vmem>>, vector<32x64xbf16>,
    %c160 = arith.constant 160 : index
    %c0_1 = arith.constant 0 : index
    %2 = vector.load %arg26[%c160, %c0_1] : memref<192x64xbf16, #tpu.memory_space<vmem>>, vector<32x64xbf16>
    tpu.vector_store %arg26[%c160, %c0_1], %0 {strides = array<i32>} : memref<192x64xbf16, #tpu.memory_space<vmem>>, vector<32x64xbf16>,
    %c0_2 = arith.constant 0 : index
    %c0_3 = arith.constant 0 : index
    %3 = vector.load %arg1[%c0_2, %c0_3] : memref<128x4xf32, #tpu.memory_space<vmem>>, vector<128x4xf32>
    %4 = arith.truncf %3 : vector<128x4xf32> to vector<128x4xbf16>
    %c0_4 = arith.constant 0 : index
    %c0_5 = arith.constant 0 : index
    %5 = vector.load %arg9[%c0_4, %c0_5] : memref<4x64xbf16, #tpu.memory_space<vmem>>, vector<4x64xbf16>
    %cst_6 = arith.constant dense<0.000000e+00> : vector<128x64xf32>
    %6 = tpu.matmul %4, %5, %cst_6 {dimension_numbers = #tpu.dot_dimension_numbers<[1], [0], [0], [1], [0, 0, 1, 1], [], []>} : vector<128x4xbf16>, vector<4x64xbf16>, vector<128x64xf32> -> vector<128x64xf32>
    %c0_7 = arith.constant 0 : index
    %c0_8 = arith.constant 0 : index
    %7 = vector.load %arg10[%c0_7, %c0_8] : memref<1x64xf32, #tpu.memory_space<vmem>>, vector<1x64xf32>
    %8 = vector.broadcast %7 : vector<1x64xf32> to vector<128x64xf32>
    %9 = arith.addf %6, %8 : vector<128x64xf32>
    %c0_9 = arith.constant 0 : index
    %c0_10 = arith.constant 0 : index
    %c0_11 = arith.constant 0 : index
    %10 = vector.load %arg2[%c0_9, %c0_10, %c0_11] : memref<3x4x64xbf16, #tpu.memory_space<vmem>>, vector<1x4x64xbf16>
    %11 = vector.shape_cast %10 : vector<1x4x64xbf16> to vector<4x64xbf16>
    %cst_12 = arith.constant dense<0.000000e+00> : vector<128x64xf32>
    %12 = tpu.matmul %4, %11, %cst_12 {dimension_numbers = #tpu.dot_dimension_numbers<[1], [0], [0], [1], [0, 0, 1, 1], [], []>} : vector<128x4xbf16>, vector<4x64xbf16>, vector<128x64xf32> -> vector<128x64xf32>
    %13 = arith.truncf %12 : vector<128x64xf32> to vector<128x64xbf16>
    %c1 = arith.constant 1 : index
    %c0_13 = arith.constant 0 : index
    %c0_14 = arith.constant 0 : index
    %14 = vector.load %arg2[%c1, %c0_13, %c0_14] : memref<3x4x64xbf16, #tpu.memory_space<vmem>>, vector<1x4x64xbf16>
    %15 = vector.shape_cast %14 : vector<1x4x64xbf16> to vector<4x64xbf16>
    %cst_15 = arith.constant dense<0.000000e+00> : vector<128x64xf32>
    %16 = tpu.matmul %4, %15, %cst_15 {dimension_numbers = #tpu.dot_dimension_numbers<[1], [0], [0], [1], [0, 0, 1, 1], [], []>} : vector<128x4xbf16>, vector<4x64xbf16>, vector<128x64xf32> -> vector<128x64xf32>
    %17 = arith.truncf %16 : vector<128x64xf32> to vector<128x64xbf16>
    %c2 = arith.constant 2 : index
    %c0_16 = arith.constant 0 : index
    %c0_17 = arith.constant 0 : index
    %18 = vector.load %arg2[%c2, %c0_16, %c0_17] : memref<3x4x64xbf16, #tpu.memory_space<vmem>>, vector<1x4x64xbf16>
    %19 = vector.shape_cast %18 : vector<1x4x64xbf16> to vector<4x64xbf16>
    %cst_18 = arith.constant dense<0.000000e+00> : vector<128x64xf32>
    %20 = tpu.matmul %4, %19, %cst_18 {dimension_numbers = #tpu.dot_dimension_numbers<[1], [0], [0], [1], [0, 0, 1, 1], [], []>} : vector<128x4xbf16>, vector<4x64xbf16>, vector<128x64xf32> -> vector<128x64xf32>
    %21 = arith.truncf %20 : vector<128x64xf32> to vector<128x64xbf16>
    %22 = tpu.concatenate %13, %17, %21 in 0 : vector<128x64xbf16>, vector<128x64xbf16>, vector<128x64xbf16> -> vector<384x64xbf16>
    %c0_19 = arith.constant 0 : index
    %c0_20 = arith.constant 0 : index
    %23 = vector.load %arg3[%c0_19, %c0_20] : memref<128x384xbf16, #tpu.memory_space<vmem>>, vector<128x384xbf16>
    %cst_21 = arith.constant dense<0.000000e+00> : vector<128x64xf32>
    %24 = tpu.matmul %23, %22, %cst_21 {dimension_numbers = #tpu.dot_dimension_numbers<[1], [0], [0], [1], [0, 0, 1, 1], [], []>} : vector<128x384xbf16>, vector<384x64xbf16>, vector<128x64xf32> -> vector<128x64xf32>
    %c0_22 = arith.constant 0 : index
    %c0_23 = arith.constant 0 : index
    %25 = vector.load %arg4[%c0_22, %c0_23] : memref<1x64xf32, #tpu.memory_space<vmem>>, vector<1x64xf32>
    %26 = vector.broadcast %25 : vector<1x64xf32> to vector<128x64xf32>
    %27 = arith.mulf %24, %26 : vector<128x64xf32>
    %c0_24 = arith.constant 0 : index
    %c0_25 = arith.constant 0 : index
    %28 = vector.load %arg5[%c0_24, %c0_25] : memref<128x64xf32, #tpu.memory_space<vmem>>, vector<128x64xf32>
    %29 = arith.addf %27, %28 : vector<128x64xf32>
    %cst_26 = arith.constant 0.000000e+00 : f32
    %30 = vector.broadcast %cst_26 : f32 to vector<128x64xf32>
    %31 = arith.maximumf %29, %30 : vector<128x64xf32>
    %32 = arith.truncf %31 : vector<128x64xf32> to vector<128x64xbf16>
    %c32 = arith.constant 32 : index
    %c0_27 = arith.constant 0 : index
    %33 = vector.load %arg26[%c32, %c0_27] : memref<192x64xbf16, #tpu.memory_space<vmem>>, vector<128x64xbf16>
    tpu.vector_store %arg26[%c32, %c0_27], %32 {strides = array<i32>} : memref<192x64xbf16, #tpu.memory_space<vmem>>, vector<128x64xbf16>,
    %c0_28 = arith.constant 0 : index
    %c0_29 = arith.constant 0 : index
    %34 = vector.load %arg26[%c0_28, %c0_29] : memref<192x64xbf16, #tpu.memory_space<vmem>>, vector<128x64xbf16>
    %c0_30 = arith.constant 0 : index
    %c0_31 = arith.constant 0 : index
    %c0_32 = arith.constant 0 : index
    %35 = vector.load %arg6[%c0_30, %c0_31, %c0_32] : memref<5x64x64xbf16, #tpu.memory_space<vmem>>, vector<1x64x64xbf16>
    %36 = vector.shape_cast %35 : vector<1x64x64xbf16> to vector<64x64xbf16>
    %cst_33 = arith.constant dense<0.000000e+00> : vector<128x64xf32>
    %37 = tpu.matmul %34, %36, %cst_33 {dimension_numbers = #tpu.dot_dimension_numbers<[1], [0], [0], [1], [0, 0, 1, 1], [], []>} : vector<128x64xbf16>, vector<64x64xbf16>, vector<128x64xf32> -> vector<128x64xf32>
    %c16 = arith.constant 16 : index
    %c0_34 = arith.constant 0 : index
    %38 = vector.load %arg26[%c16, %c0_34] : memref<192x64xbf16, #tpu.memory_space<vmem>>, vector<128x64xbf16>
    %c1_35 = arith.constant 1 : index
    %c0_36 = arith.constant 0 : index
    %c0_37 = arith.constant 0 : index
    %39 = vector.load %arg6[%c1_35, %c0_36, %c0_37] : memref<5x64x64xbf16, #tpu.memory_space<vmem>>, vector<1x64x64xbf16>
    %40 = vector.shape_cast %39 : vector<1x64x64xbf16> to vector<64x64xbf16>
    %cst_38 = arith.constant dense<0.000000e+00> : vector<128x64xf32>
    %41 = tpu.matmul %38, %40, %cst_38 {dimension_numbers = #tpu.dot_dimension_numbers<[1], [0], [0], [1], [0, 0, 1, 1], [], []>} : vector<128x64xbf16>, vector<64x64xbf16>, vector<128x64xf32> -> vector<128x64xf32>
    %42 = arith.addf %37, %41 : vector<128x64xf32>
    %c32_39 = arith.constant 32 : index
    %c0_40 = arith.constant 0 : index
    %43 = vector.load %arg26[%c32_39, %c0_40] : memref<192x64xbf16, #tpu.memory_space<vmem>>, vector<128x64xbf16>
    %c2_41 = arith.constant 2 : index
    %c0_42 = arith.constant 0 : index
    %c0_43 = arith.constant 0 : index
    %44 = vector.load %arg6[%c2_41, %c0_42, %c0_43] : memref<5x64x64xbf16, #tpu.memory_space<vmem>>, vector<1x64x64xbf16>
    %45 = vector.shape_cast %44 : vector<1x64x64xbf16> to vector<64x64xbf16>
    %cst_44 = arith.constant dense<0.000000e+00> : vector<128x64xf32>
    %46 = tpu.matmul %43, %45, %cst_44 {dimension_numbers = #tpu.dot_dimension_numbers<[1], [0], [0], [1], [0, 0, 1, 1], [], []>} : vector<128x64xbf16>, vector<64x64xbf16>, vector<128x64xf32> -> vector<128x64xf32>
    %47 = arith.addf %42, %46 : vector<128x64xf32>
    %c48 = arith.constant 48 : index
    %c0_45 = arith.constant 0 : index
    %48 = vector.load %arg26[%c48, %c0_45] : memref<192x64xbf16, #tpu.memory_space<vmem>>, vector<128x64xbf16>
    %c3 = arith.constant 3 : index
    %c0_46 = arith.constant 0 : index
    %c0_47 = arith.constant 0 : index
    %49 = vector.load %arg6[%c3, %c0_46, %c0_47] : memref<5x64x64xbf16, #tpu.memory_space<vmem>>, vector<1x64x64xbf16>
    %50 = vector.shape_cast %49 : vector<1x64x64xbf16> to vector<64x64xbf16>
    %cst_48 = arith.constant dense<0.000000e+00> : vector<128x64xf32>
    %51 = tpu.matmul %48, %50, %cst_48 {dimension_numbers = #tpu.dot_dimension_numbers<[1], [0], [0], [1], [0, 0, 1, 1], [], []>} : vector<128x64xbf16>, vector<64x64xbf16>, vector<128x64xf32> -> vector<128x64xf32>
    %52 = arith.addf %47, %51 : vector<128x64xf32>
    %c64 = arith.constant 64 : index
    %c0_49 = arith.constant 0 : index
    %53 = vector.load %arg26[%c64, %c0_49] : memref<192x64xbf16, #tpu.memory_space<vmem>>, vector<128x64xbf16>
    %c4 = arith.constant 4 : index
    %c0_50 = arith.constant 0 : index
    %c0_51 = arith.constant 0 : index
    %54 = vector.load %arg6[%c4, %c0_50, %c0_51] : memref<5x64x64xbf16, #tpu.memory_space<vmem>>, vector<1x64x64xbf16>
    %55 = vector.shape_cast %54 : vector<1x64x64xbf16> to vector<64x64xbf16>
    %cst_52 = arith.constant dense<0.000000e+00> : vector<128x64xf32>
    %56 = tpu.matmul %53, %55, %cst_52 {dimension_numbers = #tpu.dot_dimension_numbers<[1], [0], [0], [1], [0, 0, 1, 1], [], []>} : vector<128x64xbf16>, vector<64x64xbf16>, vector<128x64xf32> -> vector<128x64xf32>
    %57 = arith.addf %52, %56 : vector<128x64xf32>
    %c0_53 = arith.constant 0 : index
    %c0_54 = arith.constant 0 : index
    %58 = vector.load %arg7[%c0_53, %c0_54] : memref<1x64xf32, #tpu.memory_space<vmem>>, vector<1x64xf32>
    %59 = vector.broadcast %58 : vector<1x64xf32> to vector<128x64xf32>
    %60 = arith.mulf %57, %59 : vector<128x64xf32>
    %c0_55 = arith.constant 0 : index
    %c0_56 = arith.constant 0 : index
    %61 = vector.load %arg8[%c0_55, %c0_56] : memref<1x64xf32, #tpu.memory_space<vmem>>, vector<1x64xf32>
    %62 = vector.broadcast %61 : vector<1x64xf32> to vector<128x64xf32>
    %63 = arith.addf %60, %62 : vector<128x64xf32>
    %64 = arith.addf %63, %9 : vector<128x64xf32>
    %cst_57 = arith.constant 0.000000e+00 : f32
    %65 = vector.broadcast %cst_57 : f32 to vector<128x64xf32>
    %66 = arith.maximumf %64, %65 : vector<128x64xf32>
    %67 = arith.truncf %66 : vector<128x64xf32> to vector<128x64xbf16>
    %c0_58 = arith.constant 0 : index
    %c0_59 = arith.constant 0 : index
    %c0_60 = arith.constant 0 : index
    %68 = vector.load %arg11[%c0_58, %c0_59, %c0_60] : memref<3x64x64xbf16, #tpu.memory_space<vmem>>, vector<1x64x64xbf16>
    %69 = vector.shape_cast %68 : vector<1x64x64xbf16> to vector<64x64xbf16>
    %cst_61 = arith.constant dense<0.000000e+00> : vector<128x64xf32>
    %70 = tpu.matmul %67, %69, %cst_61 {dimension_numbers = #tpu.dot_dimension_numbers<[1], [0], [0], [1], [0, 0, 1, 1], [], []>} : vector<128x64xbf16>, vector<64x64xbf16>, vector<128x64xf32> -> vector<128x64xf32>
    %71 = arith.truncf %70 : vector<128x64xf32> to vector<128x64xbf16>
    %c1_62 = arith.constant 1 : index
    %c0_63 = arith.constant 0 : index
    %c0_64 = arith.constant 0 : index
    %72 = vector.load %arg11[%c1_62, %c0_63, %c0_64] : memref<3x64x64xbf16, #tpu.memory_space<vmem>>, vector<1x64x64xbf16>
    %73 = vector.shape_cast %72 : vector<1x64x64xbf16> to vector<64x64xbf16>
    %cst_65 = arith.constant dense<0.000000e+00> : vector<128x64xf32>
    %74 = tpu.matmul %67, %73, %cst_65 {dimension_numbers = #tpu.dot_dimension_numbers<[1], [0], [0], [1], [0, 0, 1, 1], [], []>} : vector<128x64xbf16>, vector<64x64xbf16>, vector<128x64xf32> -> vector<128x64xf32>
    %75 = arith.truncf %74 : vector<128x64xf32> to vector<128x64xbf16>
    %c2_66 = arith.constant 2 : index
    %c0_67 = arith.constant 0 : index
    %c0_68 = arith.constant 0 : index
    %76 = vector.load %arg11[%c2_66, %c0_67, %c0_68] : memref<3x64x64xbf16, #tpu.memory_space<vmem>>, vector<1x64x64xbf16>
    %77 = vector.shape_cast %76 : vector<1x64x64xbf16> to vector<64x64xbf16>
    %cst_69 = arith.constant dense<0.000000e+00> : vector<128x64xf32>
    %78 = tpu.matmul %67, %77, %cst_69 {dimension_numbers = #tpu.dot_dimension_numbers<[1], [0], [0], [1], [0, 0, 1, 1], [], []>} : vector<128x64xbf16>, vector<64x64xbf16>, vector<128x64xf32> -> vector<128x64xf32>
    %79 = arith.truncf %78 : vector<128x64xf32> to vector<128x64xbf16>
    %80 = tpu.concatenate %71, %75, %79 in 0 : vector<128x64xbf16>, vector<128x64xbf16>, vector<128x64xbf16> -> vector<384x64xbf16>
    %c0_70 = arith.constant 0 : index
    %c0_71 = arith.constant 0 : index
    %81 = vector.load %arg12[%c0_70, %c0_71] : memref<128x384xbf16, #tpu.memory_space<vmem>>, vector<128x384xbf16>
    %cst_72 = arith.constant dense<0.000000e+00> : vector<128x64xf32>
    %82 = tpu.matmul %81, %80, %cst_72 {dimension_numbers = #tpu.dot_dimension_numbers<[1], [0], [0], [1], [0, 0, 1, 1], [], []>} : vector<128x384xbf16>, vector<384x64xbf16>, vector<128x64xf32> -> vector<128x64xf32>
    %c0_73 = arith.constant 0 : index
    %c0_74 = arith.constant 0 : index
    %83 = vector.load %arg13[%c0_73, %c0_74] : memref<1x64xf32, #tpu.memory_space<vmem>>, vector<1x64xf32>
    %84 = vector.broadcast %83 : vector<1x64xf32> to vector<128x64xf32>
    %85 = arith.mulf %82, %84 : vector<128x64xf32>
    %c0_75 = arith.constant 0 : index
    %c0_76 = arith.constant 0 : index
    %86 = vector.load %arg14[%c0_75, %c0_76] : memref<128x64xf32, #tpu.memory_space<vmem>>, vector<128x64xf32>
    %87 = arith.addf %85, %86 : vector<128x64xf32>
    %cst_77 = arith.constant 0.000000e+00 : f32
    %88 = vector.broadcast %cst_77 : f32 to vector<128x64xf32>
    %89 = arith.maximumf %87, %88 : vector<128x64xf32>
    %90 = arith.truncf %89 : vector<128x64xf32> to vector<128x64xbf16>
    %c32_78 = arith.constant 32 : index
    %c0_79 = arith.constant 0 : index
    %91 = vector.load %arg26[%c32_78, %c0_79] : memref<192x64xbf16, #tpu.memory_space<vmem>>, vector<128x64xbf16>
    tpu.vector_store %arg26[%c32_78, %c0_79], %90 {strides = array<i32>} : memref<192x64xbf16, #tpu.memory_space<vmem>>, vector<128x64xbf16>,
    %c0_80 = arith.constant 0 : index
    %c0_81 = arith.constant 0 : index
    %92 = vector.load %arg26[%c0_80, %c0_81] : memref<192x64xbf16, #tpu.memory_space<vmem>>, vector<128x64xbf16>
    %c0_82 = arith.constant 0 : index
    %c0_83 = arith.constant 0 : index
    %c0_84 = arith.constant 0 : index
    %93 = vector.load %arg15[%c0_82, %c0_83, %c0_84] : memref<5x64x64xbf16, #tpu.memory_space<vmem>>, vector<1x64x64xbf16>
    %94 = vector.shape_cast %93 : vector<1x64x64xbf16> to vector<64x64xbf16>
    %cst_85 = arith.constant dense<0.000000e+00> : vector<128x64xf32>
    %95 = tpu.matmul %92, %94, %cst_85 {dimension_numbers = #tpu.dot_dimension_numbers<[1], [0], [0], [1], [0, 0, 1, 1], [], []>} : vector<128x64xbf16>, vector<64x64xbf16>, vector<128x64xf32> -> vector<128x64xf32>
    %c16_86 = arith.constant 16 : index
    %c0_87 = arith.constant 0 : index
    %96 = vector.load %arg26[%c16_86, %c0_87] : memref<192x64xbf16, #tpu.memory_space<vmem>>, vector<128x64xbf16>
    %c1_88 = arith.constant 1 : index
    %c0_89 = arith.constant 0 : index
    %c0_90 = arith.constant 0 : index
    %97 = vector.load %arg15[%c1_88, %c0_89, %c0_90] : memref<5x64x64xbf16, #tpu.memory_space<vmem>>, vector<1x64x64xbf16>
    %98 = vector.shape_cast %97 : vector<1x64x64xbf16> to vector<64x64xbf16>
    %cst_91 = arith.constant dense<0.000000e+00> : vector<128x64xf32>
    %99 = tpu.matmul %96, %98, %cst_91 {dimension_numbers = #tpu.dot_dimension_numbers<[1], [0], [0], [1], [0, 0, 1, 1], [], []>} : vector<128x64xbf16>, vector<64x64xbf16>, vector<128x64xf32> -> vector<128x64xf32>
    %100 = arith.addf %95, %99 : vector<128x64xf32>
    %c32_92 = arith.constant 32 : index
    %c0_93 = arith.constant 0 : index
    %101 = vector.load %arg26[%c32_92, %c0_93] : memref<192x64xbf16, #tpu.memory_space<vmem>>, vector<128x64xbf16>
    %c2_94 = arith.constant 2 : index
    %c0_95 = arith.constant 0 : index
    %c0_96 = arith.constant 0 : index
    %102 = vector.load %arg15[%c2_94, %c0_95, %c0_96] : memref<5x64x64xbf16, #tpu.memory_space<vmem>>, vector<1x64x64xbf16>
    %103 = vector.shape_cast %102 : vector<1x64x64xbf16> to vector<64x64xbf16>
    %cst_97 = arith.constant dense<0.000000e+00> : vector<128x64xf32>
    %104 = tpu.matmul %101, %103, %cst_97 {dimension_numbers = #tpu.dot_dimension_numbers<[1], [0], [0], [1], [0, 0, 1, 1], [], []>} : vector<128x64xbf16>, vector<64x64xbf16>, vector<128x64xf32> -> vector<128x64xf32>
    %105 = arith.addf %100, %104 : vector<128x64xf32>
    %c48_98 = arith.constant 48 : index
    %c0_99 = arith.constant 0 : index
    %106 = vector.load %arg26[%c48_98, %c0_99] : memref<192x64xbf16, #tpu.memory_space<vmem>>, vector<128x64xbf16>
    %c3_100 = arith.constant 3 : index
    %c0_101 = arith.constant 0 : index
    %c0_102 = arith.constant 0 : index
    %107 = vector.load %arg15[%c3_100, %c0_101, %c0_102] : memref<5x64x64xbf16, #tpu.memory_space<vmem>>, vector<1x64x64xbf16>
    %108 = vector.shape_cast %107 : vector<1x64x64xbf16> to vector<64x64xbf16>
    %cst_103 = arith.constant dense<0.000000e+00> : vector<128x64xf32>
    %109 = tpu.matmul %106, %108, %cst_103 {dimension_numbers = #tpu.dot_dimension_numbers<[1], [0], [0], [1], [0, 0, 1, 1], [], []>} : vector<128x64xbf16>, vector<64x64xbf16>, vector<128x64xf32> -> vector<128x64xf32>
    %110 = arith.addf %105, %109 : vector<128x64xf32>
    %c64_104 = arith.constant 64 : index
    %c0_105 = arith.constant 0 : index
    %111 = vector.load %arg26[%c64_104, %c0_105] : memref<192x64xbf16, #tpu.memory_space<vmem>>, vector<128x64xbf16>
    %c4_106 = arith.constant 4 : index
    %c0_107 = arith.constant 0 : index
    %c0_108 = arith.constant 0 : index
    %112 = vector.load %arg15[%c4_106, %c0_107, %c0_108] : memref<5x64x64xbf16, #tpu.memory_space<vmem>>, vector<1x64x64xbf16>
    %113 = vector.shape_cast %112 : vector<1x64x64xbf16> to vector<64x64xbf16>
    %cst_109 = arith.constant dense<0.000000e+00> : vector<128x64xf32>
    %114 = tpu.matmul %111, %113, %cst_109 {dimension_numbers = #tpu.dot_dimension_numbers<[1], [0], [0], [1], [0, 0, 1, 1], [], []>} : vector<128x64xbf16>, vector<64x64xbf16>, vector<128x64xf32> -> vector<128x64xf32>
    %115 = arith.addf %110, %114 : vector<128x64xf32>
    %c0_110 = arith.constant 0 : index
    %c0_111 = arith.constant 0 : index
    %116 = vector.load %arg16[%c0_110, %c0_111] : memref<1x64xf32, #tpu.memory_space<vmem>>, vector<1x64xf32>
    %117 = vector.broadcast %116 : vector<1x64xf32> to vector<128x64xf32>
    %118 = arith.mulf %115, %117 : vector<128x64xf32>
    %c0_112 = arith.constant 0 : index
    %c0_113 = arith.constant 0 : index
    %119 = vector.load %arg17[%c0_112, %c0_113] : memref<1x64xf32, #tpu.memory_space<vmem>>, vector<1x64xf32>
    %120 = vector.broadcast %119 : vector<1x64xf32> to vector<128x64xf32>
    %121 = arith.addf %118, %120 : vector<128x64xf32>
    %122 = arith.addf %121, %66 : vector<128x64xf32>
    %cst_114 = arith.constant 0.000000e+00 : f32
    %123 = vector.broadcast %cst_114 : f32 to vector<128x64xf32>
    %124 = arith.maximumf %122, %123 : vector<128x64xf32>
    %125 = arith.truncf %124 : vector<128x64xf32> to vector<128x64xbf16>
    %c0_115 = arith.constant 0 : index
    %c0_116 = arith.constant 0 : index
    %c0_117 = arith.constant 0 : index
    %126 = vector.load %arg18[%c0_115, %c0_116, %c0_117] : memref<3x64x64xbf16, #tpu.memory_space<vmem>>, vector<1x64x64xbf16>
    %127 = vector.shape_cast %126 : vector<1x64x64xbf16> to vector<64x64xbf16>
    %cst_118 = arith.constant dense<0.000000e+00> : vector<128x64xf32>
    %128 = tpu.matmul %125, %127, %cst_118 {dimension_numbers = #tpu.dot_dimension_numbers<[1], [0], [0], [1], [0, 0, 1, 1], [], []>} : vector<128x64xbf16>, vector<64x64xbf16>, vector<128x64xf32> -> vector<128x64xf32>
    %129 = arith.truncf %128 : vector<128x64xf32> to vector<128x64xbf16>
    %c1_119 = arith.constant 1 : index
    %c0_120 = arith.constant 0 : index
    %c0_121 = arith.constant 0 : index
    %130 = vector.load %arg18[%c1_119, %c0_120, %c0_121] : memref<3x64x64xbf16, #tpu.memory_space<vmem>>, vector<1x64x64xbf16>
    %131 = vector.shape_cast %130 : vector<1x64x64xbf16> to vector<64x64xbf16>
    %cst_122 = arith.constant dense<0.000000e+00> : vector<128x64xf32>
    %132 = tpu.matmul %125, %131, %cst_122 {dimension_numbers = #tpu.dot_dimension_numbers<[1], [0], [0], [1], [0, 0, 1, 1], [], []>} : vector<128x64xbf16>, vector<64x64xbf16>, vector<128x64xf32> -> vector<128x64xf32>
    %133 = arith.truncf %132 : vector<128x64xf32> to vector<128x64xbf16>
    %c2_123 = arith.constant 2 : index
    %c0_124 = arith.constant 0 : index
    %c0_125 = arith.constant 0 : index
    %134 = vector.load %arg18[%c2_123, %c0_124, %c0_125] : memref<3x64x64xbf16, #tpu.memory_space<vmem>>, vector<1x64x64xbf16>
    %135 = vector.shape_cast %134 : vector<1x64x64xbf16> to vector<64x64xbf16>
    %cst_126 = arith.constant dense<0.000000e+00> : vector<128x64xf32>
    %136 = tpu.matmul %125, %135, %cst_126 {dimension_numbers = #tpu.dot_dimension_numbers<[1], [0], [0], [1], [0, 0, 1, 1], [], []>} : vector<128x64xbf16>, vector<64x64xbf16>, vector<128x64xf32> -> vector<128x64xf32>
    %137 = arith.truncf %136 : vector<128x64xf32> to vector<128x64xbf16>
    %138 = tpu.concatenate %129, %133, %137 in 0 : vector<128x64xbf16>, vector<128x64xbf16>, vector<128x64xbf16> -> vector<384x64xbf16>
    %c0_127 = arith.constant 0 : index
    %c0_128 = arith.constant 0 : index
    %139 = vector.load %arg19[%c0_127, %c0_128] : memref<128x384xbf16, #tpu.memory_space<vmem>>, vector<128x384xbf16>
    %cst_129 = arith.constant dense<0.000000e+00> : vector<128x64xf32>
    %140 = tpu.matmul %139, %138, %cst_129 {dimension_numbers = #tpu.dot_dimension_numbers<[1], [0], [0], [1], [0, 0, 1, 1], [], []>} : vector<128x384xbf16>, vector<384x64xbf16>, vector<128x64xf32> -> vector<128x64xf32>
    %c0_130 = arith.constant 0 : index
    %c0_131 = arith.constant 0 : index
    %141 = vector.load %arg20[%c0_130, %c0_131] : memref<1x64xf32, #tpu.memory_space<vmem>>, vector<1x64xf32>
    %142 = vector.broadcast %141 : vector<1x64xf32> to vector<128x64xf32>
    %143 = arith.mulf %140, %142 : vector<128x64xf32>
    %c0_132 = arith.constant 0 : index
    %c0_133 = arith.constant 0 : index
    %144 = vector.load %arg21[%c0_132, %c0_133] : memref<128x64xf32, #tpu.memory_space<vmem>>, vector<128x64xf32>
    %145 = arith.addf %143, %144 : vector<128x64xf32>
    %cst_134 = arith.constant 0.000000e+00 : f32
    %146 = vector.broadcast %cst_134 : f32 to vector<128x64xf32>
    %147 = arith.maximumf %145, %146 : vector<128x64xf32>
    %148 = arith.truncf %147 : vector<128x64xf32> to vector<128x64xbf16>
    %c32_135 = arith.constant 32 : index
    %c0_136 = arith.constant 0 : index
    %149 = vector.load %arg26[%c32_135, %c0_136] : memref<192x64xbf16, #tpu.memory_space<vmem>>, vector<128x64xbf16>
    tpu.vector_store %arg26[%c32_135, %c0_136], %148 {strides = array<i32>} : memref<192x64xbf16, #tpu.memory_space<vmem>>, vector<128x64xbf16>,
    %c0_137 = arith.constant 0 : index
    %c0_138 = arith.constant 0 : index
    %150 = vector.load %arg26[%c0_137, %c0_138] : memref<192x64xbf16, #tpu.memory_space<vmem>>, vector<128x64xbf16>
    %c0_139 = arith.constant 0 : index
    %c0_140 = arith.constant 0 : index
    %c0_141 = arith.constant 0 : index
    %151 = vector.load %arg22[%c0_139, %c0_140, %c0_141] : memref<5x64x64xbf16, #tpu.memory_space<vmem>>, vector<1x64x64xbf16>
    %152 = vector.shape_cast %151 : vector<1x64x64xbf16> to vector<64x64xbf16>
    %cst_142 = arith.constant dense<0.000000e+00> : vector<128x64xf32>
    %153 = tpu.matmul %150, %152, %cst_142 {dimension_numbers = #tpu.dot_dimension_numbers<[1], [0], [0], [1], [0, 0, 1, 1], [], []>} : vector<128x64xbf16>, vector<64x64xbf16>, vector<128x64xf32> -> vector<128x64xf32>
    %c16_143 = arith.constant 16 : index
    %c0_144 = arith.constant 0 : index
    %154 = vector.load %arg26[%c16_143, %c0_144] : memref<192x64xbf16, #tpu.memory_space<vmem>>, vector<128x64xbf16>
    %c1_145 = arith.constant 1 : index
    %c0_146 = arith.constant 0 : index
    %c0_147 = arith.constant 0 : index
    %155 = vector.load %arg22[%c1_145, %c0_146, %c0_147] : memref<5x64x64xbf16, #tpu.memory_space<vmem>>, vector<1x64x64xbf16>
    %156 = vector.shape_cast %155 : vector<1x64x64xbf16> to vector<64x64xbf16>
    %cst_148 = arith.constant dense<0.000000e+00> : vector<128x64xf32>
    %157 = tpu.matmul %154, %156, %cst_148 {dimension_numbers = #tpu.dot_dimension_numbers<[1], [0], [0], [1], [0, 0, 1, 1], [], []>} : vector<128x64xbf16>, vector<64x64xbf16>, vector<128x64xf32> -> vector<128x64xf32>
    %158 = arith.addf %153, %157 : vector<128x64xf32>
    %c32_149 = arith.constant 32 : index
    %c0_150 = arith.constant 0 : index
    %159 = vector.load %arg26[%c32_149, %c0_150] : memref<192x64xbf16, #tpu.memory_space<vmem>>, vector<128x64xbf16>
    %c2_151 = arith.constant 2 : index
    %c0_152 = arith.constant 0 : index
    %c0_153 = arith.constant 0 : index
    %160 = vector.load %arg22[%c2_151, %c0_152, %c0_153] : memref<5x64x64xbf16, #tpu.memory_space<vmem>>, vector<1x64x64xbf16>
    %161 = vector.shape_cast %160 : vector<1x64x64xbf16> to vector<64x64xbf16>
    %cst_154 = arith.constant dense<0.000000e+00> : vector<128x64xf32>
    %162 = tpu.matmul %159, %161, %cst_154 {dimension_numbers = #tpu.dot_dimension_numbers<[1], [0], [0], [1], [0, 0, 1, 1], [], []>} : vector<128x64xbf16>, vector<64x64xbf16>, vector<128x64xf32> -> vector<128x64xf32>
    %163 = arith.addf %158, %162 : vector<128x64xf32>
    %c48_155 = arith.constant 48 : index
    %c0_156 = arith.constant 0 : index
    %164 = vector.load %arg26[%c48_155, %c0_156] : memref<192x64xbf16, #tpu.memory_space<vmem>>, vector<128x64xbf16>
    %c3_157 = arith.constant 3 : index
    %c0_158 = arith.constant 0 : index
    %c0_159 = arith.constant 0 : index
    %165 = vector.load %arg22[%c3_157, %c0_158, %c0_159] : memref<5x64x64xbf16, #tpu.memory_space<vmem>>, vector<1x64x64xbf16>
    %166 = vector.shape_cast %165 : vector<1x64x64xbf16> to vector<64x64xbf16>
    %cst_160 = arith.constant dense<0.000000e+00> : vector<128x64xf32>
    %167 = tpu.matmul %164, %166, %cst_160 {dimension_numbers = #tpu.dot_dimension_numbers<[1], [0], [0], [1], [0, 0, 1, 1], [], []>} : vector<128x64xbf16>, vector<64x64xbf16>, vector<128x64xf32> -> vector<128x64xf32>
    %168 = arith.addf %163, %167 : vector<128x64xf32>
    %c64_161 = arith.constant 64 : index
    %c0_162 = arith.constant 0 : index
    %169 = vector.load %arg26[%c64_161, %c0_162] : memref<192x64xbf16, #tpu.memory_space<vmem>>, vector<128x64xbf16>
    %c4_163 = arith.constant 4 : index
    %c0_164 = arith.constant 0 : index
    %c0_165 = arith.constant 0 : index
    %170 = vector.load %arg22[%c4_163, %c0_164, %c0_165] : memref<5x64x64xbf16, #tpu.memory_space<vmem>>, vector<1x64x64xbf16>
    %171 = vector.shape_cast %170 : vector<1x64x64xbf16> to vector<64x64xbf16>
    %cst_166 = arith.constant dense<0.000000e+00> : vector<128x64xf32>
    %172 = tpu.matmul %169, %171, %cst_166 {dimension_numbers = #tpu.dot_dimension_numbers<[1], [0], [0], [1], [0, 0, 1, 1], [], []>} : vector<128x64xbf16>, vector<64x64xbf16>, vector<128x64xf32> -> vector<128x64xf32>
    %173 = arith.addf %168, %172 : vector<128x64xf32>
    %c0_167 = arith.constant 0 : index
    %c0_168 = arith.constant 0 : index
    %174 = vector.load %arg23[%c0_167, %c0_168] : memref<1x64xf32, #tpu.memory_space<vmem>>, vector<1x64xf32>
    %175 = vector.broadcast %174 : vector<1x64xf32> to vector<128x64xf32>
    %176 = arith.mulf %173, %175 : vector<128x64xf32>
    %c0_169 = arith.constant 0 : index
    %c0_170 = arith.constant 0 : index
    %177 = vector.load %arg24[%c0_169, %c0_170] : memref<1x64xf32, #tpu.memory_space<vmem>>, vector<1x64xf32>
    %178 = vector.broadcast %177 : vector<1x64xf32> to vector<128x64xf32>
    %179 = arith.addf %176, %178 : vector<128x64xf32>
    %180 = arith.addf %179, %124 : vector<128x64xf32>
    %cst_171 = arith.constant 0.000000e+00 : f32
    %181 = vector.broadcast %cst_171 : f32 to vector<128x64xf32>
    %182 = arith.maximumf %180, %181 : vector<128x64xf32>
    %c0_172 = arith.constant 0 : index
    %c0_173 = arith.constant 0 : index
    %183 = vector.load %arg25[%c0_172, %c0_173] : memref<128x64xf32, #tpu.memory_space<vmem>>, vector<128x64xf32>
    tpu.vector_store %arg25[%c0_172, %c0_173], %182 {strides = array<i32>} : memref<128x64xf32, #tpu.memory_space<vmem>>, vector<128x64xf32>,
    return
  }
  func.func @transform_0(%arg0: i32) -> (i32, i32) {
    %c0_i32 = arith.constant 0 : i32
    %c0_i32_0 = arith.constant 0 : i32
    %c0_i32_1 = arith.constant 0 : i32
    return %c0_i32, %c0_i32_0 : i32, i32
  }
  func.func @transform_1(%arg0: i32) -> (i32, i32, i32) {
    %c0_i32 = arith.constant 0 : i32
    %c0_i32_0 = arith.constant 0 : i32
    %c0_i32_1 = arith.constant 0 : i32
    %c0_i32_2 = arith.constant 0 : i32
    return %c0_i32, %c0_i32_0, %c0_i32_1 : i32, i32, i32
  }
  func.func @transform_2(%arg0: i32) -> (i32, i32) {
    %c0_i32 = arith.constant 0 : i32
    %c0_i32_0 = arith.constant 0 : i32
    %c0_i32_1 = arith.constant 0 : i32
    return %c0_i32, %c0_i32_0 : i32, i32
  }
  func.func @transform_3(%arg0: i32) -> (i32, i32) {
    %c0_i32 = arith.constant 0 : i32
    %c0_i32_0 = arith.constant 0 : i32
    %c0_i32_1 = arith.constant 0 : i32
    return %c0_i32, %c0_i32_0 : i32, i32
  }
  func.func @transform_4(%arg0: i32) -> (i32, i32) {
    %c0_i32 = arith.constant 0 : i32
    %c0_i32_0 = arith.constant 0 : i32
    %c0_i32_1 = arith.constant 0 : i32
    return %c0_i32, %c0_i32_0 : i32, i32
  }
  func.func @transform_5(%arg0: i32) -> (i32, i32, i32) {
    %c0_i32 = arith.constant 0 : i32
    %c0_i32_0 = arith.constant 0 : i32
    %c0_i32_1 = arith.constant 0 : i32
    %c0_i32_2 = arith.constant 0 : i32
    return %c0_i32, %c0_i32_0, %c0_i32_1 : i32, i32, i32
  }
  func.func @transform_6(%arg0: i32) -> (i32, i32) {
    %c0_i32 = arith.constant 0 : i32
    %c0_i32_0 = arith.constant 0 : i32
    %c0_i32_1 = arith.constant 0 : i32
    return %c0_i32, %c0_i32_0 : i32, i32
  }
  func.func @transform_7(%arg0: i32) -> (i32, i32) {
    %c0_i32 = arith.constant 0 : i32
    %c0_i32_0 = arith.constant 0 : i32
    %c0_i32_1 = arith.constant 0 : i32
    return %c0_i32, %c0_i32_0 : i32, i32
  }
  func.func @transform_8(%arg0: i32) -> (i32, i32) {
    %c0_i32 = arith.constant 0 : i32
    %c0_i32_0 = arith.constant 0 : i32
    %c0_i32_1 = arith.constant 0 : i32
    return %c0_i32, %c0_i32_0 : i32, i32
  }
  func.func @transform_9(%arg0: i32) -> (i32, i32) {
    %c0_i32 = arith.constant 0 : i32
    %c0_i32_0 = arith.constant 0 : i32
    %c0_i32_1 = arith.constant 0 : i32
    return %c0_i32, %c0_i32_0 : i32, i32
  }
  func.func @transform_10(%arg0: i32) -> (i32, i32, i32) {
    %c0_i32 = arith.constant 0 : i32
    %c0_i32_0 = arith.constant 0 : i32
    %c0_i32_1 = arith.constant 0 : i32
    %c0_i32_2 = arith.constant 0 : i32
    return %c0_i32, %c0_i32_0, %c0_i32_1 : i32, i32, i32
  }
  func.func @transform_11(%arg0: i32) -> (i32, i32) {
    %c0_i32 = arith.constant 0 : i32
    %c0_i32_0 = arith.constant 0 : i32
    %c0_i32_1 = arith.constant 0 : i32
    return %c0_i32, %c0_i32_0 : i32, i32
  }
  func.func @transform_12(%arg0: i32) -> (i32, i32) {
    %c0_i32 = arith.constant 0 : i32
    %c0_i32_0 = arith.constant 0 : i32
    %c0_i32_1 = arith.constant 0 : i32
    return %c0_i32, %c0_i32_0 : i32, i32
  }
  func.func @transform_13(%arg0: i32) -> (i32, i32) {
    %c0_i32 = arith.constant 0 : i32
    %c0_i32_0 = arith.constant 0 : i32
    %c0_i32_1 = arith.constant 0 : i32
    return %c0_i32, %c0_i32_0 : i32, i32
  }
  func.func @transform_14(%arg0: i32) -> (i32, i32, i32) {
    %c0_i32 = arith.constant 0 : i32
    %c0_i32_0 = arith.constant 0 : i32
    %c0_i32_1 = arith.constant 0 : i32
    %c0_i32_2 = arith.constant 0 : i32
    return %c0_i32, %c0_i32_0, %c0_i32_1 : i32, i32, i32
  }
  func.func @transform_15(%arg0: i32) -> (i32, i32) {
    %c0_i32 = arith.constant 0 : i32
    %c0_i32_0 = arith.constant 0 : i32
    %c0_i32_1 = arith.constant 0 : i32
    return %c0_i32, %c0_i32_0 : i32, i32
  }
  func.func @transform_16(%arg0: i32) -> (i32, i32) {
    %c0_i32 = arith.constant 0 : i32
    %c0_i32_0 = arith.constant 0 : i32
    %c0_i32_1 = arith.constant 0 : i32
    return %c0_i32, %c0_i32_0 : i32, i32
  }
  func.func @transform_17(%arg0: i32) -> (i32, i32, i32) {
    %c0_i32 = arith.constant 0 : i32
    %c0_i32_0 = arith.constant 0 : i32
    %c0_i32_1 = arith.constant 0 : i32
    %c0_i32_2 = arith.constant 0 : i32
    return %c0_i32, %c0_i32_0, %c0_i32_1 : i32, i32, i32
  }
  func.func @transform_18(%arg0: i32) -> (i32, i32) {
    %c0_i32 = arith.constant 0 : i32
    %c0_i32_0 = arith.constant 0 : i32
    %c0_i32_1 = arith.constant 0 : i32
    return %c0_i32, %c0_i32_0 : i32, i32
  }
  func.func @transform_19(%arg0: i32) -> (i32, i32) {
    %c0_i32 = arith.constant 0 : i32
    %c0_i32_0 = arith.constant 0 : i32
    %c0_i32_1 = arith.constant 0 : i32
    return %c0_i32, %c0_i32_0 : i32, i32
  }
  func.func @transform_20(%arg0: i32) -> (i32, i32) {
    %c0_i32 = arith.constant 0 : i32
    %c0_i32_0 = arith.constant 0 : i32
    %c0_i32_1 = arith.constant 0 : i32
    return %c0_i32, %c0_i32_0 : i32, i32
  }
  func.func @transform_21(%arg0: i32) -> (i32, i32, i32) {
    %c0_i32 = arith.constant 0 : i32
    %c0_i32_0 = arith.constant 0 : i32
    %c0_i32_1 = arith.constant 0 : i32
    %c0_i32_2 = arith.constant 0 : i32
    return %c0_i32, %c0_i32_0, %c0_i32_1 : i32, i32, i32
  }
  func.func @transform_22(%arg0: i32) -> (i32, i32) {
    %c0_i32 = arith.constant 0 : i32
    %c0_i32_0 = arith.constant 0 : i32
    %c0_i32_1 = arith.constant 0 : i32
    return %c0_i32, %c0_i32_0 : i32, i32
  }
  func.func @transform_23(%arg0: i32) -> (i32, i32) {
    %c0_i32 = arith.constant 0 : i32
    %c0_i32_0 = arith.constant 0 : i32
    %c0_i32_1 = arith.constant 0 : i32
    return %c0_i32, %c0_i32_0 : i32, i32
  }
  func.func @transform_24(%arg0: i32) -> (i32, i32) {
    %c0_i32 = arith.constant 0 : i32
    %c0_i32_0 = arith.constant 0 : i32
    %c0_i32_1 = arith.constant 0 : i32
    return %c0_i32, %c0_i32_0 : i32, i32
  }
}

module attributes {stable_mosaic.version = 11 : i64} {
  func.func @_seq2seq_kernel(%arg0: i32, %arg1: memref<128x64xf32, #tpu.memory_space<vmem>>, %arg2: memref<16x6xf32, #tpu.memory_space<vmem>>, %arg3: memref<64x18xf32, #tpu.memory_space<vmem>>, %arg4: memref<1x18xf32, #tpu.memory_space<vmem>>, %arg5: memref<6x18xf32, #tpu.memory_space<vmem>>, %arg6: memref<1x18xf32, #tpu.memory_space<vmem>>, %arg7: memref<6x18xf32, #tpu.memory_space<vmem>>, %arg8: memref<1x18xf32, #tpu.memory_space<vmem>>, %arg9: memref<6x18xf32, #tpu.memory_space<vmem>>, %arg10: memref<1x18xf32, #tpu.memory_space<vmem>>, %arg11: memref<6x18xf32, #tpu.memory_space<vmem>>, %arg12: memref<1x18xf32, #tpu.memory_space<vmem>>, %arg13: memref<6x18xf32, #tpu.memory_space<vmem>>, %arg14: memref<1x18xf32, #tpu.memory_space<vmem>>, %arg15: memref<6x18xf32, #tpu.memory_space<vmem>>, %arg16: memref<1x18xf32, #tpu.memory_space<vmem>>, %arg17: memref<6x18xf32, #tpu.memory_space<vmem>>, %arg18: memref<1x18xf32, #tpu.memory_space<vmem>>, %arg19: memref<96x2xf32, #tpu.memory_space<vmem>>) attributes {dimension_semantics = [#tpu.dimension_semantics<arbitrary>], iteration_bounds = array<i64: 1>, scalar_prefetch = 0 : i64, scratch_operands = 0 : i64, tpu.core_type = #tpu.core_type<tc>, window_params = [{pipeline_mode = #tpu.pipeline_mode<synchronous>, transform_indices = @transform_0, window_bounds = array<i64: 128, 64>}, {pipeline_mode = #tpu.pipeline_mode<synchronous>, transform_indices = @transform_1, window_bounds = array<i64: 16, 6>}, {pipeline_mode = #tpu.pipeline_mode<synchronous>, transform_indices = @transform_2, window_bounds = array<i64: 64, 18>}, {pipeline_mode = #tpu.pipeline_mode<synchronous>, transform_indices = @transform_3, window_bounds = array<i64: 1, 18>}, {pipeline_mode = #tpu.pipeline_mode<synchronous>, transform_indices = @transform_4, window_bounds = array<i64: 6, 18>}, {pipeline_mode = #tpu.pipeline_mode<synchronous>, transform_indices = @transform_5, window_bounds = array<i64: 1, 18>}, {pipeline_mode = #tpu.pipeline_mode<synchronous>, transform_indices = @transform_6, window_bounds = array<i64: 6, 18>}, {pipeline_mode = #tpu.pipeline_mode<synchronous>, transform_indices = @transform_7, window_bounds = array<i64: 1, 18>}, {pipeline_mode = #tpu.pipeline_mode<synchronous>, transform_indices = @transform_8, window_bounds = array<i64: 6, 18>}, {pipeline_mode = #tpu.pipeline_mode<synchronous>, transform_indices = @transform_9, window_bounds = array<i64: 1, 18>}, {pipeline_mode = #tpu.pipeline_mode<synchronous>, transform_indices = @transform_10, window_bounds = array<i64: 6, 18>}, {pipeline_mode = #tpu.pipeline_mode<synchronous>, transform_indices = @transform_11, window_bounds = array<i64: 1, 18>}, {pipeline_mode = #tpu.pipeline_mode<synchronous>, transform_indices = @transform_12, window_bounds = array<i64: 6, 18>}, {pipeline_mode = #tpu.pipeline_mode<synchronous>, transform_indices = @transform_13, window_bounds = array<i64: 1, 18>}, {pipeline_mode = #tpu.pipeline_mode<synchronous>, transform_indices = @transform_14, window_bounds = array<i64: 6, 18>}, {pipeline_mode = #tpu.pipeline_mode<synchronous>, transform_indices = @transform_15, window_bounds = array<i64: 1, 18>}, {pipeline_mode = #tpu.pipeline_mode<synchronous>, transform_indices = @transform_16, window_bounds = array<i64: 6, 18>}, {pipeline_mode = #tpu.pipeline_mode<synchronous>, transform_indices = @transform_17, window_bounds = array<i64: 1, 18>}, {pipeline_mode = #tpu.pipeline_mode<synchronous>, transform_indices = @transform_18, window_bounds = array<i64: 96, 2>}]} {
    %c0 = arith.constant 0 : index
    %c0_0 = arith.constant 0 : index
    %0 = vector.load %arg5[%c0, %c0_0] : memref<6x18xf32, #tpu.memory_space<vmem>>, vector<6x18xf32>
    %c0_1 = arith.constant 0 : index
    %c0_2 = arith.constant 0 : index
    %1 = vector.load %arg6[%c0_1, %c0_2] : memref<1x18xf32, #tpu.memory_space<vmem>>, vector<1x18xf32>
    %c0_3 = arith.constant 0 : index
    %c0_4 = arith.constant 0 : index
    %2 = vector.load %arg7[%c0_3, %c0_4] : memref<6x18xf32, #tpu.memory_space<vmem>>, vector<6x18xf32>
    %c0_5 = arith.constant 0 : index
    %c0_6 = arith.constant 0 : index
    %3 = vector.load %arg8[%c0_5, %c0_6] : memref<1x18xf32, #tpu.memory_space<vmem>>, vector<1x18xf32>
    %c0_7 = arith.constant 0 : index
    %c0_8 = arith.constant 0 : index
    %4 = vector.load %arg9[%c0_7, %c0_8] : memref<6x18xf32, #tpu.memory_space<vmem>>, vector<6x18xf32>
    %c0_9 = arith.constant 0 : index
    %c0_10 = arith.constant 0 : index
    %5 = vector.load %arg10[%c0_9, %c0_10] : memref<1x18xf32, #tpu.memory_space<vmem>>, vector<1x18xf32>
    %c0_11 = arith.constant 0 : index
    %c0_12 = arith.constant 0 : index
    %6 = vector.load %arg11[%c0_11, %c0_12] : memref<6x18xf32, #tpu.memory_space<vmem>>, vector<6x18xf32>
    %c0_13 = arith.constant 0 : index
    %c0_14 = arith.constant 0 : index
    %7 = vector.load %arg12[%c0_13, %c0_14] : memref<1x18xf32, #tpu.memory_space<vmem>>, vector<1x18xf32>
    %c0_15 = arith.constant 0 : index
    %c0_16 = arith.constant 0 : index
    %8 = vector.load %arg13[%c0_15, %c0_16] : memref<6x18xf32, #tpu.memory_space<vmem>>, vector<6x18xf32>
    %c0_17 = arith.constant 0 : index
    %c0_18 = arith.constant 0 : index
    %9 = vector.load %arg14[%c0_17, %c0_18] : memref<1x18xf32, #tpu.memory_space<vmem>>, vector<1x18xf32>
    %c0_19 = arith.constant 0 : index
    %c0_20 = arith.constant 0 : index
    %10 = vector.load %arg15[%c0_19, %c0_20] : memref<6x18xf32, #tpu.memory_space<vmem>>, vector<6x18xf32>
    %c0_21 = arith.constant 0 : index
    %c0_22 = arith.constant 0 : index
    %11 = vector.load %arg16[%c0_21, %c0_22] : memref<1x18xf32, #tpu.memory_space<vmem>>, vector<1x18xf32>
    %c0_23 = arith.constant 0 : index
    %c0_24 = arith.constant 0 : index
    %12 = vector.load %arg17[%c0_23, %c0_24] : memref<6x18xf32, #tpu.memory_space<vmem>>, vector<6x18xf32>
    %c0_25 = arith.constant 0 : index
    %c0_26 = arith.constant 0 : index
    %13 = vector.load %arg18[%c0_25, %c0_26] : memref<1x18xf32, #tpu.memory_space<vmem>>, vector<1x18xf32>
    %c0_27 = arith.constant 0 : index
    %c0_28 = arith.constant 0 : index
    %14 = vector.load %arg1[%c0_27, %c0_28] : memref<128x64xf32, #tpu.memory_space<vmem>>, vector<128x64xf32>
    %c0_29 = arith.constant 0 : index
    %c0_30 = arith.constant 0 : index
    %15 = vector.load %arg3[%c0_29, %c0_30] : memref<64x18xf32, #tpu.memory_space<vmem>>, vector<64x18xf32>
    %cst = arith.constant dense<0.000000e+00> : vector<128x18xf32>
    %16 = tpu.matmul %14, %15, %cst {dimension_numbers = #tpu.dot_dimension_numbers<[1], [0], [0], [1], [0, 0, 1, 1], [], []>} : vector<128x64xf32>, vector<64x18xf32>, vector<128x18xf32> -> vector<128x18xf32>
    %c0_31 = arith.constant 0 : index
    %c0_32 = arith.constant 0 : index
    %17 = vector.load %arg4[%c0_31, %c0_32] : memref<1x18xf32, #tpu.memory_space<vmem>>, vector<1x18xf32>
    %18 = vector.broadcast %17 : vector<1x18xf32> to vector<128x18xf32>
    %19 = arith.addf %16, %18 : vector<128x18xf32>
    %cst_33 = arith.constant 0.000000e+00 : f32
    %20 = vector.broadcast %cst_33 : f32 to vector<16x6xf32>
    %cst_34 = arith.constant 0.000000e+00 : f32
    %21 = vector.broadcast %cst_34 : f32 to vector<16x6xf32>
    %22 = vector.extract_strided_slice %19 {offsets = [0, 0], sizes = [16, 18], strides = [1, 1]} : vector<128x18xf32> to vector<16x18xf32>
    %cst_35 = arith.constant dense<0.000000e+00> : vector<16x18xf32>
    %23 = tpu.matmul %20, %0, %cst_35 {dimension_numbers = #tpu.dot_dimension_numbers<[1], [0], [0], [1], [0, 0, 1, 1], [], []>} : vector<16x6xf32>, vector<6x18xf32>, vector<16x18xf32> -> vector<16x18xf32>
    %24 = vector.broadcast %1 : vector<1x18xf32> to vector<16x18xf32>
    %25 = arith.addf %23, %24 : vector<16x18xf32>
    %26 = vector.extract_strided_slice %22 {offsets = [0, 0], sizes = [16, 6], strides = [1, 1]} : vector<16x18xf32> to vector<16x6xf32>
    %27 = vector.extract_strided_slice %25 {offsets = [0, 0], sizes = [16, 6], strides = [1, 1]} : vector<16x18xf32> to vector<16x6xf32>
    %28 = arith.addf %26, %27 : vector<16x6xf32>
    %29 = arith.negf %28 : vector<16x6xf32>
    %30 = math.exp %29 : vector<16x6xf32>
    %cst_36 = arith.constant 1.000000e+00 : f32
    %31 = vector.broadcast %cst_36 : f32 to vector<16x6xf32>
    %32 = arith.addf %31, %30 : vector<16x6xf32>
    %33 = arith.divf %31, %32 : vector<16x6xf32>
    %34 = vector.extract_strided_slice %22 {offsets = [0, 6], sizes = [16, 6], strides = [1, 1]} : vector<16x18xf32> to vector<16x6xf32>
    %35 = vector.extract_strided_slice %25 {offsets = [0, 6], sizes = [16, 6], strides = [1, 1]} : vector<16x18xf32> to vector<16x6xf32>
    %36 = arith.addf %34, %35 : vector<16x6xf32>
    %37 = arith.negf %36 : vector<16x6xf32>
    %38 = math.exp %37 : vector<16x6xf32>
    %cst_37 = arith.constant 1.000000e+00 : f32
    %39 = vector.broadcast %cst_37 : f32 to vector<16x6xf32>
    %40 = arith.addf %39, %38 : vector<16x6xf32>
    %41 = arith.divf %39, %40 : vector<16x6xf32>
    %42 = vector.extract_strided_slice %22 {offsets = [0, 12], sizes = [16, 6], strides = [1, 1]} : vector<16x18xf32> to vector<16x6xf32>
    %43 = vector.extract_strided_slice %25 {offsets = [0, 12], sizes = [16, 6], strides = [1, 1]} : vector<16x18xf32> to vector<16x6xf32>
    %44 = arith.mulf %33, %43 : vector<16x6xf32>
    %45 = arith.addf %42, %44 : vector<16x6xf32>
    %46 = math.tanh %45 : vector<16x6xf32>
    %cst_38 = arith.constant 1.000000e+00 : f32
    %47 = vector.broadcast %cst_38 : f32 to vector<16x6xf32>
    %48 = arith.subf %47, %41 : vector<16x6xf32>
    %49 = arith.mulf %48, %46 : vector<16x6xf32>
    %50 = arith.mulf %41, %20 : vector<16x6xf32>
    %51 = arith.addf %49, %50 : vector<16x6xf32>
    %cst_39 = arith.constant dense<0.000000e+00> : vector<16x18xf32>
    %52 = tpu.matmul %51, %2, %cst_39 {dimension_numbers = #tpu.dot_dimension_numbers<[1], [0], [0], [1], [0, 0, 1, 1], [], []>} : vector<16x6xf32>, vector<6x18xf32>, vector<16x18xf32> -> vector<16x18xf32>
    %53 = vector.broadcast %3 : vector<1x18xf32> to vector<16x18xf32>
    %54 = arith.addf %52, %53 : vector<16x18xf32>
    %cst_40 = arith.constant dense<0.000000e+00> : vector<16x18xf32>
    %55 = tpu.matmul %21, %4, %cst_40 {dimension_numbers = #tpu.dot_dimension_numbers<[1], [0], [0], [1], [0, 0, 1, 1], [], []>} : vector<16x6xf32>, vector<6x18xf32>, vector<16x18xf32> -> vector<16x18xf32>
    %56 = vector.broadcast %5 : vector<1x18xf32> to vector<16x18xf32>
    %57 = arith.addf %55, %56 : vector<16x18xf32>
    %58 = vector.extract_strided_slice %54 {offsets = [0, 0], sizes = [16, 6], strides = [1, 1]} : vector<16x18xf32> to vector<16x6xf32>
    %59 = vector.extract_strided_slice %57 {offsets = [0, 0], sizes = [16, 6], strides = [1, 1]} : vector<16x18xf32> to vector<16x6xf32>
    %60 = arith.addf %58, %59 : vector<16x6xf32>
    %61 = arith.negf %60 : vector<16x6xf32>
    %62 = math.exp %61 : vector<16x6xf32>
    %cst_41 = arith.constant 1.000000e+00 : f32
    %63 = vector.broadcast %cst_41 : f32 to vector<16x6xf32>
    %64 = arith.addf %63, %62 : vector<16x6xf32>
    %65 = arith.divf %63, %64 : vector<16x6xf32>
    %66 = vector.extract_strided_slice %54 {offsets = [0, 6], sizes = [16, 6], strides = [1, 1]} : vector<16x18xf32> to vector<16x6xf32>
    %67 = vector.extract_strided_slice %57 {offsets = [0, 6], sizes = [16, 6], strides = [1, 1]} : vector<16x18xf32> to vector<16x6xf32>
    %68 = arith.addf %66, %67 : vector<16x6xf32>
    %69 = arith.negf %68 : vector<16x6xf32>
    %70 = math.exp %69 : vector<16x6xf32>
    %cst_42 = arith.constant 1.000000e+00 : f32
    %71 = vector.broadcast %cst_42 : f32 to vector<16x6xf32>
    %72 = arith.addf %71, %70 : vector<16x6xf32>
    %73 = arith.divf %71, %72 : vector<16x6xf32>
    %74 = vector.extract_strided_slice %54 {offsets = [0, 12], sizes = [16, 6], strides = [1, 1]} : vector<16x18xf32> to vector<16x6xf32>
    %75 = vector.extract_strided_slice %57 {offsets = [0, 12], sizes = [16, 6], strides = [1, 1]} : vector<16x18xf32> to vector<16x6xf32>
    %76 = arith.mulf %65, %75 : vector<16x6xf32>
    %77 = arith.addf %74, %76 : vector<16x6xf32>
    %78 = math.tanh %77 : vector<16x6xf32>
    %cst_43 = arith.constant 1.000000e+00 : f32
    %79 = vector.broadcast %cst_43 : f32 to vector<16x6xf32>
    %80 = arith.subf %79, %73 : vector<16x6xf32>
    %81 = arith.mulf %80, %78 : vector<16x6xf32>
    %82 = arith.mulf %73, %21 : vector<16x6xf32>
    %83 = arith.addf %81, %82 : vector<16x6xf32>
    %84 = vector.extract_strided_slice %19 {offsets = [16, 0], sizes = [16, 18], strides = [1, 1]} : vector<128x18xf32> to vector<16x18xf32>
    %cst_44 = arith.constant dense<0.000000e+00> : vector<16x18xf32>
    %85 = tpu.matmul %51, %0, %cst_44 {dimension_numbers = #tpu.dot_dimension_numbers<[1], [0], [0], [1], [0, 0, 1, 1], [], []>} : vector<16x6xf32>, vector<6x18xf32>, vector<16x18xf32> -> vector<16x18xf32>
    %86 = vector.broadcast %1 : vector<1x18xf32> to vector<16x18xf32>
    %87 = arith.addf %85, %86 : vector<16x18xf32>
    %88 = vector.extract_strided_slice %84 {offsets = [0, 0], sizes = [16, 6], strides = [1, 1]} : vector<16x18xf32> to vector<16x6xf32>
    %89 = vector.extract_strided_slice %87 {offsets = [0, 0], sizes = [16, 6], strides = [1, 1]} : vector<16x18xf32> to vector<16x6xf32>
    %90 = arith.addf %88, %89 : vector<16x6xf32>
    %91 = arith.negf %90 : vector<16x6xf32>
    %92 = math.exp %91 : vector<16x6xf32>
    %cst_45 = arith.constant 1.000000e+00 : f32
    %93 = vector.broadcast %cst_45 : f32 to vector<16x6xf32>
    %94 = arith.addf %93, %92 : vector<16x6xf32>
    %95 = arith.divf %93, %94 : vector<16x6xf32>
    %96 = vector.extract_strided_slice %84 {offsets = [0, 6], sizes = [16, 6], strides = [1, 1]} : vector<16x18xf32> to vector<16x6xf32>
    %97 = vector.extract_strided_slice %87 {offsets = [0, 6], sizes = [16, 6], strides = [1, 1]} : vector<16x18xf32> to vector<16x6xf32>
    %98 = arith.addf %96, %97 : vector<16x6xf32>
    %99 = arith.negf %98 : vector<16x6xf32>
    %100 = math.exp %99 : vector<16x6xf32>
    %cst_46 = arith.constant 1.000000e+00 : f32
    %101 = vector.broadcast %cst_46 : f32 to vector<16x6xf32>
    %102 = arith.addf %101, %100 : vector<16x6xf32>
    %103 = arith.divf %101, %102 : vector<16x6xf32>
    %104 = vector.extract_strided_slice %84 {offsets = [0, 12], sizes = [16, 6], strides = [1, 1]} : vector<16x18xf32> to vector<16x6xf32>
    %105 = vector.extract_strided_slice %87 {offsets = [0, 12], sizes = [16, 6], strides = [1, 1]} : vector<16x18xf32> to vector<16x6xf32>
    %106 = arith.mulf %95, %105 : vector<16x6xf32>
    %107 = arith.addf %104, %106 : vector<16x6xf32>
    %108 = math.tanh %107 : vector<16x6xf32>
    %cst_47 = arith.constant 1.000000e+00 : f32
    %109 = vector.broadcast %cst_47 : f32 to vector<16x6xf32>
    %110 = arith.subf %109, %103 : vector<16x6xf32>
    %111 = arith.mulf %110, %108 : vector<16x6xf32>
    %112 = arith.mulf %103, %51 : vector<16x6xf32>
    %113 = arith.addf %111, %112 : vector<16x6xf32>
    %cst_48 = arith.constant dense<0.000000e+00> : vector<16x18xf32>
    %114 = tpu.matmul %113, %2, %cst_48 {dimension_numbers = #tpu.dot_dimension_numbers<[1], [0], [0], [1], [0, 0, 1, 1], [], []>} : vector<16x6xf32>, vector<6x18xf32>, vector<16x18xf32> -> vector<16x18xf32>
    %115 = vector.broadcast %3 : vector<1x18xf32> to vector<16x18xf32>
    %116 = arith.addf %114, %115 : vector<16x18xf32>
    %cst_49 = arith.constant dense<0.000000e+00> : vector<16x18xf32>
    %117 = tpu.matmul %83, %4, %cst_49 {dimension_numbers = #tpu.dot_dimension_numbers<[1], [0], [0], [1], [0, 0, 1, 1], [], []>} : vector<16x6xf32>, vector<6x18xf32>, vector<16x18xf32> -> vector<16x18xf32>
    %118 = vector.broadcast %5 : vector<1x18xf32> to vector<16x18xf32>
    %119 = arith.addf %117, %118 : vector<16x18xf32>
    %120 = vector.extract_strided_slice %116 {offsets = [0, 0], sizes = [16, 6], strides = [1, 1]} : vector<16x18xf32> to vector<16x6xf32>
    %121 = vector.extract_strided_slice %119 {offsets = [0, 0], sizes = [16, 6], strides = [1, 1]} : vector<16x18xf32> to vector<16x6xf32>
    %122 = arith.addf %120, %121 : vector<16x6xf32>
    %123 = arith.negf %122 : vector<16x6xf32>
    %124 = math.exp %123 : vector<16x6xf32>
    %cst_50 = arith.constant 1.000000e+00 : f32
    %125 = vector.broadcast %cst_50 : f32 to vector<16x6xf32>
    %126 = arith.addf %125, %124 : vector<16x6xf32>
    %127 = arith.divf %125, %126 : vector<16x6xf32>
    %128 = vector.extract_strided_slice %116 {offsets = [0, 6], sizes = [16, 6], strides = [1, 1]} : vector<16x18xf32> to vector<16x6xf32>
    %129 = vector.extract_strided_slice %119 {offsets = [0, 6], sizes = [16, 6], strides = [1, 1]} : vector<16x18xf32> to vector<16x6xf32>
    %130 = arith.addf %128, %129 : vector<16x6xf32>
    %131 = arith.negf %130 : vector<16x6xf32>
    %132 = math.exp %131 : vector<16x6xf32>
    %cst_51 = arith.constant 1.000000e+00 : f32
    %133 = vector.broadcast %cst_51 : f32 to vector<16x6xf32>
    %134 = arith.addf %133, %132 : vector<16x6xf32>
    %135 = arith.divf %133, %134 : vector<16x6xf32>
    %136 = vector.extract_strided_slice %116 {offsets = [0, 12], sizes = [16, 6], strides = [1, 1]} : vector<16x18xf32> to vector<16x6xf32>
    %137 = vector.extract_strided_slice %119 {offsets = [0, 12], sizes = [16, 6], strides = [1, 1]} : vector<16x18xf32> to vector<16x6xf32>
    %138 = arith.mulf %127, %137 : vector<16x6xf32>
    %139 = arith.addf %136, %138 : vector<16x6xf32>
    %140 = math.tanh %139 : vector<16x6xf32>
    %cst_52 = arith.constant 1.000000e+00 : f32
    %141 = vector.broadcast %cst_52 : f32 to vector<16x6xf32>
    %142 = arith.subf %141, %135 : vector<16x6xf32>
    %143 = arith.mulf %142, %140 : vector<16x6xf32>
    %144 = arith.mulf %135, %83 : vector<16x6xf32>
    %145 = arith.addf %143, %144 : vector<16x6xf32>
    %146 = vector.extract_strided_slice %19 {offsets = [32, 0], sizes = [16, 18], strides = [1, 1]} : vector<128x18xf32> to vector<16x18xf32>
    %cst_53 = arith.constant dense<0.000000e+00> : vector<16x18xf32>
    %147 = tpu.matmul %113, %0, %cst_53 {dimension_numbers = #tpu.dot_dimension_numbers<[1], [0], [0], [1], [0, 0, 1, 1], [], []>} : vector<16x6xf32>, vector<6x18xf32>, vector<16x18xf32> -> vector<16x18xf32>
    %148 = vector.broadcast %1 : vector<1x18xf32> to vector<16x18xf32>
    %149 = arith.addf %147, %148 : vector<16x18xf32>
    %150 = vector.extract_strided_slice %146 {offsets = [0, 0], sizes = [16, 6], strides = [1, 1]} : vector<16x18xf32> to vector<16x6xf32>
    %151 = vector.extract_strided_slice %149 {offsets = [0, 0], sizes = [16, 6], strides = [1, 1]} : vector<16x18xf32> to vector<16x6xf32>
    %152 = arith.addf %150, %151 : vector<16x6xf32>
    %153 = arith.negf %152 : vector<16x6xf32>
    %154 = math.exp %153 : vector<16x6xf32>
    %cst_54 = arith.constant 1.000000e+00 : f32
    %155 = vector.broadcast %cst_54 : f32 to vector<16x6xf32>
    %156 = arith.addf %155, %154 : vector<16x6xf32>
    %157 = arith.divf %155, %156 : vector<16x6xf32>
    %158 = vector.extract_strided_slice %146 {offsets = [0, 6], sizes = [16, 6], strides = [1, 1]} : vector<16x18xf32> to vector<16x6xf32>
    %159 = vector.extract_strided_slice %149 {offsets = [0, 6], sizes = [16, 6], strides = [1, 1]} : vector<16x18xf32> to vector<16x6xf32>
    %160 = arith.addf %158, %159 : vector<16x6xf32>
    %161 = arith.negf %160 : vector<16x6xf32>
    %162 = math.exp %161 : vector<16x6xf32>
    %cst_55 = arith.constant 1.000000e+00 : f32
    %163 = vector.broadcast %cst_55 : f32 to vector<16x6xf32>
    %164 = arith.addf %163, %162 : vector<16x6xf32>
    %165 = arith.divf %163, %164 : vector<16x6xf32>
    %166 = vector.extract_strided_slice %146 {offsets = [0, 12], sizes = [16, 6], strides = [1, 1]} : vector<16x18xf32> to vector<16x6xf32>
    %167 = vector.extract_strided_slice %149 {offsets = [0, 12], sizes = [16, 6], strides = [1, 1]} : vector<16x18xf32> to vector<16x6xf32>
    %168 = arith.mulf %157, %167 : vector<16x6xf32>
    %169 = arith.addf %166, %168 : vector<16x6xf32>
    %170 = math.tanh %169 : vector<16x6xf32>
    %cst_56 = arith.constant 1.000000e+00 : f32
    %171 = vector.broadcast %cst_56 : f32 to vector<16x6xf32>
    %172 = arith.subf %171, %165 : vector<16x6xf32>
    %173 = arith.mulf %172, %170 : vector<16x6xf32>
    %174 = arith.mulf %165, %113 : vector<16x6xf32>
    %175 = arith.addf %173, %174 : vector<16x6xf32>
    %cst_57 = arith.constant dense<0.000000e+00> : vector<16x18xf32>
    %176 = tpu.matmul %175, %2, %cst_57 {dimension_numbers = #tpu.dot_dimension_numbers<[1], [0], [0], [1], [0, 0, 1, 1], [], []>} : vector<16x6xf32>, vector<6x18xf32>, vector<16x18xf32> -> vector<16x18xf32>
    %177 = vector.broadcast %3 : vector<1x18xf32> to vector<16x18xf32>
    %178 = arith.addf %176, %177 : vector<16x18xf32>
    %cst_58 = arith.constant dense<0.000000e+00> : vector<16x18xf32>
    %179 = tpu.matmul %145, %4, %cst_58 {dimension_numbers = #tpu.dot_dimension_numbers<[1], [0], [0], [1], [0, 0, 1, 1], [], []>} : vector<16x6xf32>, vector<6x18xf32>, vector<16x18xf32> -> vector<16x18xf32>
    %180 = vector.broadcast %5 : vector<1x18xf32> to vector<16x18xf32>
    %181 = arith.addf %179, %180 : vector<16x18xf32>
    %182 = vector.extract_strided_slice %178 {offsets = [0, 0], sizes = [16, 6], strides = [1, 1]} : vector<16x18xf32> to vector<16x6xf32>
    %183 = vector.extract_strided_slice %181 {offsets = [0, 0], sizes = [16, 6], strides = [1, 1]} : vector<16x18xf32> to vector<16x6xf32>
    %184 = arith.addf %182, %183 : vector<16x6xf32>
    %185 = arith.negf %184 : vector<16x6xf32>
    %186 = math.exp %185 : vector<16x6xf32>
    %cst_59 = arith.constant 1.000000e+00 : f32
    %187 = vector.broadcast %cst_59 : f32 to vector<16x6xf32>
    %188 = arith.addf %187, %186 : vector<16x6xf32>
    %189 = arith.divf %187, %188 : vector<16x6xf32>
    %190 = vector.extract_strided_slice %178 {offsets = [0, 6], sizes = [16, 6], strides = [1, 1]} : vector<16x18xf32> to vector<16x6xf32>
    %191 = vector.extract_strided_slice %181 {offsets = [0, 6], sizes = [16, 6], strides = [1, 1]} : vector<16x18xf32> to vector<16x6xf32>
    %192 = arith.addf %190, %191 : vector<16x6xf32>
    %193 = arith.negf %192 : vector<16x6xf32>
    %194 = math.exp %193 : vector<16x6xf32>
    %cst_60 = arith.constant 1.000000e+00 : f32
    %195 = vector.broadcast %cst_60 : f32 to vector<16x6xf32>
    %196 = arith.addf %195, %194 : vector<16x6xf32>
    %197 = arith.divf %195, %196 : vector<16x6xf32>
    %198 = vector.extract_strided_slice %178 {offsets = [0, 12], sizes = [16, 6], strides = [1, 1]} : vector<16x18xf32> to vector<16x6xf32>
    %199 = vector.extract_strided_slice %181 {offsets = [0, 12], sizes = [16, 6], strides = [1, 1]} : vector<16x18xf32> to vector<16x6xf32>
    %200 = arith.mulf %189, %199 : vector<16x6xf32>
    %201 = arith.addf %198, %200 : vector<16x6xf32>
    %202 = math.tanh %201 : vector<16x6xf32>
    %cst_61 = arith.constant 1.000000e+00 : f32
    %203 = vector.broadcast %cst_61 : f32 to vector<16x6xf32>
    %204 = arith.subf %203, %197 : vector<16x6xf32>
    %205 = arith.mulf %204, %202 : vector<16x6xf32>
    %206 = arith.mulf %197, %145 : vector<16x6xf32>
    %207 = arith.addf %205, %206 : vector<16x6xf32>
    %208 = vector.extract_strided_slice %19 {offsets = [48, 0], sizes = [16, 18], strides = [1, 1]} : vector<128x18xf32> to vector<16x18xf32>
    %cst_62 = arith.constant dense<0.000000e+00> : vector<16x18xf32>
    %209 = tpu.matmul %175, %0, %cst_62 {dimension_numbers = #tpu.dot_dimension_numbers<[1], [0], [0], [1], [0, 0, 1, 1], [], []>} : vector<16x6xf32>, vector<6x18xf32>, vector<16x18xf32> -> vector<16x18xf32>
    %210 = vector.broadcast %1 : vector<1x18xf32> to vector<16x18xf32>
    %211 = arith.addf %209, %210 : vector<16x18xf32>
    %212 = vector.extract_strided_slice %208 {offsets = [0, 0], sizes = [16, 6], strides = [1, 1]} : vector<16x18xf32> to vector<16x6xf32>
    %213 = vector.extract_strided_slice %211 {offsets = [0, 0], sizes = [16, 6], strides = [1, 1]} : vector<16x18xf32> to vector<16x6xf32>
    %214 = arith.addf %212, %213 : vector<16x6xf32>
    %215 = arith.negf %214 : vector<16x6xf32>
    %216 = math.exp %215 : vector<16x6xf32>
    %cst_63 = arith.constant 1.000000e+00 : f32
    %217 = vector.broadcast %cst_63 : f32 to vector<16x6xf32>
    %218 = arith.addf %217, %216 : vector<16x6xf32>
    %219 = arith.divf %217, %218 : vector<16x6xf32>
    %220 = vector.extract_strided_slice %208 {offsets = [0, 6], sizes = [16, 6], strides = [1, 1]} : vector<16x18xf32> to vector<16x6xf32>
    %221 = vector.extract_strided_slice %211 {offsets = [0, 6], sizes = [16, 6], strides = [1, 1]} : vector<16x18xf32> to vector<16x6xf32>
    %222 = arith.addf %220, %221 : vector<16x6xf32>
    %223 = arith.negf %222 : vector<16x6xf32>
    %224 = math.exp %223 : vector<16x6xf32>
    %cst_64 = arith.constant 1.000000e+00 : f32
    %225 = vector.broadcast %cst_64 : f32 to vector<16x6xf32>
    %226 = arith.addf %225, %224 : vector<16x6xf32>
    %227 = arith.divf %225, %226 : vector<16x6xf32>
    %228 = vector.extract_strided_slice %208 {offsets = [0, 12], sizes = [16, 6], strides = [1, 1]} : vector<16x18xf32> to vector<16x6xf32>
    %229 = vector.extract_strided_slice %211 {offsets = [0, 12], sizes = [16, 6], strides = [1, 1]} : vector<16x18xf32> to vector<16x6xf32>
    %230 = arith.mulf %219, %229 : vector<16x6xf32>
    %231 = arith.addf %228, %230 : vector<16x6xf32>
    %232 = math.tanh %231 : vector<16x6xf32>
    %cst_65 = arith.constant 1.000000e+00 : f32
    %233 = vector.broadcast %cst_65 : f32 to vector<16x6xf32>
    %234 = arith.subf %233, %227 : vector<16x6xf32>
    %235 = arith.mulf %234, %232 : vector<16x6xf32>
    %236 = arith.mulf %227, %175 : vector<16x6xf32>
    %237 = arith.addf %235, %236 : vector<16x6xf32>
    %cst_66 = arith.constant dense<0.000000e+00> : vector<16x18xf32>
    %238 = tpu.matmul %237, %2, %cst_66 {dimension_numbers = #tpu.dot_dimension_numbers<[1], [0], [0], [1], [0, 0, 1, 1], [], []>} : vector<16x6xf32>, vector<6x18xf32>, vector<16x18xf32> -> vector<16x18xf32>
    %239 = vector.broadcast %3 : vector<1x18xf32> to vector<16x18xf32>
    %240 = arith.addf %238, %239 : vector<16x18xf32>
    %cst_67 = arith.constant dense<0.000000e+00> : vector<16x18xf32>
    %241 = tpu.matmul %207, %4, %cst_67 {dimension_numbers = #tpu.dot_dimension_numbers<[1], [0], [0], [1], [0, 0, 1, 1], [], []>} : vector<16x6xf32>, vector<6x18xf32>, vector<16x18xf32> -> vector<16x18xf32>
    %242 = vector.broadcast %5 : vector<1x18xf32> to vector<16x18xf32>
    %243 = arith.addf %241, %242 : vector<16x18xf32>
    %244 = vector.extract_strided_slice %240 {offsets = [0, 0], sizes = [16, 6], strides = [1, 1]} : vector<16x18xf32> to vector<16x6xf32>
    %245 = vector.extract_strided_slice %243 {offsets = [0, 0], sizes = [16, 6], strides = [1, 1]} : vector<16x18xf32> to vector<16x6xf32>
    %246 = arith.addf %244, %245 : vector<16x6xf32>
    %247 = arith.negf %246 : vector<16x6xf32>
    %248 = math.exp %247 : vector<16x6xf32>
    %cst_68 = arith.constant 1.000000e+00 : f32
    %249 = vector.broadcast %cst_68 : f32 to vector<16x6xf32>
    %250 = arith.addf %249, %248 : vector<16x6xf32>
    %251 = arith.divf %249, %250 : vector<16x6xf32>
    %252 = vector.extract_strided_slice %240 {offsets = [0, 6], sizes = [16, 6], strides = [1, 1]} : vector<16x18xf32> to vector<16x6xf32>
    %253 = vector.extract_strided_slice %243 {offsets = [0, 6], sizes = [16, 6], strides = [1, 1]} : vector<16x18xf32> to vector<16x6xf32>
    %254 = arith.addf %252, %253 : vector<16x6xf32>
    %255 = arith.negf %254 : vector<16x6xf32>
    %256 = math.exp %255 : vector<16x6xf32>
    %cst_69 = arith.constant 1.000000e+00 : f32
    %257 = vector.broadcast %cst_69 : f32 to vector<16x6xf32>
    %258 = arith.addf %257, %256 : vector<16x6xf32>
    %259 = arith.divf %257, %258 : vector<16x6xf32>
    %260 = vector.extract_strided_slice %240 {offsets = [0, 12], sizes = [16, 6], strides = [1, 1]} : vector<16x18xf32> to vector<16x6xf32>
    %261 = vector.extract_strided_slice %243 {offsets = [0, 12], sizes = [16, 6], strides = [1, 1]} : vector<16x18xf32> to vector<16x6xf32>
    %262 = arith.mulf %251, %261 : vector<16x6xf32>
    %263 = arith.addf %260, %262 : vector<16x6xf32>
    %264 = math.tanh %263 : vector<16x6xf32>
    %cst_70 = arith.constant 1.000000e+00 : f32
    %265 = vector.broadcast %cst_70 : f32 to vector<16x6xf32>
    %266 = arith.subf %265, %259 : vector<16x6xf32>
    %267 = arith.mulf %266, %264 : vector<16x6xf32>
    %268 = arith.mulf %259, %207 : vector<16x6xf32>
    %269 = arith.addf %267, %268 : vector<16x6xf32>
    %270 = vector.extract_strided_slice %19 {offsets = [64, 0], sizes = [16, 18], strides = [1, 1]} : vector<128x18xf32> to vector<16x18xf32>
    %cst_71 = arith.constant dense<0.000000e+00> : vector<16x18xf32>
    %271 = tpu.matmul %237, %0, %cst_71 {dimension_numbers = #tpu.dot_dimension_numbers<[1], [0], [0], [1], [0, 0, 1, 1], [], []>} : vector<16x6xf32>, vector<6x18xf32>, vector<16x18xf32> -> vector<16x18xf32>
    %272 = vector.broadcast %1 : vector<1x18xf32> to vector<16x18xf32>
    %273 = arith.addf %271, %272 : vector<16x18xf32>
    %274 = vector.extract_strided_slice %270 {offsets = [0, 0], sizes = [16, 6], strides = [1, 1]} : vector<16x18xf32> to vector<16x6xf32>
    %275 = vector.extract_strided_slice %273 {offsets = [0, 0], sizes = [16, 6], strides = [1, 1]} : vector<16x18xf32> to vector<16x6xf32>
    %276 = arith.addf %274, %275 : vector<16x6xf32>
    %277 = arith.negf %276 : vector<16x6xf32>
    %278 = math.exp %277 : vector<16x6xf32>
    %cst_72 = arith.constant 1.000000e+00 : f32
    %279 = vector.broadcast %cst_72 : f32 to vector<16x6xf32>
    %280 = arith.addf %279, %278 : vector<16x6xf32>
    %281 = arith.divf %279, %280 : vector<16x6xf32>
    %282 = vector.extract_strided_slice %270 {offsets = [0, 6], sizes = [16, 6], strides = [1, 1]} : vector<16x18xf32> to vector<16x6xf32>
    %283 = vector.extract_strided_slice %273 {offsets = [0, 6], sizes = [16, 6], strides = [1, 1]} : vector<16x18xf32> to vector<16x6xf32>
    %284 = arith.addf %282, %283 : vector<16x6xf32>
    %285 = arith.negf %284 : vector<16x6xf32>
    %286 = math.exp %285 : vector<16x6xf32>
    %cst_73 = arith.constant 1.000000e+00 : f32
    %287 = vector.broadcast %cst_73 : f32 to vector<16x6xf32>
    %288 = arith.addf %287, %286 : vector<16x6xf32>
    %289 = arith.divf %287, %288 : vector<16x6xf32>
    %290 = vector.extract_strided_slice %270 {offsets = [0, 12], sizes = [16, 6], strides = [1, 1]} : vector<16x18xf32> to vector<16x6xf32>
    %291 = vector.extract_strided_slice %273 {offsets = [0, 12], sizes = [16, 6], strides = [1, 1]} : vector<16x18xf32> to vector<16x6xf32>
    %292 = arith.mulf %281, %291 : vector<16x6xf32>
    %293 = arith.addf %290, %292 : vector<16x6xf32>
    %294 = math.tanh %293 : vector<16x6xf32>
    %cst_74 = arith.constant 1.000000e+00 : f32
    %295 = vector.broadcast %cst_74 : f32 to vector<16x6xf32>
    %296 = arith.subf %295, %289 : vector<16x6xf32>
    %297 = arith.mulf %296, %294 : vector<16x6xf32>
    %298 = arith.mulf %289, %237 : vector<16x6xf32>
    %299 = arith.addf %297, %298 : vector<16x6xf32>
    %cst_75 = arith.constant dense<0.000000e+00> : vector<16x18xf32>
    %300 = tpu.matmul %299, %2, %cst_75 {dimension_numbers = #tpu.dot_dimension_numbers<[1], [0], [0], [1], [0, 0, 1, 1], [], []>} : vector<16x6xf32>, vector<6x18xf32>, vector<16x18xf32> -> vector<16x18xf32>
    %301 = vector.broadcast %3 : vector<1x18xf32> to vector<16x18xf32>
    %302 = arith.addf %300, %301 : vector<16x18xf32>
    %cst_76 = arith.constant dense<0.000000e+00> : vector<16x18xf32>
    %303 = tpu.matmul %269, %4, %cst_76 {dimension_numbers = #tpu.dot_dimension_numbers<[1], [0], [0], [1], [0, 0, 1, 1], [], []>} : vector<16x6xf32>, vector<6x18xf32>, vector<16x18xf32> -> vector<16x18xf32>
    %304 = vector.broadcast %5 : vector<1x18xf32> to vector<16x18xf32>
    %305 = arith.addf %303, %304 : vector<16x18xf32>
    %306 = vector.extract_strided_slice %302 {offsets = [0, 0], sizes = [16, 6], strides = [1, 1]} : vector<16x18xf32> to vector<16x6xf32>
    %307 = vector.extract_strided_slice %305 {offsets = [0, 0], sizes = [16, 6], strides = [1, 1]} : vector<16x18xf32> to vector<16x6xf32>
    %308 = arith.addf %306, %307 : vector<16x6xf32>
    %309 = arith.negf %308 : vector<16x6xf32>
    %310 = math.exp %309 : vector<16x6xf32>
    %cst_77 = arith.constant 1.000000e+00 : f32
    %311 = vector.broadcast %cst_77 : f32 to vector<16x6xf32>
    %312 = arith.addf %311, %310 : vector<16x6xf32>
    %313 = arith.divf %311, %312 : vector<16x6xf32>
    %314 = vector.extract_strided_slice %302 {offsets = [0, 6], sizes = [16, 6], strides = [1, 1]} : vector<16x18xf32> to vector<16x6xf32>
    %315 = vector.extract_strided_slice %305 {offsets = [0, 6], sizes = [16, 6], strides = [1, 1]} : vector<16x18xf32> to vector<16x6xf32>
    %316 = arith.addf %314, %315 : vector<16x6xf32>
    %317 = arith.negf %316 : vector<16x6xf32>
    %318 = math.exp %317 : vector<16x6xf32>
    %cst_78 = arith.constant 1.000000e+00 : f32
    %319 = vector.broadcast %cst_78 : f32 to vector<16x6xf32>
    %320 = arith.addf %319, %318 : vector<16x6xf32>
    %321 = arith.divf %319, %320 : vector<16x6xf32>
    %322 = vector.extract_strided_slice %302 {offsets = [0, 12], sizes = [16, 6], strides = [1, 1]} : vector<16x18xf32> to vector<16x6xf32>
    %323 = vector.extract_strided_slice %305 {offsets = [0, 12], sizes = [16, 6], strides = [1, 1]} : vector<16x18xf32> to vector<16x6xf32>
    %324 = arith.mulf %313, %323 : vector<16x6xf32>
    %325 = arith.addf %322, %324 : vector<16x6xf32>
    %326 = math.tanh %325 : vector<16x6xf32>
    %cst_79 = arith.constant 1.000000e+00 : f32
    %327 = vector.broadcast %cst_79 : f32 to vector<16x6xf32>
    %328 = arith.subf %327, %321 : vector<16x6xf32>
    %329 = arith.mulf %328, %326 : vector<16x6xf32>
    %330 = arith.mulf %321, %269 : vector<16x6xf32>
    %331 = arith.addf %329, %330 : vector<16x6xf32>
    %332 = vector.extract_strided_slice %19 {offsets = [80, 0], sizes = [16, 18], strides = [1, 1]} : vector<128x18xf32> to vector<16x18xf32>
    %cst_80 = arith.constant dense<0.000000e+00> : vector<16x18xf32>
    %333 = tpu.matmul %299, %0, %cst_80 {dimension_numbers = #tpu.dot_dimension_numbers<[1], [0], [0], [1], [0, 0, 1, 1], [], []>} : vector<16x6xf32>, vector<6x18xf32>, vector<16x18xf32> -> vector<16x18xf32>
    %334 = vector.broadcast %1 : vector<1x18xf32> to vector<16x18xf32>
    %335 = arith.addf %333, %334 : vector<16x18xf32>
    %336 = vector.extract_strided_slice %332 {offsets = [0, 0], sizes = [16, 6], strides = [1, 1]} : vector<16x18xf32> to vector<16x6xf32>
    %337 = vector.extract_strided_slice %335 {offsets = [0, 0], sizes = [16, 6], strides = [1, 1]} : vector<16x18xf32> to vector<16x6xf32>
    %338 = arith.addf %336, %337 : vector<16x6xf32>
    %339 = arith.negf %338 : vector<16x6xf32>
    %340 = math.exp %339 : vector<16x6xf32>
    %cst_81 = arith.constant 1.000000e+00 : f32
    %341 = vector.broadcast %cst_81 : f32 to vector<16x6xf32>
    %342 = arith.addf %341, %340 : vector<16x6xf32>
    %343 = arith.divf %341, %342 : vector<16x6xf32>
    %344 = vector.extract_strided_slice %332 {offsets = [0, 6], sizes = [16, 6], strides = [1, 1]} : vector<16x18xf32> to vector<16x6xf32>
    %345 = vector.extract_strided_slice %335 {offsets = [0, 6], sizes = [16, 6], strides = [1, 1]} : vector<16x18xf32> to vector<16x6xf32>
    %346 = arith.addf %344, %345 : vector<16x6xf32>
    %347 = arith.negf %346 : vector<16x6xf32>
    %348 = math.exp %347 : vector<16x6xf32>
    %cst_82 = arith.constant 1.000000e+00 : f32
    %349 = vector.broadcast %cst_82 : f32 to vector<16x6xf32>
    %350 = arith.addf %349, %348 : vector<16x6xf32>
    %351 = arith.divf %349, %350 : vector<16x6xf32>
    %352 = vector.extract_strided_slice %332 {offsets = [0, 12], sizes = [16, 6], strides = [1, 1]} : vector<16x18xf32> to vector<16x6xf32>
    %353 = vector.extract_strided_slice %335 {offsets = [0, 12], sizes = [16, 6], strides = [1, 1]} : vector<16x18xf32> to vector<16x6xf32>
    %354 = arith.mulf %343, %353 : vector<16x6xf32>
    %355 = arith.addf %352, %354 : vector<16x6xf32>
    %356 = math.tanh %355 : vector<16x6xf32>
    %cst_83 = arith.constant 1.000000e+00 : f32
    %357 = vector.broadcast %cst_83 : f32 to vector<16x6xf32>
    %358 = arith.subf %357, %351 : vector<16x6xf32>
    %359 = arith.mulf %358, %356 : vector<16x6xf32>
    %360 = arith.mulf %351, %299 : vector<16x6xf32>
    %361 = arith.addf %359, %360 : vector<16x6xf32>
    %cst_84 = arith.constant dense<0.000000e+00> : vector<16x18xf32>
    %362 = tpu.matmul %361, %2, %cst_84 {dimension_numbers = #tpu.dot_dimension_numbers<[1], [0], [0], [1], [0, 0, 1, 1], [], []>} : vector<16x6xf32>, vector<6x18xf32>, vector<16x18xf32> -> vector<16x18xf32>
    %363 = vector.broadcast %3 : vector<1x18xf32> to vector<16x18xf32>
    %364 = arith.addf %362, %363 : vector<16x18xf32>
    %cst_85 = arith.constant dense<0.000000e+00> : vector<16x18xf32>
    %365 = tpu.matmul %331, %4, %cst_85 {dimension_numbers = #tpu.dot_dimension_numbers<[1], [0], [0], [1], [0, 0, 1, 1], [], []>} : vector<16x6xf32>, vector<6x18xf32>, vector<16x18xf32> -> vector<16x18xf32>
    %366 = vector.broadcast %5 : vector<1x18xf32> to vector<16x18xf32>
    %367 = arith.addf %365, %366 : vector<16x18xf32>
    %368 = vector.extract_strided_slice %364 {offsets = [0, 0], sizes = [16, 6], strides = [1, 1]} : vector<16x18xf32> to vector<16x6xf32>
    %369 = vector.extract_strided_slice %367 {offsets = [0, 0], sizes = [16, 6], strides = [1, 1]} : vector<16x18xf32> to vector<16x6xf32>
    %370 = arith.addf %368, %369 : vector<16x6xf32>
    %371 = arith.negf %370 : vector<16x6xf32>
    %372 = math.exp %371 : vector<16x6xf32>
    %cst_86 = arith.constant 1.000000e+00 : f32
    %373 = vector.broadcast %cst_86 : f32 to vector<16x6xf32>
    %374 = arith.addf %373, %372 : vector<16x6xf32>
    %375 = arith.divf %373, %374 : vector<16x6xf32>
    %376 = vector.extract_strided_slice %364 {offsets = [0, 6], sizes = [16, 6], strides = [1, 1]} : vector<16x18xf32> to vector<16x6xf32>
    %377 = vector.extract_strided_slice %367 {offsets = [0, 6], sizes = [16, 6], strides = [1, 1]} : vector<16x18xf32> to vector<16x6xf32>
    %378 = arith.addf %376, %377 : vector<16x6xf32>
    %379 = arith.negf %378 : vector<16x6xf32>
    %380 = math.exp %379 : vector<16x6xf32>
    %cst_87 = arith.constant 1.000000e+00 : f32
    %381 = vector.broadcast %cst_87 : f32 to vector<16x6xf32>
    %382 = arith.addf %381, %380 : vector<16x6xf32>
    %383 = arith.divf %381, %382 : vector<16x6xf32>
    %384 = vector.extract_strided_slice %364 {offsets = [0, 12], sizes = [16, 6], strides = [1, 1]} : vector<16x18xf32> to vector<16x6xf32>
    %385 = vector.extract_strided_slice %367 {offsets = [0, 12], sizes = [16, 6], strides = [1, 1]} : vector<16x18xf32> to vector<16x6xf32>
    %386 = arith.mulf %375, %385 : vector<16x6xf32>
    %387 = arith.addf %384, %386 : vector<16x6xf32>
    %388 = math.tanh %387 : vector<16x6xf32>
    %cst_88 = arith.constant 1.000000e+00 : f32
    %389 = vector.broadcast %cst_88 : f32 to vector<16x6xf32>
    %390 = arith.subf %389, %383 : vector<16x6xf32>
    %391 = arith.mulf %390, %388 : vector<16x6xf32>
    %392 = arith.mulf %383, %331 : vector<16x6xf32>
    %393 = arith.addf %391, %392 : vector<16x6xf32>
    %394 = vector.extract_strided_slice %19 {offsets = [96, 0], sizes = [16, 18], strides = [1, 1]} : vector<128x18xf32> to vector<16x18xf32>
    %cst_89 = arith.constant dense<0.000000e+00> : vector<16x18xf32>
    %395 = tpu.matmul %361, %0, %cst_89 {dimension_numbers = #tpu.dot_dimension_numbers<[1], [0], [0], [1], [0, 0, 1, 1], [], []>} : vector<16x6xf32>, vector<6x18xf32>, vector<16x18xf32> -> vector<16x18xf32>
    %396 = vector.broadcast %1 : vector<1x18xf32> to vector<16x18xf32>
    %397 = arith.addf %395, %396 : vector<16x18xf32>
    %398 = vector.extract_strided_slice %394 {offsets = [0, 0], sizes = [16, 6], strides = [1, 1]} : vector<16x18xf32> to vector<16x6xf32>
    %399 = vector.extract_strided_slice %397 {offsets = [0, 0], sizes = [16, 6], strides = [1, 1]} : vector<16x18xf32> to vector<16x6xf32>
    %400 = arith.addf %398, %399 : vector<16x6xf32>
    %401 = arith.negf %400 : vector<16x6xf32>
    %402 = math.exp %401 : vector<16x6xf32>
    %cst_90 = arith.constant 1.000000e+00 : f32
    %403 = vector.broadcast %cst_90 : f32 to vector<16x6xf32>
    %404 = arith.addf %403, %402 : vector<16x6xf32>
    %405 = arith.divf %403, %404 : vector<16x6xf32>
    %406 = vector.extract_strided_slice %394 {offsets = [0, 6], sizes = [16, 6], strides = [1, 1]} : vector<16x18xf32> to vector<16x6xf32>
    %407 = vector.extract_strided_slice %397 {offsets = [0, 6], sizes = [16, 6], strides = [1, 1]} : vector<16x18xf32> to vector<16x6xf32>
    %408 = arith.addf %406, %407 : vector<16x6xf32>
    %409 = arith.negf %408 : vector<16x6xf32>
    %410 = math.exp %409 : vector<16x6xf32>
    %cst_91 = arith.constant 1.000000e+00 : f32
    %411 = vector.broadcast %cst_91 : f32 to vector<16x6xf32>
    %412 = arith.addf %411, %410 : vector<16x6xf32>
    %413 = arith.divf %411, %412 : vector<16x6xf32>
    %414 = vector.extract_strided_slice %394 {offsets = [0, 12], sizes = [16, 6], strides = [1, 1]} : vector<16x18xf32> to vector<16x6xf32>
    %415 = vector.extract_strided_slice %397 {offsets = [0, 12], sizes = [16, 6], strides = [1, 1]} : vector<16x18xf32> to vector<16x6xf32>
    %416 = arith.mulf %405, %415 : vector<16x6xf32>
    %417 = arith.addf %414, %416 : vector<16x6xf32>
    %418 = math.tanh %417 : vector<16x6xf32>
    %cst_92 = arith.constant 1.000000e+00 : f32
    %419 = vector.broadcast %cst_92 : f32 to vector<16x6xf32>
    %420 = arith.subf %419, %413 : vector<16x6xf32>
    %421 = arith.mulf %420, %418 : vector<16x6xf32>
    %422 = arith.mulf %413, %361 : vector<16x6xf32>
    %423 = arith.addf %421, %422 : vector<16x6xf32>
    %cst_93 = arith.constant dense<0.000000e+00> : vector<16x18xf32>
    %424 = tpu.matmul %423, %2, %cst_93 {dimension_numbers = #tpu.dot_dimension_numbers<[1], [0], [0], [1], [0, 0, 1, 1], [], []>} : vector<16x6xf32>, vector<6x18xf32>, vector<16x18xf32> -> vector<16x18xf32>
    %425 = vector.broadcast %3 : vector<1x18xf32> to vector<16x18xf32>
    %426 = arith.addf %424, %425 : vector<16x18xf32>
    %cst_94 = arith.constant dense<0.000000e+00> : vector<16x18xf32>
    %427 = tpu.matmul %393, %4, %cst_94 {dimension_numbers = #tpu.dot_dimension_numbers<[1], [0], [0], [1], [0, 0, 1, 1], [], []>} : vector<16x6xf32>, vector<6x18xf32>, vector<16x18xf32> -> vector<16x18xf32>
    %428 = vector.broadcast %5 : vector<1x18xf32> to vector<16x18xf32>
    %429 = arith.addf %427, %428 : vector<16x18xf32>
    %430 = vector.extract_strided_slice %426 {offsets = [0, 0], sizes = [16, 6], strides = [1, 1]} : vector<16x18xf32> to vector<16x6xf32>
    %431 = vector.extract_strided_slice %429 {offsets = [0, 0], sizes = [16, 6], strides = [1, 1]} : vector<16x18xf32> to vector<16x6xf32>
    %432 = arith.addf %430, %431 : vector<16x6xf32>
    %433 = arith.negf %432 : vector<16x6xf32>
    %434 = math.exp %433 : vector<16x6xf32>
    %cst_95 = arith.constant 1.000000e+00 : f32
    %435 = vector.broadcast %cst_95 : f32 to vector<16x6xf32>
    %436 = arith.addf %435, %434 : vector<16x6xf32>
    %437 = arith.divf %435, %436 : vector<16x6xf32>
    %438 = vector.extract_strided_slice %426 {offsets = [0, 6], sizes = [16, 6], strides = [1, 1]} : vector<16x18xf32> to vector<16x6xf32>
    %439 = vector.extract_strided_slice %429 {offsets = [0, 6], sizes = [16, 6], strides = [1, 1]} : vector<16x18xf32> to vector<16x6xf32>
    %440 = arith.addf %438, %439 : vector<16x6xf32>
    %441 = arith.negf %440 : vector<16x6xf32>
    %442 = math.exp %441 : vector<16x6xf32>
    %cst_96 = arith.constant 1.000000e+00 : f32
    %443 = vector.broadcast %cst_96 : f32 to vector<16x6xf32>
    %444 = arith.addf %443, %442 : vector<16x6xf32>
    %445 = arith.divf %443, %444 : vector<16x6xf32>
    %446 = vector.extract_strided_slice %426 {offsets = [0, 12], sizes = [16, 6], strides = [1, 1]} : vector<16x18xf32> to vector<16x6xf32>
    %447 = vector.extract_strided_slice %429 {offsets = [0, 12], sizes = [16, 6], strides = [1, 1]} : vector<16x18xf32> to vector<16x6xf32>
    %448 = arith.mulf %437, %447 : vector<16x6xf32>
    %449 = arith.addf %446, %448 : vector<16x6xf32>
    %450 = math.tanh %449 : vector<16x6xf32>
    %cst_97 = arith.constant 1.000000e+00 : f32
    %451 = vector.broadcast %cst_97 : f32 to vector<16x6xf32>
    %452 = arith.subf %451, %445 : vector<16x6xf32>
    %453 = arith.mulf %452, %450 : vector<16x6xf32>
    %454 = arith.mulf %445, %393 : vector<16x6xf32>
    %455 = arith.addf %453, %454 : vector<16x6xf32>
    %456 = vector.extract_strided_slice %19 {offsets = [112, 0], sizes = [16, 18], strides = [1, 1]} : vector<128x18xf32> to vector<16x18xf32>
    %cst_98 = arith.constant dense<0.000000e+00> : vector<16x18xf32>
    %457 = tpu.matmul %423, %0, %cst_98 {dimension_numbers = #tpu.dot_dimension_numbers<[1], [0], [0], [1], [0, 0, 1, 1], [], []>} : vector<16x6xf32>, vector<6x18xf32>, vector<16x18xf32> -> vector<16x18xf32>
    %458 = vector.broadcast %1 : vector<1x18xf32> to vector<16x18xf32>
    %459 = arith.addf %457, %458 : vector<16x18xf32>
    %460 = vector.extract_strided_slice %456 {offsets = [0, 0], sizes = [16, 6], strides = [1, 1]} : vector<16x18xf32> to vector<16x6xf32>
    %461 = vector.extract_strided_slice %459 {offsets = [0, 0], sizes = [16, 6], strides = [1, 1]} : vector<16x18xf32> to vector<16x6xf32>
    %462 = arith.addf %460, %461 : vector<16x6xf32>
    %463 = arith.negf %462 : vector<16x6xf32>
    %464 = math.exp %463 : vector<16x6xf32>
    %cst_99 = arith.constant 1.000000e+00 : f32
    %465 = vector.broadcast %cst_99 : f32 to vector<16x6xf32>
    %466 = arith.addf %465, %464 : vector<16x6xf32>
    %467 = arith.divf %465, %466 : vector<16x6xf32>
    %468 = vector.extract_strided_slice %456 {offsets = [0, 6], sizes = [16, 6], strides = [1, 1]} : vector<16x18xf32> to vector<16x6xf32>
    %469 = vector.extract_strided_slice %459 {offsets = [0, 6], sizes = [16, 6], strides = [1, 1]} : vector<16x18xf32> to vector<16x6xf32>
    %470 = arith.addf %468, %469 : vector<16x6xf32>
    %471 = arith.negf %470 : vector<16x6xf32>
    %472 = math.exp %471 : vector<16x6xf32>
    %cst_100 = arith.constant 1.000000e+00 : f32
    %473 = vector.broadcast %cst_100 : f32 to vector<16x6xf32>
    %474 = arith.addf %473, %472 : vector<16x6xf32>
    %475 = arith.divf %473, %474 : vector<16x6xf32>
    %476 = vector.extract_strided_slice %456 {offsets = [0, 12], sizes = [16, 6], strides = [1, 1]} : vector<16x18xf32> to vector<16x6xf32>
    %477 = vector.extract_strided_slice %459 {offsets = [0, 12], sizes = [16, 6], strides = [1, 1]} : vector<16x18xf32> to vector<16x6xf32>
    %478 = arith.mulf %467, %477 : vector<16x6xf32>
    %479 = arith.addf %476, %478 : vector<16x6xf32>
    %480 = math.tanh %479 : vector<16x6xf32>
    %cst_101 = arith.constant 1.000000e+00 : f32
    %481 = vector.broadcast %cst_101 : f32 to vector<16x6xf32>
    %482 = arith.subf %481, %475 : vector<16x6xf32>
    %483 = arith.mulf %482, %480 : vector<16x6xf32>
    %484 = arith.mulf %475, %423 : vector<16x6xf32>
    %485 = arith.addf %483, %484 : vector<16x6xf32>
    %cst_102 = arith.constant dense<0.000000e+00> : vector<16x18xf32>
    %486 = tpu.matmul %485, %2, %cst_102 {dimension_numbers = #tpu.dot_dimension_numbers<[1], [0], [0], [1], [0, 0, 1, 1], [], []>} : vector<16x6xf32>, vector<6x18xf32>, vector<16x18xf32> -> vector<16x18xf32>
    %487 = vector.broadcast %3 : vector<1x18xf32> to vector<16x18xf32>
    %488 = arith.addf %486, %487 : vector<16x18xf32>
    %cst_103 = arith.constant dense<0.000000e+00> : vector<16x18xf32>
    %489 = tpu.matmul %455, %4, %cst_103 {dimension_numbers = #tpu.dot_dimension_numbers<[1], [0], [0], [1], [0, 0, 1, 1], [], []>} : vector<16x6xf32>, vector<6x18xf32>, vector<16x18xf32> -> vector<16x18xf32>
    %490 = vector.broadcast %5 : vector<1x18xf32> to vector<16x18xf32>
    %491 = arith.addf %489, %490 : vector<16x18xf32>
    %492 = vector.extract_strided_slice %488 {offsets = [0, 0], sizes = [16, 6], strides = [1, 1]} : vector<16x18xf32> to vector<16x6xf32>
    %493 = vector.extract_strided_slice %491 {offsets = [0, 0], sizes = [16, 6], strides = [1, 1]} : vector<16x18xf32> to vector<16x6xf32>
    %494 = arith.addf %492, %493 : vector<16x6xf32>
    %495 = arith.negf %494 : vector<16x6xf32>
    %496 = math.exp %495 : vector<16x6xf32>
    %cst_104 = arith.constant 1.000000e+00 : f32
    %497 = vector.broadcast %cst_104 : f32 to vector<16x6xf32>
    %498 = arith.addf %497, %496 : vector<16x6xf32>
    %499 = arith.divf %497, %498 : vector<16x6xf32>
    %500 = vector.extract_strided_slice %488 {offsets = [0, 6], sizes = [16, 6], strides = [1, 1]} : vector<16x18xf32> to vector<16x6xf32>
    %501 = vector.extract_strided_slice %491 {offsets = [0, 6], sizes = [16, 6], strides = [1, 1]} : vector<16x18xf32> to vector<16x6xf32>
    %502 = arith.addf %500, %501 : vector<16x6xf32>
    %503 = arith.negf %502 : vector<16x6xf32>
    %504 = math.exp %503 : vector<16x6xf32>
    %cst_105 = arith.constant 1.000000e+00 : f32
    %505 = vector.broadcast %cst_105 : f32 to vector<16x6xf32>
    %506 = arith.addf %505, %504 : vector<16x6xf32>
    %507 = arith.divf %505, %506 : vector<16x6xf32>
    %508 = vector.extract_strided_slice %488 {offsets = [0, 12], sizes = [16, 6], strides = [1, 1]} : vector<16x18xf32> to vector<16x6xf32>
    %509 = vector.extract_strided_slice %491 {offsets = [0, 12], sizes = [16, 6], strides = [1, 1]} : vector<16x18xf32> to vector<16x6xf32>
    %510 = arith.mulf %499, %509 : vector<16x6xf32>
    %511 = arith.addf %508, %510 : vector<16x6xf32>
    %512 = math.tanh %511 : vector<16x6xf32>
    %cst_106 = arith.constant 1.000000e+00 : f32
    %513 = vector.broadcast %cst_106 : f32 to vector<16x6xf32>
    %514 = arith.subf %513, %507 : vector<16x6xf32>
    %515 = arith.mulf %514, %512 : vector<16x6xf32>
    %516 = arith.mulf %507, %455 : vector<16x6xf32>
    %517 = arith.addf %515, %516 : vector<16x6xf32>
    %c0_107 = arith.constant 0 : index
    %c0_108 = arith.constant 0 : index
    %518 = vector.load %arg2[%c0_107, %c0_108] : memref<16x6xf32, #tpu.memory_space<vmem>>, vector<16x6xf32>
    %cst_109 = arith.constant dense<0.000000e+00> : vector<16x18xf32>
    %519 = tpu.matmul %518, %6, %cst_109 {dimension_numbers = #tpu.dot_dimension_numbers<[1], [0], [0], [1], [0, 0, 1, 1], [], []>} : vector<16x6xf32>, vector<6x18xf32>, vector<16x18xf32> -> vector<16x18xf32>
    %520 = vector.broadcast %7 : vector<1x18xf32> to vector<16x18xf32>
    %521 = arith.addf %519, %520 : vector<16x18xf32>
    %cst_110 = arith.constant dense<0.000000e+00> : vector<16x18xf32>
    %522 = tpu.matmul %485, %8, %cst_110 {dimension_numbers = #tpu.dot_dimension_numbers<[1], [0], [0], [1], [0, 0, 1, 1], [], []>} : vector<16x6xf32>, vector<6x18xf32>, vector<16x18xf32> -> vector<16x18xf32>
    %523 = vector.broadcast %9 : vector<1x18xf32> to vector<16x18xf32>
    %524 = arith.addf %522, %523 : vector<16x18xf32>
    %525 = vector.extract_strided_slice %521 {offsets = [0, 0], sizes = [16, 6], strides = [1, 1]} : vector<16x18xf32> to vector<16x6xf32>
    %526 = vector.extract_strided_slice %524 {offsets = [0, 0], sizes = [16, 6], strides = [1, 1]} : vector<16x18xf32> to vector<16x6xf32>
    %527 = arith.addf %525, %526 : vector<16x6xf32>
    %528 = arith.negf %527 : vector<16x6xf32>
    %529 = math.exp %528 : vector<16x6xf32>
    %cst_111 = arith.constant 1.000000e+00 : f32
    %530 = vector.broadcast %cst_111 : f32 to vector<16x6xf32>
    %531 = arith.addf %530, %529 : vector<16x6xf32>
    %532 = arith.divf %530, %531 : vector<16x6xf32>
    %533 = vector.extract_strided_slice %521 {offsets = [0, 6], sizes = [16, 6], strides = [1, 1]} : vector<16x18xf32> to vector<16x6xf32>
    %534 = vector.extract_strided_slice %524 {offsets = [0, 6], sizes = [16, 6], strides = [1, 1]} : vector<16x18xf32> to vector<16x6xf32>
    %535 = arith.addf %533, %534 : vector<16x6xf32>
    %536 = arith.negf %535 : vector<16x6xf32>
    %537 = math.exp %536 : vector<16x6xf32>
    %cst_112 = arith.constant 1.000000e+00 : f32
    %538 = vector.broadcast %cst_112 : f32 to vector<16x6xf32>
    %539 = arith.addf %538, %537 : vector<16x6xf32>
    %540 = arith.divf %538, %539 : vector<16x6xf32>
    %541 = vector.extract_strided_slice %521 {offsets = [0, 12], sizes = [16, 6], strides = [1, 1]} : vector<16x18xf32> to vector<16x6xf32>
    %542 = vector.extract_strided_slice %524 {offsets = [0, 12], sizes = [16, 6], strides = [1, 1]} : vector<16x18xf32> to vector<16x6xf32>
    %543 = arith.mulf %532, %542 : vector<16x6xf32>
    %544 = arith.addf %541, %543 : vector<16x6xf32>
    %545 = math.tanh %544 : vector<16x6xf32>
    %cst_113 = arith.constant 1.000000e+00 : f32
    %546 = vector.broadcast %cst_113 : f32 to vector<16x6xf32>
    %547 = arith.subf %546, %540 : vector<16x6xf32>
    %548 = arith.mulf %547, %545 : vector<16x6xf32>
    %549 = arith.mulf %540, %485 : vector<16x6xf32>
    %550 = arith.addf %548, %549 : vector<16x6xf32>
    %cst_114 = arith.constant dense<0.000000e+00> : vector<16x18xf32>
    %551 = tpu.matmul %550, %10, %cst_114 {dimension_numbers = #tpu.dot_dimension_numbers<[1], [0], [0], [1], [0, 0, 1, 1], [], []>} : vector<16x6xf32>, vector<6x18xf32>, vector<16x18xf32> -> vector<16x18xf32>
    %552 = vector.broadcast %11 : vector<1x18xf32> to vector<16x18xf32>
    %553 = arith.addf %551, %552 : vector<16x18xf32>
    %cst_115 = arith.constant dense<0.000000e+00> : vector<16x18xf32>
    %554 = tpu.matmul %517, %12, %cst_115 {dimension_numbers = #tpu.dot_dimension_numbers<[1], [0], [0], [1], [0, 0, 1, 1], [], []>} : vector<16x6xf32>, vector<6x18xf32>, vector<16x18xf32> -> vector<16x18xf32>
    %555 = vector.broadcast %13 : vector<1x18xf32> to vector<16x18xf32>
    %556 = arith.addf %554, %555 : vector<16x18xf32>
    %557 = vector.extract_strided_slice %553 {offsets = [0, 0], sizes = [16, 6], strides = [1, 1]} : vector<16x18xf32> to vector<16x6xf32>
    %558 = vector.extract_strided_slice %556 {offsets = [0, 0], sizes = [16, 6], strides = [1, 1]} : vector<16x18xf32> to vector<16x6xf32>
    %559 = arith.addf %557, %558 : vector<16x6xf32>
    %560 = arith.negf %559 : vector<16x6xf32>
    %561 = math.exp %560 : vector<16x6xf32>
    %cst_116 = arith.constant 1.000000e+00 : f32
    %562 = vector.broadcast %cst_116 : f32 to vector<16x6xf32>
    %563 = arith.addf %562, %561 : vector<16x6xf32>
    %564 = arith.divf %562, %563 : vector<16x6xf32>
    %565 = vector.extract_strided_slice %553 {offsets = [0, 6], sizes = [16, 6], strides = [1, 1]} : vector<16x18xf32> to vector<16x6xf32>
    %566 = vector.extract_strided_slice %556 {offsets = [0, 6], sizes = [16, 6], strides = [1, 1]} : vector<16x18xf32> to vector<16x6xf32>
    %567 = arith.addf %565, %566 : vector<16x6xf32>
    %568 = arith.negf %567 : vector<16x6xf32>
    %569 = math.exp %568 : vector<16x6xf32>
    %cst_117 = arith.constant 1.000000e+00 : f32
    %570 = vector.broadcast %cst_117 : f32 to vector<16x6xf32>
    %571 = arith.addf %570, %569 : vector<16x6xf32>
    %572 = arith.divf %570, %571 : vector<16x6xf32>
    %573 = vector.extract_strided_slice %553 {offsets = [0, 12], sizes = [16, 6], strides = [1, 1]} : vector<16x18xf32> to vector<16x6xf32>
    %574 = vector.extract_strided_slice %556 {offsets = [0, 12], sizes = [16, 6], strides = [1, 1]} : vector<16x18xf32> to vector<16x6xf32>
    %575 = arith.mulf %564, %574 : vector<16x6xf32>
    %576 = arith.addf %573, %575 : vector<16x6xf32>
    %577 = math.tanh %576 : vector<16x6xf32>
    %cst_118 = arith.constant 1.000000e+00 : f32
    %578 = vector.broadcast %cst_118 : f32 to vector<16x6xf32>
    %579 = arith.subf %578, %572 : vector<16x6xf32>
    %580 = arith.mulf %579, %577 : vector<16x6xf32>
    %581 = arith.mulf %572, %517 : vector<16x6xf32>
    %582 = arith.addf %580, %581 : vector<16x6xf32>
    %583 = arith.addf %582, %518 : vector<16x6xf32>
    %584 = vector.extract_strided_slice %583 {offsets = [0, 0], sizes = [16, 2], strides = [1, 1]} : vector<16x6xf32> to vector<16x2xf32>
    %585 = vector.extract_strided_slice %583 {offsets = [0, 2], sizes = [16, 2], strides = [1, 1]} : vector<16x6xf32> to vector<16x2xf32>
    %586 = arith.addf %584, %585 : vector<16x2xf32>
    %587 = vector.extract_strided_slice %583 {offsets = [0, 4], sizes = [16, 2], strides = [1, 1]} : vector<16x6xf32> to vector<16x2xf32>
    %588 = arith.addf %586, %587 : vector<16x2xf32>
    %cst_119 = arith.constant 0.333333343 : f32
    %589 = vector.broadcast %cst_119 : f32 to vector<16x2xf32>
    %590 = arith.mulf %588, %589 : vector<16x2xf32>
    %c0_120 = arith.constant 0 : index
    %c0_121 = arith.constant 0 : index
    %591 = vector.load %arg19[%c0_120, %c0_121] : memref<96x2xf32, #tpu.memory_space<vmem>>, vector<16x2xf32>
    tpu.vector_store %arg19[%c0_120, %c0_121], %590 {strides = array<i32>} : memref<96x2xf32, #tpu.memory_space<vmem>>, vector<16x2xf32>,
    %cst_122 = arith.constant dense<0.000000e+00> : vector<16x18xf32>
    %592 = tpu.matmul %583, %6, %cst_122 {dimension_numbers = #tpu.dot_dimension_numbers<[1], [0], [0], [1], [0, 0, 1, 1], [], []>} : vector<16x6xf32>, vector<6x18xf32>, vector<16x18xf32> -> vector<16x18xf32>
    %593 = vector.broadcast %7 : vector<1x18xf32> to vector<16x18xf32>
    %594 = arith.addf %592, %593 : vector<16x18xf32>
    %cst_123 = arith.constant dense<0.000000e+00> : vector<16x18xf32>
    %595 = tpu.matmul %550, %8, %cst_123 {dimension_numbers = #tpu.dot_dimension_numbers<[1], [0], [0], [1], [0, 0, 1, 1], [], []>} : vector<16x6xf32>, vector<6x18xf32>, vector<16x18xf32> -> vector<16x18xf32>
    %596 = vector.broadcast %9 : vector<1x18xf32> to vector<16x18xf32>
    %597 = arith.addf %595, %596 : vector<16x18xf32>
    %598 = vector.extract_strided_slice %594 {offsets = [0, 0], sizes = [16, 6], strides = [1, 1]} : vector<16x18xf32> to vector<16x6xf32>
    %599 = vector.extract_strided_slice %597 {offsets = [0, 0], sizes = [16, 6], strides = [1, 1]} : vector<16x18xf32> to vector<16x6xf32>
    %600 = arith.addf %598, %599 : vector<16x6xf32>
    %601 = arith.negf %600 : vector<16x6xf32>
    %602 = math.exp %601 : vector<16x6xf32>
    %cst_124 = arith.constant 1.000000e+00 : f32
    %603 = vector.broadcast %cst_124 : f32 to vector<16x6xf32>
    %604 = arith.addf %603, %602 : vector<16x6xf32>
    %605 = arith.divf %603, %604 : vector<16x6xf32>
    %606 = vector.extract_strided_slice %594 {offsets = [0, 6], sizes = [16, 6], strides = [1, 1]} : vector<16x18xf32> to vector<16x6xf32>
    %607 = vector.extract_strided_slice %597 {offsets = [0, 6], sizes = [16, 6], strides = [1, 1]} : vector<16x18xf32> to vector<16x6xf32>
    %608 = arith.addf %606, %607 : vector<16x6xf32>
    %609 = arith.negf %608 : vector<16x6xf32>
    %610 = math.exp %609 : vector<16x6xf32>
    %cst_125 = arith.constant 1.000000e+00 : f32
    %611 = vector.broadcast %cst_125 : f32 to vector<16x6xf32>
    %612 = arith.addf %611, %610 : vector<16x6xf32>
    %613 = arith.divf %611, %612 : vector<16x6xf32>
    %614 = vector.extract_strided_slice %594 {offsets = [0, 12], sizes = [16, 6], strides = [1, 1]} : vector<16x18xf32> to vector<16x6xf32>
    %615 = vector.extract_strided_slice %597 {offsets = [0, 12], sizes = [16, 6], strides = [1, 1]} : vector<16x18xf32> to vector<16x6xf32>
    %616 = arith.mulf %605, %615 : vector<16x6xf32>
    %617 = arith.addf %614, %616 : vector<16x6xf32>
    %618 = math.tanh %617 : vector<16x6xf32>
    %cst_126 = arith.constant 1.000000e+00 : f32
    %619 = vector.broadcast %cst_126 : f32 to vector<16x6xf32>
    %620 = arith.subf %619, %613 : vector<16x6xf32>
    %621 = arith.mulf %620, %618 : vector<16x6xf32>
    %622 = arith.mulf %613, %550 : vector<16x6xf32>
    %623 = arith.addf %621, %622 : vector<16x6xf32>
    %cst_127 = arith.constant dense<0.000000e+00> : vector<16x18xf32>
    %624 = tpu.matmul %623, %10, %cst_127 {dimension_numbers = #tpu.dot_dimension_numbers<[1], [0], [0], [1], [0, 0, 1, 1], [], []>} : vector<16x6xf32>, vector<6x18xf32>, vector<16x18xf32> -> vector<16x18xf32>
    %625 = vector.broadcast %11 : vector<1x18xf32> to vector<16x18xf32>
    %626 = arith.addf %624, %625 : vector<16x18xf32>
    %cst_128 = arith.constant dense<0.000000e+00> : vector<16x18xf32>
    %627 = tpu.matmul %582, %12, %cst_128 {dimension_numbers = #tpu.dot_dimension_numbers<[1], [0], [0], [1], [0, 0, 1, 1], [], []>} : vector<16x6xf32>, vector<6x18xf32>, vector<16x18xf32> -> vector<16x18xf32>
    %628 = vector.broadcast %13 : vector<1x18xf32> to vector<16x18xf32>
    %629 = arith.addf %627, %628 : vector<16x18xf32>
    %630 = vector.extract_strided_slice %626 {offsets = [0, 0], sizes = [16, 6], strides = [1, 1]} : vector<16x18xf32> to vector<16x6xf32>
    %631 = vector.extract_strided_slice %629 {offsets = [0, 0], sizes = [16, 6], strides = [1, 1]} : vector<16x18xf32> to vector<16x6xf32>
    %632 = arith.addf %630, %631 : vector<16x6xf32>
    %633 = arith.negf %632 : vector<16x6xf32>
    %634 = math.exp %633 : vector<16x6xf32>
    %cst_129 = arith.constant 1.000000e+00 : f32
    %635 = vector.broadcast %cst_129 : f32 to vector<16x6xf32>
    %636 = arith.addf %635, %634 : vector<16x6xf32>
    %637 = arith.divf %635, %636 : vector<16x6xf32>
    %638 = vector.extract_strided_slice %626 {offsets = [0, 6], sizes = [16, 6], strides = [1, 1]} : vector<16x18xf32> to vector<16x6xf32>
    %639 = vector.extract_strided_slice %629 {offsets = [0, 6], sizes = [16, 6], strides = [1, 1]} : vector<16x18xf32> to vector<16x6xf32>
    %640 = arith.addf %638, %639 : vector<16x6xf32>
    %641 = arith.negf %640 : vector<16x6xf32>
    %642 = math.exp %641 : vector<16x6xf32>
    %cst_130 = arith.constant 1.000000e+00 : f32
    %643 = vector.broadcast %cst_130 : f32 to vector<16x6xf32>
    %644 = arith.addf %643, %642 : vector<16x6xf32>
    %645 = arith.divf %643, %644 : vector<16x6xf32>
    %646 = vector.extract_strided_slice %626 {offsets = [0, 12], sizes = [16, 6], strides = [1, 1]} : vector<16x18xf32> to vector<16x6xf32>
    %647 = vector.extract_strided_slice %629 {offsets = [0, 12], sizes = [16, 6], strides = [1, 1]} : vector<16x18xf32> to vector<16x6xf32>
    %648 = arith.mulf %637, %647 : vector<16x6xf32>
    %649 = arith.addf %646, %648 : vector<16x6xf32>
    %650 = math.tanh %649 : vector<16x6xf32>
    %cst_131 = arith.constant 1.000000e+00 : f32
    %651 = vector.broadcast %cst_131 : f32 to vector<16x6xf32>
    %652 = arith.subf %651, %645 : vector<16x6xf32>
    %653 = arith.mulf %652, %650 : vector<16x6xf32>
    %654 = arith.mulf %645, %582 : vector<16x6xf32>
    %655 = arith.addf %653, %654 : vector<16x6xf32>
    %656 = arith.addf %655, %583 : vector<16x6xf32>
    %657 = vector.extract_strided_slice %656 {offsets = [0, 0], sizes = [16, 2], strides = [1, 1]} : vector<16x6xf32> to vector<16x2xf32>
    %658 = vector.extract_strided_slice %656 {offsets = [0, 2], sizes = [16, 2], strides = [1, 1]} : vector<16x6xf32> to vector<16x2xf32>
    %659 = arith.addf %657, %658 : vector<16x2xf32>
    %660 = vector.extract_strided_slice %656 {offsets = [0, 4], sizes = [16, 2], strides = [1, 1]} : vector<16x6xf32> to vector<16x2xf32>
    %661 = arith.addf %659, %660 : vector<16x2xf32>
    %cst_132 = arith.constant 0.333333343 : f32
    %662 = vector.broadcast %cst_132 : f32 to vector<16x2xf32>
    %663 = arith.mulf %661, %662 : vector<16x2xf32>
    %c16 = arith.constant 16 : index
    %c0_133 = arith.constant 0 : index
    %664 = vector.load %arg19[%c16, %c0_133] : memref<96x2xf32, #tpu.memory_space<vmem>>, vector<16x2xf32>
    tpu.vector_store %arg19[%c16, %c0_133], %663 {strides = array<i32>} : memref<96x2xf32, #tpu.memory_space<vmem>>, vector<16x2xf32>,
    %cst_134 = arith.constant dense<0.000000e+00> : vector<16x18xf32>
    %665 = tpu.matmul %656, %6, %cst_134 {dimension_numbers = #tpu.dot_dimension_numbers<[1], [0], [0], [1], [0, 0, 1, 1], [], []>} : vector<16x6xf32>, vector<6x18xf32>, vector<16x18xf32> -> vector<16x18xf32>
    %666 = vector.broadcast %7 : vector<1x18xf32> to vector<16x18xf32>
    %667 = arith.addf %665, %666 : vector<16x18xf32>
    %cst_135 = arith.constant dense<0.000000e+00> : vector<16x18xf32>
    %668 = tpu.matmul %623, %8, %cst_135 {dimension_numbers = #tpu.dot_dimension_numbers<[1], [0], [0], [1], [0, 0, 1, 1], [], []>} : vector<16x6xf32>, vector<6x18xf32>, vector<16x18xf32> -> vector<16x18xf32>
    %669 = vector.broadcast %9 : vector<1x18xf32> to vector<16x18xf32>
    %670 = arith.addf %668, %669 : vector<16x18xf32>
    %671 = vector.extract_strided_slice %667 {offsets = [0, 0], sizes = [16, 6], strides = [1, 1]} : vector<16x18xf32> to vector<16x6xf32>
    %672 = vector.extract_strided_slice %670 {offsets = [0, 0], sizes = [16, 6], strides = [1, 1]} : vector<16x18xf32> to vector<16x6xf32>
    %673 = arith.addf %671, %672 : vector<16x6xf32>
    %674 = arith.negf %673 : vector<16x6xf32>
    %675 = math.exp %674 : vector<16x6xf32>
    %cst_136 = arith.constant 1.000000e+00 : f32
    %676 = vector.broadcast %cst_136 : f32 to vector<16x6xf32>
    %677 = arith.addf %676, %675 : vector<16x6xf32>
    %678 = arith.divf %676, %677 : vector<16x6xf32>
    %679 = vector.extract_strided_slice %667 {offsets = [0, 6], sizes = [16, 6], strides = [1, 1]} : vector<16x18xf32> to vector<16x6xf32>
    %680 = vector.extract_strided_slice %670 {offsets = [0, 6], sizes = [16, 6], strides = [1, 1]} : vector<16x18xf32> to vector<16x6xf32>
    %681 = arith.addf %679, %680 : vector<16x6xf32>
    %682 = arith.negf %681 : vector<16x6xf32>
    %683 = math.exp %682 : vector<16x6xf32>
    %cst_137 = arith.constant 1.000000e+00 : f32
    %684 = vector.broadcast %cst_137 : f32 to vector<16x6xf32>
    %685 = arith.addf %684, %683 : vector<16x6xf32>
    %686 = arith.divf %684, %685 : vector<16x6xf32>
    %687 = vector.extract_strided_slice %667 {offsets = [0, 12], sizes = [16, 6], strides = [1, 1]} : vector<16x18xf32> to vector<16x6xf32>
    %688 = vector.extract_strided_slice %670 {offsets = [0, 12], sizes = [16, 6], strides = [1, 1]} : vector<16x18xf32> to vector<16x6xf32>
    %689 = arith.mulf %678, %688 : vector<16x6xf32>
    %690 = arith.addf %687, %689 : vector<16x6xf32>
    %691 = math.tanh %690 : vector<16x6xf32>
    %cst_138 = arith.constant 1.000000e+00 : f32
    %692 = vector.broadcast %cst_138 : f32 to vector<16x6xf32>
    %693 = arith.subf %692, %686 : vector<16x6xf32>
    %694 = arith.mulf %693, %691 : vector<16x6xf32>
    %695 = arith.mulf %686, %623 : vector<16x6xf32>
    %696 = arith.addf %694, %695 : vector<16x6xf32>
    %cst_139 = arith.constant dense<0.000000e+00> : vector<16x18xf32>
    %697 = tpu.matmul %696, %10, %cst_139 {dimension_numbers = #tpu.dot_dimension_numbers<[1], [0], [0], [1], [0, 0, 1, 1], [], []>} : vector<16x6xf32>, vector<6x18xf32>, vector<16x18xf32> -> vector<16x18xf32>
    %698 = vector.broadcast %11 : vector<1x18xf32> to vector<16x18xf32>
    %699 = arith.addf %697, %698 : vector<16x18xf32>
    %cst_140 = arith.constant dense<0.000000e+00> : vector<16x18xf32>
    %700 = tpu.matmul %655, %12, %cst_140 {dimension_numbers = #tpu.dot_dimension_numbers<[1], [0], [0], [1], [0, 0, 1, 1], [], []>} : vector<16x6xf32>, vector<6x18xf32>, vector<16x18xf32> -> vector<16x18xf32>
    %701 = vector.broadcast %13 : vector<1x18xf32> to vector<16x18xf32>
    %702 = arith.addf %700, %701 : vector<16x18xf32>
    %703 = vector.extract_strided_slice %699 {offsets = [0, 0], sizes = [16, 6], strides = [1, 1]} : vector<16x18xf32> to vector<16x6xf32>
    %704 = vector.extract_strided_slice %702 {offsets = [0, 0], sizes = [16, 6], strides = [1, 1]} : vector<16x18xf32> to vector<16x6xf32>
    %705 = arith.addf %703, %704 : vector<16x6xf32>
    %706 = arith.negf %705 : vector<16x6xf32>
    %707 = math.exp %706 : vector<16x6xf32>
    %cst_141 = arith.constant 1.000000e+00 : f32
    %708 = vector.broadcast %cst_141 : f32 to vector<16x6xf32>
    %709 = arith.addf %708, %707 : vector<16x6xf32>
    %710 = arith.divf %708, %709 : vector<16x6xf32>
    %711 = vector.extract_strided_slice %699 {offsets = [0, 6], sizes = [16, 6], strides = [1, 1]} : vector<16x18xf32> to vector<16x6xf32>
    %712 = vector.extract_strided_slice %702 {offsets = [0, 6], sizes = [16, 6], strides = [1, 1]} : vector<16x18xf32> to vector<16x6xf32>
    %713 = arith.addf %711, %712 : vector<16x6xf32>
    %714 = arith.negf %713 : vector<16x6xf32>
    %715 = math.exp %714 : vector<16x6xf32>
    %cst_142 = arith.constant 1.000000e+00 : f32
    %716 = vector.broadcast %cst_142 : f32 to vector<16x6xf32>
    %717 = arith.addf %716, %715 : vector<16x6xf32>
    %718 = arith.divf %716, %717 : vector<16x6xf32>
    %719 = vector.extract_strided_slice %699 {offsets = [0, 12], sizes = [16, 6], strides = [1, 1]} : vector<16x18xf32> to vector<16x6xf32>
    %720 = vector.extract_strided_slice %702 {offsets = [0, 12], sizes = [16, 6], strides = [1, 1]} : vector<16x18xf32> to vector<16x6xf32>
    %721 = arith.mulf %710, %720 : vector<16x6xf32>
    %722 = arith.addf %719, %721 : vector<16x6xf32>
    %723 = math.tanh %722 : vector<16x6xf32>
    %cst_143 = arith.constant 1.000000e+00 : f32
    %724 = vector.broadcast %cst_143 : f32 to vector<16x6xf32>
    %725 = arith.subf %724, %718 : vector<16x6xf32>
    %726 = arith.mulf %725, %723 : vector<16x6xf32>
    %727 = arith.mulf %718, %655 : vector<16x6xf32>
    %728 = arith.addf %726, %727 : vector<16x6xf32>
    %729 = arith.addf %728, %656 : vector<16x6xf32>
    %730 = vector.extract_strided_slice %729 {offsets = [0, 0], sizes = [16, 2], strides = [1, 1]} : vector<16x6xf32> to vector<16x2xf32>
    %731 = vector.extract_strided_slice %729 {offsets = [0, 2], sizes = [16, 2], strides = [1, 1]} : vector<16x6xf32> to vector<16x2xf32>
    %732 = arith.addf %730, %731 : vector<16x2xf32>
    %733 = vector.extract_strided_slice %729 {offsets = [0, 4], sizes = [16, 2], strides = [1, 1]} : vector<16x6xf32> to vector<16x2xf32>
    %734 = arith.addf %732, %733 : vector<16x2xf32>
    %cst_144 = arith.constant 0.333333343 : f32
    %735 = vector.broadcast %cst_144 : f32 to vector<16x2xf32>
    %736 = arith.mulf %734, %735 : vector<16x2xf32>
    %c32 = arith.constant 32 : index
    %c0_145 = arith.constant 0 : index
    %737 = vector.load %arg19[%c32, %c0_145] : memref<96x2xf32, #tpu.memory_space<vmem>>, vector<16x2xf32>
    tpu.vector_store %arg19[%c32, %c0_145], %736 {strides = array<i32>} : memref<96x2xf32, #tpu.memory_space<vmem>>, vector<16x2xf32>,
    %cst_146 = arith.constant dense<0.000000e+00> : vector<16x18xf32>
    %738 = tpu.matmul %729, %6, %cst_146 {dimension_numbers = #tpu.dot_dimension_numbers<[1], [0], [0], [1], [0, 0, 1, 1], [], []>} : vector<16x6xf32>, vector<6x18xf32>, vector<16x18xf32> -> vector<16x18xf32>
    %739 = vector.broadcast %7 : vector<1x18xf32> to vector<16x18xf32>
    %740 = arith.addf %738, %739 : vector<16x18xf32>
    %cst_147 = arith.constant dense<0.000000e+00> : vector<16x18xf32>
    %741 = tpu.matmul %696, %8, %cst_147 {dimension_numbers = #tpu.dot_dimension_numbers<[1], [0], [0], [1], [0, 0, 1, 1], [], []>} : vector<16x6xf32>, vector<6x18xf32>, vector<16x18xf32> -> vector<16x18xf32>
    %742 = vector.broadcast %9 : vector<1x18xf32> to vector<16x18xf32>
    %743 = arith.addf %741, %742 : vector<16x18xf32>
    %744 = vector.extract_strided_slice %740 {offsets = [0, 0], sizes = [16, 6], strides = [1, 1]} : vector<16x18xf32> to vector<16x6xf32>
    %745 = vector.extract_strided_slice %743 {offsets = [0, 0], sizes = [16, 6], strides = [1, 1]} : vector<16x18xf32> to vector<16x6xf32>
    %746 = arith.addf %744, %745 : vector<16x6xf32>
    %747 = arith.negf %746 : vector<16x6xf32>
    %748 = math.exp %747 : vector<16x6xf32>
    %cst_148 = arith.constant 1.000000e+00 : f32
    %749 = vector.broadcast %cst_148 : f32 to vector<16x6xf32>
    %750 = arith.addf %749, %748 : vector<16x6xf32>
    %751 = arith.divf %749, %750 : vector<16x6xf32>
    %752 = vector.extract_strided_slice %740 {offsets = [0, 6], sizes = [16, 6], strides = [1, 1]} : vector<16x18xf32> to vector<16x6xf32>
    %753 = vector.extract_strided_slice %743 {offsets = [0, 6], sizes = [16, 6], strides = [1, 1]} : vector<16x18xf32> to vector<16x6xf32>
    %754 = arith.addf %752, %753 : vector<16x6xf32>
    %755 = arith.negf %754 : vector<16x6xf32>
    %756 = math.exp %755 : vector<16x6xf32>
    %cst_149 = arith.constant 1.000000e+00 : f32
    %757 = vector.broadcast %cst_149 : f32 to vector<16x6xf32>
    %758 = arith.addf %757, %756 : vector<16x6xf32>
    %759 = arith.divf %757, %758 : vector<16x6xf32>
    %760 = vector.extract_strided_slice %740 {offsets = [0, 12], sizes = [16, 6], strides = [1, 1]} : vector<16x18xf32> to vector<16x6xf32>
    %761 = vector.extract_strided_slice %743 {offsets = [0, 12], sizes = [16, 6], strides = [1, 1]} : vector<16x18xf32> to vector<16x6xf32>
    %762 = arith.mulf %751, %761 : vector<16x6xf32>
    %763 = arith.addf %760, %762 : vector<16x6xf32>
    %764 = math.tanh %763 : vector<16x6xf32>
    %cst_150 = arith.constant 1.000000e+00 : f32
    %765 = vector.broadcast %cst_150 : f32 to vector<16x6xf32>
    %766 = arith.subf %765, %759 : vector<16x6xf32>
    %767 = arith.mulf %766, %764 : vector<16x6xf32>
    %768 = arith.mulf %759, %696 : vector<16x6xf32>
    %769 = arith.addf %767, %768 : vector<16x6xf32>
    %cst_151 = arith.constant dense<0.000000e+00> : vector<16x18xf32>
    %770 = tpu.matmul %769, %10, %cst_151 {dimension_numbers = #tpu.dot_dimension_numbers<[1], [0], [0], [1], [0, 0, 1, 1], [], []>} : vector<16x6xf32>, vector<6x18xf32>, vector<16x18xf32> -> vector<16x18xf32>
    %771 = vector.broadcast %11 : vector<1x18xf32> to vector<16x18xf32>
    %772 = arith.addf %770, %771 : vector<16x18xf32>
    %cst_152 = arith.constant dense<0.000000e+00> : vector<16x18xf32>
    %773 = tpu.matmul %728, %12, %cst_152 {dimension_numbers = #tpu.dot_dimension_numbers<[1], [0], [0], [1], [0, 0, 1, 1], [], []>} : vector<16x6xf32>, vector<6x18xf32>, vector<16x18xf32> -> vector<16x18xf32>
    %774 = vector.broadcast %13 : vector<1x18xf32> to vector<16x18xf32>
    %775 = arith.addf %773, %774 : vector<16x18xf32>
    %776 = vector.extract_strided_slice %772 {offsets = [0, 0], sizes = [16, 6], strides = [1, 1]} : vector<16x18xf32> to vector<16x6xf32>
    %777 = vector.extract_strided_slice %775 {offsets = [0, 0], sizes = [16, 6], strides = [1, 1]} : vector<16x18xf32> to vector<16x6xf32>
    %778 = arith.addf %776, %777 : vector<16x6xf32>
    %779 = arith.negf %778 : vector<16x6xf32>
    %780 = math.exp %779 : vector<16x6xf32>
    %cst_153 = arith.constant 1.000000e+00 : f32
    %781 = vector.broadcast %cst_153 : f32 to vector<16x6xf32>
    %782 = arith.addf %781, %780 : vector<16x6xf32>
    %783 = arith.divf %781, %782 : vector<16x6xf32>
    %784 = vector.extract_strided_slice %772 {offsets = [0, 6], sizes = [16, 6], strides = [1, 1]} : vector<16x18xf32> to vector<16x6xf32>
    %785 = vector.extract_strided_slice %775 {offsets = [0, 6], sizes = [16, 6], strides = [1, 1]} : vector<16x18xf32> to vector<16x6xf32>
    %786 = arith.addf %784, %785 : vector<16x6xf32>
    %787 = arith.negf %786 : vector<16x6xf32>
    %788 = math.exp %787 : vector<16x6xf32>
    %cst_154 = arith.constant 1.000000e+00 : f32
    %789 = vector.broadcast %cst_154 : f32 to vector<16x6xf32>
    %790 = arith.addf %789, %788 : vector<16x6xf32>
    %791 = arith.divf %789, %790 : vector<16x6xf32>
    %792 = vector.extract_strided_slice %772 {offsets = [0, 12], sizes = [16, 6], strides = [1, 1]} : vector<16x18xf32> to vector<16x6xf32>
    %793 = vector.extract_strided_slice %775 {offsets = [0, 12], sizes = [16, 6], strides = [1, 1]} : vector<16x18xf32> to vector<16x6xf32>
    %794 = arith.mulf %783, %793 : vector<16x6xf32>
    %795 = arith.addf %792, %794 : vector<16x6xf32>
    %796 = math.tanh %795 : vector<16x6xf32>
    %cst_155 = arith.constant 1.000000e+00 : f32
    %797 = vector.broadcast %cst_155 : f32 to vector<16x6xf32>
    %798 = arith.subf %797, %791 : vector<16x6xf32>
    %799 = arith.mulf %798, %796 : vector<16x6xf32>
    %800 = arith.mulf %791, %728 : vector<16x6xf32>
    %801 = arith.addf %799, %800 : vector<16x6xf32>
    %802 = arith.addf %801, %729 : vector<16x6xf32>
    %803 = vector.extract_strided_slice %802 {offsets = [0, 0], sizes = [16, 2], strides = [1, 1]} : vector<16x6xf32> to vector<16x2xf32>
    %804 = vector.extract_strided_slice %802 {offsets = [0, 2], sizes = [16, 2], strides = [1, 1]} : vector<16x6xf32> to vector<16x2xf32>
    %805 = arith.addf %803, %804 : vector<16x2xf32>
    %806 = vector.extract_strided_slice %802 {offsets = [0, 4], sizes = [16, 2], strides = [1, 1]} : vector<16x6xf32> to vector<16x2xf32>
    %807 = arith.addf %805, %806 : vector<16x2xf32>
    %cst_156 = arith.constant 0.333333343 : f32
    %808 = vector.broadcast %cst_156 : f32 to vector<16x2xf32>
    %809 = arith.mulf %807, %808 : vector<16x2xf32>
    %c48 = arith.constant 48 : index
    %c0_157 = arith.constant 0 : index
    %810 = vector.load %arg19[%c48, %c0_157] : memref<96x2xf32, #tpu.memory_space<vmem>>, vector<16x2xf32>
    tpu.vector_store %arg19[%c48, %c0_157], %809 {strides = array<i32>} : memref<96x2xf32, #tpu.memory_space<vmem>>, vector<16x2xf32>,
    %cst_158 = arith.constant dense<0.000000e+00> : vector<16x18xf32>
    %811 = tpu.matmul %802, %6, %cst_158 {dimension_numbers = #tpu.dot_dimension_numbers<[1], [0], [0], [1], [0, 0, 1, 1], [], []>} : vector<16x6xf32>, vector<6x18xf32>, vector<16x18xf32> -> vector<16x18xf32>
    %812 = vector.broadcast %7 : vector<1x18xf32> to vector<16x18xf32>
    %813 = arith.addf %811, %812 : vector<16x18xf32>
    %cst_159 = arith.constant dense<0.000000e+00> : vector<16x18xf32>
    %814 = tpu.matmul %769, %8, %cst_159 {dimension_numbers = #tpu.dot_dimension_numbers<[1], [0], [0], [1], [0, 0, 1, 1], [], []>} : vector<16x6xf32>, vector<6x18xf32>, vector<16x18xf32> -> vector<16x18xf32>
    %815 = vector.broadcast %9 : vector<1x18xf32> to vector<16x18xf32>
    %816 = arith.addf %814, %815 : vector<16x18xf32>
    %817 = vector.extract_strided_slice %813 {offsets = [0, 0], sizes = [16, 6], strides = [1, 1]} : vector<16x18xf32> to vector<16x6xf32>
    %818 = vector.extract_strided_slice %816 {offsets = [0, 0], sizes = [16, 6], strides = [1, 1]} : vector<16x18xf32> to vector<16x6xf32>
    %819 = arith.addf %817, %818 : vector<16x6xf32>
    %820 = arith.negf %819 : vector<16x6xf32>
    %821 = math.exp %820 : vector<16x6xf32>
    %cst_160 = arith.constant 1.000000e+00 : f32
    %822 = vector.broadcast %cst_160 : f32 to vector<16x6xf32>
    %823 = arith.addf %822, %821 : vector<16x6xf32>
    %824 = arith.divf %822, %823 : vector<16x6xf32>
    %825 = vector.extract_strided_slice %813 {offsets = [0, 6], sizes = [16, 6], strides = [1, 1]} : vector<16x18xf32> to vector<16x6xf32>
    %826 = vector.extract_strided_slice %816 {offsets = [0, 6], sizes = [16, 6], strides = [1, 1]} : vector<16x18xf32> to vector<16x6xf32>
    %827 = arith.addf %825, %826 : vector<16x6xf32>
    %828 = arith.negf %827 : vector<16x6xf32>
    %829 = math.exp %828 : vector<16x6xf32>
    %cst_161 = arith.constant 1.000000e+00 : f32
    %830 = vector.broadcast %cst_161 : f32 to vector<16x6xf32>
    %831 = arith.addf %830, %829 : vector<16x6xf32>
    %832 = arith.divf %830, %831 : vector<16x6xf32>
    %833 = vector.extract_strided_slice %813 {offsets = [0, 12], sizes = [16, 6], strides = [1, 1]} : vector<16x18xf32> to vector<16x6xf32>
    %834 = vector.extract_strided_slice %816 {offsets = [0, 12], sizes = [16, 6], strides = [1, 1]} : vector<16x18xf32> to vector<16x6xf32>
    %835 = arith.mulf %824, %834 : vector<16x6xf32>
    %836 = arith.addf %833, %835 : vector<16x6xf32>
    %837 = math.tanh %836 : vector<16x6xf32>
    %cst_162 = arith.constant 1.000000e+00 : f32
    %838 = vector.broadcast %cst_162 : f32 to vector<16x6xf32>
    %839 = arith.subf %838, %832 : vector<16x6xf32>
    %840 = arith.mulf %839, %837 : vector<16x6xf32>
    %841 = arith.mulf %832, %769 : vector<16x6xf32>
    %842 = arith.addf %840, %841 : vector<16x6xf32>
    %cst_163 = arith.constant dense<0.000000e+00> : vector<16x18xf32>
    %843 = tpu.matmul %842, %10, %cst_163 {dimension_numbers = #tpu.dot_dimension_numbers<[1], [0], [0], [1], [0, 0, 1, 1], [], []>} : vector<16x6xf32>, vector<6x18xf32>, vector<16x18xf32> -> vector<16x18xf32>
    %844 = vector.broadcast %11 : vector<1x18xf32> to vector<16x18xf32>
    %845 = arith.addf %843, %844 : vector<16x18xf32>
    %cst_164 = arith.constant dense<0.000000e+00> : vector<16x18xf32>
    %846 = tpu.matmul %801, %12, %cst_164 {dimension_numbers = #tpu.dot_dimension_numbers<[1], [0], [0], [1], [0, 0, 1, 1], [], []>} : vector<16x6xf32>, vector<6x18xf32>, vector<16x18xf32> -> vector<16x18xf32>
    %847 = vector.broadcast %13 : vector<1x18xf32> to vector<16x18xf32>
    %848 = arith.addf %846, %847 : vector<16x18xf32>
    %849 = vector.extract_strided_slice %845 {offsets = [0, 0], sizes = [16, 6], strides = [1, 1]} : vector<16x18xf32> to vector<16x6xf32>
    %850 = vector.extract_strided_slice %848 {offsets = [0, 0], sizes = [16, 6], strides = [1, 1]} : vector<16x18xf32> to vector<16x6xf32>
    %851 = arith.addf %849, %850 : vector<16x6xf32>
    %852 = arith.negf %851 : vector<16x6xf32>
    %853 = math.exp %852 : vector<16x6xf32>
    %cst_165 = arith.constant 1.000000e+00 : f32
    %854 = vector.broadcast %cst_165 : f32 to vector<16x6xf32>
    %855 = arith.addf %854, %853 : vector<16x6xf32>
    %856 = arith.divf %854, %855 : vector<16x6xf32>
    %857 = vector.extract_strided_slice %845 {offsets = [0, 6], sizes = [16, 6], strides = [1, 1]} : vector<16x18xf32> to vector<16x6xf32>
    %858 = vector.extract_strided_slice %848 {offsets = [0, 6], sizes = [16, 6], strides = [1, 1]} : vector<16x18xf32> to vector<16x6xf32>
    %859 = arith.addf %857, %858 : vector<16x6xf32>
    %860 = arith.negf %859 : vector<16x6xf32>
    %861 = math.exp %860 : vector<16x6xf32>
    %cst_166 = arith.constant 1.000000e+00 : f32
    %862 = vector.broadcast %cst_166 : f32 to vector<16x6xf32>
    %863 = arith.addf %862, %861 : vector<16x6xf32>
    %864 = arith.divf %862, %863 : vector<16x6xf32>
    %865 = vector.extract_strided_slice %845 {offsets = [0, 12], sizes = [16, 6], strides = [1, 1]} : vector<16x18xf32> to vector<16x6xf32>
    %866 = vector.extract_strided_slice %848 {offsets = [0, 12], sizes = [16, 6], strides = [1, 1]} : vector<16x18xf32> to vector<16x6xf32>
    %867 = arith.mulf %856, %866 : vector<16x6xf32>
    %868 = arith.addf %865, %867 : vector<16x6xf32>
    %869 = math.tanh %868 : vector<16x6xf32>
    %cst_167 = arith.constant 1.000000e+00 : f32
    %870 = vector.broadcast %cst_167 : f32 to vector<16x6xf32>
    %871 = arith.subf %870, %864 : vector<16x6xf32>
    %872 = arith.mulf %871, %869 : vector<16x6xf32>
    %873 = arith.mulf %864, %801 : vector<16x6xf32>
    %874 = arith.addf %872, %873 : vector<16x6xf32>
    %875 = arith.addf %874, %802 : vector<16x6xf32>
    %876 = vector.extract_strided_slice %875 {offsets = [0, 0], sizes = [16, 2], strides = [1, 1]} : vector<16x6xf32> to vector<16x2xf32>
    %877 = vector.extract_strided_slice %875 {offsets = [0, 2], sizes = [16, 2], strides = [1, 1]} : vector<16x6xf32> to vector<16x2xf32>
    %878 = arith.addf %876, %877 : vector<16x2xf32>
    %879 = vector.extract_strided_slice %875 {offsets = [0, 4], sizes = [16, 2], strides = [1, 1]} : vector<16x6xf32> to vector<16x2xf32>
    %880 = arith.addf %878, %879 : vector<16x2xf32>
    %cst_168 = arith.constant 0.333333343 : f32
    %881 = vector.broadcast %cst_168 : f32 to vector<16x2xf32>
    %882 = arith.mulf %880, %881 : vector<16x2xf32>
    %c64 = arith.constant 64 : index
    %c0_169 = arith.constant 0 : index
    %883 = vector.load %arg19[%c64, %c0_169] : memref<96x2xf32, #tpu.memory_space<vmem>>, vector<16x2xf32>
    tpu.vector_store %arg19[%c64, %c0_169], %882 {strides = array<i32>} : memref<96x2xf32, #tpu.memory_space<vmem>>, vector<16x2xf32>,
    %cst_170 = arith.constant dense<0.000000e+00> : vector<16x18xf32>
    %884 = tpu.matmul %875, %6, %cst_170 {dimension_numbers = #tpu.dot_dimension_numbers<[1], [0], [0], [1], [0, 0, 1, 1], [], []>} : vector<16x6xf32>, vector<6x18xf32>, vector<16x18xf32> -> vector<16x18xf32>
    %885 = vector.broadcast %7 : vector<1x18xf32> to vector<16x18xf32>
    %886 = arith.addf %884, %885 : vector<16x18xf32>
    %cst_171 = arith.constant dense<0.000000e+00> : vector<16x18xf32>
    %887 = tpu.matmul %842, %8, %cst_171 {dimension_numbers = #tpu.dot_dimension_numbers<[1], [0], [0], [1], [0, 0, 1, 1], [], []>} : vector<16x6xf32>, vector<6x18xf32>, vector<16x18xf32> -> vector<16x18xf32>
    %888 = vector.broadcast %9 : vector<1x18xf32> to vector<16x18xf32>
    %889 = arith.addf %887, %888 : vector<16x18xf32>
    %890 = vector.extract_strided_slice %886 {offsets = [0, 0], sizes = [16, 6], strides = [1, 1]} : vector<16x18xf32> to vector<16x6xf32>
    %891 = vector.extract_strided_slice %889 {offsets = [0, 0], sizes = [16, 6], strides = [1, 1]} : vector<16x18xf32> to vector<16x6xf32>
    %892 = arith.addf %890, %891 : vector<16x6xf32>
    %893 = arith.negf %892 : vector<16x6xf32>
    %894 = math.exp %893 : vector<16x6xf32>
    %cst_172 = arith.constant 1.000000e+00 : f32
    %895 = vector.broadcast %cst_172 : f32 to vector<16x6xf32>
    %896 = arith.addf %895, %894 : vector<16x6xf32>
    %897 = arith.divf %895, %896 : vector<16x6xf32>
    %898 = vector.extract_strided_slice %886 {offsets = [0, 6], sizes = [16, 6], strides = [1, 1]} : vector<16x18xf32> to vector<16x6xf32>
    %899 = vector.extract_strided_slice %889 {offsets = [0, 6], sizes = [16, 6], strides = [1, 1]} : vector<16x18xf32> to vector<16x6xf32>
    %900 = arith.addf %898, %899 : vector<16x6xf32>
    %901 = arith.negf %900 : vector<16x6xf32>
    %902 = math.exp %901 : vector<16x6xf32>
    %cst_173 = arith.constant 1.000000e+00 : f32
    %903 = vector.broadcast %cst_173 : f32 to vector<16x6xf32>
    %904 = arith.addf %903, %902 : vector<16x6xf32>
    %905 = arith.divf %903, %904 : vector<16x6xf32>
    %906 = vector.extract_strided_slice %886 {offsets = [0, 12], sizes = [16, 6], strides = [1, 1]} : vector<16x18xf32> to vector<16x6xf32>
    %907 = vector.extract_strided_slice %889 {offsets = [0, 12], sizes = [16, 6], strides = [1, 1]} : vector<16x18xf32> to vector<16x6xf32>
    %908 = arith.mulf %897, %907 : vector<16x6xf32>
    %909 = arith.addf %906, %908 : vector<16x6xf32>
    %910 = math.tanh %909 : vector<16x6xf32>
    %cst_174 = arith.constant 1.000000e+00 : f32
    %911 = vector.broadcast %cst_174 : f32 to vector<16x6xf32>
    %912 = arith.subf %911, %905 : vector<16x6xf32>
    %913 = arith.mulf %912, %910 : vector<16x6xf32>
    %914 = arith.mulf %905, %842 : vector<16x6xf32>
    %915 = arith.addf %913, %914 : vector<16x6xf32>
    %cst_175 = arith.constant dense<0.000000e+00> : vector<16x18xf32>
    %916 = tpu.matmul %915, %10, %cst_175 {dimension_numbers = #tpu.dot_dimension_numbers<[1], [0], [0], [1], [0, 0, 1, 1], [], []>} : vector<16x6xf32>, vector<6x18xf32>, vector<16x18xf32> -> vector<16x18xf32>
    %917 = vector.broadcast %11 : vector<1x18xf32> to vector<16x18xf32>
    %918 = arith.addf %916, %917 : vector<16x18xf32>
    %cst_176 = arith.constant dense<0.000000e+00> : vector<16x18xf32>
    %919 = tpu.matmul %874, %12, %cst_176 {dimension_numbers = #tpu.dot_dimension_numbers<[1], [0], [0], [1], [0, 0, 1, 1], [], []>} : vector<16x6xf32>, vector<6x18xf32>, vector<16x18xf32> -> vector<16x18xf32>
    %920 = vector.broadcast %13 : vector<1x18xf32> to vector<16x18xf32>
    %921 = arith.addf %919, %920 : vector<16x18xf32>
    %922 = vector.extract_strided_slice %918 {offsets = [0, 0], sizes = [16, 6], strides = [1, 1]} : vector<16x18xf32> to vector<16x6xf32>
    %923 = vector.extract_strided_slice %921 {offsets = [0, 0], sizes = [16, 6], strides = [1, 1]} : vector<16x18xf32> to vector<16x6xf32>
    %924 = arith.addf %922, %923 : vector<16x6xf32>
    %925 = arith.negf %924 : vector<16x6xf32>
    %926 = math.exp %925 : vector<16x6xf32>
    %cst_177 = arith.constant 1.000000e+00 : f32
    %927 = vector.broadcast %cst_177 : f32 to vector<16x6xf32>
    %928 = arith.addf %927, %926 : vector<16x6xf32>
    %929 = arith.divf %927, %928 : vector<16x6xf32>
    %930 = vector.extract_strided_slice %918 {offsets = [0, 6], sizes = [16, 6], strides = [1, 1]} : vector<16x18xf32> to vector<16x6xf32>
    %931 = vector.extract_strided_slice %921 {offsets = [0, 6], sizes = [16, 6], strides = [1, 1]} : vector<16x18xf32> to vector<16x6xf32>
    %932 = arith.addf %930, %931 : vector<16x6xf32>
    %933 = arith.negf %932 : vector<16x6xf32>
    %934 = math.exp %933 : vector<16x6xf32>
    %cst_178 = arith.constant 1.000000e+00 : f32
    %935 = vector.broadcast %cst_178 : f32 to vector<16x6xf32>
    %936 = arith.addf %935, %934 : vector<16x6xf32>
    %937 = arith.divf %935, %936 : vector<16x6xf32>
    %938 = vector.extract_strided_slice %918 {offsets = [0, 12], sizes = [16, 6], strides = [1, 1]} : vector<16x18xf32> to vector<16x6xf32>
    %939 = vector.extract_strided_slice %921 {offsets = [0, 12], sizes = [16, 6], strides = [1, 1]} : vector<16x18xf32> to vector<16x6xf32>
    %940 = arith.mulf %929, %939 : vector<16x6xf32>
    %941 = arith.addf %938, %940 : vector<16x6xf32>
    %942 = math.tanh %941 : vector<16x6xf32>
    %cst_179 = arith.constant 1.000000e+00 : f32
    %943 = vector.broadcast %cst_179 : f32 to vector<16x6xf32>
    %944 = arith.subf %943, %937 : vector<16x6xf32>
    %945 = arith.mulf %944, %942 : vector<16x6xf32>
    %946 = arith.mulf %937, %874 : vector<16x6xf32>
    %947 = arith.addf %945, %946 : vector<16x6xf32>
    %948 = arith.addf %947, %875 : vector<16x6xf32>
    %949 = vector.extract_strided_slice %948 {offsets = [0, 0], sizes = [16, 2], strides = [1, 1]} : vector<16x6xf32> to vector<16x2xf32>
    %950 = vector.extract_strided_slice %948 {offsets = [0, 2], sizes = [16, 2], strides = [1, 1]} : vector<16x6xf32> to vector<16x2xf32>
    %951 = arith.addf %949, %950 : vector<16x2xf32>
    %952 = vector.extract_strided_slice %948 {offsets = [0, 4], sizes = [16, 2], strides = [1, 1]} : vector<16x6xf32> to vector<16x2xf32>
    %953 = arith.addf %951, %952 : vector<16x2xf32>
    %cst_180 = arith.constant 0.333333343 : f32
    %954 = vector.broadcast %cst_180 : f32 to vector<16x2xf32>
    %955 = arith.mulf %953, %954 : vector<16x2xf32>
    %c80 = arith.constant 80 : index
    %c0_181 = arith.constant 0 : index
    %956 = vector.load %arg19[%c80, %c0_181] : memref<96x2xf32, #tpu.memory_space<vmem>>, vector<16x2xf32>
    tpu.vector_store %arg19[%c80, %c0_181], %955 {strides = array<i32>} : memref<96x2xf32, #tpu.memory_space<vmem>>, vector<16x2xf32>,
    return
  }
  func.func @transform_0(%arg0: i32) -> (i32, i32) {
    %c0_i32 = arith.constant 0 : i32
    %c0_i32_0 = arith.constant 0 : i32
    %c0_i32_1 = arith.constant 0 : i32
    return %c0_i32, %c0_i32_0 : i32, i32
  }
  func.func @transform_1(%arg0: i32) -> (i32, i32) {
    %c0_i32 = arith.constant 0 : i32
    %c0_i32_0 = arith.constant 0 : i32
    %c0_i32_1 = arith.constant 0 : i32
    return %c0_i32, %c0_i32_0 : i32, i32
  }
  func.func @transform_2(%arg0: i32) -> (i32, i32) {
    %c0_i32 = arith.constant 0 : i32
    %c0_i32_0 = arith.constant 0 : i32
    %c0_i32_1 = arith.constant 0 : i32
    return %c0_i32, %c0_i32_0 : i32, i32
  }
  func.func @transform_3(%arg0: i32) -> (i32, i32) {
    %c0_i32 = arith.constant 0 : i32
    %c0_i32_0 = arith.constant 0 : i32
    %c0_i32_1 = arith.constant 0 : i32
    return %c0_i32, %c0_i32_0 : i32, i32
  }
  func.func @transform_4(%arg0: i32) -> (i32, i32) {
    %c0_i32 = arith.constant 0 : i32
    %c0_i32_0 = arith.constant 0 : i32
    %c0_i32_1 = arith.constant 0 : i32
    return %c0_i32, %c0_i32_0 : i32, i32
  }
  func.func @transform_5(%arg0: i32) -> (i32, i32) {
    %c0_i32 = arith.constant 0 : i32
    %c0_i32_0 = arith.constant 0 : i32
    %c0_i32_1 = arith.constant 0 : i32
    return %c0_i32, %c0_i32_0 : i32, i32
  }
  func.func @transform_6(%arg0: i32) -> (i32, i32) {
    %c0_i32 = arith.constant 0 : i32
    %c0_i32_0 = arith.constant 0 : i32
    %c0_i32_1 = arith.constant 0 : i32
    return %c0_i32, %c0_i32_0 : i32, i32
  }
  func.func @transform_7(%arg0: i32) -> (i32, i32) {
    %c0_i32 = arith.constant 0 : i32
    %c0_i32_0 = arith.constant 0 : i32
    %c0_i32_1 = arith.constant 0 : i32
    return %c0_i32, %c0_i32_0 : i32, i32
  }
  func.func @transform_8(%arg0: i32) -> (i32, i32) {
    %c0_i32 = arith.constant 0 : i32
    %c0_i32_0 = arith.constant 0 : i32
    %c0_i32_1 = arith.constant 0 : i32
    return %c0_i32, %c0_i32_0 : i32, i32
  }
  func.func @transform_9(%arg0: i32) -> (i32, i32) {
    %c0_i32 = arith.constant 0 : i32
    %c0_i32_0 = arith.constant 0 : i32
    %c0_i32_1 = arith.constant 0 : i32
    return %c0_i32, %c0_i32_0 : i32, i32
  }
  func.func @transform_10(%arg0: i32) -> (i32, i32) {
    %c0_i32 = arith.constant 0 : i32
    %c0_i32_0 = arith.constant 0 : i32
    %c0_i32_1 = arith.constant 0 : i32
    return %c0_i32, %c0_i32_0 : i32, i32
  }
  func.func @transform_11(%arg0: i32) -> (i32, i32) {
    %c0_i32 = arith.constant 0 : i32
    %c0_i32_0 = arith.constant 0 : i32
    %c0_i32_1 = arith.constant 0 : i32
    return %c0_i32, %c0_i32_0 : i32, i32
  }
  func.func @transform_12(%arg0: i32) -> (i32, i32) {
    %c0_i32 = arith.constant 0 : i32
    %c0_i32_0 = arith.constant 0 : i32
    %c0_i32_1 = arith.constant 0 : i32
    return %c0_i32, %c0_i32_0 : i32, i32
  }
  func.func @transform_13(%arg0: i32) -> (i32, i32) {
    %c0_i32 = arith.constant 0 : i32
    %c0_i32_0 = arith.constant 0 : i32
    %c0_i32_1 = arith.constant 0 : i32
    return %c0_i32, %c0_i32_0 : i32, i32
  }
  func.func @transform_14(%arg0: i32) -> (i32, i32) {
    %c0_i32 = arith.constant 0 : i32
    %c0_i32_0 = arith.constant 0 : i32
    %c0_i32_1 = arith.constant 0 : i32
    return %c0_i32, %c0_i32_0 : i32, i32
  }
  func.func @transform_15(%arg0: i32) -> (i32, i32) {
    %c0_i32 = arith.constant 0 : i32
    %c0_i32_0 = arith.constant 0 : i32
    %c0_i32_1 = arith.constant 0 : i32
    return %c0_i32, %c0_i32_0 : i32, i32
  }
  func.func @transform_16(%arg0: i32) -> (i32, i32) {
    %c0_i32 = arith.constant 0 : i32
    %c0_i32_0 = arith.constant 0 : i32
    %c0_i32_1 = arith.constant 0 : i32
    return %c0_i32, %c0_i32_0 : i32, i32
  }
  func.func @transform_17(%arg0: i32) -> (i32, i32) {
    %c0_i32 = arith.constant 0 : i32
    %c0_i32_0 = arith.constant 0 : i32
    %c0_i32_1 = arith.constant 0 : i32
    return %c0_i32, %c0_i32_0 : i32, i32
  }
  func.func @transform_18(%arg0: i32) -> (i32, i32) {
    %c0_i32 = arith.constant 0 : i32
    %c0_i32_0 = arith.constant 0 : i32
    %c0_i32_1 = arith.constant 0 : i32
    return %c0_i32, %c0_i32_0 : i32, i32
  }
}

</mosaic_0001>

<bundles_post_ra>
// kernel: tile.37
= control target key start
LH: loop header
LB: loop body
LE: loop exit
PB: predicated region body
PF: predicated region fallthrough
CT: control target
= control target key end

     0   :  { %vm17_vm0 = vcmask 130048   ;;  %s62_s0 = inlined_call_operand.vmem [shape: f32[16,3,2], index: 0, kind: input, shape index: {}]   ;;  %s63_s1 = inlined_call_operand.vmem [shape: f32[16,6], index: 1, kind: output, shape index: {}]  }
   0x1   :  { %v30_v0 = vld [vmem:[%s62_s0 + $0x4] sm:$0x3]  ;;  %v31_v1 = vld [vmem:[%s62_s0 + $0x2] sm:$0x3]  ;;  %v14_v2 = vld [vmem:[%s62_s0] sm:$0x3] }
   0x2   :  { %9 = vst [vmem:[#allocation0] sm:$0x3] %v30_v0  ;;  %13 = vst [vmem:[#allocation0 + $0x10] sm:$0x3] %v31_v1 }
   0x3   :  { %15 = vst [vmem:[#allocation0 + $0x8] sm:$0x3] %v14_v2 }
   0x9   :  { %v20_v4 = vld [vmem:[#allocation0 + $0x10] sm:$0x3]   ;;  %v25_v5 = vld [vmem:[#allocation0] sm:$0x3]  }
   0xa   :  { %v16_v3 = vld [vmem:[#allocation0 + $0x8] sm:$0x3]   ;;  %32 = vst.msk [vmem:[%s63_s1 + $0x2] sm:$0x3] %vm17_vm0, %v20_v4   ;;  %33 = vst.msk [vmem:[%s63_s1 + $0x4] sm:$0x3] %vm17_vm0, %v25_v5  }
   0xb   :  { %18 = vst.msk [vmem:[%s63_s1] sm:$0x3] %vm17_vm0, %v16_v3  }

// kernel: model_forward.3
= control target key start
LH: loop header
LB: loop body
LE: loop exit
PB: predicated region body
PF: predicated region fallthrough
CT: control target
= control target key end

     0   :  { %vm308_vm0 = vcmask 1045504   ;;  %v6969_v2 = vmov 0.0   ;;  %vm104_vm1 = vcmask 523264   ;;  %s6971_s30 = smov 12   ;;  %s6972_s20 = smov 122   ;;  %vm304_vm2 = vcmask 48128   ;;  %s8351_s2 = inlined_call_operand.vmem [shape: f32[64,18], index: 2, kind: input, shape index: {}]   ;;  %s8352_s4 = inlined_call_operand.vmem [shape: f32[6,18], index: 4, kind: input, shape index: {}]   ;;  %s8353_s0 = inlined_call_operand.vmem [shape: f32[128,64], index: 0, kind: input, shape index: {}]   ;;  %s8354_s5 = inlined_call_operand.vmem [shape: f32[1,18], index: 5, kind: input, shape index: {}]   ;;  %s8355_s3 = inlined_call_operand.vmem [shape: f32[1,18], index: 3, kind: input, shape index: {}]   ;;  %s8356_s6 = inlined_call_operand.vmem [shape: f32[6,18], index: 6, kind: input, shape index: {}]   ;;  %s8357_s8 = inlined_call_operand.vmem [shape: f32[6,18], index: 8, kind: input, shape index: {}]   ;;  %s8358_s9 = inlined_call_operand.vmem [shape: f32[1,18], index: 9, kind: input, shape index: {}]   ;;  %s8359_s7 = inlined_call_operand.vmem [shape: f32[1,18], index: 7, kind: input, shape index: {}]   ;;  %s8360_s12 = inlined_call_operand.vmem [shape: f32[6,18], index: 12, kind: input, shape index: {}]   ;;  %s8361_s10 = inlined_call_operand.vmem [shape: f32[6,18], index: 10, kind: input, shape index: {}]   ;;  %s8362_s1 = inlined_call_operand.vmem [shape: f32[16,6], index: 1, kind: input, shape index: {}]   ;;  %s8363_s13 = inlined_call_operand.vmem [shape: f32[1,18], index: 13, kind: input, shape index: {}]   ;;  %s8364_s11 = inlined_call_operand.vmem [shape: f32[1,18], index: 11, kind: input, shape index: {}]   ;;  %s8365_s16 = inlined_call_operand.vmem [shape: f32[6,18], index: 16, kind: input, shape index: {}]   ;;  %s8366_s14 = inlined_call_operand.vmem [shape: f32[6,18], index: 14, kind: input, shape index: {}]   ;;  %s8367_s17 = inlined_call_operand.vmem [shape: f32[1,18], index: 17, kind: input, shape index: {}]   ;;  %s8368_s15 = inlined_call_operand.vmem [shape: f32[1,18], index: 15, kind: input, shape index: {}]   ;;  %s8369_s18 = inlined_call_operand.vmem [shape: f32[96,2], index: 18, kind: output, shape index: {}]  }
   0x1   :  { %8373 = sst [smem:[#allocation2_spill]] %s8351_s2  ;;  %6373 = vmatprep.mubr.f32.mxu1 %v6969_v2  ;;  %v7121_v13 = vld [vmem:[%s8354_s5] ss:$0 sm:$0xff]  ;;  %s6973_s22 = smov 6   ;;  %vm3616_vm3 = vcmask 15360  }
   0x2   :  { %8374 = sst [smem:[#allocation3_spill]] %s8352_s4  ;;  %v7130_v19 = vld [vmem:[%s8355_s3] ss:$0 sm:$0xff] }
   0x3   :  { %8375 = sst [smem:[#allocation4_spill]] %s8353_s0  ;;  %v7139_v40 = vld [vmem:[%s8356_s6] sm:$0x3f] }
   0x4   :  { %s8376_s29 = sld [smem:[#allocation2_spill]]  ;;  %v7150_v43 = vld [vmem:[%s8357_s8] sm:$0x3f] }
   0x5   :  { %s8377_s19 = sld [smem:[#allocation3_spill]] }
   0x6   :  { %s8378_s24 = sld [smem:[#allocation4_spill]] }
   0xa   :  { %v96_v0 = vld [vmem:[%s8376_s29 + $0x38] sm:$0xff]  ;;  %v95_v3 = vld [vmem:[%s8376_s29 + $0x30] sm:$0xff]  ;;  %v94_v4 = vld [vmem:[%s8376_s29 + $0x28] sm:$0xff] }
   0xb   :  { %v7077_v1 = vld [vmem:[%s8377_s19] sm:$0x3f]  ;;  %6331 = vmatprep.subr.mxu0 %v96_v0  ;;  %v92_v7 = vld [vmem:[%s8376_s29 + $0x18] sm:$0xff]  ;;  %v91_v8 = vld [vmem:[%s8376_s29 + $0x10] sm:$0xff] }
   0xc   :  { %6371 = vmatprep.subr.msk.mxu1 %vm308_vm0, %v7077_v1  ;;  %6332 = vmatpush3.msra.mxu0 %v96_v0  ;;  %v73_v5 = vld [vmem:[%s8378_s24] sm:$0xff]  ;;  %v90_v9 = vld [vmem:[%s8376_s29 + $0x8] sm:$0xff]  ;;  %v75_v48 = vld [vmem:[%s8378_s24 + $0x10] sm:$0xff] }
   0xd   :  { %6372 = vmatpush3.msk.msra.mxu1 %vm308_vm0, %v7077_v1  ;;  %6333 = vmatprep.subr.mxu0 %v95_v3  ;;  %v93_v6 = vld [vmem:[%s8376_s29 + $0x20] sm:$0xff]  ;;  %v74_v11 = vld [vmem:[%s8378_s24 + $0x8] sm:$0xff]  ;;  %v76_v49 = vld [vmem:[%s8378_s24 + $0x18] sm:$0xff] }
   0xe   :  { %6374 = vmatmul.mubr.f32.vlgmr.msra.gmra.mxu1 %v6969_v2  ;;  %6334 = vmatpush3.msra.mxu0 %v95_v3  ;;  %v89_v10 = vld [vmem:[%s8376_s29] sm:$0xff]  ;;  %s6970_s29 = smov 116  }
   0xf   :  { %6347 = vmatprep.mubr.msk.f32.mxu0 %vm104_vm1, %v73_v5  ;;  %6335 = vmatprep.subr.mxu0 %v94_v4  ;;  %v7194_v0 = vld [vmem:[%s8358_s9] ss:$0 sm:$0xff] }
  0x10   :  { %6336 = vmatpush3.msra.mxu0 %v94_v4  ;;  %6376 = vmatprep.subr.msk.mxu1 %vm308_vm0, %v7139_v40 }
  0x11   :  { %6337 = vmatprep.subr.mxu0 %v93_v6  ;;  %6377 = vmatpush3.msk.msra.mxu1 %vm308_vm0, %v7139_v40 }
  0x12   :  { %6338 = vmatpush3.msra.mxu0 %v93_v6  ;;  %6381 = vmatprep.subr.msk.mxu1 %vm308_vm0, %v7150_v43 }
  0x13   :  { %6339 = vmatprep.subr.mxu0 %v92_v7 }
  0x14   :  { %6340 = vmatpush3.msra.mxu0 %v92_v7 }
  0x15   :  { %6341 = vmatprep.subr.mxu0 %v91_v8 }
  0x16   :  { %6342 = vmatpush3.msra.mxu0 %v91_v8 }
  0x17   :  { %6343 = vmatprep.subr.mxu0 %v90_v9 }
  0x18   :  { %6344 = vmatpush3.msra.mxu0 %v90_v9 }
  0x19   :  { %6345 = vmatprep.subr.mxu0 %v89_v10 }
  0x1a   :  { %6346 = vmatpush3.msra.mxu0 %v89_v10  ;;  %v7208_v10 = vld [vmem:[%s8359_s7] ss:$0 sm:$0xff] }
  0x1b   :  { %6348 = vmatmul.mubr.msk.f32.vlgmr.msra.gmra.mxu0 %vm104_vm1, %v74_v11  ;;  %6431 = vmatprep.subr.msk.mxu0 %vm308_vm0, %v7077_v1 }
  0x1c   :  { %6432 = vmatpush3.msk.msra.mxu0 %vm308_vm0, %v7077_v1  ;;  %6350 = vmatprep.mubr.msk.f32.mxu0 %vm104_vm1, %v75_v48 }
  0x1d   :  { %6441 = vmatprep.subr.msk.mxu0 %vm308_vm0, %v7150_v43 }
  0x1f   :  { %6351 = vmatmul.mubr.msk.f32.gmra.mxu0 %vm104_vm1, %v76_v49 }
  0xce   :  { %v6375_v12 = vpop.f32.mrf.mxu1 }
  0xcf   :  { %v384_v16 = vadd.f32 %v6375_v12, %v7121_v13 }
  0xd0   :  { %v378_v14 = vpop.f32.mrf.mxu1 }
  0xd1   :  { %v379_v15 = vadd.f32 %v7121_v13, %v378_v14 }
  0xd3   :  { %403 = vrot.lane.b32.xlu0 %v379_v15, %s6970_s29 }
  0xd7   :  { %405 = vrot.lane.b32.xlu0 %v384_v16, %s6970_s29 }
  0xdb   :  { %v6349_v17 = vpop.f32.mrf.mxu0 }
  0xdc   :  { %v225_v21 = vadd.f32 %v6349_v17, %v7130_v19 }
  0xdd   :  { %v219_v18 = vpop.f32.mrf.mxu0 }
  0xde   :  { %v220_v20 = vadd.f32 %v7130_v19, %v219_v18  ;;  %v388_v23 = vadd.f32 %v384_v16, %v225_v21 }
  0xdf   :  { %v6352_v6 = vpop.f32.mrf.mxu0 }
  0xe0   :  { %v387_v22 = vadd.f32 %v379_v15, %v220_v20  ;;  %v5963_v25 = vmul.f32 -1.442695, %v388_v23  ;;  %v235_v8 = vadd.f32 %v6352_v6, %v7130_v19 }
  0xe1   :  { %v229_v7 = vpop.f32.mrf.mxu0 }
  0xe2   :  { %v5962_v24 = vmul.f32 -1.442695, %v387_v22  ;;  %v230_v9 = vadd.f32 %v7130_v19, %v229_v7 }
  0xe4   :  { %6618 = vpow2.f32 %v5962_v24 }
  0xe5   :  { %6620 = vpow2.f32 %v5963_v25 }
  0xf1   :  { %v6619_v26 = vpop.eup %6618 }
  0xf2   :  { %v395_v27 = vadd.f32 1.0, %v6619_v26  ;;  %v6621_v28 = vpop.eup %6620 }
  0xf3   :  { %v396_v29 = vadd.f32 1.0, %v6621_v28 }
  0xf4   :  { %6622 = vrcp.f32 %v395_v27 }
  0xf5   :  { %6624 = vrcp.f32 %v396_v29 }
 0x101   :  { %v6623_v30 = vpop.eup %6622 }
 0x102   :  { %v6625_v33 = vpop.eup %6624  ;;  %v423_v44 = vsub.f32 1.0, %v6623_v30  ;;  %v435_v46 = vmul.f32 0.0, %v6623_v30 }
 0x103   :  { %v424_v51 = vsub.f32 1.0, %v6625_v33  ;;  %v436_v53 = vmul.f32 0.0, %v6625_v33 }
 0x145   :  { %v404_v31 = vpop.permute.xlu0 %403 }
 0x146   :  { %v409_v32 = vmul.f32 %v6623_v30, %v404_v31 }
 0x148   :  { %413 = vrot.lane.b32.xlu1 %v409_v32, %s6971_s30 }
 0x149   :  { %v406_v34 = vpop.permute.xlu0 %405 }
 0x14a   :  { %v410_v35 = vmul.f32 %v6625_v33, %v406_v34 }
 0x14c   :  { %415 = vrot.lane.b32.xlu1 %v410_v35, %s6971_s30 }
 0x1ba   :  { %v414_v36 = vpop.permute.xlu1 %413 }
 0x1bb   :  { %v419_v37 = vadd.f32 %v414_v36, %v220_v20 }
 0x1bd   :  { %6626 = vtanh.f32 %v419_v37 }
 0x1be   :  { %v416_v38 = vpop.permute.xlu1 %415 }
 0x1bf   :  { %v420_v39 = vadd.f32 %v416_v38, %v225_v21 }
 0x1c1   :  { %6628 = vtanh.f32 %v420_v39 }
 0x1ca   :  { %v6627_v41 = vpop.eup %6626 }
 0x1cb   :  { %427 = vrot.lane.b32.xlu0 %v6627_v41, %s6972_s20 }
 0x1ce   :  { %v6629_v42 = vpop.eup %6628 }
 0x1cf   :  { %429 = vrot.lane.b32.xlu1 %v6629_v42, %s6972_s20 }
 0x23d   :  { %v428_v45 = vpop.permute.xlu0 %427 }
 0x23e   :  { %v433_v47 = vmul.f32 %v428_v45, %v423_v44 }
 0x240   :  { %v7163_v50 = vadd.f32 %v435_v46, %v433_v47 }
 0x241   :  { %v430_v52 = vpop.permute.xlu1 %429 }
 0x242   :  { %v434_v54 = vmul.f32 %v430_v52, %v424_v51  ;;  %447 = vrot.lane.b32.xlu0 %v7163_v50, %s6972_s20 }
 0x244   :  { %v7168_v55 = vadd.f32 %v436_v53, %v434_v54 }
 0x246   :  { %449 = vrot.lane.b32.xlu1 %v7168_v55, %s6972_s20 }
 0x2b4   :  { %v448_v56 = vpop.permute.xlu0 %447 }
 0x2b5   :  { %6378 = vmatprep.mubr.msk.f32.mxu1 %vm304_vm2, %v448_v56 }
 0x2b8   :  { %v450_v57 = vpop.permute.xlu1 %449 }
 0x2b9   :  { %6379 = vmatmul.mubr.msk.f32.vlgmr.msra.gmra.mxu1 %vm304_vm2, %v450_v57 }
 0x2ba   :  { %6382 = vmatpush3.msk.msra.mxu1 %vm308_vm0, %v7150_v43  ;;  %6383 = vmatprep.mubr.f32.mxu1 %v6969_v2 }
 0x2bb   :  { %6386 = vmatprep.subr.msk.mxu1 %vm308_vm0, %v7077_v1 }
 0x2bd   :  { %6384 = vmatmul.mubr.f32.vlgmr.msra.gmra.mxu1 %v6969_v2 }
 0x2be   :  { %6387 = vmatpush3.msk.msra.mxu1 %vm308_vm0, %v7077_v1  ;;  %6388 = vmatprep.mubr.msk.f32.mxu1 %vm304_vm2, %v448_v56 }
 0x2bf   :  { %6391 = vmatprep.subr.msk.mxu1 %vm308_vm0, %v7139_v40 }
 0x2c1   :  { %6389 = vmatmul.mubr.msk.f32.vlgmr.msra.gmra.mxu1 %vm304_vm2, %v450_v57 }
 0x2c2   :  { %6392 = vmatpush3.msk.msra.mxu1 %vm308_vm0, %v7139_v40 }
 0x2c3   :  { %6396 = vmatprep.subr.msk.mxu1 %vm308_vm0, %v7150_v43 }
 0x379   :  { %v6380_v58 = vpop.f32.mrf.mxu1 }
 0x37a   :  { %v530_v12 = vadd.f32 %v6380_v58, %v7208_v10 }
 0x37b   :  { %v524_v59 = vpop.f32.mrf.mxu1 }
 0x37c   :  { %v525_v15 = vadd.f32 %v7208_v10, %v524_v59 }
 0x37d   :  { %v6385_v60 = vpop.f32.mrf.mxu1 }
 0x37e   :  { %v614_v4 = vadd.f32 %v6385_v60, %v7194_v0 }
 0x37f   :  { %v608_v61 = vpop.f32.mrf.mxu1 }
 0x380   :  { %v609_v5 = vadd.f32 %v7194_v0, %v608_v61  ;;  %v618_v16 = vadd.f32 %v614_v4, %v530_v12  ;;  %v77_v61 = vld [vmem:[%s8378_s24 + $0x20] sm:$0xff] }
 0x381   :  { %v6390_v62 = vpop.f32.mrf.mxu1  ;;  %6353 = vmatprep.mubr.msk.f32.mxu0 %vm104_vm1, %v77_v61 }
 0x382   :  { %v741_v63 = vadd.f32 %v6390_v62, %v7121_v13  ;;  %v617_v18 = vadd.f32 %v609_v5, %v525_v15  ;;  %v5971_v21 = vmul.f32 -1.442695, %v618_v16  ;;  %v78_v62 = vld [vmem:[%s8378_s24 + $0x28] sm:$0xff] }
 0x383   :  { %v735_v2 = vpop.f32.mrf.mxu1  ;;  %6354 = vmatmul.mubr.msk.f32.gmra.mxu0 %vm104_vm1, %v78_v62 }
 0x384   :  { %v736_v3 = vadd.f32 %v7121_v13, %v735_v2  ;;  %762 = vrot.lane.b32.xlu1 %v741_v63, %s6970_s29  ;;  %v745_v11 = vadd.f32 %v741_v63, %v235_v8  ;;  %v5970_v22 = vmul.f32 -1.442695, %v617_v18 }
 0x386   :  { %760 = vrot.lane.b32.xlu0 %v736_v3, %s6970_s29  ;;  %v744_v14 = vadd.f32 %v736_v3, %v230_v9  ;;  %v5976_v17 = vmul.f32 -1.442695, %v745_v11 }
 0x388   :  { %635 = vrot.lane.b32.xlu1 %v614_v4, %s6970_s29  ;;  %v5975_v20 = vmul.f32 -1.442695, %v744_v14  ;;  %6630 = vpow2.f32 %v5976_v17 }
 0x38a   :  { %633 = vrot.lane.b32.xlu0 %v609_v5, %s6970_s29  ;;  %6632 = vpow2.f32 %v5975_v20 }
 0x38b   :  { %6634 = vpow2.f32 %v5971_v21 }
 0x38c   :  { %6636 = vpow2.f32 %v5970_v22 }
 0x395   :  { %v6631_v23 = vpop.eup %6630 }
 0x396   :  { %v753_v25 = vadd.f32 1.0, %v6631_v23 }
 0x397   :  { %v6633_v24 = vpop.eup %6632 }
 0x398   :  { %v6635_v26 = vpop.eup %6634  ;;  %v752_v27 = vadd.f32 1.0, %v6633_v24  ;;  %6638 = vrcp.f32 %v753_v25 }
 0x399   :  { %v6637_v28 = vpop.eup %6636  ;;  %v626_v29 = vadd.f32 1.0, %v6635_v26 }
 0x39a   :  { %v625_v30 = vadd.f32 1.0, %v6637_v28  ;;  %6640 = vrcp.f32 %v752_v27 }
 0x39b   :  { %6642 = vrcp.f32 %v626_v29 }
 0x39c   :  { %6644 = vrcp.f32 %v625_v30 }
 0x3a5   :  { %v6639_v31 = vpop.eup %6638 }
 0x3a6   :  { %v781_v59 = vsub.f32 1.0, %v6639_v31  ;;  %v793_v63 = vmul.f32 %v6639_v31, %v7168_v55 }
 0x3a7   :  { %v6641_v34 = vpop.eup %6640 }
 0x3a8   :  { %v6643_v37 = vpop.eup %6642  ;;  %v780_v3 = vsub.f32 1.0, %v6641_v34  ;;  %v792_v6 = vmul.f32 %v6641_v34, %v7163_v50 }
 0x3a9   :  { %v6645_v41 = vpop.eup %6644 }
 0x3aa   :  { %v653_v55 = vsub.f32 1.0, %v6645_v41  ;;  %v665_v17 = vmul.f32 0.0, %v6645_v41 }
 0x3f6   :  { %v763_v32 = vpop.permute.xlu1 %762 }
 0x3f7   :  { %v767_v33 = vmul.f32 %v6639_v31, %v763_v32 }
 0x3f8   :  { %v761_v35 = vpop.permute.xlu0 %760 }
 0x3f9   :  { %v766_v36 = vmul.f32 %v6641_v34, %v761_v35  ;;  %772 = vrot.lane.b32.xlu1 %v767_v33, %s6971_s30 }
 0x3fa   :  { %v636_v38 = vpop.permute.xlu1 %635 }
 0x3fb   :  { %v640_v39 = vmul.f32 %v6643_v37, %v636_v38  ;;  %770 = vrot.lane.b32.xlu0 %v766_v36, %s6971_s30 }
 0x3fc   :  { %v634_v42 = vpop.permute.xlu0 %633 }
 0x3fd   :  { %v639_v44 = vmul.f32 %v6645_v41, %v634_v42  ;;  %645 = vrot.lane.b32.xlu1 %v640_v39, %s6971_s30 }
 0x3ff   :  { %643 = vrot.lane.b32.xlu0 %v639_v44, %s6971_s30 }
 0x443   :  { %v6355_v34 = vpop.f32.mrf.mxu0 }
 0x444   :  { %v245_v36 = vadd.f32 %v6355_v34, %v7130_v19 }
 0x445   :  { %v239_v35 = vpop.f32.mrf.mxu0 }
 0x46b   :  { %v773_v45 = vpop.permute.xlu1 %772 }
 0x46c   :  { %v777_v46 = vadd.f32 %v773_v45, %v235_v8  ;;  %v654_v8 = vsub.f32 1.0, %v6643_v37 }
 0x46d   :  { %v771_v47 = vpop.permute.xlu0 %770 }
 0x46e   :  { %6646 = vtanh.f32 %v777_v46  ;;  %v776_v48 = vadd.f32 %v771_v47, %v230_v9 }
 0x46f   :  { %v646_v49 = vpop.permute.xlu1 %645 }
 0x470   :  { %6648 = vtanh.f32 %v776_v48  ;;  %v650_v51 = vadd.f32 %v646_v49, %v530_v12  ;;  %v666_v12 = vmul.f32 0.0, %v6643_v37  ;;  %v240_v37 = vadd.f32 %v7130_v19, %v239_v35 }
 0x471   :  { %v644_v52 = vpop.permute.xlu0 %643 }
 0x472   :  { %6650 = vtanh.f32 %v650_v51  ;;  %v649_v53 = vadd.f32 %v644_v52, %v525_v15 }
 0x474   :  { %6652 = vtanh.f32 %v649_v53 }
 0x47b   :  { %v6647_v54 = vpop.eup %6646 }
 0x47c   :  { %786 = vrot.lane.b32.xlu1 %v6647_v54, %s6972_s20 }
 0x47d   :  { %v6649_v56 = vpop.eup %6648 }
 0x47e   :  { %784 = vrot.lane.b32.xlu0 %v6649_v56, %s6972_s20 }
 0x47f   :  { %v6651_v57 = vpop.eup %6650 }
 0x480   :  { %659 = vrot.lane.b32.xlu1 %v6651_v57, %s6972_s20 }
 0x481   :  { %v6653_v58 = vpop.eup %6652 }
 0x482   :  { %657 = vrot.lane.b32.xlu0 %v6653_v58, %s6972_s20 }
 0x4ee   :  { %v787_v60 = vpop.permute.xlu1 %786 }
 0x4ef   :  { %v791_v2 = vmul.f32 %v787_v60, %v781_v59 }
 0x4f0   :  { %v785_v4 = vpop.permute.xlu0 %784 }
 0x4f1   :  { %v7229_v5 = vadd.f32 %v793_v63, %v791_v2  ;;  %v790_v7 = vmul.f32 %v785_v4, %v780_v3 }
 0x4f2   :  { %v660_v9 = vpop.permute.xlu1 %659 }
 0x4f3   :  { %v7232_v11 = vadd.f32 %v792_v6, %v790_v7  ;;  %v664_v14 = vmul.f32 %v660_v9, %v654_v8  ;;  %800 = vrot.lane.b32.xlu1 %v7229_v5, %s6972_s20 }
 0x4f4   :  { %v658_v15 = vpop.permute.xlu0 %657 }
 0x4f5   :  { %v7236_v16 = vadd.f32 %v666_v12, %v664_v14  ;;  %v663_v18 = vmul.f32 %v658_v15, %v653_v55  ;;  %798 = vrot.lane.b32.xlu0 %v7232_v11, %s6972_s20 }
 0x4f7   :  { %v7240_v50 = vadd.f32 %v665_v17, %v663_v18  ;;  %885 = vrot.lane.b32.xlu1 %v7236_v16, %s6972_s20 }
 0x4f9   :  { %883 = vrot.lane.b32.xlu0 %v7240_v50, %s6972_s20 }
 0x565   :  { %v801_v20 = vpop.permute.xlu1 %800 }
 0x567   :  { %v799_v21 = vpop.permute.xlu0 %798 }
 0x568   :  { %6393 = vmatprep.mubr.msk.f32.mxu1 %vm304_vm2, %v799_v21 }
 0x569   :  { %6394 = vmatmul.mubr.msk.f32.vlgmr.msra.gmra.mxu1 %vm304_vm2, %v801_v20  ;;  %v886_v23 = vpop.permute.xlu1 %885 }
 0x56a   :  { %6397 = vmatpush3.msk.msra.mxu1 %vm308_vm0, %v7150_v43 }
 0x56b   :  { %v884_v22 = vpop.permute.xlu0 %883  ;;  %6401 = vmatprep.subr.msk.mxu1 %vm308_vm0, %v7077_v1 }
 0x56c   :  { %6398 = vmatprep.mubr.msk.f32.mxu1 %vm304_vm2, %v884_v22 }
 0x56d   :  { %6399 = vmatmul.mubr.msk.f32.vlgmr.msra.gmra.mxu1 %vm304_vm2, %v886_v23 }
 0x56e   :  { %6402 = vmatpush3.msk.msra.mxu1 %vm308_vm0, %v7077_v1  ;;  %6403 = vmatprep.mubr.msk.f32.mxu1 %vm304_vm2, %v799_v21 }
 0x56f   :  { %6406 = vmatprep.subr.msk.mxu1 %vm308_vm0, %v7139_v40 }
 0x571   :  { %6404 = vmatmul.mubr.msk.f32.vlgmr.msra.gmra.mxu1 %vm304_vm2, %v801_v20 }
 0x572   :  { %6407 = vmatpush3.msk.msra.mxu1 %vm308_vm0, %v7139_v40 }
 0x573   :  { %6411 = vmatprep.subr.msk.mxu1 %vm308_vm0, %v7150_v43 }
 0x629   :  { %v6395_v24 = vpop.f32.mrf.mxu1 }
 0x62a   :  { %v878_v39 = vadd.f32 %v6395_v24, %v7208_v10 }
 0x62b   :  { %v872_v25 = vpop.f32.mrf.mxu1 }
 0x62c   :  { %v873_v42 = vadd.f32 %v7208_v10, %v872_v25 }
 0x62d   :  { %v6400_v26 = vpop.f32.mrf.mxu1 }
 0x62e   :  { %v963_v32 = vadd.f32 %v6400_v26, %v7194_v0 }
 0x62f   :  { %v957_v27 = vpop.f32.mrf.mxu1 }
 0x630   :  { %v958_v33 = vadd.f32 %v7194_v0, %v957_v27  ;;  %v967_v44 = vadd.f32 %v963_v32, %v878_v39 }
 0x631   :  { %v6405_v28 = vpop.f32.mrf.mxu1 }
 0x632   :  { %v1090_v29 = vadd.f32 %v6405_v28, %v7121_v13  ;;  %v966_v46 = vadd.f32 %v958_v33, %v873_v42  ;;  %v5984_v48 = vmul.f32 -1.442695, %v967_v44 }
 0x633   :  { %v1084_v30 = vpop.f32.mrf.mxu1 }
 0x634   :  { %v1085_v31 = vadd.f32 %v7121_v13, %v1084_v30  ;;  %1111 = vrot.lane.b32.xlu1 %v1090_v29, %s6970_s29  ;;  %v1094_v38 = vadd.f32 %v1090_v29, %v245_v36  ;;  %v5983_v49 = vmul.f32 -1.442695, %v966_v46  ;;  %v79_v29 = vld [vmem:[%s8378_s24 + $0x30] sm:$0xff]  ;;  %v80_v30 = vld [vmem:[%s8378_s24 + $0x38] sm:$0xff] }
 0x635   :  { %6356 = vmatprep.mubr.msk.f32.mxu0 %vm104_vm1, %v79_v29 }
 0x636   :  { %1109 = vrot.lane.b32.xlu0 %v1085_v31, %s6970_s29  ;;  %v1093_v41 = vadd.f32 %v1085_v31, %v240_v37  ;;  %v5989_v45 = vmul.f32 -1.442695, %v1094_v38  ;;  %6357 = vmatmul.mubr.msk.f32.gmra.mxu0 %vm104_vm1, %v80_v30 }
 0x638   :  { %984 = vrot.lane.b32.xlu1 %v963_v32, %s6970_s29  ;;  %v5988_v47 = vmul.f32 -1.442695, %v1093_v41  ;;  %6654 = vpow2.f32 %v5989_v45 }
 0x63a   :  { %982 = vrot.lane.b32.xlu0 %v958_v33, %s6970_s29  ;;  %6656 = vpow2.f32 %v5988_v47 }
 0x63b   :  { %6658 = vpow2.f32 %v5984_v48 }
 0x63c   :  { %6660 = vpow2.f32 %v5983_v49 }
 0x645   :  { %v6655_v51 = vpop.eup %6654 }
 0x646   :  { %v1102_v53 = vadd.f32 1.0, %v6655_v51 }
 0x647   :  { %v6657_v52 = vpop.eup %6656 }
 0x648   :  { %v6659_v54 = vpop.eup %6658  ;;  %v1101_v56 = vadd.f32 1.0, %v6657_v52  ;;  %6662 = vrcp.f32 %v1102_v53 }
 0x649   :  { %v6661_v57 = vpop.eup %6660  ;;  %v975_v58 = vadd.f32 1.0, %v6659_v54 }
 0x64a   :  { %v974_v59 = vadd.f32 1.0, %v6661_v57  ;;  %6664 = vrcp.f32 %v1101_v56 }
 0x64b   :  { %6666 = vrcp.f32 %v975_v58 }
 0x64c   :  { %6668 = vrcp.f32 %v974_v59 }
 0x655   :  { %v6663_v60 = vpop.eup %6662 }
 0x656   :  { %v1130_v27 = vsub.f32 1.0, %v6663_v60  ;;  %v1142_v31 = vmul.f32 %v6663_v60, %v7229_v5 }
 0x657   :  { %v6665_v63 = vpop.eup %6664 }
 0x658   :  { %v6667_v4 = vpop.eup %6666  ;;  %v1129_v33 = vsub.f32 1.0, %v6665_v63 }
 0x659   :  { %v6669_v8 = vpop.eup %6668  ;;  %v1003_v38 = vsub.f32 1.0, %v6667_v4 }
 0x65a   :  { %v1002_v5 = vsub.f32 1.0, %v6669_v8  ;;  %v1014_v47 = vmul.f32 %v6669_v8, %v7240_v50 }
 0x6a6   :  { %v1112_v61 = vpop.permute.xlu1 %1111 }
 0x6a7   :  { %v1116_v62 = vmul.f32 %v6663_v60, %v1112_v61 }
 0x6a8   :  { %v1110_v2 = vpop.permute.xlu0 %1109 }
 0x6a9   :  { %v1115_v3 = vmul.f32 %v6665_v63, %v1110_v2  ;;  %1121 = vrot.lane.b32.xlu1 %v1116_v62, %s6971_s30 }
 0x6aa   :  { %v985_v6 = vpop.permute.xlu1 %984 }
 0x6ab   :  { %v989_v7 = vmul.f32 %v6667_v4, %v985_v6  ;;  %1119 = vrot.lane.b32.xlu0 %v1115_v3, %s6971_s30 }
 0x6ac   :  { %v983_v9 = vpop.permute.xlu0 %982 }
 0x6ad   :  { %v988_v12 = vmul.f32 %v6669_v8, %v983_v9  ;;  %994 = vrot.lane.b32.xlu1 %v989_v7, %s6971_s30 }
 0x6af   :  { %992 = vrot.lane.b32.xlu0 %v988_v12, %s6971_s30 }
 0x71b   :  { %v1122_v14 = vpop.permute.xlu1 %1121 }
 0x71c   :  { %v1126_v55 = vadd.f32 %v1122_v14, %v245_v36  ;;  %v1141_v36 = vmul.f32 %v6665_v63, %v7232_v11  ;;  %v6358_v63 = vpop.f32.mrf.mxu0 }
 0x71d   :  { %v1120_v15 = vpop.permute.xlu0 %1119  ;;  %v255_v3 = vadd.f32 %v6358_v63, %v7130_v19  ;;  %v88_v63 = vld [vmem:[%s8378_s24 + $0x78] sm:$0xff] }
 0x71e   :  { %6670 = vtanh.f32 %v1126_v55  ;;  %v1125_v17 = vadd.f32 %v1120_v15, %v240_v37  ;;  %v249_v2 = vpop.f32.mrf.mxu0 }
 0x71f   :  { %v995_v18 = vpop.permute.xlu1 %994 }
 0x720   :  { %6672 = vtanh.f32 %v1125_v17  ;;  %v999_v20 = vadd.f32 %v995_v18, %v878_v39 }
 0x721   :  { %v993_v21 = vpop.permute.xlu0 %992 }
 0x722   :  { %6674 = vtanh.f32 %v999_v20  ;;  %v998_v22 = vadd.f32 %v993_v21, %v873_v42  ;;  %v1015_v42 = vmul.f32 %v6667_v4, %v7236_v16  ;;  %v250_v4 = vadd.f32 %v7130_v19, %v249_v2 }
 0x724   :  { %6676 = vtanh.f32 %v998_v22 }
 0x72b   :  { %v6671_v23 = vpop.eup %6670 }
 0x72c   :  { %1135 = vrot.lane.b32.xlu1 %v6671_v23, %s6972_s20 }
 0x72d   :  { %v6673_v24 = vpop.eup %6672 }
 0x72e   :  { %1133 = vrot.lane.b32.xlu0 %v6673_v24, %s6972_s20 }
 0x72f   :  { %v6675_v25 = vpop.eup %6674 }
 0x730   :  { %1008 = vrot.lane.b32.xlu1 %v6675_v25, %s6972_s20 }
 0x731   :  { %v6677_v26 = vpop.eup %6676 }
 0x732   :  { %1006 = vrot.lane.b32.xlu0 %v6677_v26, %s6972_s20 }
 0x79e   :  { %v1136_v28 = vpop.permute.xlu1 %1135 }
 0x79f   :  { %v1140_v32 = vmul.f32 %v1136_v28, %v1130_v27 }
 0x7a0   :  { %v1134_v34 = vpop.permute.xlu0 %1133 }
 0x7a1   :  { %v7293_v35 = vadd.f32 %v1142_v31, %v1140_v32  ;;  %v1139_v37 = vmul.f32 %v1134_v34, %v1129_v33 }
 0x7a2   :  { %v1009_v39 = vpop.permute.xlu1 %1008 }
 0x7a3   :  { %v7296_v41 = vadd.f32 %v1141_v36, %v1139_v37  ;;  %v1013_v44 = vmul.f32 %v1009_v39, %v1003_v38  ;;  %1149 = vrot.lane.b32.xlu1 %v7293_v35, %s6972_s20 }
 0x7a4   :  { %v1007_v45 = vpop.permute.xlu0 %1006 }
 0x7a5   :  { %v7301_v46 = vadd.f32 %v1015_v42, %v1013_v44  ;;  %v1012_v48 = vmul.f32 %v1007_v45, %v1002_v5  ;;  %1147 = vrot.lane.b32.xlu0 %v7296_v41, %s6972_s20 }
 0x7a7   :  { %v7306_v11 = vadd.f32 %v1014_v47, %v1012_v48  ;;  %1234 = vrot.lane.b32.xlu1 %v7301_v46, %s6972_s20 }
 0x7a9   :  { %1232 = vrot.lane.b32.xlu0 %v7306_v11, %s6972_s20 }
 0x815   :  { %v1150_v16 = vpop.permute.xlu1 %1149 }
 0x817   :  { %v1148_v49 = vpop.permute.xlu0 %1147 }
 0x818   :  { %6408 = vmatprep.mubr.msk.f32.mxu1 %vm304_vm2, %v1148_v49 }
 0x819   :  { %6409 = vmatmul.mubr.msk.f32.vlgmr.msra.gmra.mxu1 %vm304_vm2, %v1150_v16  ;;  %v1235_v51 = vpop.permute.xlu1 %1234 }
 0x81a   :  { %6412 = vmatpush3.msk.msra.mxu1 %vm308_vm0, %v7150_v43 }
 0x81b   :  { %v1233_v50 = vpop.permute.xlu0 %1232  ;;  %6416 = vmatprep.subr.msk.mxu1 %vm308_vm0, %v7077_v1 }
 0x81c   :  { %6413 = vmatprep.mubr.msk.f32.mxu1 %vm304_vm2, %v1233_v50 }
 0x81d   :  { %6414 = vmatmul.mubr.msk.f32.vlgmr.msra.gmra.mxu1 %vm304_vm2, %v1235_v51  ;;  %v81_v51 = vld [vmem:[%s8378_s24 + $0x40] sm:$0xff] }
 0x81e   :  { %6417 = vmatpush3.msk.msra.mxu1 %vm308_vm0, %v7077_v1  ;;  %6418 = vmatprep.mubr.msk.f32.mxu1 %vm304_vm2, %v1148_v49 }
 0x81f   :  { %6421 = vmatprep.subr.msk.mxu1 %vm308_vm0, %v7139_v40  ;;  %6359 = vmatprep.mubr.msk.f32.mxu0 %vm104_vm1, %v81_v51 }
 0x821   :  { %6419 = vmatmul.mubr.msk.f32.vlgmr.msra.gmra.mxu1 %vm304_vm2, %v1150_v16 }
 0x822   :  { %6422 = vmatpush3.msk.msra.mxu1 %vm308_vm0, %v7139_v40 }
 0x823   :  { %6426 = vmatprep.subr.msk.mxu1 %vm308_vm0, %v7150_v43 }
 0x8d9   :  { %v6410_v52 = vpop.f32.mrf.mxu1 }
 0x8da   :  { %v1227_v7 = vadd.f32 %v6410_v52, %v7208_v10  ;;  %v82_v52 = vld [vmem:[%s8378_s24 + $0x48] sm:$0xff] }
 0x8db   :  { %v1221_v53 = vpop.f32.mrf.mxu1  ;;  %6360 = vmatmul.mubr.msk.f32.gmra.mxu0 %vm104_vm1, %v82_v52 }
 0x8dc   :  { %v1222_v9 = vadd.f32 %v7208_v10, %v1221_v53  ;;  %v83_v53 = vld [vmem:[%s8378_s24 + $0x50] sm:$0xff] }
 0x8dd   :  { %v6415_v54 = vpop.f32.mrf.mxu1  ;;  %6362 = vmatprep.mubr.msk.f32.mxu0 %vm104_vm1, %v83_v53 }
 0x8de   :  { %v1312_v61 = vadd.f32 %v6415_v54, %v7194_v0 }
 0x8df   :  { %v1306_v56 = vpop.f32.mrf.mxu1 }
 0x8e0   :  { %v1307_v62 = vadd.f32 %v7194_v0, %v1306_v56  ;;  %v1316_v12 = vadd.f32 %v1312_v61, %v1227_v7  ;;  %v84_v56 = vld [vmem:[%s8378_s24 + $0x58] sm:$0xff] }
 0x8e1   :  { %v6420_v57 = vpop.f32.mrf.mxu1  ;;  %6363 = vmatmul.mubr.msk.f32.gmra.mxu0 %vm104_vm1, %v84_v56 }
 0x8e2   :  { %v1439_v58 = vadd.f32 %v6420_v57, %v7121_v13  ;;  %v1315_v55 = vadd.f32 %v1307_v62, %v1222_v9  ;;  %v5997_v17 = vmul.f32 -1.442695, %v1316_v12 }
 0x8e3   :  { %v1433_v59 = vpop.f32.mrf.mxu1 }
 0x8e4   :  { %v1434_v60 = vadd.f32 %v7121_v13, %v1433_v59  ;;  %1460 = vrot.lane.b32.xlu1 %v1439_v58, %s6970_s29  ;;  %v1443_v6 = vadd.f32 %v1439_v58, %v255_v3  ;;  %v5996_v18 = vmul.f32 -1.442695, %v1315_v55  ;;  %v85_v58 = vld [vmem:[%s8378_s24 + $0x60] sm:$0xff] }
 0x8e5   :  { %6365 = vmatprep.mubr.msk.f32.mxu0 %vm104_vm1, %v85_v58 }
 0x8e6   :  { %1458 = vrot.lane.b32.xlu0 %v1434_v60, %s6970_s29  ;;  %v1442_v8 = vadd.f32 %v1434_v60, %v250_v4  ;;  %v6002_v14 = vmul.f32 -1.442695, %v1443_v6  ;;  %v86_v60 = vld [vmem:[%s8378_s24 + $0x68] sm:$0xff] }
 0x8e7   :  { %6366 = vmatmul.mubr.msk.f32.gmra.mxu0 %vm104_vm1, %v86_v60 }
 0x8e8   :  { %1333 = vrot.lane.b32.xlu1 %v1312_v61, %s6970_s29  ;;  %v6001_v15 = vmul.f32 -1.442695, %v1442_v8  ;;  %6678 = vpow2.f32 %v6002_v14 }
 0x8ea   :  { %1331 = vrot.lane.b32.xlu0 %v1307_v62, %s6970_s29  ;;  %6680 = vpow2.f32 %v6001_v15  ;;  %v87_v62 = vld [vmem:[%s8378_s24 + $0x70] sm:$0xff] }
 0x8eb   :  { %6682 = vpow2.f32 %v5997_v17  ;;  %6368 = vmatprep.mubr.msk.f32.mxu0 %vm104_vm1, %v87_v62 }
 0x8ec   :  { %6684 = vpow2.f32 %v5996_v18  ;;  %6369 = vmatmul.mubr.msk.f32.gmra.mxu0 %vm104_vm1, %v88_v63 }
 0x8f5   :  { %v6679_v20 = vpop.eup %6678 }
 0x8f6   :  { %v1451_v22 = vadd.f32 1.0, %v6679_v20 }
 0x8f7   :  { %v6681_v21 = vpop.eup %6680 }
 0x8f8   :  { %v6683_v23 = vpop.eup %6682  ;;  %v1450_v24 = vadd.f32 1.0, %v6681_v21  ;;  %6686 = vrcp.f32 %v1451_v22 }
 0x8f9   :  { %v6685_v25 = vpop.eup %6684  ;;  %v1324_v26 = vadd.f32 1.0, %v6683_v23 }
 0x8fa   :  { %v1323_v27 = vadd.f32 1.0, %v6685_v25  ;;  %6688 = vrcp.f32 %v1450_v24 }
 0x8fb   :  { %6690 = vrcp.f32 %v1324_v26 }
 0x8fc   :  { %6692 = vrcp.f32 %v1323_v27 }
 0x905   :  { %v6687_v28 = vpop.eup %6686 }
 0x906   :  { %v1479_v2 = vsub.f32 1.0, %v6687_v28 }
 0x907   :  { %v6689_v31 = vpop.eup %6688 }
 0x908   :  { %v6691_v34 = vpop.eup %6690  ;;  %v1490_v12 = vmul.f32 %v6689_v31, %v7296_v41 }
 0x909   :  { %v6693_v38 = vpop.eup %6692  ;;  %v1352_v55 = vsub.f32 1.0, %v6691_v34  ;;  %v1364_v18 = vmul.f32 %v6691_v34, %v7301_v46 }
 0x90a   :  { %v1351_v21 = vsub.f32 1.0, %v6693_v38  ;;  %v1363_v23 = vmul.f32 %v6693_v38, %v7306_v11 }
 0x956   :  { %v1461_v29 = vpop.permute.xlu1 %1460 }
 0x957   :  { %v1465_v30 = vmul.f32 %v6687_v28, %v1461_v29 }
 0x958   :  { %v1459_v32 = vpop.permute.xlu0 %1458 }
 0x959   :  { %v1464_v33 = vmul.f32 %v6689_v31, %v1459_v32  ;;  %1470 = vrot.lane.b32.xlu1 %v1465_v30, %s6971_s30 }
 0x95a   :  { %v1334_v36 = vpop.permute.xlu1 %1333 }
 0x95b   :  { %v1338_v37 = vmul.f32 %v6691_v34, %v1334_v36  ;;  %1468 = vrot.lane.b32.xlu0 %v1464_v33, %s6971_s30 }
 0x95c   :  { %v1332_v39 = vpop.permute.xlu0 %1331 }
 0x95d   :  { %v1337_v42 = vmul.f32 %v6693_v38, %v1332_v39  ;;  %1343 = vrot.lane.b32.xlu1 %v1338_v37, %s6971_s30 }
 0x95f   :  { %1341 = vrot.lane.b32.xlu0 %v1337_v42, %s6971_s30 }
 0x99b   :  { %v6361_v27 = vpop.f32.mrf.mxu0 }
 0x9cb   :  { %v1471_v44 = vpop.permute.xlu1 %1470 }
 0x9cc   :  { %v1475_v5 = vadd.f32 %v1471_v44, %v255_v3 }
 0x9cd   :  { %v1469_v45 = vpop.permute.xlu0 %1468 }
 0x9ce   :  { %6694 = vtanh.f32 %v1475_v5  ;;  %v1474_v47 = vadd.f32 %v1469_v45, %v250_v4  ;;  %v1491_v4 = vmul.f32 %v6687_v28, %v7293_v35 }
 0x9cf   :  { %v1344_v48 = vpop.permute.xlu1 %1343 }
 0x9d0   :  { %6696 = vtanh.f32 %v1474_v47  ;;  %v1348_v16 = vadd.f32 %v1344_v48, %v1227_v7  ;;  %v1478_v7 = vsub.f32 1.0, %v6689_v31  ;;  %v265_v47 = vadd.f32 %v6361_v27, %v7130_v19 }
 0x9d1   :  { %v1342_v49 = vpop.permute.xlu0 %1341 }
 0x9d2   :  { %6698 = vtanh.f32 %v1348_v16  ;;  %v1347_v50 = vadd.f32 %v1342_v49, %v1222_v9 }
 0x9d4   :  { %6700 = vtanh.f32 %v1347_v50 }
 0x9db   :  { %v6695_v54 = vpop.eup %6694 }
 0x9dc   :  { %1484 = vrot.lane.b32.xlu1 %v6695_v54, %s6972_s20 }
 0x9dd   :  { %v6697_v57 = vpop.eup %6696 }
 0x9de   :  { %1482 = vrot.lane.b32.xlu0 %v6697_v57, %s6972_s20 }
 0x9df   :  { %v6699_v59 = vpop.eup %6698 }
 0x9e0   :  { %1357 = vrot.lane.b32.xlu1 %v6699_v59, %s6972_s20 }
 0x9e1   :  { %v6701_v61 = vpop.eup %6700 }
 0x9e2   :  { %1355 = vrot.lane.b32.xlu0 %v6701_v61, %s6972_s20 }
 0xa4e   :  { %v1485_v3 = vpop.permute.xlu1 %1484 }
 0xa4f   :  { %v1489_v6 = vmul.f32 %v1485_v3, %v1479_v2 }
 0xa50   :  { %v1483_v8 = vpop.permute.xlu0 %1482 }
 0xa51   :  { %v7383_v9 = vadd.f32 %v1491_v4, %v1489_v6  ;;  %v1488_v14 = vmul.f32 %v1483_v8, %v1478_v7 }
 0xa52   :  { %v1358_v15 = vpop.permute.xlu1 %1357 }
 0xa53   :  { %v7386_v17 = vadd.f32 %v1490_v12, %v1488_v14  ;;  %v1362_v20 = vmul.f32 %v1358_v15, %v1352_v55  ;;  %1498 = vrot.lane.b32.xlu1 %v7383_v9, %s6972_s20 }
 0xa54   :  { %v1356_v35 = vpop.permute.xlu0 %1355 }
 0xa55   :  { %v7391_v22 = vadd.f32 %v1364_v18, %v1362_v20  ;;  %v1361_v24 = vmul.f32 %v1356_v35, %v1351_v21  ;;  %1496 = vrot.lane.b32.xlu0 %v7386_v17, %s6972_s20 }
 0xa57   :  { %v7396_v41 = vadd.f32 %v1363_v23, %v1361_v24  ;;  %1583 = vrot.lane.b32.xlu1 %v7391_v22, %s6972_s20 }
 0xa59   :  { %1581 = vrot.lane.b32.xlu0 %v7396_v41, %s6972_s20 }
 0xac5   :  { %v1499_v46 = vpop.permute.xlu1 %1498 }
 0xac7   :  { %v1497_v25 = vpop.permute.xlu0 %1496 }
 0xac8   :  { %6423 = vmatprep.mubr.msk.f32.mxu1 %vm304_vm2, %v1497_v25  ;;  %6433 = vmatprep.mubr.msk.f32.mxu0 %vm304_vm2, %v1497_v25 }
 0xac9   :  { %6424 = vmatmul.mubr.msk.f32.vlgmr.msra.gmra.mxu1 %vm304_vm2, %v1499_v46  ;;  %6434 = vmatmul.mubr.msk.f32.vlgmr.msra.gmra.mxu0 %vm304_vm2, %v1499_v46  ;;  %v1584_v26 = vpop.permute.xlu1 %1583 }
 0xaca   :  { %6427 = vmatpush3.msk.msra.mxu1 %vm308_vm0, %v7150_v43  ;;  %6442 = vmatpush3.msk.msra.mxu0 %vm308_vm0, %v7150_v43  ;;  %v259_v43 = vpop.f32.mrf.mxu0 }
 0xacb   :  { %v1582_v11 = vpop.permute.xlu0 %1581  ;;  %6436 = vmatprep.subr.msk.mxu1 %vm308_vm0, %v7139_v40  ;;  %6451 = vmatprep.subr.msk.mxu0 %vm308_vm0, %v7139_v40  ;;  %v260_v49 = vadd.f32 %v7130_v19, %v259_v43 }
 0xacc   :  { %6428 = vmatprep.mubr.msk.f32.mxu1 %vm304_vm2, %v1582_v11  ;;  %v7420_v28 = vpop.f32.mrf.mxu0 }
 0xacd   :  { %6429 = vmatmul.mubr.msk.f32.vlgmr.msra.gmra.mxu1 %vm304_vm2, %v1584_v26 }
 0xace   :  { %6437 = vmatpush3.msk.msra.mxu1 %vm308_vm0, %v7139_v40  ;;  %v7422_v29 = vpop.f32.mrf.mxu0 }
 0xacf   :  { %6446 = vmatprep.subr.msk.mxu1 %vm308_vm0, %v7077_v1 }
 0xad0   :  { %v7424_v30 = vpop.f32.mrf.mxu0 }
 0xad2   :  { %v7426_v31 = vpop.f32.mrf.mxu0 }
 0xad4   :  { %v7428_v32 = vpop.f32.mrf.mxu0 }
 0xad6   :  { %v7430_v33 = vpop.f32.mrf.mxu0 }
 0xb89   :  { %v6425_v34 = vpop.f32.mrf.mxu1  ;;  %v6435_v40 = vpop.f32.mrf.mxu0 }
 0xb8a   :  { %v1788_v44 = vadd.f32 %v6435_v40, %v7121_v13  ;;  %v1576_v45 = vadd.f32 %v6425_v34, %v7208_v10 }
 0xb8b   :  { %v1570_v36 = vpop.f32.mrf.mxu1  ;;  %v1782_v42 = vpop.f32.mrf.mxu0 }
 0xb8c   :  { %v1783_v5 = vadd.f32 %v7121_v13, %v1782_v42  ;;  %v1571_v48 = vadd.f32 %v7208_v10, %v1570_v36  ;;  %v1792_v51 = vadd.f32 %v1788_v44, %v265_v47 }
 0xb8d   :  { %v6430_v37 = vpop.f32.mrf.mxu1 }
 0xb8e   :  { %v1661_v1 = vadd.f32 %v6430_v37, %v7194_v0  ;;  %v1791_v53 = vadd.f32 %v1783_v5, %v260_v49  ;;  %v6015_v56 = vmul.f32 -1.442695, %v1792_v51 }
 0xb8f   :  { %v1655_v38 = vpop.f32.mrf.mxu1 }
 0xb90   :  { %v1656_v39 = vadd.f32 %v7194_v0, %v1655_v38  ;;  %1682 = vrot.lane.b32.xlu1 %v1661_v1, %s6970_s29  ;;  %v1665_v16 = vadd.f32 %v1661_v1, %v1576_v45  ;;  %v6014_v13 = vmul.f32 -1.442695, %v1791_v53 }
 0xb92   :  { %1680 = vrot.lane.b32.xlu0 %v1656_v39, %s6970_s29  ;;  %v1664_v50 = vadd.f32 %v1656_v39, %v1571_v48  ;;  %v6010_v52 = vmul.f32 -1.442695, %v1665_v16 }
 0xb94   :  { %1809 = vrot.lane.b32.xlu1 %v1788_v44, %s6970_s29  ;;  %v6009_v54 = vmul.f32 -1.442695, %v1664_v50  ;;  %6702 = vpow2.f32 %v6010_v52 }
 0xb96   :  { %1807 = vrot.lane.b32.xlu0 %v1783_v5, %s6970_s29  ;;  %6704 = vpow2.f32 %v6009_v54 }
 0xb97   :  { %6706 = vpow2.f32 %v6015_v56 }
 0xb98   :  { %6708 = vpow2.f32 %v6014_v13 }
 0xba1   :  { %v6703_v57 = vpop.eup %6702 }
 0xba2   :  { %v1673_v59 = vadd.f32 1.0, %v6703_v57  ;;  %v7484_v57 = vld [vmem:[%s8377_s19] sm:$0x3f] }
 0xba3   :  { %v6705_v58 = vpop.eup %6704 }
 0xba4   :  { %v6707_v60 = vpop.eup %6706  ;;  %v1672_v61 = vadd.f32 1.0, %v6705_v58  ;;  %6710 = vrcp.f32 %v1673_v59  ;;  %v7496_v59 = vld [vmem:[%s8357_s8] sm:$0x3f] }
 0xba5   :  { %v6709_v62 = vpop.eup %6708  ;;  %v1800_v63 = vadd.f32 1.0, %v6707_v60 }
 0xba6   :  { %v1799_v19 = vadd.f32 1.0, %v6709_v62  ;;  %6712 = vrcp.f32 %v1672_v61 }
 0xba7   :  { %6714 = vrcp.f32 %v1800_v63 }
 0xba8   :  { %6716 = vrcp.f32 %v1799_v19 }
 0xbb1   :  { %v6711_v2 = vpop.eup %6710 }
 0xbb2   :  { %v1701_v40 = vsub.f32 1.0, %v6711_v2  ;;  %v1713_v1 = vmul.f32 %v6711_v2, %v7391_v22 }
 0xbb3   :  { %v6713_v6 = vpop.eup %6712 }
 0xbb4   :  { %v6715_v12 = vpop.eup %6714  ;;  %v1700_v39 = vsub.f32 1.0, %v6713_v6  ;;  %v1712_v5 = vmul.f32 %v6713_v6, %v7396_v41 }
 0xbb5   :  { %v6717_v15 = vpop.eup %6716 }
 0xbb6   :  { %v1827_v51 = vsub.f32 1.0, %v6717_v15  ;;  %v1839_v53 = vmul.f32 %v6717_v15, %v7386_v17  ;;  %v7477_v17 = vld [vmem:[%s8356_s6] sm:$0x3f] }
 0xc02   :  { %v1683_v3 = vpop.permute.xlu1 %1682 }
 0xc03   :  { %v1687_v4 = vmul.f32 %v6711_v2, %v1683_v3 }
 0xc04   :  { %v1681_v7 = vpop.permute.xlu0 %1680 }
 0xc05   :  { %v1686_v8 = vmul.f32 %v6713_v6, %v1681_v7  ;;  %1692 = vrot.lane.b32.xlu1 %v1687_v4, %s6971_s30  ;;  %v7512_v4 = vld [vmem:[%s8354_s5] ss:$0 sm:$0xff] }
 0xc06   :  { %v1810_v14 = vpop.permute.xlu1 %1809 }
 0xc07   :  { %v1814_v55 = vmul.f32 %v6715_v12, %v1810_v14  ;;  %1690 = vrot.lane.b32.xlu0 %v1686_v8, %s6971_s30 }
 0xc08   :  { %v1808_v18 = vpop.permute.xlu0 %1807 }
 0xc09   :  { %v1813_v20 = vmul.f32 %v6717_v15, %v1808_v18  ;;  %1819 = vrot.lane.b32.xlu1 %v1814_v55, %s6971_s30  ;;  %v7523_v18 = vld [vmem:[%s8355_s3] ss:$0 sm:$0xff] }
 0xc0b   :  { %1817 = vrot.lane.b32.xlu0 %v1813_v20, %s6971_s30  ;;  %v275_v20 = vadd.f32 %v7523_v18, %v7420_v28 }
 0xc77   :  { %v1693_v21 = vpop.permute.xlu1 %1692 }
 0xc78   :  { %v1697_v35 = vadd.f32 %v1693_v21, %v1576_v45 }
 0xc79   :  { %v1691_v23 = vpop.permute.xlu0 %1690 }
 0xc7a   :  { %6718 = vtanh.f32 %v1697_v35  ;;  %v1696_v24 = vadd.f32 %v1691_v23, %v1571_v48  ;;  %v270_v35 = vadd.f32 %v7523_v18, %v7422_v29 }
 0xc7b   :  { %v1820_v46 = vpop.permute.xlu1 %1819 }
 0xc7c   :  { %6720 = vtanh.f32 %v1696_v24  ;;  %v1824_v25 = vadd.f32 %v1820_v46, %v265_v47  ;;  %v1828_v47 = vsub.f32 1.0, %v6715_v12 }
 0xc7d   :  { %v1818_v11 = vpop.permute.xlu0 %1817 }
 0xc7e   :  { %6722 = vtanh.f32 %v1824_v25  ;;  %v1823_v26 = vadd.f32 %v1818_v11, %v260_v49  ;;  %v1840_v49 = vmul.f32 %v6715_v12, %v7383_v9 }
 0xc80   :  { %6724 = vtanh.f32 %v1823_v26 }
 0xc87   :  { %v6719_v27 = vpop.eup %6718 }
 0xc88   :  { %1706 = vrot.lane.b32.xlu1 %v6719_v27, %s6972_s20 }
 0xc89   :  { %v6721_v43 = vpop.eup %6720 }
 0xc8a   :  { %1704 = vrot.lane.b32.xlu0 %v6721_v43, %s6972_s20 }
 0xc8b   :  { %v6723_v34 = vpop.eup %6722 }
 0xc8c   :  { %1833 = vrot.lane.b32.xlu1 %v6723_v34, %s6972_s20 }
 0xc8d   :  { %v6725_v36 = vpop.eup %6724 }
 0xc8e   :  { %1831 = vrot.lane.b32.xlu0 %v6725_v36, %s6972_s20 }
 0xcfa   :  { %v1707_v37 = vpop.permute.xlu1 %1706 }
 0xcfb   :  { %v1711_v38 = vmul.f32 %v1707_v37, %v1701_v40 }
 0xcfc   :  { %v1705_v42 = vpop.permute.xlu0 %1704 }
 0xcfd   :  { %v7453_v44 = vadd.f32 %v1713_v1, %v1711_v38  ;;  %v1710_v45 = vmul.f32 %v1705_v42, %v1700_v39 }
 0xcfe   :  { %v1834_v48 = vpop.permute.xlu1 %1833 }
 0xcff   :  { %v7456_v16 = vadd.f32 %v1712_v5, %v1710_v45  ;;  %v1838_v50 = vmul.f32 %v1834_v48, %v1828_v47  ;;  %1932 = vrot.lane.b32.xlu1 %v7453_v44, %s6972_s20 }
 0xd00   :  { %v1832_v22 = vpop.permute.xlu0 %1831 }
 0xd01   :  { %v7461_v52 = vadd.f32 %v1840_v49, %v1838_v50  ;;  %v1837_v54 = vmul.f32 %v1832_v22, %v1827_v51  ;;  %1930 = vrot.lane.b32.xlu0 %v7456_v16, %s6972_s20 }
 0xd03   :  { %v7466_v41 = vadd.f32 %v1839_v53, %v1837_v54  ;;  %1847 = vrot.lane.b32.xlu1 %v7461_v52, %s6972_s20 }
 0xd05   :  { %1845 = vrot.lane.b32.xlu0 %v7466_v41, %s6972_s20 }
 0xd71   :  { %v1933_v9 = vpop.permute.xlu1 %1932 }
 0xd73   :  { %v1931_v56 = vpop.permute.xlu0 %1930 }
 0xd74   :  { %6443 = vmatprep.mubr.msk.f32.mxu0 %vm304_vm2, %v1931_v56 }
 0xd75   :  { %6444 = vmatmul.mubr.msk.f32.vlgmr.msra.gmra.mxu0 %vm304_vm2, %v1933_v9  ;;  %v1848_v58 = vpop.permute.xlu1 %1847 }
 0xd76   :  { %6452 = vmatpush3.msk.msra.mxu0 %vm308_vm0, %v7477_v17 }
 0xd77   :  { %v1846_v13 = vpop.permute.xlu0 %1845  ;;  %6461 = vmatprep.subr.msk.mxu0 %vm308_vm0, %v7484_v57 }
 0xd78   :  { %6438 = vmatprep.mubr.msk.f32.mxu1 %vm304_vm2, %v1846_v13 }
 0xd79   :  { %6439 = vmatmul.mubr.msk.f32.vlgmr.msra.gmra.mxu1 %vm304_vm2, %v1848_v58 }
 0xd7a   :  { %6448 = vmatprep.mubr.msk.f32.mxu1 %vm304_vm2, %v1846_v13  ;;  %6447 = vmatpush3.msk.msra.mxu1 %vm308_vm0, %v7484_v57 }
 0xd7b   :  { %6456 = vmatprep.subr.msk.mxu1 %vm308_vm0, %v7496_v59 }
 0xd7d   :  { %6449 = vmatmul.mubr.msk.f32.vlgmr.msra.gmra.mxu1 %vm304_vm2, %v1848_v58 }
 0xd7e   :  { %6457 = vmatpush3.msk.msra.mxu1 %vm308_vm0, %v7496_v59 }
 0xd7f   :  { %6466 = vmatprep.subr.msk.mxu1 %vm308_vm0, %v7477_v17 }
 0xe35   :  { %v6445_v60 = vpop.f32.mrf.mxu0 }
 0xe36   :  { %v2010_v61 = vadd.f32 %v6445_v60, %v7194_v0 }
 0xe37   :  { %v2004_v62 = vpop.f32.mrf.mxu0 }
 0xe38   :  { %v2005_v63 = vadd.f32 %v7194_v0, %v2004_v62  ;;  %2031 = vrot.lane.b32.xlu1 %v2010_v61, %s6970_s29 }
 0xe39   :  { %v6440_v19 = vpop.f32.mrf.mxu1 }
 0xe3a   :  { %2029 = vrot.lane.b32.xlu0 %v2005_v63, %s6970_s29  ;;  %v1925_v0 = vadd.f32 %v6440_v19, %v7208_v10 }
 0xe3b   :  { %v1919_v2 = vpop.f32.mrf.mxu1 }
 0xe3c   :  { %v1920_v12 = vadd.f32 %v7208_v10, %v1919_v2  ;;  %v2014_v14 = vadd.f32 %v2010_v61, %v1925_v0 }
 0xe3d   :  { %v6450_v3 = vpop.f32.mrf.mxu1 }
 0xe3e   :  { %v2137_v6 = vadd.f32 %v7512_v4, %v6450_v3  ;;  %v2013_v55 = vadd.f32 %v2005_v63, %v1920_v12  ;;  %v6023_v15 = vmul.f32 -1.442695, %v2014_v14 }
 0xe3f   :  { %v2131_v7 = vpop.f32.mrf.mxu1 }
 0xe40   :  { %v2132_v8 = vadd.f32 %v7512_v4, %v2131_v7  ;;  %2158 = vrot.lane.b32.xlu1 %v2137_v6, %s6970_s29  ;;  %v6022_v21 = vmul.f32 -1.442695, %v2013_v55  ;;  %6726 = vpow2.f32 %v6023_v15  ;;  %v2141_v23 = vadd.f32 %v2137_v6, %v275_v20 }
 0xe42   :  { %2156 = vrot.lane.b32.xlu0 %v2132_v8, %s6970_s29  ;;  %6728 = vpow2.f32 %v6022_v21  ;;  %v2140_v24 = vadd.f32 %v2132_v8, %v270_v35  ;;  %v6028_v10 = vmul.f32 -1.442695, %v2141_v23 }
 0xe44   :  { %v6027_v46 = vmul.f32 -1.442695, %v2140_v24  ;;  %6730 = vpow2.f32 %v6028_v10 }
 0xe46   :  { %6732 = vpow2.f32 %v6027_v46 }
 0xe4d   :  { %v6727_v25 = vpop.eup %6726 }
 0xe4e   :  { %v2022_v26 = vadd.f32 1.0, %v6727_v25 }
 0xe4f   :  { %v6729_v11 = vpop.eup %6728 }
 0xe50   :  { %v2021_v27 = vadd.f32 1.0, %v6729_v11  ;;  %6734 = vrcp.f32 %v2022_v26  ;;  %v7578_v26 = vld [vmem:[%s8358_s9] ss:$0 sm:$0xff] }
 0xe51   :  { %v6731_v43 = vpop.eup %6730 }
 0xe52   :  { %6736 = vrcp.f32 %v2021_v27  ;;  %v2149_v34 = vadd.f32 1.0, %v6731_v43 }
 0xe53   :  { %v6733_v28 = vpop.eup %6732 }
 0xe54   :  { %v2148_v36 = vadd.f32 1.0, %v6733_v28  ;;  %6738 = vrcp.f32 %v2149_v34 }
 0xe56   :  { %6740 = vrcp.f32 %v2148_v36 }
 0xe5d   :  { %v6735_v29 = vpop.eup %6734 }
 0xe5e   :  { %v2050_v63 = vsub.f32 1.0, %v6735_v29  ;;  %v2062_v2 = vmul.f32 %v6735_v29, %v7453_v44 }
 0xe5f   :  { %v6737_v1 = vpop.eup %6736 }
 0xe60   :  { %v2049_v6 = vsub.f32 1.0, %v6737_v1 }
 0xe61   :  { %v6739_v42 = vpop.eup %6738 }
 0xe62   :  { %v2177_v55 = vsub.f32 1.0, %v6739_v42  ;;  %v2189_v44 = vmul.f32 %v6739_v42, %v7461_v52 }
 0xe63   :  { %v6741_v47 = vpop.eup %6740 }
 0xe64   :  { %v2176_v21 = vsub.f32 1.0, %v6741_v47 }
 0xeaa   :  { %v2032_v40 = vpop.permute.xlu1 %2031 }
 0xeab   :  { %v2036_v37 = vmul.f32 %v6735_v29, %v2032_v40 }
 0xeac   :  { %v2030_v38 = vpop.permute.xlu0 %2029 }
 0xead   :  { %v2035_v39 = vmul.f32 %v6737_v1, %v2030_v38  ;;  %2041 = vrot.lane.b32.xlu1 %v2036_v37, %s6971_s30  ;;  %v7591_v38 = vld [vmem:[%s8359_s7] ss:$0 sm:$0xff] }
 0xeaf   :  { %2039 = vrot.lane.b32.xlu0 %v2035_v39, %s6971_s30 }
 0xeb2   :  { %v2159_v5 = vpop.permute.xlu1 %2158 }
 0xeb3   :  { %v2163_v45 = vmul.f32 %v6739_v42, %v2159_v5 }
 0xeb4   :  { %v2157_v48 = vpop.permute.xlu0 %2156 }
 0xeb5   :  { %v2162_v49 = vmul.f32 %v6741_v47, %v2157_v48  ;;  %2168 = vrot.lane.b32.xlu1 %v2163_v45, %s6971_s30 }
 0xeb7   :  { %2166 = vrot.lane.b32.xlu0 %v2162_v49, %s6971_s30  ;;  %v285_v49 = vadd.f32 %v7523_v18, %v7424_v30 }
 0xf1f   :  { %v2042_v50 = vpop.permute.xlu1 %2041 }
 0xf20   :  { %v2046_v51 = vadd.f32 %v2042_v50, %v1925_v0  ;;  %v2061_v0 = vmul.f32 %v6737_v1, %v7456_v16  ;;  %v2188_v16 = vmul.f32 %v6741_v47, %v7466_v41  ;;  %v280_v50 = vadd.f32 %v7523_v18, %v7426_v31 }
 0xf21   :  { %v2040_v22 = vpop.permute.xlu0 %2039 }
 0xf22   :  { %6742 = vtanh.f32 %v2046_v51  ;;  %v2045_v53 = vadd.f32 %v2040_v22, %v1920_v12 }
 0xf24   :  { %6744 = vtanh.f32 %v2045_v53 }
 0xf27   :  { %v2169_v54 = vpop.permute.xlu1 %2168 }
 0xf28   :  { %v2173_v9 = vadd.f32 %v2169_v54, %v275_v20 }
 0xf29   :  { %v2167_v56 = vpop.permute.xlu0 %2166 }
 0xf2a   :  { %6746 = vtanh.f32 %v2173_v9  ;;  %v2172_v13 = vadd.f32 %v2167_v56, %v270_v35 }
 0xf2c   :  { %6748 = vtanh.f32 %v2172_v13 }
 0xf2f   :  { %v6743_v58 = vpop.eup %6742 }
 0xf30   :  { %2055 = vrot.lane.b32.xlu1 %v6743_v58, %s6972_s20 }
 0xf31   :  { %v6745_v60 = vpop.eup %6744 }
 0xf32   :  { %2053 = vrot.lane.b32.xlu0 %v6745_v60, %s6972_s20 }
 0xf37   :  { %v6747_v61 = vpop.eup %6746 }
 0xf38   :  { %2182 = vrot.lane.b32.xlu1 %v6747_v61, %s6972_s20 }
 0xf39   :  { %v6749_v62 = vpop.eup %6748 }
 0xf3a   :  { %2180 = vrot.lane.b32.xlu0 %v6749_v62, %s6972_s20 }
 0xfa2   :  { %v2056_v19 = vpop.permute.xlu1 %2055 }
 0xfa3   :  { %v2060_v3 = vmul.f32 %v2056_v19, %v2050_v63 }
 0xfa4   :  { %v2054_v7 = vpop.permute.xlu0 %2053 }
 0xfa5   :  { %v7538_v8 = vadd.f32 %v2062_v2, %v2060_v3  ;;  %v2059_v12 = vmul.f32 %v2054_v7, %v2049_v6 }
 0xfa7   :  { %v7541_v14 = vadd.f32 %v2061_v0, %v2059_v12  ;;  %2281 = vrot.lane.b32.xlu1 %v7538_v8, %s6972_s20 }
 0xfa9   :  { %2279 = vrot.lane.b32.xlu0 %v7541_v14, %s6972_s20 }
 0xfaa   :  { %v2183_v15 = vpop.permute.xlu1 %2182 }
 0xfab   :  { %v2187_v20 = vmul.f32 %v2183_v15, %v2177_v55 }
 0xfac   :  { %v2181_v35 = vpop.permute.xlu0 %2180 }
 0xfad   :  { %v7548_v23 = vadd.f32 %v2189_v44, %v2187_v20  ;;  %v2186_v24 = vmul.f32 %v2181_v35, %v2176_v21 }
 0xfaf   :  { %v7551_v10 = vadd.f32 %v2188_v16, %v2186_v24  ;;  %2196 = vrot.lane.b32.xlu1 %v7548_v23, %s6972_s20 }
 0xfb1   :  { %2194 = vrot.lane.b32.xlu0 %v7551_v10, %s6972_s20 }
0x1019   :  { %v2282_v25 = vpop.permute.xlu1 %2281 }
0x101b   :  { %v2280_v46 = vpop.permute.xlu0 %2279 }
0x101c   :  { %6458 = vmatprep.mubr.msk.f32.mxu1 %vm304_vm2, %v2280_v46 }
0x101d   :  { %6459 = vmatmul.mubr.msk.f32.vlgmr.msra.gmra.mxu1 %vm304_vm2, %v2282_v25 }
0x101e   :  { %6467 = vmatpush3.msk.msra.mxu1 %vm308_vm0, %v7477_v17 }
0x101f   :  { %6476 = vmatprep.subr.msk.mxu1 %vm308_vm0, %v7484_v57 }
0x1021   :  { %v2197_v41 = vpop.permute.xlu1 %2196 }
0x1023   :  { %v2195_v52 = vpop.permute.xlu0 %2194 }
0x1024   :  { %6453 = vmatprep.mubr.msk.f32.mxu0 %vm304_vm2, %v2195_v52 }
0x1025   :  { %6454 = vmatmul.mubr.msk.f32.vlgmr.msra.gmra.mxu0 %vm304_vm2, %v2197_v41 }
0x1026   :  { %6463 = vmatprep.mubr.msk.f32.mxu0 %vm304_vm2, %v2195_v52  ;;  %6462 = vmatpush3.msk.msra.mxu0 %vm308_vm0, %v7484_v57 }
0x1027   :  { %6471 = vmatprep.subr.msk.mxu0 %vm308_vm0, %v7496_v59 }
0x1029   :  { %6464 = vmatmul.mubr.msk.f32.vlgmr.msra.gmra.mxu0 %vm304_vm2, %v2197_v41 }
0x102a   :  { %6472 = vmatpush3.msk.msra.mxu0 %vm308_vm0, %v7496_v59 }
0x102b   :  { %6481 = vmatprep.subr.msk.mxu0 %vm308_vm0, %v7477_v17 }
0x10dd   :  { %v6460_v11 = vpop.f32.mrf.mxu1 }
0x10de   :  { %v2359_v27 = vadd.f32 %v7578_v26, %v6460_v11 }
0x10df   :  { %v2353_v43 = vpop.f32.mrf.mxu1 }
0x10e0   :  { %v2354_v28 = vadd.f32 %v7578_v26, %v2353_v43  ;;  %2380 = vrot.lane.b32.xlu1 %v2359_v27, %s6970_s29 }
0x10e2   :  { %2378 = vrot.lane.b32.xlu0 %v2354_v28, %s6970_s29 }
0x10e5   :  { %v6455_v34 = vpop.f32.mrf.mxu0 }
0x10e6   :  { %v2274_v39 = vadd.f32 %v7591_v38, %v6455_v34 }
0x10e7   :  { %v2268_v36 = vpop.f32.mrf.mxu0 }
0x10e8   :  { %v2269_v42 = vadd.f32 %v7591_v38, %v2268_v36  ;;  %v2363_v5 = vadd.f32 %v2359_v27, %v2274_v39 }
0x10e9   :  { %v6465_v29 = vpop.f32.mrf.mxu0 }
0x10ea   :  { %v2486_v40 = vadd.f32 %v7512_v4, %v6465_v29  ;;  %v2362_v45 = vadd.f32 %v2354_v28, %v2269_v42  ;;  %v6036_v47 = vmul.f32 -1.442695, %v2363_v5 }
0x10eb   :  { %v2480_v37 = vpop.f32.mrf.mxu0 }
0x10ec   :  { %v2481_v1 = vadd.f32 %v7512_v4, %v2480_v37  ;;  %2507 = vrot.lane.b32.xlu1 %v2486_v40, %s6970_s29  ;;  %v6035_v48 = vmul.f32 -1.442695, %v2362_v45  ;;  %6750 = vpow2.f32 %v6036_v47  ;;  %v2490_v51 = vadd.f32 %v2486_v40, %v285_v49 }
0x10ee   :  { %2505 = vrot.lane.b32.xlu0 %v2481_v1, %s6970_s29  ;;  %6752 = vpow2.f32 %v6035_v48  ;;  %v2489_v22 = vadd.f32 %v2481_v1, %v280_v50  ;;  %v6041_v53 = vmul.f32 -1.442695, %v2490_v51 }
0x10f0   :  { %v6040_v54 = vmul.f32 -1.442695, %v2489_v22  ;;  %6754 = vpow2.f32 %v6041_v53 }
0x10f2   :  { %6756 = vpow2.f32 %v6040_v54 }
0x10f9   :  { %v6751_v9 = vpop.eup %6750 }
0x10fa   :  { %v2371_v13 = vadd.f32 1.0, %v6751_v9 }
0x10fb   :  { %v6753_v56 = vpop.eup %6752 }
0x10fc   :  { %v2370_v58 = vadd.f32 1.0, %v6753_v56  ;;  %6758 = vrcp.f32 %v2371_v13 }
0x10fd   :  { %v6755_v60 = vpop.eup %6754 }
0x10fe   :  { %6760 = vrcp.f32 %v2370_v58  ;;  %v2498_v62 = vadd.f32 1.0, %v6755_v60 }
0x10ff   :  { %v6757_v61 = vpop.eup %6756 }
0x1100   :  { %v2497_v30 = vadd.f32 1.0, %v6757_v61  ;;  %6762 = vrcp.f32 %v2498_v62 }
0x1102   :  { %6764 = vrcp.f32 %v2497_v30 }
0x1109   :  { %v6759_v63 = vpop.eup %6758 }
0x110a   :  { %v2399_v28 = vsub.f32 1.0, %v6759_v63  ;;  %v2411_v36 = vmul.f32 %v6759_v63, %v7538_v8 }
0x110b   :  { %v6761_v2 = vpop.eup %6760 }
0x110c   :  { %v2398_v40 = vsub.f32 1.0, %v6761_v2 }
0x110d   :  { %v6763_v7 = vpop.eup %6762 }
0x110e   :  { %v2526_v45 = vsub.f32 1.0, %v6763_v7  ;;  %v2538_v8 = vmul.f32 %v6763_v7, %v7548_v23 }
0x110f   :  { %v6765_v55 = vpop.eup %6764 }
0x1152   :  { %v2381_v19 = vpop.permute.xlu1 %2380 }
0x1153   :  { %v2385_v31 = vmul.f32 %v6759_v63, %v2381_v19 }
0x1154   :  { %v2379_v3 = vpop.permute.xlu0 %2378 }
0x1155   :  { %v2384_v6 = vmul.f32 %v6761_v2, %v2379_v3  ;;  %2390 = vrot.lane.b32.xlu1 %v2385_v31, %s6971_s30 }
0x1157   :  { %2388 = vrot.lane.b32.xlu0 %v2384_v6, %s6971_s30 }
0x115e   :  { %v2508_v0 = vpop.permute.xlu1 %2507 }
0x115f   :  { %v2512_v12 = vmul.f32 %v6763_v7, %v2508_v0  ;;  %v295_v7 = vadd.f32 %v7523_v18, %v7428_v32 }
0x1160   :  { %v2506_v15 = vpop.permute.xlu0 %2505 }
0x1161   :  { %v2511_v44 = vmul.f32 %v6765_v55, %v2506_v15  ;;  %2517 = vrot.lane.b32.xlu1 %v2512_v12, %s6971_s30 }
0x1163   :  { %2515 = vrot.lane.b32.xlu0 %v2511_v44, %s6971_s30 }
0x11c7   :  { %v2391_v20 = vpop.permute.xlu1 %2390 }
0x11c8   :  { %v2395_v21 = vadd.f32 %v2391_v20, %v2274_v39  ;;  %v2410_v39 = vmul.f32 %v6761_v2, %v7541_v14  ;;  %v2537_v14 = vmul.f32 %v6765_v55, %v7551_v10 }
0x11c9   :  { %v2389_v35 = vpop.permute.xlu0 %2388 }
0x11ca   :  { %6766 = vtanh.f32 %v2395_v21  ;;  %v2394_v16 = vadd.f32 %v2389_v35, %v2269_v42 }
0x11cc   :  { %6768 = vtanh.f32 %v2394_v16 }
0x11d3   :  { %v2518_v24 = vpop.permute.xlu1 %2517 }
0x11d4   :  { %v2522_v46 = vadd.f32 %v2518_v24, %v285_v49  ;;  %v2525_v49 = vsub.f32 1.0, %v6765_v55 }
0x11d5   :  { %v2516_v25 = vpop.permute.xlu0 %2515 }
0x11d6   :  { %6770 = vtanh.f32 %v2522_v46  ;;  %v2521_v52 = vadd.f32 %v2516_v25, %v280_v50 }
0x11d7   :  { %v6767_v41 = vpop.eup %6766 }
0x11d8   :  { %6772 = vtanh.f32 %v2521_v52  ;;  %2404 = vrot.lane.b32.xlu1 %v6767_v41, %s6972_s20 }
0x11d9   :  { %v6769_v11 = vpop.eup %6768 }
0x11da   :  { %2402 = vrot.lane.b32.xlu0 %v6769_v11, %s6972_s20 }
0x11e3   :  { %v6771_v27 = vpop.eup %6770 }
0x11e4   :  { %2531 = vrot.lane.b32.xlu1 %v6771_v27, %s6972_s20 }
0x11e5   :  { %v6773_v43 = vpop.eup %6772 }
0x11e6   :  { %2529 = vrot.lane.b32.xlu0 %v6773_v43, %s6972_s20 }
0x124a   :  { %v2405_v34 = vpop.permute.xlu1 %2404 }
0x124b   :  { %v2409_v29 = vmul.f32 %v2405_v34, %v2399_v28 }
0x124c   :  { %v2403_v37 = vpop.permute.xlu0 %2402 }
0x124d   :  { %v7608_v1 = vadd.f32 %v2411_v36, %v2409_v29  ;;  %v2408_v42 = vmul.f32 %v2403_v37, %v2398_v40 }
0x124f   :  { %v7611_v5 = vadd.f32 %v2410_v39, %v2408_v42  ;;  %2630 = vrot.lane.b32.xlu1 %v7608_v1, %s6972_s20 }
0x1251   :  { %2628 = vrot.lane.b32.xlu0 %v7611_v5, %s6972_s20 }
0x1256   :  { %v2532_v47 = vpop.permute.xlu1 %2531 }
0x1257   :  { %v2536_v48 = vmul.f32 %v2532_v47, %v2526_v45 }
0x1258   :  { %v2530_v50 = vpop.permute.xlu0 %2529 }
0x1259   :  { %v7618_v51 = vadd.f32 %v2538_v8, %v2536_v48  ;;  %v2535_v22 = vmul.f32 %v2530_v50, %v2525_v49 }
0x125b   :  { %v7621_v53 = vadd.f32 %v2537_v14, %v2535_v22  ;;  %2545 = vrot.lane.b32.xlu1 %v7618_v51, %s6972_s20 }
0x125d   :  { %2543 = vrot.lane.b32.xlu0 %v7621_v53, %s6972_s20 }
0x12c1   :  { %v2631_v9 = vpop.permute.xlu1 %2630 }
0x12c3   :  { %v2629_v54 = vpop.permute.xlu0 %2628 }
0x12c4   :  { %6473 = vmatprep.mubr.msk.f32.mxu0 %vm304_vm2, %v2629_v54 }
0x12c5   :  { %6474 = vmatmul.mubr.msk.f32.vlgmr.msra.gmra.mxu0 %vm304_vm2, %v2631_v9 }
0x12c6   :  { %6482 = vmatpush3.msk.msra.mxu0 %vm308_vm0, %v7477_v17 }
0x12cd   :  { %v2546_v10 = vpop.permute.xlu1 %2545 }
0x12cf   :  { %v2544_v23 = vpop.permute.xlu0 %2543 }
0x12d0   :  { %6468 = vmatprep.mubr.msk.f32.mxu1 %vm304_vm2, %v2544_v23 }
0x12d1   :  { %6469 = vmatmul.mubr.msk.f32.vlgmr.msra.gmra.mxu1 %vm304_vm2, %v2546_v10 }
0x12d2   :  { %6478 = vmatprep.mubr.msk.f32.mxu1 %vm304_vm2, %v2544_v23  ;;  %6477 = vmatpush3.msk.msra.mxu1 %vm308_vm0, %v7484_v57 }
0x12d3   :  { %6486 = vmatprep.subr.msk.mxu1 %vm308_vm0, %v7496_v59 }
0x12d5   :  { %6479 = vmatmul.mubr.msk.f32.vlgmr.msra.gmra.mxu1 %vm304_vm2, %v2546_v10 }
0x12d6   :  { %6487 = vmatpush3.msk.msra.mxu1 %vm308_vm0, %v7496_v59 }
0x1385   :  { %v6475_v17 = vpop.f32.mrf.mxu0 }
0x1386   :  { %v2708_v56 = vadd.f32 %v7578_v26, %v6475_v17 }
0x1387   :  { %v2702_v13 = vpop.f32.mrf.mxu0 }
0x1388   :  { %v2703_v58 = vadd.f32 %v7578_v26, %v2702_v13  ;;  %2729 = vrot.lane.b32.xlu1 %v2708_v56, %s6970_s29 }
0x138a   :  { %2727 = vrot.lane.b32.xlu0 %v2703_v58, %s6970_s29 }
0x1391   :  { %v6470_v60 = vpop.f32.mrf.mxu1 }
0x1392   :  { %v2623_v59 = vadd.f32 %v7591_v38, %v6470_v60 }
0x1393   :  { %v2617_v57 = vpop.f32.mrf.mxu1 }
0x1394   :  { %v2618_v19 = vadd.f32 %v7591_v38, %v2617_v57  ;;  %v2712_v31 = vadd.f32 %v2708_v56, %v2623_v59 }
0x1395   :  { %v6480_v61 = vpop.f32.mrf.mxu1 }
0x1396   :  { %v2835_v62 = vadd.f32 %v7512_v4, %v6480_v61  ;;  %v2711_v2 = vadd.f32 %v2703_v58, %v2618_v19  ;;  %v6049_v3 = vmul.f32 -1.442695, %v2712_v31 }
0x1397   :  { %v2829_v30 = vpop.f32.mrf.mxu1 }
0x1398   :  { %v2830_v63 = vadd.f32 %v7512_v4, %v2829_v30  ;;  %2856 = vrot.lane.b32.xlu1 %v2835_v62, %s6970_s29  ;;  %v6048_v6 = vmul.f32 -1.442695, %v2711_v2  ;;  %6774 = vpow2.f32 %v6049_v3  ;;  %v290_v4 = vadd.f32 %v7523_v18, %v7430_v33 }
0x1399   :  { %v2839_v0 = vadd.f32 %v2835_v62, %v295_v7 }
0x139a   :  { %2854 = vrot.lane.b32.xlu0 %v2830_v63, %s6970_s29  ;;  %6776 = vpow2.f32 %v6048_v6  ;;  %v2838_v12 = vadd.f32 %v2830_v63, %v290_v4 }
0x139b   :  { %v6054_v55 = vmul.f32 -1.442695, %v2839_v0 }
0x139c   :  { %v6053_v44 = vmul.f32 -1.442695, %v2838_v12  ;;  %v7715_v12 = vld [vmem:[%s8362_s1 + $0x8] sm:$0xff] }
0x139d   :  { %6778 = vpow2.f32 %v6054_v55 }
0x139e   :  { %6780 = vpow2.f32 %v6053_v44 }
0x13a5   :  { %v6775_v15 = vpop.eup %6774 }
0x13a6   :  { %v2720_v21 = vadd.f32 1.0, %v6775_v15 }
0x13a7   :  { %v6777_v20 = vpop.eup %6776 }
0x13a8   :  { %v2719_v35 = vadd.f32 1.0, %v6777_v20  ;;  %6782 = vrcp.f32 %v2720_v21  ;;  %v7728_v21 = vld [vmem:[%s8363_s13] ss:$0 sm:$0xff] }
0x13aa   :  { %6784 = vrcp.f32 %v2719_v35  ;;  %v6779_v16 = vpop.eup %6778 }
0x13ab   :  { %v6781_v24 = vpop.eup %6780  ;;  %v2847_v46 = vadd.f32 1.0, %v6779_v16 }
0x13ac   :  { %v2846_v52 = vadd.f32 1.0, %v6781_v24 }
0x13ad   :  { %6786 = vrcp.f32 %v2847_v46 }
0x13ae   :  { %6788 = vrcp.f32 %v2846_v52 }
0x13b5   :  { %v6783_v25 = vpop.eup %6782 }
0x13b6   :  { %v2748_v54 = vsub.f32 1.0, %v6783_v25  ;;  %v2760_v23 = vmul.f32 %v6783_v25, %v7608_v1  ;;  %v7676_v1 = vld [vmem:[%s8360_s12] sm:$0x3f] }
0x13b7   :  { %v6785_v33 = vpop.eup %6784  ;;  %6496 = vmatprep.subr.msk.mxu1 %vm308_vm0, %v7676_v1 }
0x13b8   :  { %v2747_v17 = vsub.f32 1.0, %v6785_v33  ;;  %v2759_v58 = vmul.f32 %v6785_v33, %v7611_v5  ;;  %v7683_v5 = vld [vmem:[%s8361_s10] sm:$0x3f] }
0x13b9   :  { %6491 = vmatprep.subr.msk.mxu0 %vm308_vm0, %v7683_v5 }
0x13ba   :  { %v6787_v27 = vpop.eup %6786 }
0x13bb   :  { %v6789_v34 = vpop.eup %6788  ;;  %v2875_v61 = vsub.f32 1.0, %v6787_v27  ;;  %v2887_v30 = vmul.f32 %v6787_v27, %v7618_v51 }
0x13bc   :  { %v2886_v2 = vmul.f32 %v6789_v34, %v7621_v53  ;;  %v7704_v53 = vld [vmem:[%s8362_s1] sm:$0xff] }
0x13fa   :  { %v2730_v32 = vpop.permute.xlu1 %2729 }
0x13fb   :  { %v2734_v41 = vmul.f32 %v6783_v25, %v2730_v32 }
0x13fc   :  { %v2728_v18 = vpop.permute.xlu0 %2727 }
0x13fd   :  { %v2733_v11 = vmul.f32 %v6785_v33, %v2728_v18  ;;  %2739 = vrot.lane.b32.xlu1 %v2734_v41, %s6971_s30 }
0x13ff   :  { %2737 = vrot.lane.b32.xlu0 %v2733_v11, %s6971_s30 }
0x140a   :  { %v2857_v43 = vpop.permute.xlu1 %2856 }
0x140b   :  { %v2861_v28 = vmul.f32 %v6787_v27, %v2857_v43  ;;  %v7739_v43 = vld [vmem:[%s8364_s11] ss:$0 sm:$0xff] }
0x140c   :  { %v2855_v36 = vpop.permute.xlu0 %2854 }
0x140d   :  { %v2860_v29 = vmul.f32 %v6789_v34, %v2855_v36  ;;  %2866 = vrot.lane.b32.xlu1 %v2861_v28, %s6971_s30 }
0x140f   :  { %2864 = vrot.lane.b32.xlu0 %v2860_v29, %s6971_s30 }
0x146f   :  { %v2740_v40 = vpop.permute.xlu1 %2739 }
0x1470   :  { %v2744_v37 = vadd.f32 %v2740_v40, %v2623_v59  ;;  %v2874_v59 = vsub.f32 1.0, %v6789_v34 }
0x1471   :  { %v2738_v39 = vpop.permute.xlu0 %2737 }
0x1472   :  { %6790 = vtanh.f32 %v2744_v37  ;;  %v2743_v42 = vadd.f32 %v2738_v39, %v2618_v19 }
0x1474   :  { %6792 = vtanh.f32 %v2743_v42 }
0x147f   :  { %v6791_v45 = vpop.eup %6790  ;;  %v2867_v47 = vpop.permute.xlu1 %2866 }
0x1480   :  { %v2871_v8 = vadd.f32 %v2867_v47, %v295_v7  ;;  %2753 = vrot.lane.b32.xlu1 %v6791_v45, %s6972_s20 }
0x1481   :  { %v6793_v48 = vpop.eup %6792  ;;  %v2865_v49 = vpop.permute.xlu0 %2864 }
0x1482   :  { %6794 = vtanh.f32 %v2871_v8  ;;  %v2870_v50 = vadd.f32 %v2865_v49, %v290_v4  ;;  %2751 = vrot.lane.b32.xlu0 %v6793_v48, %s6972_s20 }
0x1484   :  { %6796 = vtanh.f32 %v2870_v50 }
0x148f   :  { %v6795_v14 = vpop.eup %6794 }
0x1490   :  { %2880 = vrot.lane.b32.xlu1 %v6795_v14, %s6972_s20 }
0x1491   :  { %v6797_v22 = vpop.eup %6796 }
0x1492   :  { %2878 = vrot.lane.b32.xlu0 %v6797_v22, %s6972_s20 }
0x14f2   :  { %v2754_v9 = vpop.permute.xlu1 %2753 }
0x14f3   :  { %v2758_v10 = vmul.f32 %v2754_v9, %v2748_v54 }
0x14f4   :  { %v2752_v56 = vpop.permute.xlu0 %2751 }
0x14f5   :  { %v7664_v13 = vadd.f32 %v2760_v23, %v2758_v10  ;;  %v2757_v60 = vmul.f32 %v2752_v56, %v2747_v17 }
0x14f7   :  { %v7667_v57 = vadd.f32 %v2759_v58, %v2757_v60  ;;  %2979 = vrot.lane.b32.xlu1 %v7664_v13, %s6972_s20 }
0x14f9   :  { %2977 = vrot.lane.b32.xlu0 %v7667_v57, %s6972_s20 }
0x1502   :  { %v2881_v62 = vpop.permute.xlu1 %2880 }
0x1503   :  { %v2885_v63 = vmul.f32 %v2881_v62, %v2875_v61 }
0x1504   :  { %v2879_v19 = vpop.permute.xlu0 %2878 }
0x1505   :  { %v7688_v31 = vadd.f32 %v2887_v30, %v2885_v63  ;;  %v2884_v3 = vmul.f32 %v2879_v19, %v2874_v59 }
0x1507   :  { %v7691_v6 = vadd.f32 %v2886_v2, %v2884_v3  ;;  %2894 = vrot.lane.b32.xlu1 %v7688_v31, %s6972_s20 }
0x1509   :  { %2892 = vrot.lane.b32.xlu0 %v7691_v6, %s6972_s20 }
0x1569   :  { %v2980_v4 = vpop.permute.xlu1 %2979 }
0x156b   :  { %v2978_v7 = vpop.permute.xlu0 %2977 }
0x156c   :  { %6488 = vmatprep.mubr.msk.f32.mxu1 %vm304_vm2, %v2978_v7 }
0x156d   :  { %6489 = vmatmul.mubr.msk.f32.vlgmr.msra.gmra.mxu1 %vm304_vm2, %v2980_v4 }
0x156e   :  { %6497 = vmatpush3.msk.msra.mxu1 %vm308_vm0, %v7676_v1 }
0x1579   :  { %v2895_v0 = vpop.permute.xlu1 %2894 }
0x157b   :  { %v2893_v51 = vpop.permute.xlu0 %2892 }
0x157c   :  { %6483 = vmatprep.mubr.msk.f32.mxu0 %vm304_vm2, %v2893_v51  ;;  %6498 = vmatprep.mubr.msk.f32.mxu1 %vm304_vm2, %v2893_v51 }
0x157d   :  { %6484 = vmatmul.mubr.msk.f32.vlgmr.msra.gmra.mxu0 %vm304_vm2, %v2895_v0  ;;  %6499 = vmatmul.mubr.msk.f32.vlgmr.msra.gmra.mxu1 %vm304_vm2, %v2895_v0 }
0x157e   :  { %6492 = vmatpush3.msk.msra.mxu0 %vm308_vm0, %v7683_v5  ;;  %6493 = vmatprep.mubr.msk.f32.mxu0 %vm304_vm2, %v7704_v53 }
0x1581   :  { %6494 = vmatmul.mubr.msk.f32.vlgmr.msra.gmra.mxu0 %vm304_vm2, %v7715_v12 }
0x162d   :  { %v6490_v55 = vpop.f32.mrf.mxu1 }
0x162e   :  { %v3057_v15 = vadd.f32 %v7578_v26, %v6490_v55  ;;  %v7752_v55 = vld [vmem:[%s8365_s16] sm:$0x3f] }
0x162f   :  { %v3051_v44 = vpop.f32.mrf.mxu1  ;;  %6506 = vmatprep.subr.msk.mxu1 %vm308_vm0, %v7752_v55 }
0x1630   :  { %v3052_v20 = vadd.f32 %v7578_v26, %v3051_v44  ;;  %3078 = vrot.lane.b32.xlu1 %v3057_v15, %s6970_s29  ;;  %6507 = vmatpush3.msk.msra.mxu1 %vm308_vm0, %v7752_v55 }
0x1631   :  { %6516 = vmatprep.subr.msk.mxu1 %vm308_vm0, %v7676_v1 }
0x1632   :  { %3076 = vrot.lane.b32.xlu0 %v3052_v20, %s6970_s29 }
0x163d   :  { %v6500_v35 = vpop.f32.mrf.mxu1  ;;  %v6485_v26 = vpop.f32.mrf.mxu0 }
0x163e   :  { %v3285_v16 = vadd.f32 %v6500_v35, %v7728_v21  ;;  %v2972_v32 = vadd.f32 %v7591_v38, %v6485_v26 }
0x163f   :  { %v3279_v24 = vpop.f32.mrf.mxu1  ;;  %v2966_v25 = vpop.f32.mrf.mxu0 }
0x1640   :  { %v3280_v46 = vadd.f32 %v7728_v21, %v3279_v24  ;;  %3306 = vrot.lane.b32.xlu1 %v3285_v16, %s6970_s29  ;;  %v2967_v52 = vadd.f32 %v7591_v38, %v2966_v25  ;;  %v3061_v41 = vadd.f32 %v3057_v15, %v2972_v32 }
0x1641   :  { %v6495_v27 = vpop.f32.mrf.mxu0 }
0x1642   :  { %3304 = vrot.lane.b32.xlu0 %v3280_v46, %s6970_s29  ;;  %v3060_v33 = vadd.f32 %v3052_v20, %v2967_v52  ;;  %v6062_v18 = vmul.f32 -1.442695, %v3061_v41  ;;  %v3201_v34 = vadd.f32 %v6495_v27, %v7739_v43 }
0x1643   :  { %v3195_v28 = vpop.f32.mrf.mxu0 }
0x1644   :  { %v6061_v11 = vmul.f32 -1.442695, %v3060_v33  ;;  %6798 = vpow2.f32 %v6062_v18  ;;  %v3196_v36 = vadd.f32 %v7739_v43, %v3195_v28  ;;  %v3289_v29 = vadd.f32 %v3285_v16, %v3201_v34 }
0x1646   :  { %6800 = vpow2.f32 %v6061_v11  ;;  %v3288_v40 = vadd.f32 %v3280_v46, %v3196_v36  ;;  %v6072_v38 = vmul.f32 -1.442695, %v3289_v29 }
0x1648   :  { %v6071_v39 = vmul.f32 -1.442695, %v3288_v40  ;;  %6802 = vpow2.f32 %v6072_v38 }
0x164a   :  { %6804 = vpow2.f32 %v6071_v39  ;;  %v7814_v39 = vld [vmem:[%s8367_s17] ss:$0 sm:$0xff] }
0x1651   :  { %v6799_v37 = vpop.eup %6798 }
0x1652   :  { %v3069_v45 = vadd.f32 1.0, %v6799_v37 }
0x1653   :  { %v6801_v42 = vpop.eup %6800 }
0x1654   :  { %v3068_v47 = vadd.f32 1.0, %v6801_v42  ;;  %6806 = vrcp.f32 %v3069_v45 }
0x1655   :  { %v6803_v8 = vpop.eup %6802 }
0x1656   :  { %6808 = vrcp.f32 %v3068_v47  ;;  %v3297_v49 = vadd.f32 1.0, %v6803_v8 }
0x1657   :  { %v6805_v48 = vpop.eup %6804 }
0x1658   :  { %v3296_v22 = vadd.f32 1.0, %v6805_v48  ;;  %6810 = vrcp.f32 %v3297_v49  ;;  %v7823_v49 = vld [vmem:[%s8368_s15] ss:$0 sm:$0xff] }
0x165a   :  { %6812 = vrcp.f32 %v3296_v22 }
0x1661   :  { %v6807_v50 = vpop.eup %6806 }
0x1662   :  { %v3097_v20 = vsub.f32 1.0, %v6807_v50  ;;  %v3109_v16 = vmul.f32 %v6807_v50, %v7664_v13  ;;  %v7775_v13 = vld [vmem:[%s8366_s14] sm:$0x3f] }
0x1663   :  { %v6809_v9 = vpop.eup %6808  ;;  %6501 = vmatprep.subr.msk.mxu0 %vm308_vm0, %v7775_v13 }
0x1664   :  { %v3096_v46 = vsub.f32 1.0, %v6809_v9  ;;  %6502 = vmatpush3.msk.msra.mxu0 %vm308_vm0, %v7775_v13 }
0x1665   :  { %v6811_v17 = vpop.eup %6810  ;;  %6511 = vmatprep.subr.msk.mxu0 %vm308_vm0, %v7683_v5 }
0x1666   :  { %v3337_v18 = vmul.f32 %v6811_v17, %v7688_v31 }
0x1667   :  { %v6813_v60 = vpop.eup %6812 }
0x1668   :  { %v3324_v27 = vsub.f32 1.0, %v6813_v60 }
0x16a2   :  { %v3079_v14 = vpop.permute.xlu1 %3078 }
0x16a3   :  { %v3083_v54 = vmul.f32 %v6807_v50, %v3079_v14 }
0x16a4   :  { %v3077_v23 = vpop.permute.xlu0 %3076 }
0x16a5   :  { %v3082_v10 = vmul.f32 %v6809_v9, %v3077_v23  ;;  %3088 = vrot.lane.b32.xlu1 %v3083_v54, %s6971_s30 }
0x16a7   :  { %3086 = vrot.lane.b32.xlu0 %v3082_v10, %s6971_s30 }
0x16b2   :  { %v3307_v56 = vpop.permute.xlu1 %3306 }
0x16b3   :  { %v3311_v58 = vmul.f32 %v6811_v17, %v3307_v56 }
0x16b4   :  { %v3305_v61 = vpop.permute.xlu0 %3304 }
0x16b5   :  { %v3310_v62 = vmul.f32 %v6813_v60, %v3305_v61  ;;  %3316 = vrot.lane.b32.xlu1 %v3311_v58, %s6971_s30 }
0x16b7   :  { %3314 = vrot.lane.b32.xlu0 %v3310_v62, %s6971_s30 }
0x1717   :  { %v3089_v30 = vpop.permute.xlu1 %3088 }
0x1718   :  { %v3093_v63 = vadd.f32 %v3089_v30, %v2972_v32  ;;  %v3108_v32 = vmul.f32 %v6809_v9, %v7667_v57  ;;  %v3325_v57 = vsub.f32 1.0, %v6811_v17 }
0x1719   :  { %v3087_v59 = vpop.permute.xlu0 %3086 }
0x171a   :  { %6814 = vtanh.f32 %v3093_v63  ;;  %v3092_v19 = vadd.f32 %v3087_v59, %v2967_v52 }
0x171c   :  { %6816 = vtanh.f32 %v3092_v19 }
0x1727   :  { %v6815_v2 = vpop.eup %6814  ;;  %v3317_v3 = vpop.permute.xlu1 %3316 }
0x1728   :  { %v3321_v7 = vadd.f32 %v3317_v3, %v3201_v34  ;;  %3102 = vrot.lane.b32.xlu1 %v6815_v2, %s6972_s20 }
0x1729   :  { %v6817_v4 = vpop.eup %6816  ;;  %v3315_v51 = vpop.permute.xlu0 %3314 }
0x172a   :  { %6818 = vtanh.f32 %v3321_v7  ;;  %v3320_v0 = vadd.f32 %v3315_v51, %v3196_v36  ;;  %3100 = vrot.lane.b32.xlu0 %v6817_v4, %s6972_s20  ;;  %v3336_v36 = vmul.f32 %v6813_v60, %v7691_v6 }
0x172c   :  { %6820 = vtanh.f32 %v3320_v0 }
0x1737   :  { %v6819_v15 = vpop.eup %6818 }
0x1738   :  { %3330 = vrot.lane.b32.xlu1 %v6819_v15, %s6972_s20 }
0x1739   :  { %v6821_v44 = vpop.eup %6820 }
0x173a   :  { %3328 = vrot.lane.b32.xlu0 %v6821_v44, %s6972_s20 }
0x179a   :  { %v3103_v35 = vpop.permute.xlu1 %3102 }
0x179b   :  { %v3107_v24 = vmul.f32 %v3103_v35, %v3097_v20 }
0x179c   :  { %v3101_v26 = vpop.permute.xlu0 %3100 }
0x179d   :  { %v7763_v25 = vadd.f32 %v3109_v16, %v3107_v24  ;;  %v3106_v52 = vmul.f32 %v3101_v26, %v3096_v46 }
0x179f   :  { %v7766_v41 = vadd.f32 %v3108_v32, %v3106_v52  ;;  %3444 = vrot.lane.b32.xlu1 %v7763_v25, %s6972_s20 }
0x17a1   :  { %3442 = vrot.lane.b32.xlu0 %v7766_v41, %s6972_s20 }
0x17aa   :  { %v3331_v33 = vpop.permute.xlu1 %3330 }
0x17ab   :  { %v3335_v11 = vmul.f32 %v3331_v33, %v3325_v57 }
0x17ac   :  { %v3329_v28 = vpop.permute.xlu0 %3328 }
0x17ad   :  { %v7784_v34 = vadd.f32 %v3337_v18, %v3335_v11  ;;  %v3334_v29 = vmul.f32 %v3329_v28, %v3324_v27 }
0x17af   :  { %v7787_v40 = vadd.f32 %v3336_v36, %v3334_v29  ;;  %3350 = vrot.lane.b32.xlu1 %v7784_v34, %s6972_s20 }
0x17b1   :  { %3348 = vrot.lane.b32.xlu0 %v7787_v40, %s6972_s20 }
0x1811   :  { %v3445_v37 = vpop.permute.xlu1 %3444 }
0x1813   :  { %v3443_v38 = vpop.permute.xlu0 %3442 }
0x1814   :  { %6508 = vmatprep.mubr.msk.f32.mxu1 %vm304_vm2, %v3443_v38 }
0x1815   :  { %6509 = vmatmul.mubr.msk.f32.vlgmr.msra.gmra.mxu1 %vm304_vm2, %v3445_v37 }
0x1816   :  { %6517 = vmatpush3.msk.msra.mxu1 %vm308_vm0, %v7676_v1 }
0x1817   :  { %6526 = vmatprep.subr.msk.mxu1 %vm308_vm0, %v7752_v55 }
0x1821   :  { %v3351_v6 = vpop.permute.xlu1 %3350 }
0x1823   :  { %v3349_v31 = vpop.permute.xlu0 %3348 }
0x1824   :  { %6503 = vmatprep.mubr.msk.f32.mxu0 %vm304_vm2, %v3349_v31  ;;  %6518 = vmatprep.mubr.msk.f32.mxu1 %vm304_vm2, %v3349_v31 }
0x1825   :  { %6504 = vmatmul.mubr.msk.f32.vlgmr.msra.gmra.mxu0 %vm304_vm2, %v3351_v6  ;;  %6519 = vmatmul.mubr.msk.f32.vlgmr.msra.gmra.mxu1 %vm304_vm2, %v3351_v6 }
0x1826   :  { %6512 = vmatpush3.msk.msra.mxu0 %vm308_vm0, %v7683_v5  ;;  %6527 = vmatpush3.msk.msra.mxu1 %vm308_vm0, %v7752_v55 }
0x1827   :  { %6521 = vmatprep.subr.msk.mxu0 %vm308_vm0, %v7775_v13  ;;  %6536 = vmatprep.subr.msk.mxu1 %vm308_vm0, %v7676_v1 }
0x18d5   :  { %v6510_v42 = vpop.f32.mrf.mxu1 }
0x18d6   :  { %v3525_v45 = vadd.f32 %v6510_v42, %v7814_v39 }
0x18d7   :  { %v3519_v47 = vpop.f32.mrf.mxu1 }
0x18d8   :  { %v3520_v8 = vadd.f32 %v7814_v39, %v3519_v47  ;;  %3546 = vrot.lane.b32.xlu1 %v3525_v45, %s6970_s29 }
0x18da   :  { %3544 = vrot.lane.b32.xlu0 %v3520_v8, %s6970_s29 }
0x18e5   :  { %v6505_v48 = vpop.f32.mrf.mxu0  ;;  %v6520_v52 = vpop.f32.mrf.mxu1 }
0x18e6   :  { %v3431_v14 = vadd.f32 %v6505_v48, %v7823_v49  ;;  %v3774_v11 = vadd.f32 %v6520_v52, %v7728_v21 }
0x18e7   :  { %v3425_v50 = vpop.f32.mrf.mxu0 }
0x18e8   :  { %v3426_v22 = vadd.f32 %v7823_v49, %v3425_v50  ;;  %v3529_v54 = vadd.f32 %v3525_v45, %v3431_v14 }
0x18ea   :  { %v3528_v9 = vadd.f32 %v3520_v8, %v3426_v22  ;;  %v6082_v23 = vmul.f32 -1.442695, %v3529_v54 }
0x18ec   :  { %v6081_v10 = vmul.f32 -1.442695, %v3528_v9  ;;  %6822 = vpow2.f32 %v6082_v23 }
0x18ee   :  { %6824 = vpow2.f32 %v6081_v10 }
0x18f9   :  { %v6823_v17 = vpop.eup %6822 }
0x18fa   :  { %v3537_v58 = vadd.f32 1.0, %v6823_v17 }
0x18fb   :  { %v6825_v56 = vpop.eup %6824 }
0x18fc   :  { %v3536_v60 = vadd.f32 1.0, %v6825_v56  ;;  %6826 = vrcp.f32 %v3537_v58 }
0x18fe   :  { %6828 = vrcp.f32 %v3536_v60 }
0x1909   :  { %v6827_v61 = vpop.eup %6826 }
0x190a   :  { %v3565_v15 = vsub.f32 1.0, %v6827_v61  ;;  %v3577_v20 = vmul.f32 %v6827_v61, %v7763_v25  ;;  %v3768_v25 = vpop.f32.mrf.mxu1 }
0x190b   :  { %v6829_v63 = vpop.eup %6828 }
0x190c   :  { %v3564_v16 = vsub.f32 1.0, %v6829_v63  ;;  %v3576_v26 = vmul.f32 %v6829_v63, %v7766_v41  ;;  %v3769_v41 = vadd.f32 %v7728_v21, %v3768_v25 }
0x194a   :  { %v3547_v62 = vpop.permute.xlu1 %3546 }
0x194b   :  { %v3551_v30 = vmul.f32 %v6827_v61, %v3547_v62 }
0x194c   :  { %v3545_v59 = vpop.permute.xlu0 %3544 }
0x194d   :  { %v3550_v19 = vmul.f32 %v6829_v63, %v3545_v59  ;;  %3556 = vrot.lane.b32.xlu1 %v3551_v30, %s6971_s30 }
0x194f   :  { %3554 = vrot.lane.b32.xlu0 %v3550_v19, %s6971_s30 }
0x19bf   :  { %v3557_v2 = vpop.permute.xlu1 %3556 }
0x19c0   :  { %v3561_v3 = vadd.f32 %v3557_v2, %v3431_v14 }
0x19c1   :  { %v3555_v7 = vpop.permute.xlu0 %3554 }
0x19c2   :  { %6830 = vtanh.f32 %v3561_v3  ;;  %v3560_v4 = vadd.f32 %v3555_v7, %v3426_v22 }
0x19c4   :  { %6832 = vtanh.f32 %v3560_v4 }
0x19cf   :  { %v6831_v51 = vpop.eup %6830 }
0x19d0   :  { %3570 = vrot.lane.b32.xlu1 %v6831_v51, %s6972_s20 }
0x19d1   :  { %v6833_v0 = vpop.eup %6832 }
0x19d2   :  { %3568 = vrot.lane.b32.xlu0 %v6833_v0, %s6972_s20 }
0x19d4   :  { %3582 = vrot.lane.b32.xlu1 %v7715_v12, %s6973_s22 }
0x19d6   :  { %3580 = vrot.lane.b32.xlu0 %v7704_v53, %s6973_s22 }
0x1a42   :  { %v3571_v44 = vpop.permute.xlu1 %3570 }
0x1a43   :  { %v3575_v35 = vmul.f32 %v3571_v44, %v3565_v15 }
0x1a44   :  { %v3569_v24 = vpop.permute.xlu0 %3568 }
0x1a45   :  { %v7834_v46 = vadd.f32 %v3577_v20, %v3575_v35  ;;  %v3574_v32 = vmul.f32 %v3569_v24, %v3564_v16 }
0x1a46   :  { %v3583_v57 = vpop.permute.xlu1 %3582 }
0x1a47   :  { %v7837_v33 = vadd.f32 %v3576_v26, %v3574_v32  ;;  %v7840_v12 = vadd.f32 %v3583_v57, %v7834_v46 }
0x1a48   :  { %v3581_v53 = vpop.permute.xlu0 %3580 }
0x1a49   :  { %v7843_v18 = vadd.f32 %v3581_v53, %v7837_v33  ;;  %3621 = vrot.lane.b32.xlu1 %v7840_v12, %s6972_s20 }
0x1a4b   :  { %3619 = vrot.lane.b32.xlu0 %v7843_v18, %s6972_s20 }
0x1a4d   :  { %3795 = vrot.lane.b32.xlu1 %v3774_v11, %s6970_s29 }
0x1a4f   :  { %3793 = vrot.lane.b32.xlu0 %v3769_v41, %s6970_s29 }
0x1abb   :  { %v3622_v28 = vpop.permute.xlu1 %3621 }
0x1abd   :  { %v3620_v27 = vpop.permute.xlu0 %3619 }
0x1abe   :  { %6513 = vmatprep.mubr.msk.f32.mxu0 %vm304_vm2, %v3620_v27 }
0x1abf   :  { %6514 = vmatmul.mubr.msk.f32.vlgmr.msra.gmra.mxu0 %vm304_vm2, %v3622_v28  ;;  %v3796_v22 = vpop.permute.xlu1 %3795 }
0x1ac0   :  { %6522 = vmatpush3.msk.msra.mxu0 %vm308_vm0, %v7775_v13 }
0x1ac1   :  { %6531 = vmatprep.subr.msk.mxu0 %vm308_vm0, %v7683_v5  ;;  %v3794_v23 = vpop.permute.xlu0 %3793 }
0x1b7f   :  { %v6515_v36 = vpop.f32.mrf.mxu0 }
0x1b80   :  { %v3699_v29 = vadd.f32 %v6515_v36, %v7739_v43 }
0x1b81   :  { %v3693_v38 = vpop.f32.mrf.mxu0 }
0x1b82   :  { %v3778_v37 = vadd.f32 %v3774_v11, %v3699_v29  ;;  %v3694_v31 = vadd.f32 %v7739_v43, %v3693_v38 }
0x1b84   :  { %v6090_v6 = vmul.f32 -1.442695, %v3778_v37  ;;  %v3777_v42 = vadd.f32 %v3769_v41, %v3694_v31 }
0x1b86   :  { %6834 = vpow2.f32 %v6090_v6  ;;  %v6089_v45 = vmul.f32 -1.442695, %v3777_v42 }
0x1b88   :  { %6836 = vpow2.f32 %v6089_v45 }
0x1b93   :  { %v6835_v47 = vpop.eup %6834 }
0x1b94   :  { %v3786_v8 = vadd.f32 1.0, %v6835_v47 }
0x1b95   :  { %v6837_v48 = vpop.eup %6836 }
0x1b96   :  { %6838 = vrcp.f32 %v3786_v8  ;;  %v3785_v50 = vadd.f32 1.0, %v6837_v48 }
0x1b98   :  { %6840 = vrcp.f32 %v3785_v50 }
0x1ba3   :  { %v6839_v14 = vpop.eup %6838 }
0x1ba4   :  { %v3800_v54 = vmul.f32 %v6839_v14, %v3796_v22  ;;  %v3814_v30 = vsub.f32 1.0, %v6839_v14  ;;  %v3826_v59 = vmul.f32 %v6839_v14, %v7784_v34 }
0x1ba5   :  { %v6841_v9 = vpop.eup %6840 }
0x1ba6   :  { %3805 = vrot.lane.b32.xlu1 %v3800_v54, %s6971_s30  ;;  %v3799_v10 = vmul.f32 %v6841_v9, %v3794_v23  ;;  %v3813_v2 = vsub.f32 1.0, %v6841_v9  ;;  %v3825_v4 = vmul.f32 %v6841_v9, %v7787_v40 }
0x1ba8   :  { %3803 = vrot.lane.b32.xlu0 %v3799_v10, %s6971_s30 }
0x1c18   :  { %v3806_v17 = vpop.permute.xlu1 %3805 }
0x1c19   :  { %v3810_v56 = vadd.f32 %v3806_v17, %v3699_v29 }
0x1c1a   :  { %v3804_v58 = vpop.permute.xlu0 %3803 }
0x1c1b   :  { %6842 = vtanh.f32 %v3810_v56  ;;  %v3809_v60 = vadd.f32 %v3804_v58, %v3694_v31 }
0x1c1d   :  { %6844 = vtanh.f32 %v3809_v60 }
0x1c28   :  { %v6843_v61 = vpop.eup %6842 }
0x1c29   :  { %3819 = vrot.lane.b32.xlu1 %v6843_v61, %s6972_s20 }
0x1c2a   :  { %v6845_v62 = vpop.eup %6844 }
0x1c2b   :  { %3817 = vrot.lane.b32.xlu0 %v6845_v62, %s6972_s20 }
0x1c2d   :  { %3918 = vrot.lane.b32.xlu1 %v7834_v46, %s6972_s20 }
0x1c2f   :  { %3916 = vrot.lane.b32.xlu0 %v7837_v33, %s6972_s20 }
0x1c9b   :  { %v3820_v63 = vpop.permute.xlu1 %3819 }
0x1c9c   :  { %v3824_v19 = vmul.f32 %v3820_v63, %v3814_v30 }
0x1c9d   :  { %v3818_v3 = vpop.permute.xlu0 %3817 }
0x1c9e   :  { %v7870_v7 = vadd.f32 %v3826_v59, %v3824_v19  ;;  %v3823_v51 = vmul.f32 %v3818_v3, %v3813_v2 }
0x1c9f   :  { %v3919_v44 = vpop.permute.xlu1 %3918 }
0x1ca0   :  { %v7873_v0 = vadd.f32 %v3825_v4, %v3823_v51  ;;  %3833 = vrot.lane.b32.xlu1 %v7870_v7, %s6972_s20 }
0x1ca1   :  { %v3917_v15 = vpop.permute.xlu0 %3916 }
0x1ca2   :  { %3831 = vrot.lane.b32.xlu0 %v7873_v0, %s6972_s20  ;;  %6528 = vmatprep.mubr.msk.f32.mxu1 %vm304_vm2, %v3917_v15 }
0x1ca3   :  { %6529 = vmatmul.mubr.msk.f32.vlgmr.msra.gmra.mxu1 %vm304_vm2, %v3919_v44 }
0x1ca4   :  { %6537 = vmatpush3.msk.msra.mxu1 %vm308_vm0, %v7676_v1 }
0x1ca5   :  { %6546 = vmatprep.subr.msk.mxu1 %vm308_vm0, %v7752_v55 }
0x1d12   :  { %v3834_v40 = vpop.permute.xlu1 %3833 }
0x1d14   :  { %v3832_v34 = vpop.permute.xlu0 %3831 }
0x1d15   :  { %6523 = vmatprep.mubr.msk.f32.mxu0 %vm304_vm2, %v3832_v34  ;;  %6538 = vmatprep.mubr.msk.f32.mxu1 %vm304_vm2, %v3832_v34 }
0x1d16   :  { %6524 = vmatmul.mubr.msk.f32.vlgmr.msra.gmra.mxu0 %vm304_vm2, %v3834_v40  ;;  %6539 = vmatmul.mubr.msk.f32.vlgmr.msra.gmra.mxu1 %vm304_vm2, %v3834_v40 }
0x1d17   :  { %6532 = vmatpush3.msk.msra.mxu0 %vm308_vm0, %v7683_v5  ;;  %6547 = vmatpush3.msk.msra.mxu1 %vm308_vm0, %v7752_v55 }
0x1d18   :  { %6541 = vmatprep.subr.msk.mxu0 %vm308_vm0, %v7775_v13  ;;  %6556 = vmatprep.subr.msk.mxu1 %vm308_vm0, %v7676_v1 }
0x1d63   :  { %v6530_v20 = vpop.f32.mrf.mxu1 }
0x1d64   :  { %v3996_v35 = vadd.f32 %v6530_v20, %v7814_v39 }
0x1d65   :  { %v3990_v16 = vpop.f32.mrf.mxu1 }
0x1d66   :  { %v3991_v24 = vadd.f32 %v7814_v39, %v3990_v16  ;;  %4017 = vrot.lane.b32.xlu1 %v3996_v35, %s6970_s29 }
0x1d68   :  { %4015 = vrot.lane.b32.xlu0 %v3991_v24, %s6970_s29 }
0x1dd6   :  { %v6525_v26 = vpop.f32.mrf.mxu0  ;;  %v6540_v62 = vpop.f32.mrf.mxu1 }
0x1dd7   :  { %v3911_v32 = vadd.f32 %v6525_v26, %v7823_v49  ;;  %v4238_v19 = vadd.f32 %v6540_v62, %v7728_v21 }
0x1dd8   :  { %v3905_v52 = vpop.f32.mrf.mxu0  ;;  %v4018_v37 = vpop.permute.xlu1 %4017 }
0x1dd9   :  { %v4000_v57 = vadd.f32 %v3996_v35, %v3911_v32  ;;  %v3906_v53 = vadd.f32 %v7823_v49, %v3905_v52 }
0x1dda   :  { %v4016_v42 = vpop.permute.xlu0 %4015 }
0x1ddb   :  { %v6098_v25 = vmul.f32 -1.442695, %v4000_v57  ;;  %v3999_v11 = vadd.f32 %v3991_v24, %v3906_v53 }
0x1ddd   :  { %6846 = vpow2.f32 %v6098_v25  ;;  %v6097_v41 = vmul.f32 -1.442695, %v3999_v11 }
0x1ddf   :  { %6848 = vpow2.f32 %v6097_v41 }
0x1dea   :  { %v6847_v27 = vpop.eup %6846 }
0x1deb   :  { %v4008_v28 = vadd.f32 1.0, %v6847_v27 }
0x1dec   :  { %v6849_v36 = vpop.eup %6848 }
0x1ded   :  { %6850 = vrcp.f32 %v4008_v28  ;;  %v4007_v29 = vadd.f32 1.0, %v6849_v36 }
0x1def   :  { %6852 = vrcp.f32 %v4007_v29 }
0x1dfa   :  { %v6851_v38 = vpop.eup %6850 }
0x1dfb   :  { %v4022_v31 = vmul.f32 %v6851_v38, %v4018_v37  ;;  %v4036_v54 = vsub.f32 1.0, %v6851_v38  ;;  %v4048_v23 = vmul.f32 %v6851_v38, %v7834_v46  ;;  %v4232_v46 = vpop.f32.mrf.mxu1 }
0x1dfc   :  { %v6853_v6 = vpop.eup %6852 }
0x1dfd   :  { %v4021_v45 = vmul.f32 %v6853_v6, %v4016_v42  ;;  %4027 = vrot.lane.b32.xlu1 %v4022_v31, %s6971_s30  ;;  %v4035_v17 = vsub.f32 1.0, %v6853_v6  ;;  %v4047_v60 = vmul.f32 %v6853_v6, %v7837_v33  ;;  %v4233_v33 = vadd.f32 %v7728_v21, %v4232_v46 }
0x1dff   :  { %4025 = vrot.lane.b32.xlu0 %v4021_v45, %s6971_s30 }
0x1e6f   :  { %v4028_v47 = vpop.permute.xlu1 %4027 }
0x1e70   :  { %v4032_v8 = vadd.f32 %v4028_v47, %v3911_v32 }
0x1e71   :  { %v4026_v48 = vpop.permute.xlu0 %4025 }
0x1e72   :  { %6854 = vtanh.f32 %v4032_v8  ;;  %v4031_v50 = vadd.f32 %v4026_v48, %v3906_v53 }
0x1e74   :  { %6856 = vtanh.f32 %v4031_v50 }
0x1e7f   :  { %v6855_v14 = vpop.eup %6854 }
0x1e80   :  { %4041 = vrot.lane.b32.xlu1 %v6855_v14, %s6972_s20 }
0x1e81   :  { %v6857_v22 = vpop.eup %6856 }
0x1e82   :  { %4039 = vrot.lane.b32.xlu0 %v6857_v22, %s6972_s20 }
0x1ef2   :  { %v4042_v9 = vpop.permute.xlu1 %4041 }
0x1ef3   :  { %v4046_v10 = vmul.f32 %v4042_v9, %v4036_v54 }
0x1ef4   :  { %v4040_v56 = vpop.permute.xlu0 %4039 }
0x1ef5   :  { %v7908_v58 = vadd.f32 %v4048_v23, %v4046_v10  ;;  %v4045_v61 = vmul.f32 %v4040_v56, %v4035_v17 }
0x1ef7   :  { %v7913_v30 = vadd.f32 %v7908_v58, %v7840_v12  ;;  %v7915_v63 = vadd.f32 %v4047_v60, %v4045_v61 }
0x1ef9   :  { %v7919_v59 = vadd.f32 %v7915_v63, %v7843_v18  ;;  %4085 = vrot.lane.b32.xlu1 %v7913_v30, %s6972_s20 }
0x1efb   :  { %4083 = vrot.lane.b32.xlu0 %v7919_v59, %s6972_s20 }
0x1efd   :  { %4259 = vrot.lane.b32.xlu1 %v4238_v19, %s6970_s29 }
0x1eff   :  { %4257 = vrot.lane.b32.xlu0 %v4233_v33, %s6970_s29 }
0x1f6b   :  { %v4086_v3 = vpop.permute.xlu1 %4085 }
0x1f6d   :  { %v4084_v2 = vpop.permute.xlu0 %4083 }
0x1f6e   :  { %6533 = vmatprep.mubr.msk.f32.mxu0 %vm304_vm2, %v4084_v2 }
0x1f6f   :  { %6534 = vmatmul.mubr.msk.f32.vlgmr.msra.gmra.mxu0 %vm304_vm2, %v4086_v3  ;;  %v4260_v57 = vpop.permute.xlu1 %4259 }
0x1f70   :  { %6542 = vmatpush3.msk.msra.mxu0 %vm308_vm0, %v7775_v13 }
0x1f71   :  { %6551 = vmatprep.subr.msk.mxu0 %vm308_vm0, %v7683_v5  ;;  %v4258_v11 = vpop.permute.xlu0 %4257 }
0x202f   :  { %v6535_v4 = vpop.f32.mrf.mxu0 }
0x2030   :  { %v4163_v51 = vadd.f32 %v6535_v4, %v7739_v43 }
0x2031   :  { %v4157_v15 = vpop.f32.mrf.mxu0 }
0x2032   :  { %v4242_v44 = vadd.f32 %v4238_v19, %v4163_v51  ;;  %v4158_v34 = vadd.f32 %v7739_v43, %v4157_v15 }
0x2034   :  { %v6106_v40 = vmul.f32 -1.442695, %v4242_v44  ;;  %v4241_v20 = vadd.f32 %v4233_v33, %v4158_v34 }
0x2036   :  { %6858 = vpow2.f32 %v6106_v40  ;;  %v6105_v35 = vmul.f32 -1.442695, %v4241_v20 }
0x2038   :  { %6860 = vpow2.f32 %v6105_v35 }
0x2043   :  { %v6859_v16 = vpop.eup %6858 }
0x2044   :  { %v4250_v24 = vadd.f32 1.0, %v6859_v16 }
0x2045   :  { %v6861_v26 = vpop.eup %6860 }
0x2046   :  { %6862 = vrcp.f32 %v4250_v24  ;;  %v4249_v32 = vadd.f32 1.0, %v6861_v26 }
0x2048   :  { %6864 = vrcp.f32 %v4249_v32 }
0x2053   :  { %v6863_v52 = vpop.eup %6862 }
0x2054   :  { %v4264_v53 = vmul.f32 %v6863_v52, %v4260_v57  ;;  %v4278_v31 = vsub.f32 1.0, %v6863_v52  ;;  %v4290_v42 = vmul.f32 %v6863_v52, %v7870_v7 }
0x2055   :  { %v6865_v25 = vpop.eup %6864 }
0x2056   :  { %4269 = vrot.lane.b32.xlu1 %v4264_v53, %s6971_s30  ;;  %v4263_v41 = vmul.f32 %v6865_v25, %v4258_v11  ;;  %v4277_v47 = vsub.f32 1.0, %v6865_v25  ;;  %v4289_v50 = vmul.f32 %v6865_v25, %v7873_v0 }
0x2058   :  { %4267 = vrot.lane.b32.xlu0 %v4263_v41, %s6971_s30 }
0x20c8   :  { %v4270_v27 = vpop.permute.xlu1 %4269 }
0x20c9   :  { %v4274_v28 = vadd.f32 %v4270_v27, %v4163_v51 }
0x20ca   :  { %v4268_v36 = vpop.permute.xlu0 %4267 }
0x20cb   :  { %6866 = vtanh.f32 %v4274_v28  ;;  %v4273_v29 = vadd.f32 %v4268_v36, %v4158_v34 }
0x20cd   :  { %6868 = vtanh.f32 %v4273_v29 }
0x20d8   :  { %v6867_v38 = vpop.eup %6866 }
0x20d9   :  { %4283 = vrot.lane.b32.xlu1 %v6867_v38, %s6972_s20 }
0x20da   :  { %v6869_v37 = vpop.eup %6868 }
0x20db   :  { %4281 = vrot.lane.b32.xlu0 %v6869_v37, %s6972_s20 }
0x20dd   :  { %4382 = vrot.lane.b32.xlu1 %v7908_v58, %s6972_s20 }
0x20df   :  { %4380 = vrot.lane.b32.xlu0 %v7915_v63, %s6972_s20 }
0x214b   :  { %v4284_v6 = vpop.permute.xlu1 %4283 }
0x214c   :  { %v4288_v45 = vmul.f32 %v4284_v6, %v4278_v31 }
0x214d   :  { %v4282_v8 = vpop.permute.xlu0 %4281 }
0x214e   :  { %v7946_v48 = vadd.f32 %v4290_v42, %v4288_v45  ;;  %v4287_v14 = vmul.f32 %v4282_v8, %v4277_v47 }
0x214f   :  { %v4383_v9 = vpop.permute.xlu1 %4382 }
0x2150   :  { %v7949_v22 = vadd.f32 %v4289_v50, %v4287_v14  ;;  %4297 = vrot.lane.b32.xlu1 %v7946_v48, %s6972_s20 }
0x2151   :  { %v4381_v54 = vpop.permute.xlu0 %4380 }
0x2152   :  { %4295 = vrot.lane.b32.xlu0 %v7949_v22, %s6972_s20  ;;  %6548 = vmatprep.mubr.msk.f32.mxu1 %vm304_vm2, %v4381_v54 }
0x2153   :  { %6549 = vmatmul.mubr.msk.f32.vlgmr.msra.gmra.mxu1 %vm304_vm2, %v4383_v9 }
0x2154   :  { %6557 = vmatpush3.msk.msra.mxu1 %vm308_vm0, %v7676_v1 }
0x2155   :  { %6566 = vmatprep.subr.msk.mxu1 %vm308_vm0, %v7752_v55 }
0x21c2   :  { %v4298_v0 = vpop.permute.xlu1 %4297 }
0x21c4   :  { %v4296_v7 = vpop.permute.xlu0 %4295 }
0x21c5   :  { %6543 = vmatprep.mubr.msk.f32.mxu0 %vm304_vm2, %v4296_v7  ;;  %6558 = vmatprep.mubr.msk.f32.mxu1 %vm304_vm2, %v4296_v7 }
0x21c6   :  { %6544 = vmatmul.mubr.msk.f32.vlgmr.msra.gmra.mxu0 %vm304_vm2, %v4298_v0  ;;  %6559 = vmatmul.mubr.msk.f32.vlgmr.msra.gmra.mxu1 %vm304_vm2, %v4298_v0 }
0x21c7   :  { %6552 = vmatpush3.msk.msra.mxu0 %vm308_vm0, %v7683_v5  ;;  %6567 = vmatpush3.msk.msra.mxu1 %vm308_vm0, %v7752_v55 }
0x21c8   :  { %6561 = vmatprep.subr.msk.mxu0 %vm308_vm0, %v7775_v13  ;;  %6576 = vmatprep.subr.msk.mxu1 %vm308_vm0, %v7676_v1 }
0x2213   :  { %v6550_v23 = vpop.f32.mrf.mxu1 }
0x2214   :  { %v4460_v10 = vadd.f32 %v6550_v23, %v7814_v39 }
0x2215   :  { %v4454_v17 = vpop.f32.mrf.mxu1 }
0x2216   :  { %v4455_v56 = vadd.f32 %v7814_v39, %v4454_v17  ;;  %4481 = vrot.lane.b32.xlu1 %v4460_v10, %s6970_s29 }
0x2218   :  { %4479 = vrot.lane.b32.xlu0 %v4455_v56, %s6970_s29 }
0x2286   :  { %v6545_v60 = vpop.f32.mrf.mxu0  ;;  %v6560_v31 = vpop.f32.mrf.mxu1 }
0x2287   :  { %v4375_v61 = vadd.f32 %v6545_v60, %v7823_v49  ;;  %v4702_v47 = vadd.f32 %v6560_v31, %v7728_v21 }
0x2288   :  { %v4369_v62 = vpop.f32.mrf.mxu0  ;;  %v4482_v34 = vpop.permute.xlu1 %4481 }
0x2289   :  { %v4464_v46 = vadd.f32 %v4460_v10, %v4375_v61  ;;  %v4370_v19 = vadd.f32 %v7823_v49, %v4369_v62 }
0x228a   :  { %v4480_v35 = vpop.permute.xlu0 %4479 }
0x228b   :  { %v6114_v33 = vmul.f32 -1.442695, %v4464_v46  ;;  %v4463_v2 = vadd.f32 %v4455_v56, %v4370_v19 }
0x228d   :  { %6870 = vpow2.f32 %v6114_v33  ;;  %v6113_v1 = vmul.f32 -1.442695, %v4463_v2 }
0x228f   :  { %6872 = vpow2.f32 %v6113_v1 }
0x229a   :  { %v6871_v3 = vpop.eup %6870 }
0x229b   :  { %v4472_v4 = vadd.f32 1.0, %v6871_v3 }
0x229c   :  { %v6873_v51 = vpop.eup %6872 }
0x229d   :  { %6874 = vrcp.f32 %v4472_v4  ;;  %v4471_v15 = vadd.f32 1.0, %v6873_v51 }
0x229f   :  { %6876 = vrcp.f32 %v4471_v15 }
0x22aa   :  { %v6875_v44 = vpop.eup %6874 }
0x22ab   :  { %v4486_v40 = vmul.f32 %v6875_v44, %v4482_v34  ;;  %v4500_v25 = vsub.f32 1.0, %v6875_v44  ;;  %v4512_v41 = vmul.f32 %v6875_v44, %v7908_v58  ;;  %v4696_v58 = vpop.f32.mrf.mxu1 }
0x22ac   :  { %v6877_v20 = vpop.eup %6876 }
0x22ad   :  { %v4485_v16 = vmul.f32 %v6877_v20, %v4480_v35  ;;  %4491 = vrot.lane.b32.xlu1 %v4486_v40, %s6971_s30  ;;  %v4499_v28 = vsub.f32 1.0, %v6877_v20  ;;  %v4511_v38 = vmul.f32 %v6877_v20, %v7915_v63  ;;  %v4697_v63 = vadd.f32 %v7728_v21, %v4696_v58 }
0x22af   :  { %4489 = vrot.lane.b32.xlu0 %v4485_v16, %s6971_s30 }
0x231f   :  { %v4492_v24 = vpop.permute.xlu1 %4491 }
0x2320   :  { %v4496_v26 = vadd.f32 %v4492_v24, %v4375_v61 }
0x2321   :  { %v4490_v32 = vpop.permute.xlu0 %4489 }
0x2322   :  { %6878 = vtanh.f32 %v4496_v26  ;;  %v4495_v52 = vadd.f32 %v4490_v32, %v4370_v19 }
0x2324   :  { %6880 = vtanh.f32 %v4495_v52 }
0x232f   :  { %v6879_v57 = vpop.eup %6878 }
0x2330   :  { %4505 = vrot.lane.b32.xlu1 %v6879_v57, %s6972_s20 }
0x2331   :  { %v6881_v53 = vpop.eup %6880 }
0x2332   :  { %4503 = vrot.lane.b32.xlu0 %v6881_v53, %s6972_s20 }
0x23a2   :  { %v4506_v11 = vpop.permute.xlu1 %4505 }
0x23a3   :  { %v4510_v27 = vmul.f32 %v4506_v11, %v4500_v25  ;;  %v8049_v11 = vld [vmem:[%s8361_s10] sm:$0x3f] }
0x23a4   :  { %v4504_v36 = vpop.permute.xlu0 %4503 }
0x23a5   :  { %v7984_v29 = vadd.f32 %v4512_v41, %v4510_v27  ;;  %v4509_v37 = vmul.f32 %v4504_v36, %v4499_v28 }
0x23a7   :  { %v7989_v6 = vadd.f32 %v7984_v29, %v7913_v30  ;;  %v7991_v42 = vadd.f32 %v4511_v38, %v4509_v37 }
0x23a9   :  { %v7995_v45 = vadd.f32 %v7991_v42, %v7919_v59  ;;  %4549 = vrot.lane.b32.xlu1 %v7989_v6, %s6972_s20 }
0x23ab   :  { %4547 = vrot.lane.b32.xlu0 %v7995_v45, %s6972_s20 }
0x23ad   :  { %4723 = vrot.lane.b32.xlu1 %v4702_v47, %s6970_s29 }
0x23af   :  { %4721 = vrot.lane.b32.xlu0 %v4697_v63, %s6970_s29 }
0x241b   :  { %v4550_v50 = vpop.permute.xlu1 %4549 }
0x241d   :  { %v4548_v8 = vpop.permute.xlu0 %4547 }
0x241e   :  { %6553 = vmatprep.mubr.msk.f32.mxu0 %vm304_vm2, %v4548_v8 }
0x241f   :  { %6554 = vmatmul.mubr.msk.f32.vlgmr.msra.gmra.mxu0 %vm304_vm2, %v4550_v50 }
0x2420   :  { %6562 = vmatpush3.msk.msra.mxu0 %vm308_vm0, %v7775_v13 }
0x2421   :  { %6571 = vmatprep.subr.msk.mxu0 %vm308_vm0, %v7683_v5  ;;  %v4724_v5 = vpop.permute.xlu1 %4723  ;;  %v4722_v33 = vpop.permute.xlu0 %4721 }
0x24df   :  { %v6555_v14 = vpop.f32.mrf.mxu0 }
0x24e0   :  { %v4627_v54 = vadd.f32 %v6555_v14, %v7739_v43 }
0x24e1   :  { %v4621_v21 = vpop.f32.mrf.mxu0 }
0x24e2   :  { %v4706_v9 = vadd.f32 %v4702_v47, %v4627_v54  ;;  %v4622_v7 = vadd.f32 %v7739_v43, %v4621_v21 }
0x24e4   :  { %v6122_v0 = vmul.f32 -1.442695, %v4706_v9  ;;  %v4705_v23 = vadd.f32 %v4697_v63, %v4622_v7 }
0x24e6   :  { %6882 = vpow2.f32 %v6122_v0  ;;  %v6121_v10 = vmul.f32 -1.442695, %v4705_v23 }
0x24e8   :  { %6884 = vpow2.f32 %v6121_v10 }
0x24f3   :  { %v6883_v17 = vpop.eup %6882 }
0x24f4   :  { %v4714_v56 = vadd.f32 1.0, %v6883_v17 }
0x24f5   :  { %v6885_v60 = vpop.eup %6884 }
0x24f6   :  { %6886 = vrcp.f32 %v4714_v56  ;;  %v4713_v61 = vadd.f32 1.0, %v6885_v60 }
0x24f8   :  { %6888 = vrcp.f32 %v4713_v61 }
0x2503   :  { %v6887_v62 = vpop.eup %6886 }
0x2504   :  { %v4728_v46 = vmul.f32 %v6887_v62, %v4724_v5  ;;  %v4742_v44 = vsub.f32 1.0, %v6887_v62  ;;  %v4754_v40 = vmul.f32 %v6887_v62, %v7946_v48  ;;  %v8036_v48 = vld [vmem:[%s8360_s12] sm:$0x3f] }
0x2505   :  { %v6889_v19 = vpop.eup %6888 }
0x2506   :  { %4733 = vrot.lane.b32.xlu1 %v4728_v46, %s6971_s30  ;;  %v4727_v2 = vmul.f32 %v6889_v19, %v4722_v33  ;;  %v4741_v35 = vsub.f32 1.0, %v6889_v19  ;;  %v4753_v26 = vmul.f32 %v6889_v19, %v7949_v22 }
0x2508   :  { %4731 = vrot.lane.b32.xlu0 %v4727_v2, %s6971_s30 }
0x2578   :  { %v4734_v43 = vpop.permute.xlu1 %4733 }
0x2579   :  { %v4738_v1 = vadd.f32 %v4734_v43, %v4627_v54 }
0x257a   :  { %v4732_v3 = vpop.permute.xlu0 %4731 }
0x257b   :  { %6890 = vtanh.f32 %v4738_v1  ;;  %v4737_v4 = vadd.f32 %v4732_v3, %v4622_v7 }
0x257d   :  { %6892 = vtanh.f32 %v4737_v4 }
0x2588   :  { %v6891_v51 = vpop.eup %6890 }
0x2589   :  { %4747 = vrot.lane.b32.xlu1 %v6891_v51, %s6972_s20 }
0x258a   :  { %v6893_v15 = vpop.eup %6892 }
0x258b   :  { %4745 = vrot.lane.b32.xlu0 %v6893_v15, %s6972_s20 }
0x258d   :  { %4846 = vrot.lane.b32.xlu1 %v7984_v29, %s6972_s20 }
0x258f   :  { %4844 = vrot.lane.b32.xlu0 %v7991_v42, %s6972_s20 }
0x25fb   :  { %v4748_v34 = vpop.permute.xlu1 %4747 }
0x25fc   :  { %v4752_v20 = vmul.f32 %v4748_v34, %v4742_v44 }
0x25fd   :  { %v4746_v16 = vpop.permute.xlu0 %4745 }
0x25fe   :  { %v8022_v24 = vadd.f32 %v4754_v40, %v4752_v20  ;;  %v4751_v32 = vmul.f32 %v4746_v16, %v4741_v35 }
0x25ff   :  { %v4847_v53 = vpop.permute.xlu1 %4846 }
0x2600   :  { %v8025_v52 = vadd.f32 %v4753_v26, %v4751_v32  ;;  %4761 = vrot.lane.b32.xlu1 %v8022_v24, %s6972_s20  ;;  %v8105_v32 = vld [vmem:[%s8364_s11] ss:$0 sm:$0xff] }
0x2601   :  { %v4845_v57 = vpop.permute.xlu0 %4844 }
0x2602   :  { %4759 = vrot.lane.b32.xlu0 %v8025_v52, %s6972_s20  ;;  %6568 = vmatprep.mubr.msk.f32.mxu1 %vm304_vm2, %v4845_v57 }
0x2603   :  { %6569 = vmatmul.mubr.msk.f32.vlgmr.msra.gmra.mxu1 %vm304_vm2, %v4847_v53 }
0x2604   :  { %6577 = vmatpush3.msk.msra.mxu1 %vm308_vm0, %v8036_v48 }
0x2605   :  { %6586 = vmatprep.subr.msk.mxu1 %vm308_vm0, %v7752_v55 }
0x2672   :  { %v4762_v25 = vpop.permute.xlu1 %4761 }
0x2674   :  { %v4760_v22 = vpop.permute.xlu0 %4759 }
0x2675   :  { %6563 = vmatprep.mubr.msk.f32.mxu0 %vm304_vm2, %v4760_v22  ;;  %6578 = vmatprep.mubr.msk.f32.mxu1 %vm304_vm2, %v4760_v22 }
0x2676   :  { %6564 = vmatmul.mubr.msk.f32.vlgmr.msra.gmra.mxu0 %vm304_vm2, %v4762_v25  ;;  %6579 = vmatmul.mubr.msk.f32.vlgmr.msra.gmra.mxu1 %vm304_vm2, %v4762_v25 }
0x2677   :  { %6572 = vmatpush3.msk.msra.mxu0 %vm308_vm0, %v8049_v11  ;;  %6587 = vmatpush3.msk.msra.mxu1 %vm308_vm0, %v7752_v55 }
0x2678   :  { %6581 = vmatprep.subr.msk.mxu0 %vm308_vm0, %v7775_v13  ;;  %6596 = vmatprep.subr.msk.mxu1 %vm308_vm0, %v8036_v48 }
0x26c3   :  { %v6570_v41 = vpop.f32.mrf.mxu1 }
0x26c4   :  { %v4924_v27 = vadd.f32 %v6570_v41, %v7814_v39 }
0x26c5   :  { %v4918_v28 = vpop.f32.mrf.mxu1 }
0x26c6   :  { %v4919_v36 = vadd.f32 %v7814_v39, %v4918_v28  ;;  %4945 = vrot.lane.b32.xlu1 %v4924_v27, %s6970_s29 }
0x26c8   :  { %4943 = vrot.lane.b32.xlu0 %v4919_v36, %s6970_s29 }
0x2736   :  { %v6565_v38 = vpop.f32.mrf.mxu0  ;;  %v6580_v51 = vpop.f32.mrf.mxu1 }
0x2737   :  { %v4839_v37 = vadd.f32 %v6565_v38, %v7823_v49 }
0x2738   :  { %v4833_v55 = vpop.f32.mrf.mxu0  ;;  %v4946_v9 = vpop.permute.xlu1 %4945 }
0x2739   :  { %v4928_v31 = vadd.f32 %v4924_v27, %v4839_v37  ;;  %v4834_v58 = vadd.f32 %v7823_v49, %v4833_v55 }
0x273a   :  { %v4944_v23 = vpop.permute.xlu0 %4943 }
0x273b   :  { %v6130_v47 = vmul.f32 -1.442695, %v4928_v31  ;;  %v4927_v63 = vadd.f32 %v4919_v36, %v4834_v58 }
0x273d   :  { %6894 = vpow2.f32 %v6130_v47  ;;  %v6129_v8 = vmul.f32 -1.442695, %v4927_v63 }
0x273f   :  { %6896 = vpow2.f32 %v6129_v8 }
0x274a   :  { %v6895_v50 = vpop.eup %6894 }
0x274b   :  { %v4936_v14 = vadd.f32 1.0, %v6895_v50 }
0x274c   :  { %v6897_v54 = vpop.eup %6896 }
0x274d   :  { %6898 = vrcp.f32 %v4936_v14  ;;  %v4935_v39 = vadd.f32 1.0, %v6897_v54 }
0x274f   :  { %6900 = vrcp.f32 %v4935_v39 }
0x275a   :  { %v6899_v21 = vpop.eup %6898 }
0x275b   :  { %v4950_v7 = vmul.f32 %v6899_v21, %v4946_v9  ;;  %v4964_v5 = vsub.f32 1.0, %v6899_v21  ;;  %v4976_v19 = vmul.f32 %v6899_v21, %v7984_v29  ;;  %v5160_v29 = vpop.f32.mrf.mxu1 }
0x275c   :  { %v6901_v0 = vpop.eup %6900 }
0x275d   :  { %v4949_v10 = vmul.f32 %v6901_v0, %v4944_v23  ;;  %4955 = vrot.lane.b32.xlu1 %v4950_v7, %s6971_s30  ;;  %v4963_v2 = vsub.f32 1.0, %v6901_v0  ;;  %v4975_v3 = vmul.f32 %v6901_v0, %v7991_v42  ;;  %v8088_v42 = vld [vmem:[%s8363_s13] ss:$0 sm:$0xff] }
0x275e   :  { %v5166_v40 = vadd.f32 %v8088_v42, %v6580_v51  ;;  %v5161_v20 = vadd.f32 %v8088_v42, %v5160_v29  ;;  %v8161_v51 = vld [vmem:[%s8368_s15] ss:$0 sm:$0xff]  ;;  %s6974_s15 = smov 126  }
0x275f   :  { %4953 = vrot.lane.b32.xlu0 %v4949_v10, %s6971_s30 }
0x27cf   :  { %v4956_v49 = vpop.permute.xlu1 %4955 }
0x27d0   :  { %v4960_v17 = vadd.f32 %v4956_v49, %v4839_v37 }
0x27d1   :  { %v4954_v56 = vpop.permute.xlu0 %4953 }
0x27d2   :  { %6902 = vtanh.f32 %v4960_v17  ;;  %v4959_v60 = vadd.f32 %v4954_v56, %v4834_v58 }
0x27d4   :  { %6904 = vtanh.f32 %v4959_v60 }
0x27df   :  { %v6903_v61 = vpop.eup %6902 }
0x27e0   :  { %4969 = vrot.lane.b32.xlu1 %v6903_v61, %s6972_s20 }
0x27e1   :  { %v6905_v62 = vpop.eup %6904 }
0x27e2   :  { %4967 = vrot.lane.b32.xlu0 %v6905_v62, %s6972_s20 }
0x2852   :  { %v4970_v46 = vpop.permute.xlu1 %4969 }
0x2853   :  { %v4974_v33 = vmul.f32 %v4970_v46, %v4964_v5 }
0x2854   :  { %v4968_v43 = vpop.permute.xlu0 %4967 }
0x2855   :  { %v8070_v1 = vadd.f32 %v4976_v19, %v4974_v33  ;;  %v4973_v4 = vmul.f32 %v4968_v43, %v4963_v2  ;;  %v8152_v2 = vld [vmem:[%s8367_s17] ss:$0 sm:$0xff]  ;;  %s6975_s17 = smov 124  }
0x2857   :  { %v8075_v15 = vadd.f32 %v8070_v1, %v7989_v6  ;;  %v8077_v44 = vadd.f32 %v4975_v3, %v4973_v4 }
0x2859   :  { %v8081_v34 = vadd.f32 %v8077_v44, %v7995_v45  ;;  %5013 = vrot.lane.b32.xlu1 %v8075_v15, %s6972_s20 }
0x285b   :  { %5011 = vrot.lane.b32.xlu0 %v8081_v34, %s6972_s20 }
0x285d   :  { %5187 = vrot.lane.b32.xlu1 %v5166_v40, %s6970_s29 }
0x285f   :  { %5185 = vrot.lane.b32.xlu0 %v5161_v20, %s6970_s29 }
0x28cb   :  { %v5014_v16 = vpop.permute.xlu1 %5013 }
0x28cd   :  { %v5012_v35 = vpop.permute.xlu0 %5011 }
0x28ce   :  { %6573 = vmatprep.mubr.msk.f32.mxu0 %vm304_vm2, %v5012_v35 }
0x28cf   :  { %6574 = vmatmul.mubr.msk.f32.vlgmr.msra.gmra.mxu0 %vm304_vm2, %v5014_v16  ;;  %v5188_v31 = vpop.permute.xlu1 %5187 }
0x28d0   :  { %6582 = vmatpush3.msk.msra.mxu0 %vm308_vm0, %v7775_v13 }
0x28d1   :  { %6591 = vmatprep.subr.msk.mxu0 %vm308_vm0, %v8049_v11  ;;  %v5186_v63 = vpop.permute.xlu0 %5185 }
0x298f   :  { %v6575_v26 = vpop.f32.mrf.mxu0 }
0x2990   :  { %v5091_v57 = vadd.f32 %v8105_v32, %v6575_v26 }
0x2991   :  { %v5085_v53 = vpop.f32.mrf.mxu0 }
0x2992   :  { %v5170_v22 = vadd.f32 %v5166_v40, %v5091_v57  ;;  %v5086_v25 = vadd.f32 %v8105_v32, %v5085_v53 }
0x2994   :  { %v6138_v41 = vmul.f32 -1.442695, %v5170_v22  ;;  %v5169_v27 = vadd.f32 %v5161_v20, %v5086_v25 }
0x2996   :  { %6906 = vpow2.f32 %v6138_v41  ;;  %v6137_v28 = vmul.f32 -1.442695, %v5169_v27 }
0x2998   :  { %6908 = vpow2.f32 %v6137_v28 }
0x29a3   :  { %v6907_v13 = vpop.eup %6906 }
0x29a4   :  { %v5178_v36 = vadd.f32 1.0, %v6907_v13 }
0x29a5   :  { %v6909_v38 = vpop.eup %6908 }
0x29a6   :  { %6910 = vrcp.f32 %v5178_v36  ;;  %v5177_v37 = vadd.f32 1.0, %v6909_v38 }
0x29a8   :  { %6912 = vrcp.f32 %v5177_v37 }
0x29b3   :  { %v6911_v55 = vpop.eup %6910 }
0x29b4   :  { %v5192_v58 = vmul.f32 %v6911_v55, %v5188_v31  ;;  %v5206_v7 = vsub.f32 1.0, %v6911_v55  ;;  %v5218_v23 = vmul.f32 %v6911_v55, %v8022_v24  ;;  %v6965_v24 = vld [vmem:[%s8365_s16] sm:$0x3f] }
0x29b5   :  { %v6913_v47 = vpop.eup %6912 }
0x29b6   :  { %5197 = vrot.lane.b32.xlu1 %v5192_v58, %s6971_s30  ;;  %v5191_v8 = vmul.f32 %v6913_v47, %v5186_v63  ;;  %v5205_v49 = vsub.f32 1.0, %v6913_v47  ;;  %v5217_v60 = vmul.f32 %v6913_v47, %v8025_v52 }
0x29b8   :  { %5195 = vrot.lane.b32.xlu0 %v5191_v8, %s6971_s30 }
0x2a28   :  { %v5198_v50 = vpop.permute.xlu1 %5197 }
0x2a29   :  { %v5202_v14 = vadd.f32 %v5198_v50, %v5091_v57 }
0x2a2a   :  { %v5196_v54 = vpop.permute.xlu0 %5195 }
0x2a2b   :  { %6914 = vtanh.f32 %v5202_v14  ;;  %v5201_v39 = vadd.f32 %v5196_v54, %v5086_v25 }
0x2a2d   :  { %6916 = vtanh.f32 %v5201_v39 }
0x2a38   :  { %v6915_v21 = vpop.eup %6914 }
0x2a39   :  { %5211 = vrot.lane.b32.xlu1 %v6915_v21, %s6972_s20 }
0x2a3a   :  { %v6917_v9 = vpop.eup %6916 }
0x2a3b   :  { %5209 = vrot.lane.b32.xlu0 %v6917_v9, %s6972_s20 }
0x2a3d   :  { %5310 = vrot.lane.b32.xlu1 %v8070_v1, %s6972_s20 }
0x2a3f   :  { %5308 = vrot.lane.b32.xlu0 %v8077_v44, %s6972_s20 }
0x2aab   :  { %v5212_v0 = vpop.permute.xlu1 %5211 }
0x2aac   :  { %v5216_v10 = vmul.f32 %v5212_v0, %v5206_v7 }
0x2aad   :  { %v5210_v17 = vpop.permute.xlu0 %5209 }
0x2aae   :  { %v8118_v56 = vadd.f32 %v5218_v23, %v5216_v10  ;;  %v5215_v61 = vmul.f32 %v5210_v17, %v5205_v49 }
0x2aaf   :  { %v5311_v46 = vpop.permute.xlu1 %5310 }
0x2ab0   :  { %v8121_v62 = vadd.f32 %v5217_v60, %v5215_v61  ;;  %5225 = vrot.lane.b32.xlu1 %v8118_v56, %s6972_s20 }
0x2ab1   :  { %v5309_v5 = vpop.permute.xlu0 %5308 }
0x2ab2   :  { %5223 = vrot.lane.b32.xlu0 %v8121_v62, %s6972_s20  ;;  %6588 = vmatprep.mubr.msk.f32.mxu1 %vm304_vm2, %v5309_v5 }
0x2ab3   :  { %6589 = vmatmul.mubr.msk.f32.vlgmr.msra.gmra.mxu1 %vm304_vm2, %v5311_v46 }
0x2ab4   :  { %6597 = vmatpush3.msk.msra.mxu1 %vm308_vm0, %v8036_v48  ;;  %v8145_v48 = vld [vmem:[%s8366_s14] sm:$0x3f] }
0x2ab5   :  { %6606 = vmatprep.subr.msk.mxu1 %vm308_vm0, %v6965_v24 }
0x2b22   :  { %v5226_v19 = vpop.permute.xlu1 %5225 }
0x2b24   :  { %v5224_v52 = vpop.permute.xlu0 %5223 }
0x2b25   :  { %6583 = vmatprep.mubr.msk.f32.mxu0 %vm304_vm2, %v5224_v52  ;;  %6598 = vmatprep.mubr.msk.f32.mxu1 %vm304_vm2, %v5224_v52 }
0x2b26   :  { %6584 = vmatmul.mubr.msk.f32.vlgmr.msra.gmra.mxu0 %vm304_vm2, %v5226_v19  ;;  %6599 = vmatmul.mubr.msk.f32.vlgmr.msra.gmra.mxu1 %vm304_vm2, %v5226_v19 }
0x2b27   :  { %6592 = vmatpush3.msk.msra.mxu0 %vm308_vm0, %v8049_v11  ;;  %6607 = vmatpush3.msk.msra.mxu1 %vm308_vm0, %v6965_v24 }
0x2b28   :  { %6601 = vmatprep.subr.msk.mxu0 %vm308_vm0, %v8145_v48 }
0x2b73   :  { %v6590_v33 = vpop.f32.mrf.mxu1 }
0x2b74   :  { %v5388_v43 = vadd.f32 %v8152_v2, %v6590_v33 }
0x2b75   :  { %v5382_v3 = vpop.f32.mrf.mxu1 }
0x2b76   :  { %v5383_v11 = vadd.f32 %v8152_v2, %v5382_v3  ;;  %5409 = vrot.lane.b32.xlu1 %v5388_v43, %s6970_s29 }
0x2b78   :  { %5407 = vrot.lane.b32.xlu0 %v5383_v11, %s6970_s29 }
0x2be6   :  { %v6585_v4 = vpop.f32.mrf.mxu0  ;;  %v6600_v10 = vpop.f32.mrf.mxu1 }
0x2be7   :  { %v5303_v29 = vadd.f32 %v8161_v51, %v6585_v4  ;;  %v5630_v61 = vadd.f32 %v8088_v42, %v6600_v10 }
0x2be8   :  { %v5297_v40 = vpop.f32.mrf.mxu0  ;;  %v5410_v28 = vpop.permute.xlu1 %5409 }
0x2be9   :  { %v5392_v20 = vadd.f32 %v5388_v43, %v5303_v29  ;;  %v5298_v35 = vadd.f32 %v8161_v51, %v5297_v40 }
0x2bea   :  { %v5408_v38 = vpop.permute.xlu0 %5407 }
0x2beb   :  { %v6146_v16 = vmul.f32 -1.442695, %v5392_v20  ;;  %v5391_v26 = vadd.f32 %v5383_v11, %v5298_v35 }
0x2bed   :  { %6918 = vpow2.f32 %v6146_v16  ;;  %v6145_v57 = vmul.f32 -1.442695, %v5391_v26 }
0x2bef   :  { %6920 = vpow2.f32 %v6145_v57 }
0x2bfa   :  { %v6919_v53 = vpop.eup %6918 }
0x2bfb   :  { %v5400_v22 = vadd.f32 1.0, %v6919_v53 }
0x2bfc   :  { %v6921_v25 = vpop.eup %6920 }
0x2bfd   :  { %6922 = vrcp.f32 %v5400_v22  ;;  %v5399_v41 = vadd.f32 1.0, %v6921_v25 }
0x2bff   :  { %6924 = vrcp.f32 %v5399_v41 }
0x2c0a   :  { %v6923_v27 = vpop.eup %6922 }
0x2c0b   :  { %v5414_v13 = vmul.f32 %v6923_v27, %v5410_v28  ;;  %v5428_v50 = vsub.f32 1.0, %v6923_v27  ;;  %v5440_v54 = vmul.f32 %v6923_v27, %v8070_v1  ;;  %v5624_v1 = vpop.f32.mrf.mxu1 }
0x2c0c   :  { %v6925_v36 = vpop.eup %6924 }
0x2c0d   :  { %v5413_v37 = vmul.f32 %v6925_v36, %v5408_v38  ;;  %5419 = vrot.lane.b32.xlu1 %v5414_v13, %s6971_s30  ;;  %v5427_v21 = vsub.f32 1.0, %v6925_v36  ;;  %v5439_v0 = vmul.f32 %v6925_v36, %v8077_v44  ;;  %v5625_v44 = vadd.f32 %v8088_v42, %v5624_v1 }
0x2c0f   :  { %5417 = vrot.lane.b32.xlu0 %v5413_v37, %s6971_s30 }
0x2c7f   :  { %v5420_v55 = vpop.permute.xlu1 %5419 }
0x2c80   :  { %v5424_v31 = vadd.f32 %v5420_v55, %v5303_v29 }
0x2c81   :  { %v5418_v58 = vpop.permute.xlu0 %5417 }
0x2c82   :  { %6926 = vtanh.f32 %v5424_v31  ;;  %v5423_v47 = vadd.f32 %v5418_v58, %v5298_v35 }
0x2c84   :  { %6928 = vtanh.f32 %v5423_v47 }
0x2c8f   :  { %v6927_v63 = vpop.eup %6926 }
0x2c90   :  { %5433 = vrot.lane.b32.xlu1 %v6927_v63, %s6972_s20 }
0x2c91   :  { %v6929_v8 = vpop.eup %6928 }
0x2c92   :  { %5431 = vrot.lane.b32.xlu0 %v6929_v8, %s6972_s20 }
0x2d02   :  { %v5434_v14 = vpop.permute.xlu1 %5433 }
0x2d03   :  { %v5438_v39 = vmul.f32 %v5434_v14, %v5428_v50 }
0x2d04   :  { %v5432_v9 = vpop.permute.xlu0 %5431 }
0x2d05   :  { %v8170_v7 = vadd.f32 %v5440_v54, %v5438_v39  ;;  %v5437_v23 = vmul.f32 %v5432_v9, %v5427_v21 }
0x2d07   :  { %v8175_v49 = vadd.f32 %v8170_v7, %v8075_v15  ;;  %v8177_v17 = vadd.f32 %v5439_v0, %v5437_v23 }
0x2d09   :  { %v8181_v60 = vadd.f32 %v8177_v17, %v8081_v34  ;;  %5477 = vrot.lane.b32.xlu1 %v8175_v49, %s6972_s20 }
0x2d0b   :  { %5475 = vrot.lane.b32.xlu0 %v8181_v60, %s6972_s20 }
0x2d0d   :  { %5651 = vrot.lane.b32.xlu1 %v5630_v61, %s6970_s29 }
0x2d0f   :  { %5649 = vrot.lane.b32.xlu0 %v5625_v44, %s6970_s29 }
0x2d7b   :  { %v5478_v46 = vpop.permute.xlu1 %5477 }
0x2d7d   :  { %v5476_v5 = vpop.permute.xlu0 %5475 }
0x2d7e   :  { %6593 = vmatprep.mubr.msk.f32.mxu0 %vm304_vm2, %v5476_v5 }
0x2d7f   :  { %6594 = vmatmul.mubr.msk.f32.vlgmr.msra.gmra.mxu0 %vm304_vm2, %v5478_v46 }
0x2d80   :  { %6602 = vmatpush3.msk.msra.mxu0 %vm308_vm0, %v8145_v48  ;;  %v5652_v48 = vpop.permute.xlu1 %5651 }
0x2d81   :  { %v5650_v57 = vpop.permute.xlu0 %5649 }
0x2e3f   :  { %v6595_v24 = vpop.f32.mrf.mxu0 }
0x2e40   :  { %v5555_v52 = vadd.f32 %v8105_v32, %v6595_v24 }
0x2e41   :  { %v5549_v19 = vpop.f32.mrf.mxu0 }
0x2e42   :  { %v5634_v33 = vadd.f32 %v5630_v61, %v5555_v52  ;;  %v5550_v42 = vadd.f32 %v8105_v32, %v5549_v19 }
0x2e44   :  { %v6154_v43 = vmul.f32 -1.442695, %v5634_v33  ;;  %v5633_v3 = vadd.f32 %v5625_v44, %v5550_v42 }
0x2e46   :  { %6930 = vpow2.f32 %v6154_v43  ;;  %v6153_v11 = vmul.f32 -1.442695, %v5633_v3 }
0x2e48   :  { %6932 = vpow2.f32 %v6153_v11 }
0x2e53   :  { %v6931_v4 = vpop.eup %6930 }
0x2e54   :  { %v5642_v29 = vadd.f32 1.0, %v6931_v4 }
0x2e55   :  { %v6933_v40 = vpop.eup %6932 }
0x2e56   :  { %6934 = vrcp.f32 %v5642_v29  ;;  %v5641_v20 = vadd.f32 1.0, %v6933_v40 }
0x2e58   :  { %6936 = vrcp.f32 %v5641_v20 }
0x2e63   :  { %v6935_v35 = vpop.eup %6934 }
0x2e64   :  { %v5656_v16 = vmul.f32 %v6935_v35, %v5652_v48  ;;  %v5670_v13 = vsub.f32 1.0, %v6935_v35  ;;  %v5682_v38 = vmul.f32 %v6935_v35, %v8118_v56 }
0x2e65   :  { %v6937_v26 = vpop.eup %6936 }
0x2e66   :  { %5661 = vrot.lane.b32.xlu1 %v5656_v16, %s6971_s30  ;;  %v5655_v53 = vmul.f32 %v6937_v26, %v5650_v57  ;;  %v5669_v55 = vsub.f32 1.0, %v6937_v26  ;;  %v5681_v47 = vmul.f32 %v6937_v26, %v8121_v62 }
0x2e68   :  { %5659 = vrot.lane.b32.xlu0 %v5655_v53, %s6971_s30 }
0x2ed8   :  { %v5662_v32 = vpop.permute.xlu1 %5661 }
0x2ed9   :  { %v5666_v22 = vadd.f32 %v5662_v32, %v5555_v52 }
0x2eda   :  { %v5660_v25 = vpop.permute.xlu0 %5659 }
0x2edb   :  { %6938 = vtanh.f32 %v5666_v22  ;;  %v5665_v41 = vadd.f32 %v5660_v25, %v5550_v42 }
0x2edd   :  { %6940 = vtanh.f32 %v5665_v41 }
0x2ee8   :  { %v6939_v27 = vpop.eup %6938 }
0x2ee9   :  { %5675 = vrot.lane.b32.xlu1 %v6939_v27, %s6972_s20 }
0x2eea   :  { %v6941_v28 = vpop.eup %6940 }
0x2eeb   :  { %5673 = vrot.lane.b32.xlu0 %v6941_v28, %s6972_s20 }
0x2eed   :  { %5774 = vrot.lane.b32.xlu1 %v8170_v7, %s6972_s20 }
0x2eef   :  { %5772 = vrot.lane.b32.xlu0 %v8177_v17, %s6972_s20 }
0x2f5b   :  { %v5676_v36 = vpop.permute.xlu1 %5675 }
0x2f5c   :  { %v5680_v37 = vmul.f32 %v5676_v36, %v5670_v13 }
0x2f5d   :  { %v5674_v31 = vpop.permute.xlu0 %5673 }
0x2f5e   :  { %v5684_v58 = vadd.f32 %v5682_v38, %v5680_v37  ;;  %v5679_v63 = vmul.f32 %v5674_v31, %v5669_v55 }
0x2f5f   :  { %v5775_v14 = vpop.permute.xlu1 %5774 }
0x2f60   :  { %v5683_v8 = vadd.f32 %v5681_v47, %v5679_v63  ;;  %5689 = vrot.lane.b32.xlu1 %v5684_v58, %s6972_s20 }
0x2f61   :  { %v5773_v50 = vpop.permute.xlu0 %5772 }
0x2f62   :  { %5687 = vrot.lane.b32.xlu0 %v5683_v8, %s6972_s20  ;;  %6608 = vmatprep.mubr.msk.f32.mxu1 %vm304_vm2, %v5773_v50 }
0x2f63   :  { %6609 = vmatmul.mubr.msk.f32.vlgmr.msra.gmra.mxu1 %vm304_vm2, %v5775_v14 }
0x2fd2   :  { %v5690_v56 = vpop.permute.xlu1 %5689 }
0x2fd4   :  { %v5688_v54 = vpop.permute.xlu0 %5687 }
0x2fd5   :  { %6603 = vmatprep.mubr.msk.f32.mxu0 %vm304_vm2, %v5688_v54 }
0x2fd6   :  { %6604 = vmatmul.mubr.msk.f32.vlgmr.msra.gmra.mxu0 %vm304_vm2, %v5690_v56 }
0x3023   :  { %v6610_v39 = vpop.f32.mrf.mxu1 }
0x3024   :  { %v5852_v62 = vadd.f32 %v8152_v2, %v6610_v39 }
0x3025   :  { %v5846_v21 = vpop.f32.mrf.mxu1 }
0x3026   :  { %v5847_v9 = vadd.f32 %v8152_v2, %v5846_v21  ;;  %5873 = vrot.lane.b32.xlu1 %v5852_v62, %s6970_s29 }
0x3028   :  { %5871 = vrot.lane.b32.xlu0 %v5847_v9, %s6970_s29 }
0x3096   :  { %v6605_v0 = vpop.f32.mrf.mxu0 }
0x3097   :  { %v5767_v23 = vadd.f32 %v8161_v51, %v6605_v0 }
0x3098   :  { %v5761_v10 = vpop.f32.mrf.mxu0  ;;  %v5874_v42 = vpop.permute.xlu1 %5873 }
0x3099   :  { %v5856_v1 = vadd.f32 %v5852_v62, %v5767_v23  ;;  %v5762_v61 = vadd.f32 %v8161_v51, %v5761_v10 }
0x309a   :  { %v5872_v11 = vpop.permute.xlu0 %5871 }
0x309b   :  { %v6162_v44 = vmul.f32 -1.442695, %v5856_v1  ;;  %v5855_v5 = vadd.f32 %v5847_v9, %v5762_v61 }
0x309d   :  { %6942 = vpow2.f32 %v6162_v44  ;;  %v6161_v46 = vmul.f32 -1.442695, %v5855_v5 }
0x309f   :  { %6944 = vpow2.f32 %v6161_v46 }
0x30aa   :  { %v6943_v24 = vpop.eup %6942 }
0x30ab   :  { %v5864_v52 = vadd.f32 1.0, %v6943_v24 }
0x30ac   :  { %v6945_v19 = vpop.eup %6944 }
0x30ad   :  { %6946 = vrcp.f32 %v5864_v52  ;;  %v5863_v2 = vadd.f32 1.0, %v6945_v19 }
0x30af   :  { %6948 = vrcp.f32 %v5863_v2 }
0x30ba   :  { %v6947_v33 = vpop.eup %6946 }
0x30bb   :  { %v5878_v43 = vmul.f32 %v6947_v33, %v5874_v42  ;;  %v5892_v16 = vsub.f32 1.0, %v6947_v33  ;;  %v5904_v57 = vmul.f32 %v6947_v33, %v8170_v7 }
0x30bc   :  { %v6949_v3 = vpop.eup %6948 }
0x30bd   :  { %v5877_v4 = vmul.f32 %v6949_v3, %v5872_v11  ;;  %5883 = vrot.lane.b32.xlu1 %v5878_v43, %s6971_s30  ;;  %v5891_v32 = vsub.f32 1.0, %v6949_v3  ;;  %v5903_v41 = vmul.f32 %v6949_v3, %v8177_v17 }
0x30bf   :  { %5881 = vrot.lane.b32.xlu0 %v5877_v4, %s6971_s30 }
0x312f   :  { %v5884_v51 = vpop.permute.xlu1 %5883 }
0x3130   :  { %v5888_v29 = vadd.f32 %v5884_v51, %v5767_v23 }
0x3131   :  { %v5882_v40 = vpop.permute.xlu0 %5881 }
0x3132   :  { %6950 = vtanh.f32 %v5888_v29  ;;  %v5887_v20 = vadd.f32 %v5882_v40, %v5762_v61 }
0x3134   :  { %6952 = vtanh.f32 %v5887_v20 }
0x313f   :  { %v6951_v35 = vpop.eup %6950 }
0x3140   :  { %5897 = vrot.lane.b32.xlu1 %v6951_v35, %s6972_s20 }
0x3141   :  { %v6953_v48 = vpop.eup %6952 }
0x3142   :  { %5895 = vrot.lane.b32.xlu0 %v6953_v48, %s6972_s20 }
0x3144   :  { %3592 = vrot.lane.b32.xlu1 %v7840_v12, %s6974_s15 }
0x3146   :  { %3590 = vrot.lane.b32.xlu0 %v7843_v18, %s6974_s15 }
0x3148   :  { %4057 = vrot.lane.b32.xlu1 %v7913_v30, %s6974_s15 }
0x314a   :  { %4055 = vrot.lane.b32.xlu0 %v7919_v59, %s6974_s15 }
0x314c   :  { %4521 = vrot.lane.b32.xlu1 %v7989_v6, %s6974_s15 }
0x314e   :  { %4519 = vrot.lane.b32.xlu0 %v7995_v45, %s6974_s15 }
0x3150   :  { %4985 = vrot.lane.b32.xlu1 %v8075_v15, %s6974_s15 }
0x3152   :  { %4983 = vrot.lane.b32.xlu0 %v8081_v34, %s6974_s15 }
0x3154   :  { %5449 = vrot.lane.b32.xlu1 %v8175_v49, %s6974_s15 }
0x3156   :  { %5447 = vrot.lane.b32.xlu0 %v8181_v60, %s6974_s15 }
0x3158   :  { %3600 = vrot.lane.b32.xlu1 %v7840_v12, %s6975_s17 }
0x315a   :  { %3598 = vrot.lane.b32.xlu0 %v7843_v18, %s6975_s17 }
0x315c   :  { %4065 = vrot.lane.b32.xlu1 %v7913_v30, %s6975_s17 }
0x315e   :  { %4063 = vrot.lane.b32.xlu0 %v7919_v59, %s6975_s17 }
0x3160   :  { %4529 = vrot.lane.b32.xlu1 %v7989_v6, %s6975_s17 }
0x3162   :  { %4527 = vrot.lane.b32.xlu0 %v7995_v45, %s6975_s17 }
0x3164   :  { %4993 = vrot.lane.b32.xlu1 %v8075_v15, %s6975_s17 }
0x3166   :  { %4991 = vrot.lane.b32.xlu0 %v8081_v34, %s6975_s17 }
0x3168   :  { %5457 = vrot.lane.b32.xlu1 %v8175_v49, %s6975_s17 }
0x316a   :  { %5455 = vrot.lane.b32.xlu0 %v8181_v60, %s6975_s17 }
0x31b2   :  { %v5898_v26 = vpop.permute.xlu1 %5897 }
0x31b3   :  { %v5902_v53 = vmul.f32 %v5898_v26, %v5892_v16 }
0x31b4   :  { %v5896_v22 = vpop.permute.xlu0 %5895 }
0x31b5   :  { %v5906_v25 = vadd.f32 %v5904_v57, %v5902_v53  ;;  %v5901_v27 = vmul.f32 %v5896_v22, %v5891_v32 }
0x31b6   :  { %v3593_v28 = vpop.permute.xlu1 %3592 }
0x31b7   :  { %v8266_v13 = vadd.f32 %v5906_v25, %v8175_v49  ;;  %v5905_v36 = vadd.f32 %v5903_v41, %v5901_v27  ;;  %v3597_v50 = vadd.f32 %v3593_v28, %v7840_v12 }
0x31b8   :  { %v3591_v38 = vpop.permute.xlu0 %3590 }
0x31b9   :  { %v8269_v37 = vadd.f32 %v5905_v36, %v8181_v60  ;;  %5913 = vrot.lane.b32.xlu1 %v8266_v13, %s6974_s15  ;;  %v3596_v54 = vadd.f32 %v3591_v38, %v7843_v18 }
0x31ba   :  { %v4058_v7 = vpop.permute.xlu1 %4057 }
0x31bb   :  { %5911 = vrot.lane.b32.xlu0 %v8269_v37, %s6974_s15  ;;  %v4062_v62 = vadd.f32 %v4058_v7, %v7913_v30 }
0x31bc   :  { %v4056_v55 = vpop.permute.xlu0 %4055 }
0x31bd   :  { %5921 = vrot.lane.b32.xlu1 %v8266_v13, %s6975_s17  ;;  %v4061_v23 = vadd.f32 %v4056_v55, %v7919_v59 }
0x31be   :  { %v4522_v17 = vpop.permute.xlu1 %4521 }
0x31bf   :  { %5919 = vrot.lane.b32.xlu0 %v8269_v37, %s6975_s17  ;;  %v4526_v44 = vadd.f32 %v4522_v17, %v7989_v6 }
0x31c0   :  { %v4520_v31 = vpop.permute.xlu0 %4519 }
0x31c1   :  { %v4525_v46 = vadd.f32 %v4520_v31, %v7995_v45 }
0x31c2   :  { %v4986_v58 = vpop.permute.xlu1 %4985 }
0x31c3   :  { %v4990_v59 = vadd.f32 %v4986_v58, %v8075_v15 }
0x31c4   :  { %v4984_v47 = vpop.permute.xlu0 %4983 }
0x31c5   :  { %v4989_v6 = vadd.f32 %v4984_v47, %v8081_v34 }
0x31c6   :  { %v5450_v63 = vpop.permute.xlu1 %5449 }
0x31c7   :  { %v5454_v45 = vadd.f32 %v5450_v63, %v8175_v49 }
0x31c8   :  { %v5448_v8 = vpop.permute.xlu0 %5447 }
0x31c9   :  { %v5453_v15 = vadd.f32 %v5448_v8, %v8181_v60 }
0x31ca   :  { %v3601_v14 = vpop.permute.xlu1 %3600 }
0x31cb   :  { %v3605_v56 = vadd.f32 %v3601_v14, %v3597_v50 }
0x31cc   :  { %v3599_v39 = vpop.permute.xlu0 %3598 }
0x31cd   :  { %v3607_v21 = vmul.f32 0.33333334, %v3605_v56  ;;  %v3604_v9 = vadd.f32 %v3599_v39, %v3596_v54 }
0x31ce   :  { %v4066_v0 = vpop.permute.xlu1 %4065 }
0x31cf   :  { %v3606_v10 = vmul.f32 0.33333334, %v3604_v9  ;;  %v4070_v1 = vadd.f32 %v4066_v0, %v4062_v62  ;;  %3612 = vrot.lane.b32.xlu1 %v3607_v21, %s6972_s20 }
0x31d0   :  { %v4064_v61 = vpop.permute.xlu0 %4063 }
0x31d1   :  { %v4072_v12 = vmul.f32 0.33333334, %v4070_v1  ;;  %v4069_v5 = vadd.f32 %v4064_v61, %v4061_v23  ;;  %3610 = vrot.lane.b32.xlu0 %v3606_v10, %s6972_s20 }
0x31d2   :  { %v4530_v18 = vpop.permute.xlu1 %4529 }
0x31d3   :  { %v4071_v30 = vmul.f32 0.33333334, %v4069_v5  ;;  %v4534_v24 = vadd.f32 %v4530_v18, %v4526_v44  ;;  %4077 = vrot.lane.b32.xlu1 %v4072_v12, %s6972_s20 }
0x31d4   :  { %v4528_v52 = vpop.permute.xlu0 %4527 }
0x31d5   :  { %v4536_v19 = vmul.f32 0.33333334, %v4534_v24  ;;  %v4533_v2 = vadd.f32 %v4528_v52, %v4525_v46  ;;  %4075 = vrot.lane.b32.xlu0 %v4071_v30, %s6972_s20 }
0x31d6   :  { %v4994_v33 = vpop.permute.xlu1 %4993 }
0x31d7   :  { %v4535_v42 = vmul.f32 0.33333334, %v4533_v2  ;;  %v4998_v43 = vadd.f32 %v4994_v33, %v4990_v59  ;;  %4541 = vrot.lane.b32.xlu1 %v4536_v19, %s6972_s20 }
0x31d8   :  { %v4992_v3 = vpop.permute.xlu0 %4991 }
0x31d9   :  { %v5000_v11 = vmul.f32 0.33333334, %v4998_v43  ;;  %v4997_v4 = vadd.f32 %v4992_v3, %v4989_v6  ;;  %4539 = vrot.lane.b32.xlu0 %v4535_v42, %s6972_s20 }
0x31da   :  { %v5458_v51 = vpop.permute.xlu1 %5457 }
0x31db   :  { %v4999_v29 = vmul.f32 0.33333334, %v4997_v4  ;;  %v5462_v40 = vadd.f32 %v5458_v51, %v5454_v45  ;;  %5005 = vrot.lane.b32.xlu1 %v5000_v11, %s6972_s20 }
0x31dc   :  { %v5456_v20 = vpop.permute.xlu0 %5455 }
0x31dd   :  { %v5464_v34 = vmul.f32 0.33333334, %v5462_v40  ;;  %v5461_v35 = vadd.f32 %v5456_v20, %v5453_v15  ;;  %5003 = vrot.lane.b32.xlu0 %v4999_v29, %s6972_s20 }
0x31df   :  { %v5463_v48 = vmul.f32 0.33333334, %v5461_v35  ;;  %5469 = vrot.lane.b32.xlu1 %v5464_v34, %s6972_s20 }
0x31e1   :  { %5467 = vrot.lane.b32.xlu0 %v5463_v48, %s6972_s20 }
0x322b   :  { %v5914_v49 = vpop.permute.xlu1 %5913 }
0x322c   :  { %v5918_v26 = vadd.f32 %v5914_v49, %v8266_v13 }
0x322d   :  { %v5912_v16 = vpop.permute.xlu0 %5911 }
0x322e   :  { %v5917_v60 = vadd.f32 %v5912_v16, %v8269_v37 }
0x322f   :  { %v5922_v57 = vpop.permute.xlu1 %5921 }
0x3230   :  { %v5926_v53 = vadd.f32 %v5922_v57, %v5918_v26 }
0x3231   :  { %v5920_v32 = vpop.permute.xlu0 %5919 }
0x3232   :  { %v5928_v22 = vmul.f32 0.33333334, %v5926_v53  ;;  %v5925_v25 = vadd.f32 %v5920_v32, %v5917_v60 }
0x3234   :  { %v5927_v41 = vmul.f32 0.33333334, %v5925_v25  ;;  %5933 = vrot.lane.b32.xlu1 %v5928_v22, %s6972_s20 }
0x3236   :  { %5931 = vrot.lane.b32.xlu0 %v5927_v41, %s6972_s20 }
0x3241   :  { %v3613_v27 = vpop.permute.xlu1 %3612 }
0x3242   :  { %3618 = vst.msk [vmem:[%s8369_s18 + $0x8] sm:$0xff] %vm3616_vm3, %v3613_v27 }
0x3243   :  { %v3611_v28 = vpop.permute.xlu0 %3610 }
0x3244   :  { %3617 = vst.msk [vmem:[%s8369_s18] sm:$0xff] %vm3616_vm3, %v3611_v28 }
0x3245   :  { %v4078_v13 = vpop.permute.xlu1 %4077 }
0x3246   :  { %4082 = vst.msk [vmem:[%s8369_s18 + $0x18] sm:$0xff] %vm3616_vm3, %v4078_v13 }
0x3247   :  { %v4076_v36 = vpop.permute.xlu0 %4075 }
0x3248   :  { %4081 = vst.msk [vmem:[%s8369_s18 + $0x10] sm:$0xff] %vm3616_vm3, %v4076_v36 }
0x3249   :  { %v4542_v38 = vpop.permute.xlu1 %4541 }
0x324a   :  { %4546 = vst.msk [vmem:[%s8369_s18 + $0x28] sm:$0xff] %vm3616_vm3, %v4542_v38 }
0x324b   :  { %v4540_v37 = vpop.permute.xlu0 %4539 }
0x324c   :  { %4545 = vst.msk [vmem:[%s8369_s18 + $0x20] sm:$0xff] %vm3616_vm3, %v4540_v37 }
0x324d   :  { %v5006_v7 = vpop.permute.xlu1 %5005 }
0x324e   :  { %5010 = vst.msk [vmem:[%s8369_s18 + $0x38] sm:$0xff] %vm3616_vm3, %v5006_v7 }
0x324f   :  { %v5004_v55 = vpop.permute.xlu0 %5003 }
0x3250   :  { %5009 = vst.msk [vmem:[%s8369_s18 + $0x30] sm:$0xff] %vm3616_vm3, %v5004_v55 }
0x3251   :  { %v5470_v17 = vpop.permute.xlu1 %5469 }
0x3252   :  { %5474 = vst.msk [vmem:[%s8369_s18 + $0x48] sm:$0xff] %vm3616_vm3, %v5470_v17 }
0x3253   :  { %v5468_v31 = vpop.permute.xlu0 %5467 }
0x3254   :  { %5473 = vst.msk [vmem:[%s8369_s18 + $0x40] sm:$0xff] %vm3616_vm3, %v5468_v31 }
0x32a6   :  { %v5934_v58 = vpop.permute.xlu1 %5933 }
0x32a7   :  { %5938 = vst.msk [vmem:[%s8369_s18 + $0x58] sm:$0xff] %vm3616_vm3, %v5934_v58 }
0x32a8   :  { %v5932_v47 = vpop.permute.xlu0 %5931 }
0x32a9   :  { %5937 = vst.msk [vmem:[%s8369_s18 + $0x50] sm:$0xff] %vm3616_vm3, %v5932_v47 }

// kernel: model_forward.2
= control target key start
LH: loop header
LB: loop body
LE: loop exit
PB: predicated region body
PF: predicated region fallthrough
CT: control target
= control target key end

     0   :  { %vm144_vm0 = vcmask 1041408   ;;  %vm119_vm1 = vcmask 31744   ;;  %vm78_vm2 = vcmask 519168   ;;  %vm1178_vm3 = vcmask 523264   ;;  %s10634_s8 = inlined_call_operand.vmem [shape: bf16[4,64], index: 8, kind: input, shape index: {}]   ;;  %s10635_s1 = inlined_call_operand.vmem [shape: bf16[3,4,64], index: 1, kind: input, shape index: {}]   ;;  %s10636_s0 = inlined_call_operand.vmem [shape: f32[128,4], index: 0, kind: input, shape index: {}]   ;;  %s10637_s2 = inlined_call_operand.vmem [shape: bf16[128,384], index: 2, kind: input, shape index: {}]   ;;  %s10638_s5 = inlined_call_operand.vmem [shape: bf16[5,64,64], index: 5, kind: input, shape index: {}]   ;;  %s10639_s3 = inlined_call_operand.vmem [shape: f32[1,64], index: 3, kind: input, shape index: {}]   ;;  %s10640_s4 = inlined_call_operand.vmem [shape: f32[128,64], index: 4, kind: input, shape index: {}]   ;;  %s10641_s10 = inlined_call_operand.vmem [shape: bf16[3,64,64], index: 10, kind: input, shape index: {}]   ;;  %s10642_s9 = inlined_call_operand.vmem [shape: f32[1,64], index: 9, kind: input, shape index: {}]   ;;  %s10643_s6 = inlined_call_operand.vmem [shape: f32[1,64], index: 6, kind: input, shape index: {}]   ;;  %s10644_s7 = inlined_call_operand.vmem [shape: f32[1,64], index: 7, kind: input, shape index: {}]   ;;  %s10645_s11 = inlined_call_operand.vmem [shape: bf16[128,384], index: 11, kind: input, shape index: {}]   ;;  %s10646_s14 = inlined_call_operand.vmem [shape: bf16[5,64,64], index: 14, kind: input, shape index: {}]   ;;  %s10647_s12 = inlined_call_operand.vmem [shape: f32[1,64], index: 12, kind: input, shape index: {}]   ;;  %s10648_s13 = inlined_call_operand.vmem [shape: f32[128,64], index: 13, kind: input, shape index: {}]   ;;  %s10649_s17 = inlined_call_operand.vmem [shape: bf16[3,64,64], index: 17, kind: input, shape index: {}]   ;;  %s10650_s15 = inlined_call_operand.vmem [shape: f32[1,64], index: 15, kind: input, shape index: {}]   ;;  %s10651_s16 = inlined_call_operand.vmem [shape: f32[1,64], index: 16, kind: input, shape index: {}]   ;;  %s10652_s18 = inlined_call_operand.vmem [shape: bf16[128,384], index: 18, kind: input, shape index: {}]   ;;  %s10653_s21 = inlined_call_operand.vmem [shape: bf16[5,64,64], index: 21, kind: input, shape index: {}]   ;;  %s10654_s19 = inlined_call_operand.vmem [shape: f32[1,64], index: 19, kind: input, shape index: {}]   ;;  %s10655_s20 = inlined_call_operand.vmem [shape: f32[128,64], index: 20, kind: input, shape index: {}]   ;;  %s10656_s22 = inlined_call_operand.vmem [shape: f32[1,64], index: 22, kind: input, shape index: {}]   ;;  %s10657_s23 = inlined_call_operand.vmem [shape: f32[1,64], index: 23, kind: input, shape index: {}]   ;;  %s10658_s24 = inlined_call_operand.vmem [shape: f32[128,64], index: 24, kind: output, shape index: {}]  }
   0x1   :  { %10723 = sst [smem:[#allocation23_spill]] %s10634_s8 }
   0x2   :  { %10724 = sst [smem:[#allocation24_spill]] %s10635_s1 }
   0x3   :  { %10725 = sst [smem:[#allocation25_spill]] %s10636_s0 }
   0x4   :  { %10726 = sst [smem:[#allocation26_spill]] %s10637_s2 }
   0x5   :  { %10727 = sst [smem:[#allocation27_spill]] %s10638_s5 }
   0x6   :  { %10728 = sst [smem:[#allocation28_spill]] %s10639_s3 }
   0x7   :  { %10729 = sst [smem:[#allocation29_spill]] %s10640_s4 }
   0x8   :  { %10730 = sst [smem:[#allocation30_spill]] %s10641_s10 }
   0x9   :  { %10731 = sst [smem:[#allocation31_spill]] %s10642_s9 }
   0xa   :  { %s10732_s27 = sld [smem:[#allocation23_spill]] }
   0xb   :  { %s10733_s0 = sld [smem:[#allocation24_spill]] }
   0xc   :  { %s10734_s10 = sld [smem:[#allocation25_spill]] }
   0xd   :  { %s10747_s8 = sld [smem:[#allocation27_spill]] }
   0xe   :  { %s10748_s2 = sld [smem:[#allocation28_spill]] }
   0xf   :  { %s10749_s9 = sld [smem:[#allocation29_spill]] }
  0x10   :  { %v111_v0 = vld [vmem:[%s10732_s27] sm:$0x3]  ;;  %s10735_s27 = sld [smem:[#allocation26_spill]] }
  0x11   :  { %v245_v1 = vld [vmem:[%s10733_s0] sm:$0x3]  ;;  %8206 = vmatprep.subr.msk.bf16.mxu0 %vm144_vm0, %v111_v0  ;;  %v146_v3 = vsel %vm144_vm0, %v111_v0, 0  ;;  %v6332_v10 = vld [vmem:[%s10733_s0 + $0x2] sm:$0x3]  ;;  %s10750_s26 = sld [smem:[#allocation30_spill]] }
  0x12   :  { %v87_v2 = vld [vmem:[%s10734_s10] sm:$0xff]  ;;  %8207 = vmatprep.subr.msk.bf16.mxu1 %vm144_vm0, %v245_v1  ;;  %v247_v4 = vsel %vm144_vm0, %v245_v1, 0  ;;  %v88_v5 = vld [vmem:[%s10734_s10 + $0x8] sm:$0xff]  ;;  %v89_v6 = vld [vmem:[%s10734_s10 + $0x10] sm:$0xff]  ;;  %7535 = vmatpush3.bf16.msra.mxu0 %v146_v3  ;;  %v357_v13 = vsel %vm144_vm0, %v6332_v10, 0 }
  0x13   :  { %v90_v7 = vld [vmem:[%s10734_s10 + $0x18] sm:$0xff]  ;;  %7553 = vmatpush3.bf16.msra.mxu1 %v247_v4  ;;  %v103_v8 = vpack.c.bf16 %v88_v5, %v87_v2  ;;  %v91_v11 = vld [vmem:[%s10734_s10 + $0x20] sm:$0xff]  ;;  %v92_v12 = vld [vmem:[%s10734_s10 + $0x28] sm:$0xff]  ;;  %8208 = vmatprep.subr.msk.bf16.mxu0 %vm144_vm0, %v6332_v10 }
  0x14   :  { %v104_v9 = vpack.c.bf16 %v90_v7, %v89_v6  ;;  %v105_v14 = vpack.c.bf16 %v92_v12, %v91_v11  ;;  %v93_v15 = vld [vmem:[%s10734_s10 + $0x30] sm:$0xff]  ;;  %v94_v16 = vld [vmem:[%s10734_s10 + $0x38] sm:$0xff]  ;;  %v6341_v17 = vld [vmem:[%s10733_s0 + $0x4] sm:$0x3] }
  0x15   :  { %7536 = vmatprep.mubr.msk.bf16.mxu0 %vm119_vm1, %v103_v8  ;;  %7554 = vmatprep.mubr.msk.bf16.mxu1 %vm119_vm1, %v103_v8  ;;  %v95_v18 = vld [vmem:[%s10734_s10 + $0x40] sm:$0xff]  ;;  %v96_v19 = vld [vmem:[%s10734_s10 + $0x48] sm:$0xff]  ;;  %v467_v20 = vsel %vm144_vm0, %v6341_v17, 0  ;;  %v106_v21 = vpack.c.bf16 %v94_v16, %v93_v15  ;;  %v97_v23 = vld [vmem:[%s10734_s10 + $0x50] sm:$0xff] }
  0x16   :  { %7537 = vmatmul.mubr.msk.bf16.vlgmr.msra.gmra.mxu0 %vm119_vm1, %v104_v9  ;;  %7555 = vmatmul.mubr.msk.bf16.vlgmr.msra.gmra.mxu1 %vm119_vm1, %v104_v9  ;;  %v107_v22 = vpack.c.bf16 %v96_v19, %v95_v18  ;;  %v98_v24 = vld [vmem:[%s10734_s10 + $0x58] sm:$0xff]  ;;  %v99_v25 = vld [vmem:[%s10734_s10 + $0x60] sm:$0xff]  ;;  %v100_v26 = vld [vmem:[%s10734_s10 + $0x68] sm:$0xff] }
  0x17   :  { %7571 = vmatpush3.bf16.msra.mxu0 %v357_v13  ;;  %7540 = vmatprep.mubr.msk.bf16.mxu0 %vm119_vm1, %v105_v14  ;;  %v108_v27 = vpack.c.bf16 %v98_v24, %v97_v23  ;;  %v109_v28 = vpack.c.bf16 %v100_v26, %v99_v25  ;;  %v101_v29 = vld [vmem:[%s10734_s10 + $0x70] sm:$0xff]  ;;  %v102_v30 = vld [vmem:[%s10734_s10 + $0x78] sm:$0xff] }
  0x18   :  { %7558 = vmatprep.mubr.msk.bf16.mxu1 %vm119_vm1, %v105_v14  ;;  %8209 = vmatprep.subr.msk.bf16.mxu1 %vm144_vm0, %v6341_v17  ;;  %v110_v31 = vpack.c.bf16 %v102_v30, %v101_v29  ;;  %v8213_v32 = vld [vmem:[%s10735_s27 + $0x4] ss:$12 sps:$4 sm:$0xff]   ;;  %v8214_v33 = vld [vmem:[%s10735_s27 + $0x8] ss:$12 sps:$4 sm:$0xff]  }
  0x19   :  { %7589 = vmatpush3.bf16.msra.mxu1 %v467_v20 }
  0x1e   :  { %7541 = vmatmul.mubr.msk.bf16.gmra.mxu0 %vm119_vm1, %v106_v21  ;;  %7559 = vmatmul.mubr.msk.bf16.gmra.mxu1 %vm119_vm1, %v106_v21 }
  0x1f   :  { %7544 = vmatprep.mubr.msk.bf16.mxu0 %vm119_vm1, %v107_v22  ;;  %7562 = vmatprep.mubr.msk.bf16.mxu1 %vm119_vm1, %v107_v22 }
  0x26   :  { %7545 = vmatmul.mubr.msk.bf16.gmra.mxu0 %vm119_vm1, %v108_v27  ;;  %7563 = vmatmul.mubr.msk.bf16.gmra.mxu1 %vm119_vm1, %v108_v27 }
  0x27   :  { %7548 = vmatprep.mubr.msk.bf16.mxu0 %vm119_vm1, %v109_v28  ;;  %7566 = vmatprep.mubr.msk.bf16.mxu1 %vm119_vm1, %v109_v28 }
  0x2e   :  { %7549 = vmatmul.mubr.msk.bf16.gmra.mxu0 %vm119_vm1, %v110_v31  ;;  %7567 = vmatmul.mubr.msk.bf16.gmra.mxu1 %vm119_vm1, %v110_v31 }
  0x2f   :  { %7572 = vmatprep.mubr.msk.bf16.mxu0 %vm119_vm1, %v103_v8  ;;  %7590 = vmatprep.mubr.msk.bf16.mxu1 %vm119_vm1, %v103_v8 }
  0x36   :  { %7573 = vmatmul.mubr.msk.bf16.vlgmr.msra.gmra.mxu0 %vm119_vm1, %v104_v9  ;;  %7591 = vmatmul.mubr.msk.bf16.vlgmr.msra.gmra.mxu1 %vm119_vm1, %v104_v9 }
  0x37   :  { %7576 = vmatprep.mubr.msk.bf16.mxu0 %vm119_vm1, %v105_v14  ;;  %7594 = vmatprep.mubr.msk.bf16.mxu1 %vm119_vm1, %v105_v14 }
  0x3e   :  { %7577 = vmatmul.mubr.msk.bf16.gmra.mxu0 %vm119_vm1, %v106_v21  ;;  %7595 = vmatmul.mubr.msk.bf16.gmra.mxu1 %vm119_vm1, %v106_v21 }
  0x3f   :  { %7580 = vmatprep.mubr.msk.bf16.mxu0 %vm119_vm1, %v107_v22  ;;  %7598 = vmatprep.mubr.msk.bf16.mxu1 %vm119_vm1, %v107_v22 }
  0x46   :  { %7581 = vmatmul.mubr.msk.bf16.gmra.mxu0 %vm119_vm1, %v108_v27  ;;  %7599 = vmatmul.mubr.msk.bf16.gmra.mxu1 %vm119_vm1, %v108_v27 }
  0x47   :  { %7584 = vmatprep.mubr.msk.bf16.mxu0 %vm119_vm1, %v109_v28  ;;  %7602 = vmatprep.mubr.msk.bf16.mxu1 %vm119_vm1, %v109_v28 }
  0x4e   :  { %7585 = vmatmul.mubr.msk.bf16.gmra.mxu0 %vm119_vm1, %v110_v31  ;;  %7603 = vmatmul.mubr.msk.bf16.gmra.mxu1 %vm119_vm1, %v110_v31 }
  0x4f   :  { %766 = vmatprep.mubr.bf16.mxu0 %v8213_v32  ;;  %7622 = vmatprep.mubr.bf16.mxu1 %v8214_v33 }
  0xd6   :  { %v8722_v34 = vpop.f32.mrf.mxu0  ;;  %v8724_v35 = vpop.f32.mrf.mxu1 }
  0xd8   :  { %v8726_v36 = vpop.f32.mrf.mxu0  ;;  %v8728_v37 = vpop.f32.mrf.mxu1 }
  0xda   :  { %v8730_v38 = vpop.f32.mrf.mxu0  ;;  %v8732_v39 = vpop.f32.mrf.mxu1 }
  0xdc   :  { %v8736_v41 = vpop.f32.mrf.mxu0  ;;  %v8738_v42 = vpop.f32.mrf.mxu1 }
  0xde   :  { %v8740_v43 = vpop.f32.mrf.mxu0  ;;  %v8742_v44 = vpop.f32.mrf.mxu1 }
  0xe0   :  { %v8744_v45 = vpop.f32.mrf.mxu0  ;;  %v8746_v46 = vpop.f32.mrf.mxu1 }
  0xe2   :  { %v8748_v47 = vpop.f32.mrf.mxu0  ;;  %v8750_v48 = vpop.f32.mrf.mxu1 }
  0xe4   :  { %v8754_v50 = vpop.f32.mrf.mxu0  ;;  %v8756_v51 = vpop.f32.mrf.mxu1 }
  0xe5   :  { %10736 = vst [vmem:[#allocation3_spill] sm:$0xff] %v8754_v50 }
  0xe6   :  { %v8758_v52 = vpop.f32.mrf.mxu0  ;;  %v8760_v53 = vpop.f32.mrf.mxu1 }
  0xe7   :  { %10737 = vst [vmem:[#allocation4_spill] sm:$0xff] %v8758_v52 }
  0xe8   :  { %v8762_v54 = vpop.f32.mrf.mxu0  ;;  %v8764_v55 = vpop.f32.mrf.mxu1 }
  0xe9   :  { %10738 = vst [vmem:[#allocation5_spill] sm:$0xff] %v8762_v54 }
  0xea   :  { %v8766_v56 = vpop.f32.mrf.mxu0  ;;  %v8768_v57 = vpop.f32.mrf.mxu1 }
  0xeb   :  { %10739 = vst [vmem:[#allocation6_spill] sm:$0xff] %v8766_v56 }
  0xec   :  { %v8770_v58 = vpop.f32.mrf.mxu0  ;;  %v8772_v59 = vpop.f32.mrf.mxu1 }
  0xed   :  { %10740 = vst [vmem:[#allocation7_spill] sm:$0xff] %v8770_v58 }
  0xee   :  { %v8774_v60 = vpop.f32.mrf.mxu0  ;;  %v7568_v61 = vpop.f32.mrf.mxu1 }
  0xef   :  { %10741 = vst [vmem:[#allocation8_spill] sm:$0xff] %v8774_v60 }
  0xf0   :  { %v8776_v62 = vpop.f32.mrf.mxu0  ;;  %v331_v63 = vpop.f32.mrf.mxu1 }
  0xf1   :  { %10742 = vst [vmem:[#allocation9_spill] sm:$0xff] %v8776_v62 }
  0xf2   :  { %v8778_v0 = vpop.f32.mrf.mxu0  ;;  %v7569_v1 = vpop.f32.mrf.mxu1 }
  0xf3   :  { %10743 = vst [vmem:[#allocation10_spill] sm:$0xff] %v8778_v0 }
  0xf4   :  { %v8780_v2 = vpop.f32.mrf.mxu0  ;;  %v334_v3 = vpop.f32.mrf.mxu1 }
  0xf5   :  { %10744 = vst [vmem:[#allocation11_spill] sm:$0xff] %v8780_v2  ;;  %v353_v2 = vpack.c.bf16 %v7569_v1, %v7568_v61  ;;  %v352_v54 = vpack.c.bf16 %v334_v3, %v331_v63  ;;  %v351_v61 = vpack.c.bf16 %v8768_v57, %v8760_v53  ;;  %v348_v53 = vpack.c.bf16 %v8756_v51, %v8746_v46  ;;  %v8211_v51 = vld [vmem:[%s10735_s27] ss:$12 sps:$4 sm:$0xff]   ;;  %v8221_v63 = vld [vmem:[%s10735_s27 + $0x30] ss:$12 sps:$4 sm:$0xff]  }
  0xf6   :  { %v8782_v4 = vpop.f32.mrf.mxu0  ;;  %v8784_v5 = vpop.f32.mrf.mxu1  ;;  %v346_v46 = vpack.c.bf16 %v8738_v42, %v8728_v37  ;;  %v8215_v57 = vld [vmem:[%s10735_s27 + $0x20] ss:$12 sps:$4 sm:$0xff]   ;;  %v8218_v37 = vld [vmem:[%s10735_s27 + $0x18] ss:$12 sps:$4 sm:$0xff]   ;;  %v8223_v42 = vld [vmem:[%s10735_s27 + $0x50] ss:$12 sps:$4 sm:$0xff]  }
  0xf7   :  { %v8235_v3 = vld [vmem:[%s10735_s27 + $0x98] ss:$12 sps:$4 sm:$0xff]  }
  0xf8   :  { %v8786_v6 = vpop.f32.mrf.mxu0  ;;  %v8788_v7 = vpop.f32.mrf.mxu1 }
  0xfa   :  { %v8790_v8 = vpop.f32.mrf.mxu0  ;;  %v8792_v9 = vpop.f32.mrf.mxu1 }
  0xfc   :  { %v8794_v10 = vpop.f32.mrf.mxu0  ;;  %v8796_v11 = vpop.f32.mrf.mxu1 }
  0xfe   :  { %v7578_v12 = vpop.f32.mrf.mxu0  ;;  %v7596_v13 = vpop.f32.mrf.mxu1 }
 0x100   :  { %v409_v14 = vpop.f32.mrf.mxu0  ;;  %v519_v15 = vpop.f32.mrf.mxu1 }
 0x102   :  { %v7579_v16 = vpop.f32.mrf.mxu0  ;;  %v7597_v17 = vpop.f32.mrf.mxu1 }
 0x104   :  { %v412_v18 = vpop.f32.mrf.mxu0  ;;  %v522_v19 = vpop.f32.mrf.mxu1 }
 0x106   :  { %v7582_v20 = vpop.f32.mrf.mxu0  ;;  %v7600_v21 = vpop.f32.mrf.mxu1 }
 0x108   :  { %v425_v22 = vpop.f32.mrf.mxu0  ;;  %v535_v23 = vpop.f32.mrf.mxu1 }
 0x10a   :  { %v7583_v24 = vpop.f32.mrf.mxu0  ;;  %v7601_v25 = vpop.f32.mrf.mxu1 }
 0x10b   :  { %v571_v56 = vpack.c.bf16 %v7601_v25, %v7600_v21  ;;  %v461_v52 = vpack.c.bf16 %v7583_v24, %v7582_v20  ;;  %v8248_v20 = vld [vmem:[%s10747_s8 + $0x28] sm:$0xff]   ;;  %v8249_v21 = vld [vmem:[%s10747_s8] sm:$0xff]   ;;  %v8260_v25 = vld [vmem:[%s10747_s8 + $0x78] sm:$0xff]  }
 0x10c   :  { %v428_v26 = vpop.f32.mrf.mxu0  ;;  %v538_v27 = vpop.f32.mrf.mxu1 }
 0x10d   :  { %v570_v50 = vpack.c.bf16 %v538_v27, %v535_v23  ;;  %v460_v1 = vpack.c.bf16 %v428_v26, %v425_v22  ;;  %v8250_v22 = vld [vmem:[%s10747_s8 + $0x20] sm:$0xff]   ;;  %v8261_v26 = vld [vmem:[%s10747_s8 + $0x70] sm:$0xff]   ;;  %v8930_v27 = vld [vmem:[%s10747_s8 + $0x58] sm:$0xff]  }
 0x10e   :  { %v7586_v28 = vpop.f32.mrf.mxu0  ;;  %v7604_v29 = vpop.f32.mrf.mxu1 }
 0x110   :  { %v441_v30 = vpop.f32.mrf.mxu0  ;;  %v551_v31 = vpop.f32.mrf.mxu1 }
 0x112   :  { %v7587_v32 = vpop.f32.mrf.mxu0  ;;  %v7605_v33 = vpop.f32.mrf.mxu1 }
 0x113   :  { %v463_v40 = vpack.c.bf16 %v7587_v32, %v7586_v28  ;;  %v573_v49 = vpack.c.bf16 %v7605_v33, %v7604_v29  ;;  %v8264_v28 = vld [vmem:[%s10747_s8 + $0x68] sm:$0xff]   ;;  %v8266_v29 = vld [vmem:[%s10747_s8 + $0x60] sm:$0xff]  }
 0x114   :  { %v444_v0 = vpop.f32.mrf.mxu0  ;;  %v554_v62 = vpop.f32.mrf.mxu1 }
 0x115   :  { %v462_v60 = vpack.c.bf16 %v444_v0, %v441_v30  ;;  %7042 = vmatprep.subr.bf16.mxu0 %v463_v40  ;;  %7606 = vmatprep.subr.bf16.mxu1 %v573_v49  ;;  %v572_v58 = vpack.c.bf16 %v554_v62, %v551_v31  ;;  %v350_v40 = vpack.c.bf16 %v8772_v59, %v8764_v55  ;;  %v8219_v59 = vld [vmem:[%s10735_s27 + $0x34] ss:$12 sps:$4 sm:$0xff]  }
 0x116   :  { %7043 = vmatpush3.bf16.msra.mxu0 %v353_v2  ;;  %7607 = vmatpush3.bf16.msra.mxu1 %v573_v49  ;;  %v459_v49 = vpack.c.bf16 %v7579_v16, %v7578_v12  ;;  %v457_v55 = vpack.c.bf16 %v8790_v8, %v8782_v4  ;;  %v8230_v62 = vld [vmem:[%s10735_s27 + $0x68] ss:$12 sps:$4 sm:$0xff]   ;;  %v8231_v0 = vld [vmem:[%s10735_s27 + $0x80] ss:$12 sps:$4 sm:$0xff]  }
 0x117   :  { %7044 = vmatprep.subr.bf16.mxu0 %v462_v60  ;;  %7608 = vmatprep.subr.bf16.mxu1 %v572_v58  ;;  %v569_v60 = vpack.c.bf16 %v7597_v17, %v7596_v13  ;;  %v8224_v2 = vld [vmem:[%s10735_s27 + $0x4c] ss:$12 sps:$4 sm:$0xff]   ;;  %v8226_v4 = vld [vmem:[%s10735_s27 + $0x48] ss:$12 sps:$4 sm:$0xff]  }
 0x118   :  { %v8232_v8 = vld [vmem:[%s10735_s27 + $0x7c] ss:$12 sps:$4 sm:$0xff]   ;;  %v8240_v12 = vld [vmem:[%s10735_s27 + $0xac] ss:$12 sps:$4 sm:$0xff]   ;;  %v8245_v16 = vld [vmem:[%s10747_s8 + $0x10] sm:$0xff]  }
 0x119   :  { %v8242_v13 = vld [vmem:[%s10735_s27 + $0xa8] ss:$12 sps:$4 sm:$0xff]  }
 0x11a   :  { %7045 = vmatpush3.bf16.msra.mxu0 %v352_v54  ;;  %7609 = vmatpush3.bf16.msra.mxu1 %v572_v58  ;;  %v458_v54 = vpack.c.bf16 %v412_v18, %v409_v14  ;;  %v10745_v58 = vpack.c.bf16 %v8750_v48, %v8742_v44  ;;  %v456_v44 = vpack.c.bf16 %v8794_v10, %v8786_v6  ;;  %v8227_v6 = vld [vmem:[%s10735_s27 + $0x64] ss:$12 sps:$4 sm:$0xff]   ;;  %v8237_v10 = vld [vmem:[%s10735_s27 + $0x94] ss:$12 sps:$4 sm:$0xff]   ;;  %v8243_v14 = vld [vmem:[%s10747_s8 + $0x18] sm:$0xff]  }
 0x11b   :  { %7046 = vmatprep.subr.bf16.mxu0 %v461_v52  ;;  %7610 = vmatprep.subr.bf16.mxu1 %v571_v56  ;;  %v568_v52 = vpack.c.bf16 %v522_v19, %v519_v15  ;;  %v566_v48 = vpack.c.bf16 %v8796_v11, %v8788_v7  ;;  %v8229_v7 = vld [vmem:[%s10735_s27 + $0x60] ss:$12 sps:$4 sm:$0xff]   ;;  %v8239_v11 = vld [vmem:[%s10735_s27 + $0x90] ss:$12 sps:$4 sm:$0xff]   ;;  %v8490_v19 = vmov 0  }
 0x11c   :  { %v8244_v15 = vld [vmem:[%s10747_s8 + $0x38] sm:$0xff]   ;;  %v8246_v17 = vld [vmem:[%s10747_s8 + $0x30] sm:$0xff]   ;;  %v8247_v18 = vld [vmem:[%s10747_s8 + $0x8] sm:$0xff]   ;;  %79 = vst.msk [vmem:[#allocation2] sm:$0xf] %vm78_vm2, %v8490_v19 }
 0x11d   :  { %80 = vst.msk [vmem:[#allocation2 + $0x4] sm:$0xf] %vm78_vm2, %v8490_v19  ;;  %81 = vst.msk [vmem:[#allocation2 + $0x8] sm:$0xf] %vm78_vm2, %v8490_v19 }
 0x11e   :  { %7047 = vmatpush3.bf16.msra.mxu0 %v351_v61  ;;  %7611 = vmatpush3.bf16.msra.mxu1 %v571_v56  ;;  %v10746_v56 = vpack.c.bf16 %v8732_v39, %v8724_v35  ;;  %v8216_v35 = vld [vmem:[%s10735_s27 + $0x1c] ss:$12 sps:$4 sm:$0xff]   ;;  %v8222_v39 = vld [vmem:[%s10735_s27 + $0x38] ss:$12 sps:$4 sm:$0xff]   ;;  %82 = vst.msk [vmem:[#allocation2 + $0xc] sm:$0xf] %vm78_vm2, %v8490_v19 }
 0x11f   :  { %7048 = vmatprep.subr.bf16.mxu0 %v460_v1  ;;  %7612 = vmatprep.subr.bf16.mxu1 %v570_v50  ;;  %83 = vst.msk [vmem:[#allocation2 + $0x50] sm:$0xf] %vm78_vm2, %v8490_v19  ;;  %84 = vst.msk [vmem:[#allocation2 + $0x54] sm:$0xf] %vm78_vm2, %v8490_v19 }
 0x120   :  { %85 = vst.msk [vmem:[#allocation2 + $0x58] sm:$0xf] %vm78_vm2, %v8490_v19  ;;  %86 = vst.msk [vmem:[#allocation2 + $0x5c] sm:$0xf] %vm78_vm2, %v8490_v19 }
 0x122   :  { %7049 = vmatpush3.bf16.msra.mxu0 %v350_v40  ;;  %7613 = vmatpush3.bf16.msra.mxu1 %v570_v50  ;;  %v567_v50 = vpack.c.bf16 %v8792_v9, %v8784_v5  ;;  %v8236_v5 = vld [vmem:[%s10735_s27 + $0xb0] ss:$12 sps:$4 sm:$0xff]   ;;  %v8234_v9 = vld [vmem:[%s10735_s27 + $0x78] ss:$12 sps:$4 sm:$0xff]   ;;  %v8942_v40 = vld [vmem:[%s10748_s2] ss:$0 sm:$0xff] }
 0x123   :  { %7050 = vmatprep.subr.bf16.mxu0 %v459_v49  ;;  %7614 = vmatprep.subr.bf16.mxu1 %v569_v60  ;;  %s10758_s2 = sld [smem:[#allocation31_spill]] }
 0x124   :  { %v8251_v23 = vld [vmem:[#allocation2] sm:$0xff]  }
 0x125   :  { %v8252_v24 = vld [vmem:[#allocation2 + $0x8] sm:$0xff]  }
 0x126   :  { %7051 = vmatpush3.bf16.msra.mxu0 %v10745_v58  ;;  %7615 = vmatpush3.bf16.msra.mxu1 %v569_v60 }
 0x127   :  { %7052 = vmatprep.subr.bf16.mxu0 %v458_v54  ;;  %7616 = vmatprep.subr.bf16.mxu1 %v568_v52  ;;  %v951_v54 = vld [vmem:[%s10749_s9] sm:$0xff] }
 0x12a   :  { %7053 = vmatpush3.bf16.msra.mxu0 %v348_v53  ;;  %7617 = vmatpush3.bf16.msra.mxu1 %v568_v52 }
 0x12b   :  { %7054 = vmatprep.subr.bf16.mxu0 %v457_v55  ;;  %7618 = vmatprep.subr.bf16.mxu1 %v567_v50 }
 0x12e   :  { %7055 = vmatpush3.bf16.msra.mxu0 %v10746_v56  ;;  %7619 = vmatpush3.bf16.msra.mxu1 %v567_v50  ;;  %v952_v56 = vld [vmem:[%s10749_s9 + $0x8] sm:$0xff] }
 0x12f   :  { %7056 = vmatprep.subr.bf16.mxu0 %v456_v44  ;;  %7620 = vmatprep.subr.bf16.mxu1 %v566_v48 }
 0x132   :  { %7057 = vmatpush3.bf16.msra.mxu0 %v346_v46  ;;  %7621 = vmatpush3.bf16.msra.mxu1 %v566_v48 }
 0x133   :  { %7662 = vmatprep.subr.bf16.mxu0 %v8243_v14  ;;  %7638 = vmatprep.subr.bf16.mxu1 %v8244_v15 }
 0x135   :  { %767 = vmatmul.mubr.bf16.vlgmr.msra.gmra.mxu0 %v8211_v51  ;;  %7623 = vmatmul.mubr.bf16.vlgmr.msra.gmra.mxu1 %v8215_v57 }
 0x136   :  { %774 = vmatprep.mubr.bf16.mxu0 %v8216_v35  ;;  %7626 = vmatprep.mubr.bf16.mxu1 %v8222_v39 }
 0x137   :  { %7663 = vmatpush3.bf16.msra.mxu0 %v8243_v14  ;;  %7639 = vmatpush3.bf16.msra.mxu1 %v8244_v15 }
 0x138   :  { %7664 = vmatprep.subr.bf16.mxu0 %v8245_v16  ;;  %7640 = vmatprep.subr.bf16.mxu1 %v8246_v17 }
 0x13b   :  { %7665 = vmatpush3.bf16.msra.mxu0 %v8245_v16  ;;  %7641 = vmatpush3.bf16.msra.mxu1 %v8246_v17 }
 0x13c   :  { %7666 = vmatprep.subr.bf16.mxu0 %v8247_v18  ;;  %7642 = vmatprep.subr.bf16.mxu1 %v8248_v20 }
 0x13d   :  { %775 = vmatmul.mubr.bf16.gmra.mxu0 %v8218_v37  ;;  %7627 = vmatmul.mubr.bf16.gmra.mxu1 %v8223_v42 }
 0x13e   :  { %782 = vmatprep.mubr.bf16.mxu0 %v8219_v59  ;;  %7630 = vmatprep.mubr.bf16.mxu1 %v8230_v62 }
 0x13f   :  { %7667 = vmatpush3.bf16.msra.mxu0 %v8247_v18  ;;  %7643 = vmatpush3.bf16.msra.mxu1 %v8248_v20  ;;  %v955_v20 = vld [vmem:[%s10749_s9 + $0x20] sm:$0xff] }
 0x140   :  { %7668 = vmatprep.subr.bf16.mxu0 %v8249_v21  ;;  %7644 = vmatprep.subr.bf16.mxu1 %v8250_v22 }
 0x143   :  { %7669 = vmatpush3.bf16.msra.mxu0 %v8249_v21  ;;  %7645 = vmatpush3.bf16.msra.mxu1 %v8250_v22 }
 0x144   :  { %7710 = vmatprep.subr.bf16.mxu0 %v8260_v25  ;;  %7686 = vmatprep.subr.bf16.mxu1 %v8930_v27 }
 0x145   :  { %783 = vmatmul.mubr.bf16.gmra.mxu0 %v8221_v63  ;;  %7631 = vmatmul.mubr.bf16.gmra.mxu1 %v8231_v0  ;;  %v953_v63 = vld [vmem:[%s10749_s9 + $0x10] sm:$0xff] }
 0x146   :  { %790 = vmatprep.mubr.bf16.mxu0 %v8224_v2  ;;  %7634 = vmatprep.mubr.bf16.mxu1 %v8235_v3 }
 0x14d   :  { %791 = vmatmul.mubr.bf16.gmra.mxu0 %v8226_v4  ;;  %7635 = vmatmul.mubr.bf16.gmra.mxu1 %v8236_v5 }
 0x14e   :  { %798 = vmatprep.mubr.bf16.mxu0 %v8227_v6  ;;  %7646 = vmatprep.mubr.msk.bf16.mxu1 %vm1178_vm3, %v8252_v24 }
 0x155   :  { %799 = vmatmul.mubr.bf16.gmra.mxu0 %v8229_v7 }
 0x156   :  { %806 = vmatprep.mubr.bf16.mxu0 %v8232_v8 }
 0x15d   :  { %807 = vmatmul.mubr.bf16.gmra.mxu0 %v8234_v9 }
 0x15e   :  { %814 = vmatprep.mubr.bf16.mxu0 %v8237_v10  ;;  %v954_v10 = vld [vmem:[%s10749_s9 + $0x18] sm:$0xff] }
 0x165   :  { %815 = vmatmul.mubr.bf16.gmra.mxu0 %v8239_v11 }
 0x166   :  { %822 = vmatprep.mubr.bf16.mxu0 %v8240_v12 }
 0x16d   :  { %823 = vmatmul.mubr.bf16.gmra.mxu0 %v8242_v13 }
 0x16e   :  { %7670 = vmatprep.mubr.msk.bf16.mxu0 %vm1178_vm3, %v8251_v23 }
 0x175   :  { %7671 = vmatmul.mubr.msk.bf16.vlgmr.msra.gmra.mxu0 %vm1178_vm3, %v8252_v24 }
 0x176   :  { %7711 = vmatpush3.bf16.msra.mxu0 %v8260_v25 }
 0x177   :  { %7712 = vmatprep.subr.bf16.mxu0 %v8261_v26 }
 0x17a   :  { %7713 = vmatpush3.bf16.msra.mxu0 %v8261_v26 }
 0x17b   :  { %7714 = vmatprep.subr.bf16.mxu0 %v8264_v28 }
 0x17e   :  { %7715 = vmatpush3.bf16.msra.mxu0 %v8264_v28 }
 0x17f   :  { %7716 = vmatprep.subr.bf16.mxu0 %v8266_v29 }
 0x182   :  { %7717 = vmatpush3.bf16.msra.mxu0 %v8266_v29 }
 0x1f5   :  { %v7058_v30 = vpop.f32.mrf.mxu0  ;;  %v7624_v31 = vpop.f32.mrf.mxu1 }
 0x1f7   :  { %v7059_v32 = vpop.f32.mrf.mxu0  ;;  %v865_v33 = vpop.f32.mrf.mxu1 }
 0x1f8   :  { %v7060_v61 = vadd.f32 %v7059_v32, %v7058_v30  ;;  %v8259_v32 = vld [vmem:[%s10747_s8 + $0x50] sm:$0xff]  }
 0x1f9   :  { %v7061_v1 = vpop.f32.mrf.mxu0  ;;  %v7625_v49 = vpop.f32.mrf.mxu1 }
 0x1fa   :  { %v866_v60 = vadd.f32 %v7060_v61, %v865_v33 }
 0x1fb   :  { %v7062_v52 = vpop.f32.mrf.mxu0  ;;  %v868_v58 = vpop.f32.mrf.mxu1 }
 0x1fc   :  { %v935_v53 = vmul.f32 %v8942_v40, %v866_v60  ;;  %v7063_v55 = vadd.f32 %v7062_v52, %v7061_v1 }
 0x1fd   :  { %v7064_v50 = vpop.f32.mrf.mxu0  ;;  %v7628_v51 = vpop.f32.mrf.mxu1 }
 0x1fe   :  { %v967_v44 = vadd.f32 %v951_v54, %v935_v53  ;;  %v869_v48 = vadd.f32 %v7063_v55, %v868_v58 }
 0x1ff   :  { %v7065_v46 = vpop.f32.mrf.mxu0  ;;  %v881_v2 = vpop.f32.mrf.mxu1 }
 0x200   :  { %v983_v57 = vmax.f32 %v967_v44, 0.0  ;;  %v936_v35 = vmul.f32 %v8942_v40, %v869_v48  ;;  %v7066_v39 = vadd.f32 %v7065_v46, %v7064_v50  ;;  %v957_v50 = vld [vmem:[%s10749_s9 + $0x30] sm:$0xff]  ;;  %v8263_v44 = vld [vmem:[%s10747_s8 + $0x48] sm:$0xff]  }
 0x201   :  { %v7067_v37 = vpop.f32.mrf.mxu0  ;;  %v7629_v12 = vpop.f32.mrf.mxu1 }
 0x202   :  { %v6958_v42 = vpack.c.bf16 %v983_v57, %v983_v57  ;;  %v968_v59 = vadd.f32 %v952_v56, %v936_v35  ;;  %v874_v62 = vadd.f32 %v7624_v31, %v7066_v39  ;;  %v956_v31 = vld [vmem:[%s10749_s9 + $0x28] sm:$0xff] }
 0x203   :  { %v7068_v0 = vpop.f32.mrf.mxu0  ;;  %v884_v22 = vpop.f32.mrf.mxu1 }
 0x204   :  { %1063 = vst.msk [vmem:[#allocation2 + $0x10] sm:$0xf] %vm78_vm2, %v6958_v42  ;;  %v984_v3 = vmax.f32 %v968_v59, 0.0  ;;  %v937_v4 = vmul.f32 %v8942_v40, %v874_v62  ;;  %v7069_v5 = vadd.f32 %v7068_v0, %v7067_v37  ;;  %v8268_v59 = vld [vmem:[%s10747_s8 + $0x40] sm:$0xff]  }
 0x205   :  { %v7070_v6 = vpop.f32.mrf.mxu0  ;;  %v8973_v1 = vpop.f32.mrf.mxu1 }
 0x206   :  { %v6959_v7 = vpack.c.bf16 %v984_v3, %v984_v3  ;;  %v969_v8 = vadd.f32 %v953_v63, %v937_v4  ;;  %v877_v9 = vadd.f32 %v7625_v49, %v7069_v5 }
 0x207   :  { %v7071_v11 = vpop.f32.mrf.mxu0  ;;  %v897_v56 = vpop.f32.mrf.mxu1 }
 0x208   :  { %1064 = vst.msk [vmem:[#allocation2 + $0x14] sm:$0xf] %vm78_vm2, %v6959_v7  ;;  %v985_v13 = vmax.f32 %v969_v8, 0.0  ;;  %v938_v14 = vmul.f32 %v8942_v40, %v877_v9  ;;  %v7072_v15 = vadd.f32 %v7071_v11, %v7070_v6  ;;  %v959_v9 = vld [vmem:[%s10749_s9 + $0x40] sm:$0xff] }
 0x209   :  { %v7073_v16 = vpop.f32.mrf.mxu0  ;;  %v7633_v0 = vpop.f32.mrf.mxu1 }
 0x20a   :  { %v6960_v17 = vpack.c.bf16 %v985_v13, %v985_v13  ;;  %v970_v18 = vadd.f32 %v954_v10, %v938_v14  ;;  %v882_v19 = vadd.f32 %v7072_v15, %v881_v2  ;;  %v9004_v10 = vld [vmem:[%s10747_s8 + $0x98] sm:$0xff]  }
 0x20b   :  { %v7074_v21 = vpop.f32.mrf.mxu0 }
 0x20c   :  { %1065 = vst.msk [vmem:[#allocation2 + $0x18] sm:$0xf] %vm78_vm2, %v6960_v17  ;;  %v986_v23 = vmax.f32 %v970_v18, 0.0  ;;  %v939_v24 = vmul.f32 %v8942_v40, %v882_v19  ;;  %v7075_v25 = vadd.f32 %v7074_v21, %v7073_v16 }
 0x20d   :  { %v7076_v26 = vpop.f32.mrf.mxu0 }
 0x20e   :  { %v6961_v28 = vpack.c.bf16 %v986_v23, %v986_v23  ;;  %v971_v29 = vadd.f32 %v955_v20, %v939_v24  ;;  %v885_v30 = vadd.f32 %v7075_v25, %v884_v22  ;;  %v960_v20 = vld [vmem:[%s10749_s9 + $0x48] sm:$0xff] }
 0x20f   :  { %v7077_v33 = vpop.f32.mrf.mxu0  ;;  %v8253_v61 = vld [vmem:[#allocation2 + $0x10] sm:$0xff]  }
 0x210   :  { %1066 = vst.msk [vmem:[#allocation2 + $0x1c] sm:$0xf] %vm78_vm2, %v6961_v28  ;;  %v987_v49 = vmax.f32 %v971_v29, 0.0  ;;  %v940_v60 = vmul.f32 %v8942_v40, %v885_v30  ;;  %v7078_v54 = vadd.f32 %v7077_v33, %v7076_v26  ;;  %7647 = vmatmul.mubr.msk.bf16.vlgmr.msra.gmra.mxu1 %vm1178_vm3, %v8253_v61  ;;  %7674 = vmatprep.mubr.msk.bf16.mxu0 %vm1178_vm3, %v8253_v61 }
 0x211   :  { %v7079_v52 = vpop.f32.mrf.mxu0  ;;  %7687 = vmatpush3.bf16.msra.mxu1 %v8930_v27  ;;  %v958_v27 = vld [vmem:[%s10749_s9 + $0x38] sm:$0xff] }
 0x212   :  { %v6962_v58 = vpack.c.bf16 %v987_v49, %v987_v49  ;;  %v972_v53 = vadd.f32 %v956_v31, %v940_v60  ;;  %v890_v55 = vadd.f32 %v7628_v51, %v7078_v54  ;;  %7688 = vmatprep.subr.bf16.mxu1 %v8259_v32 }
 0x213   :  { %v7080_v48 = vpop.f32.mrf.mxu0 }
 0x214   :  { %1067 = vst.msk [vmem:[#allocation2 + $0x20] sm:$0xf] %vm78_vm2, %v6962_v58  ;;  %v988_v46 = vmax.f32 %v972_v53, 0.0  ;;  %v941_v57 = vmul.f32 %v8942_v40, %v890_v55  ;;  %v7081_v35 = vadd.f32 %v7080_v48, %v7079_v52 }
 0x215   :  { %v7082_v51 = vpop.f32.mrf.mxu0  ;;  %7689 = vmatpush3.bf16.msra.mxu1 %v8259_v32  ;;  %v961_v32 = vld [vmem:[%s10749_s9 + $0x50] sm:$0xff] }
 0x216   :  { %v6963_v39 = vpack.c.bf16 %v988_v46, %v988_v46  ;;  %v973_v37 = vadd.f32 %v957_v50, %v941_v57  ;;  %v893_v42 = vadd.f32 %v7629_v12, %v7081_v35  ;;  %7690 = vmatprep.subr.bf16.mxu1 %v8263_v44  ;;  %v900_v12 = vpop.f32.mrf.mxu1 }
 0x217   :  { %v7083_v62 = vpop.f32.mrf.mxu0  ;;  %v8254_v63 = vld [vmem:[#allocation2 + $0x18] sm:$0xff]  }
 0x218   :  { %1068 = vst.msk [vmem:[#allocation2 + $0x24] sm:$0xf] %vm78_vm2, %v6963_v39  ;;  %v989_v2 = vmax.f32 %v973_v37, 0.0  ;;  %v942_v3 = vmul.f32 %v8942_v40, %v893_v42  ;;  %v7084_v4 = vadd.f32 %v7083_v62, %v7082_v51  ;;  %7650 = vmatprep.mubr.msk.bf16.mxu1 %vm1178_vm3, %v8254_v63  ;;  %7675 = vmatmul.mubr.msk.bf16.gmra.mxu0 %vm1178_vm3, %v8254_v63  ;;  %v7636_v28 = vpop.f32.mrf.mxu1  ;;  %v963_v42 = vld [vmem:[%s10749_s9 + $0x60] sm:$0xff] }
 0x219   :  { %v7085_v5 = vpop.f32.mrf.mxu0  ;;  %7691 = vmatpush3.bf16.msra.mxu1 %v8263_v44 }
 0x21a   :  { %v6964_v6 = vpack.c.bf16 %v989_v2, %v989_v2  ;;  %v974_v7 = vadd.f32 %v958_v27, %v942_v3  ;;  %v898_v8 = vadd.f32 %v7084_v4, %v897_v56  ;;  %7692 = vmatprep.subr.bf16.mxu1 %v8268_v59  ;;  %v913_v54 = vpop.f32.mrf.mxu1 }
 0x21b   :  { %v7086_v11 = vpop.f32.mrf.mxu0 }
 0x21c   :  { %1069 = vst.msk [vmem:[#allocation2 + $0x28] sm:$0xf] %vm78_vm2, %v6964_v6  ;;  %v990_v13 = vmax.f32 %v974_v7, 0.0  ;;  %v943_v14 = vmul.f32 %v8942_v40, %v898_v8  ;;  %v7087_v15 = vadd.f32 %v7086_v11, %v7085_v5  ;;  %v7637_v57 = vpop.f32.mrf.mxu1  ;;  %v964_v6 = vld [vmem:[%s10749_s9 + $0x68] sm:$0xff] }
 0x21d   :  { %v7088_v16 = vpop.f32.mrf.mxu0  ;;  %7693 = vmatpush3.bf16.msra.mxu1 %v8268_v59 }
 0x21e   :  { %v6965_v17 = vpack.c.bf16 %v990_v13, %v990_v13  ;;  %v975_v18 = vadd.f32 %v959_v9, %v943_v14  ;;  %v901_v19 = vadd.f32 %v7087_v15, %v900_v12  ;;  %7734 = vmatprep.subr.bf16.mxu1 %v9004_v10 }
 0x21f   :  { %v7089_v21 = vpop.f32.mrf.mxu0  ;;  %v8255_v22 = vld [vmem:[#allocation2 + $0x20] sm:$0xff]  }
 0x220   :  { %1070 = vst.msk [vmem:[#allocation2 + $0x2c] sm:$0xf] %vm78_vm2, %v6965_v17  ;;  %v991_v23 = vmax.f32 %v975_v18, 0.0  ;;  %v944_v24 = vmul.f32 %v8942_v40, %v901_v19  ;;  %v7090_v25 = vadd.f32 %v7089_v21, %v7088_v16  ;;  %7651 = vmatmul.mubr.msk.bf16.gmra.mxu1 %vm1178_vm3, %v8255_v22  ;;  %7678 = vmatprep.mubr.msk.bf16.mxu0 %vm1178_vm3, %v8255_v22  ;;  %v965_v17 = vld [vmem:[%s10749_s9 + $0x70] sm:$0xff] }
 0x221   :  { %v7091_v26 = vpop.f32.mrf.mxu0 }
 0x222   :  { %v6966_v29 = vpack.c.bf16 %v991_v23, %v991_v23  ;;  %v976_v30 = vadd.f32 %v960_v20, %v944_v24  ;;  %v906_v31 = vadd.f32 %v8973_v1, %v7090_v25  ;;  %v962_v1 = vld [vmem:[%s10749_s9 + $0x58] sm:$0xff] }
 0x223   :  { %v7092_v33 = vpop.f32.mrf.mxu0  ;;  %v966_v25 = vld [vmem:[%s10749_s9 + $0x78] sm:$0xff] }
 0x224   :  { %1071 = vst.msk [vmem:[#allocation2 + $0x30] sm:$0xf] %vm78_vm2, %v6966_v29  ;;  %v992_v61 = vmax.f32 %v976_v30, 0.0  ;;  %v945_v49 = vmul.f32 %v8942_v40, %v906_v31  ;;  %v7093_v60 = vadd.f32 %v7092_v33, %v7091_v26  ;;  %v8265_v30 = vld [vmem:[#allocation2 + $0x18] sm:$0xff]  }
 0x225   :  { %v7094_v52 = vpop.f32.mrf.mxu0 }
 0x226   :  { %v6967_v58 = vpack.c.bf16 %v992_v61, %v992_v61  ;;  %v977_v53 = vadd.f32 %v961_v32, %v945_v49  ;;  %v909_v55 = vadd.f32 %v7633_v0, %v7093_v60  ;;  %v916_v0 = vpop.f32.mrf.mxu1  ;;  %v8269_v49 = vld [vmem:[#allocation2 + $0x20] sm:$0xff]  }
 0x227   :  { %v7095_v50 = vpop.f32.mrf.mxu0  ;;  %v8256_v44 = vld [vmem:[#allocation2 + $0x28] sm:$0xff]  }
 0x228   :  { %1072 = vst.msk [vmem:[#allocation2 + $0x34] sm:$0xf] %vm78_vm2, %v6967_v58  ;;  %v993_v48 = vmax.f32 %v977_v53, 0.0  ;;  %v946_v56 = vmul.f32 %v8942_v40, %v909_v55  ;;  %v7096_v46 = vadd.f32 %v7095_v50, %v7094_v52  ;;  %7654 = vmatprep.mubr.msk.bf16.mxu1 %vm1178_vm3, %v8256_v44  ;;  %7679 = vmatmul.mubr.msk.bf16.gmra.mxu0 %vm1178_vm3, %v8256_v44  ;;  %v8271_v52 = vld [vmem:[#allocation2 + $0x28] sm:$0xff]   ;;  %v8279_v58 = vld [vmem:[%s10747_s8 + $0x90] sm:$0xff]   ;;  %v8275_v55 = vld [vmem:[#allocation2 + $0x20] sm:$0xff]  }
 0x229   :  { %v7097_v35 = vpop.f32.mrf.mxu0  ;;  %v8283_v50 = vld [vmem:[%s10747_s8 + $0x88] sm:$0xff]  }
 0x22a   :  { %v6968_v51 = vpack.c.bf16 %v993_v48, %v993_v48  ;;  %v978_v39 = vadd.f32 %v962_v1, %v946_v56  ;;  %v914_v37 = vadd.f32 %v7096_v46, %v913_v54  ;;  %v8270_v54 = vld [vmem:[#allocation2 + $0x10] sm:$0xff]   ;;  %v8277_v44 = vld [vmem:[#allocation2 + $0x28] sm:$0xff]  }
 0x22b   :  { %v7098_v27 = vpop.f32.mrf.mxu0 }
 0x22c   :  { %1073 = vst.msk [vmem:[#allocation2 + $0x38] sm:$0xf] %vm78_vm2, %v6968_v51  ;;  %v994_v59 = vmax.f32 %v978_v39, 0.0  ;;  %v947_v62 = vmul.f32 %v8942_v40, %v914_v37  ;;  %v7099_v63 = vadd.f32 %v7098_v27, %v7097_v35  ;;  %v8287_v37 = vld [vmem:[#allocation2 + $0x20] sm:$0xff]  }
 0x22d   :  { %v7100_v2 = vpop.f32.mrf.mxu0 }
 0x22e   :  { %v6969_v3 = vpack.c.bf16 %v994_v59, %v994_v59  ;;  %v979_v4 = vadd.f32 %v963_v42, %v947_v62  ;;  %v917_v5 = vadd.f32 %v7099_v63, %v916_v0  ;;  %v8289_v42 = vld [vmem:[#allocation2 + $0x28] sm:$0xff]   ;;  %v8294_v63 = vld [vmem:[#allocation2 + $0x50] sm:$0xff]  }
 0x22f   :  { %v7101_v7 = vpop.f32.mrf.mxu0  ;;  %v8258_v8 = vld [vmem:[#allocation2 + $0x30] sm:$0xff]  }
 0x230   :  { %1074 = vst.msk [vmem:[#allocation2 + $0x3c] sm:$0xf] %vm78_vm2, %v6969_v3  ;;  %v995_v9 = vmax.f32 %v979_v4, 0.0  ;;  %v948_v11 = vmul.f32 %v8942_v40, %v917_v5  ;;  %v7102_v12 = vadd.f32 %v7101_v7, %v7100_v2  ;;  %7655 = vmatmul.mubr.msk.bf16.gmra.mxu1 %vm1178_vm3, %v8258_v8  ;;  %7682 = vmatprep.mubr.msk.bf16.mxu0 %vm1178_vm3, %v8258_v8  ;;  %v8273_v53 = vld [vmem:[#allocation2 + $0x30] sm:$0xff]   ;;  %v8295_v2 = vld [vmem:[#allocation2 + $0x58] sm:$0xff]   ;;  %v8300_v7 = vld [vmem:[%s10750_s26 + $0x8] sm:$0xff]  }
 0x231   :  { %v7103_v13 = vpop.f32.mrf.mxu0  ;;  %v8280_v56 = vld [vmem:[#allocation2 + $0x30] sm:$0xff]   ;;  %v8296_v3 = vld [vmem:[%s10750_s26 + $0x18] sm:$0xff]   ;;  %v8301_v8 = vld [vmem:[%s10750_s26 + $0x28] sm:$0xff]  }
 0x232   :  { %v6970_v14 = vpack.c.bf16 %v995_v9, %v995_v9  ;;  %v980_v15 = vadd.f32 %v964_v6, %v948_v11  ;;  %v922_v16 = vadd.f32 %v7636_v28, %v7102_v12  ;;  %v8290_v27 = vld [vmem:[#allocation2 + $0x30] sm:$0xff]   ;;  %7758 = vmatprep.subr.bf16.mxu0 %v8296_v3  ;;  %v8297_v4 = vld [vmem:[%s10750_s26 + $0x38] sm:$0xff]   ;;  %v8302_v9 = vld [vmem:[%s10750_s26] sm:$0xff]  }
 0x233   :  { %v7104_v18 = vpop.f32.mrf.mxu0  ;;  %v8298_v5 = vld [vmem:[%s10750_s26 + $0x10] sm:$0xff]   ;;  %v8303_v11 = vld [vmem:[%s10750_s26 + $0x20] sm:$0xff]   ;;  %v9117_v12 = vld [vmem:[%s10750_s26 + $0x58] sm:$0xff]  }
 0x234   :  { %1075 = vst.msk [vmem:[#allocation2 + $0x40] sm:$0xf] %vm78_vm2, %v6970_v14  ;;  %v996_v19 = vmax.f32 %v980_v15, 0.0  ;;  %v949_v20 = vmul.f32 %v8942_v40, %v922_v16  ;;  %v7105_v21 = vadd.f32 %v7104_v18, %v7103_v13  ;;  %v8299_v6 = vld [vmem:[%s10750_s26 + $0x30] sm:$0xff]   ;;  %10751 = vst [vmem:[#allocation12_spill] sm:$0xff] %v9117_v12 }
 0x235   :  { %v7672_v13 = vpop.f32.mrf.mxu0 }
 0x236   :  { %v6971_v22 = vpack.c.bf16 %v996_v19, %v996_v19  ;;  %v981_v23 = vadd.f32 %v965_v17, %v949_v20  ;;  %v925_v24 = vadd.f32 %v7637_v57, %v7105_v21  ;;  %v8286_v57 = vld [vmem:[%s10747_s8 + $0x80] sm:$0xff]  }
 0x237   :  { %v8262_v26 = vld [vmem:[#allocation2 + $0x38] sm:$0xff]   ;;  %v1366_v14 = vpop.f32.mrf.mxu0 }
 0x238   :  { %1076 = vst.msk [vmem:[#allocation2 + $0x44] sm:$0xf] %vm78_vm2, %v6971_v22  ;;  %v997_v28 = vmax.f32 %v981_v23, 0.0  ;;  %v950_v29 = vmul.f32 %v8942_v40, %v925_v24  ;;  %7658 = vmatprep.mubr.msk.bf16.mxu1 %vm1178_vm3, %v8262_v26  ;;  %7683 = vmatmul.mubr.msk.bf16.gmra.mxu0 %vm1178_vm3, %v8262_v26  ;;  %v8272_v40 = vld [vmem:[#allocation2 + $0x18] sm:$0xff]  }
 0x239   :  { %7718 = vmatprep.mubr.msk.bf16.mxu0 %vm1178_vm3, %v8265_v30  ;;  %v8276_v1 = vld [vmem:[#allocation2 + $0x38] sm:$0xff]   ;;  %v7673_v15 = vpop.f32.mrf.mxu0 }
 0x23a   :  { %v6972_v31 = vpack.c.bf16 %v997_v28, %v997_v28  ;;  %v982_v32 = vadd.f32 %v966_v25, %v950_v29  ;;  %v8282_v35 = vld [vmem:[#allocation2 + $0x38] sm:$0xff]  }
 0x23b   :  { %v8291_v59 = vld [vmem:[#allocation2 + $0x38] sm:$0xff]   ;;  %v1369_v17 = vpop.f32.mrf.mxu0 }
 0x23c   :  { %1077 = vst.msk [vmem:[#allocation2 + $0x48] sm:$0xf] %vm78_vm2, %v6972_v31  ;;  %v998_v33 = vmax.f32 %v982_v32, 0.0 }
 0x23e   :  { %v6973_v61 = vpack.c.bf16 %v998_v33, %v998_v33 }
 0x23f   :  { %v8267_v60 = vld [vmem:[#allocation2 + $0x40] sm:$0xff]  }
 0x240   :  { %1078 = vst.msk [vmem:[#allocation2 + $0x4c] sm:$0xf] %vm78_vm2, %v6973_v61  ;;  %7659 = vmatmul.mubr.msk.bf16.gmra.mxu1 %vm1178_vm3, %v8267_v60  ;;  %7719 = vmatmul.mubr.msk.bf16.vlgmr.msra.gmra.mxu0 %vm1178_vm3, %v8269_v49  ;;  %v8278_v48 = vld [vmem:[#allocation2 + $0x40] sm:$0xff]  }
 0x241   :  { %7694 = vmatprep.mubr.msk.bf16.mxu1 %vm1178_vm3, %v8270_v54  ;;  %7722 = vmatprep.mubr.msk.bf16.mxu0 %vm1178_vm3, %v8271_v52  ;;  %v8284_v51 = vld [vmem:[#allocation2 + $0x40] sm:$0xff]  }
 0x242   :  { %v8292_v62 = vld [vmem:[#allocation2 + $0x40] sm:$0xff]   ;;  %7759 = vmatpush3.bf16.msra.mxu0 %v8296_v3 }
 0x243   :  { %7760 = vmatprep.subr.bf16.mxu0 %v8298_v5 }
 0x246   :  { %7761 = vmatpush3.bf16.msra.mxu0 %v8298_v5 }
 0x247   :  { %v8281_v46 = vld [vmem:[#allocation2 + $0x48] sm:$0xff]   ;;  %7762 = vmatprep.subr.bf16.mxu0 %v8300_v7 }
 0x248   :  { %7695 = vmatmul.mubr.msk.bf16.vlgmr.msra.gmra.mxu1 %vm1178_vm3, %v8272_v40  ;;  %7723 = vmatmul.mubr.msk.bf16.gmra.mxu0 %vm1178_vm3, %v8273_v53  ;;  %v8285_v39 = vld [vmem:[#allocation2 + $0x48] sm:$0xff]  }
 0x249   :  { %7698 = vmatprep.mubr.msk.bf16.mxu1 %vm1178_vm3, %v8275_v55  ;;  %7726 = vmatprep.mubr.msk.bf16.mxu0 %vm1178_vm3, %v8276_v1  ;;  %v8293_v0 = vld [vmem:[#allocation2 + $0x48] sm:$0xff]  }
 0x24a   :  { %7735 = vmatpush3.bf16.msra.mxu1 %v9004_v10  ;;  %v8288_v10 = vld [vmem:[#allocation2 + $0x50] sm:$0xff]   ;;  %7763 = vmatpush3.bf16.msra.mxu0 %v8300_v7 }
 0x24b   :  { %7736 = vmatprep.subr.bf16.mxu1 %v8279_v58  ;;  %7764 = vmatprep.subr.bf16.mxu0 %v8302_v9 }
 0x24e   :  { %7737 = vmatpush3.bf16.msra.mxu1 %v8279_v58  ;;  %7765 = vmatpush3.bf16.msra.mxu0 %v8302_v9 }
 0x24f   :  { %7738 = vmatprep.subr.bf16.mxu1 %v8283_v50  ;;  %7806 = vmatprep.subr.bf16.mxu0 %v9117_v12 }
 0x250   :  { %7699 = vmatmul.mubr.msk.bf16.gmra.mxu1 %vm1178_vm3, %v8277_v44  ;;  %7727 = vmatmul.mubr.msk.bf16.gmra.mxu0 %vm1178_vm3, %v8278_v48 }
 0x251   :  { %7702 = vmatprep.mubr.msk.bf16.mxu1 %vm1178_vm3, %v8280_v56  ;;  %7730 = vmatprep.mubr.msk.bf16.mxu0 %vm1178_vm3, %v8281_v46 }
 0x252   :  { %7739 = vmatpush3.bf16.msra.mxu1 %v8283_v50 }
 0x253   :  { %7740 = vmatprep.subr.bf16.mxu1 %v8286_v57 }
 0x256   :  { %7741 = vmatpush3.bf16.msra.mxu1 %v8286_v57 }
 0x257   :  { %7782 = vmatprep.subr.bf16.mxu1 %v8297_v4 }
 0x258   :  { %7703 = vmatmul.mubr.msk.bf16.gmra.mxu1 %vm1178_vm3, %v8282_v35  ;;  %7731 = vmatmul.mubr.msk.bf16.gmra.mxu0 %vm1178_vm3, %v8288_v10 }
 0x259   :  { %7706 = vmatprep.mubr.msk.bf16.mxu1 %vm1178_vm3, %v8284_v51 }
 0x260   :  { %7707 = vmatmul.mubr.msk.bf16.gmra.mxu1 %vm1178_vm3, %v8285_v39 }
 0x261   :  { %7742 = vmatprep.mubr.msk.bf16.mxu1 %vm1178_vm3, %v8287_v37 }
 0x268   :  { %7743 = vmatmul.mubr.msk.bf16.vlgmr.msra.gmra.mxu1 %vm1178_vm3, %v8289_v42 }
 0x269   :  { %7746 = vmatprep.mubr.msk.bf16.mxu1 %vm1178_vm3, %v8290_v27  ;;  %7783 = vmatpush3.bf16.msra.mxu1 %v8297_v4 }
 0x26a   :  { %7784 = vmatprep.subr.bf16.mxu1 %v8299_v6 }
 0x26d   :  { %7785 = vmatpush3.bf16.msra.mxu1 %v8299_v6 }
 0x26e   :  { %7786 = vmatprep.subr.bf16.mxu1 %v8301_v8 }
 0x270   :  { %7747 = vmatmul.mubr.msk.bf16.gmra.mxu1 %vm1178_vm3, %v8291_v59 }
 0x271   :  { %7750 = vmatprep.mubr.msk.bf16.mxu1 %vm1178_vm3, %v8292_v62  ;;  %7787 = vmatpush3.bf16.msra.mxu1 %v8301_v8 }
 0x272   :  { %7788 = vmatprep.subr.bf16.mxu1 %v8303_v11 }
 0x275   :  { %7789 = vmatpush3.bf16.msra.mxu1 %v8303_v11 }
 0x278   :  { %7751 = vmatmul.mubr.msk.bf16.gmra.mxu1 %vm1178_vm3, %v8293_v0 }
 0x279   :  { %7754 = vmatprep.mubr.msk.bf16.mxu1 %vm1178_vm3, %v8294_v63 }
 0x280   :  { %7755 = vmatmul.mubr.msk.bf16.gmra.mxu1 %vm1178_vm3, %v8295_v2 }
 0x2d0   :  { %v7648_v16 = vpop.f32.mrf.mxu1 }
 0x2d1   :  { %v1375_v7 = vadd.f32 %v7672_v13, %v7648_v16 }
 0x2d2   :  { %v1237_v18 = vpop.f32.mrf.mxu1 }
 0x2d3   :  { %v1367_v9 = vadd.f32 %v1366_v14, %v1237_v18 }
 0x2d4   :  { %v7649_v20 = vpop.f32.mrf.mxu1 }
 0x2d6   :  { %v1240_v22 = vpop.f32.mrf.mxu1 }
 0x2d8   :  { %v9120_v19 = vpop.f32.mrf.mxu0 }
 0x2da   :  { %v9122_v21 = vpop.f32.mrf.mxu0 }
 0x2dc   :  { %v9124_v23 = vpop.f32.mrf.mxu0 }
 0x2de   :  { %v9128_v25 = vpop.f32.mrf.mxu0 }
 0x2e0   :  { %v9126_v24 = vpop.f32.mrf.mxu1 }
 0x2e2   :  { %v9130_v26 = vpop.f32.mrf.mxu1 }
 0x2e4   :  { %v9134_v29 = vpop.f32.mrf.mxu1 }
 0x2e6   :  { %v9138_v31 = vpop.f32.mrf.mxu1 }
 0x2e8   :  { %v9132_v28 = vpop.f32.mrf.mxu0 }
 0x2ea   :  { %v9136_v30 = vpop.f32.mrf.mxu0 }
 0x2ec   :  { %v9140_v32 = vpop.f32.mrf.mxu0 }
 0x2ee   :  { %v9144_v61 = vpop.f32.mrf.mxu0 }
 0x2f0   :  { %v9142_v33 = vpop.f32.mrf.mxu1 }
 0x2f2   :  { %v9146_v49 = vpop.f32.mrf.mxu1 }
 0x2f4   :  { %v9150_v54 = vpop.f32.mrf.mxu1 }
 0x2f6   :  { %v9154_v40 = vpop.f32.mrf.mxu1 }
 0x2f8   :  { %v9148_v60 = vpop.f32.mrf.mxu0 }
 0x2fa   :  { %v9152_v52 = vpop.f32.mrf.mxu0 }
 0x2fc   :  { %v9156_v58 = vpop.f32.mrf.mxu0 }
 0x2fd   :  { %10752 = vst [vmem:[#allocation13_spill] sm:$0xff] %v9156_v58 }
 0x2fe   :  { %v9162_v1 = vpop.f32.mrf.mxu0 }
 0x2ff   :  { %10753 = vst [vmem:[#allocation14_spill] sm:$0xff] %v9162_v1 }
 0x300   :  { %v9158_v53 = vpop.f32.mrf.mxu1  ;;  %v7720_v48 = vpop.f32.mrf.mxu0 }
 0x302   :  { %v9160_v55 = vpop.f32.mrf.mxu1  ;;  %v1802_v57 = vpop.f32.mrf.mxu0 }
 0x304   :  { %v9164_v50 = vpop.f32.mrf.mxu1  ;;  %v7721_v51 = vpop.f32.mrf.mxu0 }
 0x306   :  { %v9166_v44 = vpop.f32.mrf.mxu1  ;;  %v1805_v42 = vpop.f32.mrf.mxu0 }
 0x307   :  { %10754 = vst [vmem:[#allocation15_spill] sm:$0xff] %v9166_v44  ;;  %v9193_v44 = vld [vmem:[%s10758_s2] ss:$0 sm:$0xff] }
 0x308   :  { %v7696_v56 = vpop.f32.mrf.mxu1  ;;  %v9170_v62 = vpop.f32.mrf.mxu0  ;;  %v191_v13 = vadd.f32 %v8722_v34, %v9193_v44  ;;  %v183_v14 = vadd.f32 %v9193_v44, %v8726_v36  ;;  %v9218_v36 = vld [vmem:[%s10643_s6] ss:$0 sm:$0xff] }
 0x309   :  { %v1641_v11 = vadd.f32 %v7696_v56, %v1375_v7  ;;  %v194_v7 = vadd.f32 %v8730_v38, %v9193_v44  ;;  %v9226_v38 = vadd.f32 %v8748_v47, %v9193_v44  ;;  %v9245_v47 = vld [vmem:[%s10644_s7] ss:$0 sm:$0xff] }
 0x30a   :  { %v1576_v46 = vpop.f32.mrf.mxu1  ;;  %v9176_v2 = vpop.f32.mrf.mxu0 }
 0x30b   :  { %v1867_v56 = vadd.f32 %v7720_v48, %v1641_v11 }
 0x30c   :  { %v7697_v10 = vpop.f32.mrf.mxu1  ;;  %v9182_v5 = vpop.f32.mrf.mxu0 }
 0x30e   :  { %v1579_v35 = vpop.f32.mrf.mxu1  ;;  %v9188_v1 = vpop.f32.mrf.mxu0 }
 0x310   :  { %v7700_v39 = vpop.f32.mrf.mxu1  ;;  %v9203_v18 = vpop.f32.mrf.mxu0 }
 0x312   :  { %v1592_v37 = vpop.f32.mrf.mxu1 }
 0x314   :  { %v7701_v27 = vpop.f32.mrf.mxu1 }
 0x316   :  { %v9168_v59 = vpop.f32.mrf.mxu1 }
 0x318   :  { %v9172_v63 = vpop.f32.mrf.mxu1 }
 0x31a   :  { %v9174_v0 = vpop.f32.mrf.mxu1 }
 0x31b   :  { %10755 = vst [vmem:[#allocation16_spill] sm:$0xff] %v9174_v0  ;;  %v1370_v0 = vadd.f32 %v1369_v17, %v1240_v22  ;;  %v9213_v17 = vadd.f32 %v8740_v43, %v9193_v44  ;;  %v9222_v22 = vadd.f32 %v9193_v44, %v8744_v45  ;;  %v1391_v45 = vadd.f32 %v9120_v19, %v9126_v24 }
 0x31c   :  { %v9178_v3 = vpop.f32.mrf.mxu1  ;;  %v1394_v19 = vadd.f32 %v9124_v23, %v9134_v29 }
 0x31d   :  { %10756 = vst [vmem:[#allocation17_spill] sm:$0xff] %v9178_v3  ;;  %v1378_v3 = vadd.f32 %v7673_v15, %v7649_v20  ;;  %v9209_v15 = vadd.f32 %v9193_v44, %v8736_v41  ;;  %v1640_v20 = vadd.f32 %v1579_v35, %v1370_v0  ;;  %v10764_v0 = vld [vmem:[#allocation5_spill] sm:$0xff]  ;;  %v1645_v24 = vadd.f32 %v7700_v39, %v1391_v45 }
 0x31e   :  { %v9180_v4 = vpop.f32.mrf.mxu1  ;;  %v1646_v23 = vadd.f32 %v7701_v27, %v1394_v19  ;;  %v1410_v45 = vadd.f32 %v9140_v32, %v9150_v54 }
 0x31f   :  { %10757 = vst [vmem:[#allocation18_spill] sm:$0xff] %v9180_v4  ;;  %v1639_v4 = vadd.f32 %v1576_v46, %v1367_v9  ;;  %v1642_v16 = vadd.f32 %v7697_v10, %v1378_v3  ;;  %v10760_v46 = vld [vmem:[#allocation3_spill] sm:$0xff]  ;;  %v10762_v10 = vld [vmem:[#allocation4_spill] sm:$0xff]  ;;  %v9238_v3 = vadd.f32 %v9193_v44, %v10764_v0  ;;  %v9249_v9 = vpop.f32.mrf.mxu0 }
 0x320   :  { %v9184_v6 = vpop.f32.mrf.mxu1  ;;  %v9230_v43 = vadd.f32 %v9193_v44, %v10760_v46  ;;  %v9234_v35 = vadd.f32 %v10762_v10, %v9193_v44  ;;  %v10766_v46 = vld [vmem:[#allocation6_spill] sm:$0xff] }
 0x321   :  { %v1865_v48 = vadd.f32 %v1802_v57, %v1639_v4  ;;  %10765 = vst [vmem:[#allocation5_spill] sm:$0xff] %v9238_v3  ;;  %v1383_v4 = vadd.f32 %v9122_v21, %v9130_v26  ;;  %v9254_v10 = vadd.f32 %v10766_v46, %v9193_v44  ;;  %v1866_v3 = vadd.f32 %v1805_v42, %v1640_v20  ;;  %v7729_v39 = vpop.f32.mrf.mxu0 }
 0x322   :  { %v9186_v8 = vpop.f32.mrf.mxu1  ;;  %10761 = vst [vmem:[#allocation3_spill] sm:$0xff] %v9230_v43  ;;  %10763 = vst [vmem:[#allocation4_spill] sm:$0xff] %v9234_v35  ;;  %v10767_v43 = vld [vmem:[#allocation7_spill] sm:$0xff] }
 0x324   :  { %v9195_v12 = vpop.f32.mrf.mxu1  ;;  %v10770_v46 = vld [vmem:[#allocation17_spill] sm:$0xff] }
 0x325   :  { %v1650_v19 = vadd.f32 %v10770_v46, %v1410_v45 }
 0x326   :  { %v9197_v58 = vpop.f32.mrf.mxu1 }
 0x327   :  { %10759 = vst [vmem:[#allocation19_spill] sm:$0xff] %v9197_v58  ;;  %v1643_v58 = vadd.f32 %v1592_v37, %v1383_v4 }
 0x328   :  { %v7744_v34 = vpop.f32.mrf.mxu1 }
 0x329   :  { %v2093_v41 = vadd.f32 %v7744_v34, %v1867_v56  ;;  %v1868_v34 = vadd.f32 %v7721_v51, %v1642_v16  ;;  %v1386_v51 = vadd.f32 %v9128_v25, %v9138_v31  ;;  %v1407_v16 = vadd.f32 %v9132_v28, %v9142_v33 }
 0x32a   :  { %v2028_v57 = vpop.f32.mrf.mxu1  ;;  %v1871_v28 = vadd.f32 %v9170_v62, %v1645_v24  ;;  %v1402_v33 = vadd.f32 %v9144_v61, %v9154_v40  ;;  %v1837_v62 = vpop.f32.mrf.mxu0 }
 0x32b   :  { %v2116_v11 = vmul.f32 %v9218_v36, %v2093_v41  ;;  %v2091_v56 = vadd.f32 %v2028_v57, %v1865_v48  ;;  %v9262_v41 = vadd.f32 %v9193_v44, %v10767_v43  ;;  %v1399_v43 = vadd.f32 %v9136_v30, %v9146_v49 }
 0x32c   :  { %v7745_v0 = vpop.f32.mrf.mxu1  ;;  %v1644_v25 = vadd.f32 %v9168_v59, %v1386_v51  ;;  %v1423_v30 = vadd.f32 %v9148_v60, %v9158_v53  ;;  %v1649_v49 = vadd.f32 %v9172_v63, %v1407_v16  ;;  %v1872_v59 = vadd.f32 %v9182_v5, %v1646_v23  ;;  %v10769_v5 = vld [vmem:[#allocation16_spill] sm:$0xff] }
 0x32d   :  { %v2139_v35 = vadd.f32 %v9245_v47, %v2116_v11  ;;  %v2114_v21 = vmul.f32 %v9218_v36, %v2091_v56  ;;  %v2094_v26 = vadd.f32 %v7745_v0, %v1868_v34  ;;  %v1647_v11 = vadd.f32 %v10769_v5, %v1399_v43  ;;  %v10771_v0 = vld [vmem:[#allocation18_spill] sm:$0xff]  ;;  %v10778_v5 = vld [vmem:[#allocation3_spill] sm:$0xff] }
 0x32e   :  { %v2031_v29 = vpop.f32.mrf.mxu1  ;;  %v1870_v4 = vadd.f32 %v9188_v1, %v1644_v25  ;;  %v1875_v24 = vadd.f32 %v9203_v18, %v1649_v49  ;;  %v1648_v1 = vadd.f32 %v10771_v0, %v1402_v33  ;;  %v1653_v25 = vadd.f32 %v9184_v6, %v1423_v30 }
 0x32f   :  { %v9268_v42 = vadd.f32 %v2139_v35, %v191_v13  ;;  %v2137_v37 = vadd.f32 %v9245_v47, %v2114_v21  ;;  %v2117_v20 = vmul.f32 %v9218_v36, %v2094_v26  ;;  %v2092_v48 = vadd.f32 %v2031_v29, %v1866_v3 }
 0x330   :  { %v7748_v31 = vpop.f32.mrf.mxu1  ;;  %v1869_v35 = vadd.f32 %v9176_v2, %v1643_v58  ;;  %v1415_v58 = vadd.f32 %v9152_v52, %v9160_v55  ;;  %v10768_v2 = vld [vmem:[#allocation13_spill] sm:$0xff]  ;;  %v1873_v43 = vadd.f32 %v9249_v9, %v1647_v11  ;;  %v1876_v33 = vadd.f32 %v7729_v39, %v1650_v19 }
 0x331   :  { %v2140_v27 = vadd.f32 %v9245_v47, %v2117_v20  ;;  %v2115_v13 = vmul.f32 %v9218_v36, %v2092_v48  ;;  %v2097_v32 = vadd.f32 %v7748_v31, %v1871_v28  ;;  %v9287_v3 = vadd.f32 %v2137_v37, %v183_v14  ;;  %v7732_v14 = vpop.f32.mrf.mxu0  ;;  %v8305_v9 = vld [vmem:[%s10750_s26 + $0x50] sm:$0xff]  }
 0x332   :  { %v2044_v54 = vpop.f32.mrf.mxu1  ;;  %v1426_v60 = vadd.f32 %v10768_v2, %v9164_v50  ;;  %v10679_v51 = vmax.f32 %v9268_v42, 0.0  ;;  %v1651_v49 = vadd.f32 %v9186_v8, %v1415_v58  ;;  %v10777_v2 = vld [vmem:[#allocation14_spill] sm:$0xff]  ;;  %v8306_v8 = vld [vmem:[%s10750_s26 + $0x48] sm:$0xff]  }
 0x333   :  { %v9289_v57 = vadd.f32 %v2140_v27, %v194_v7  ;;  %v2138_v61 = vadd.f32 %v9245_v47, %v2115_v13  ;;  %v2095_v40 = vadd.f32 %v2044_v54, %v1869_v35  ;;  %v2120_v53 = vmul.f32 %v9218_v36, %v2097_v32  ;;  %v1850_v20 = vpop.f32.mrf.mxu0  ;;  %v10780_v58 = vld [vmem:[#allocation4_spill] sm:$0xff] }
 0x334   :  { %v7749_v63 = vpop.f32.mrf.mxu1  ;;  %v10681_v21 = vmax.f32 %v9287_v3, 0.0 }
 0x335   :  { %v9300_v7 = vadd.f32 %v2138_v61, %v9209_v15  ;;  %v2118_v56 = vmul.f32 %v9218_v36, %v2095_v40  ;;  %v2098_v34 = vadd.f32 %v7749_v63, %v1872_v59  ;;  %v10680_v52 = vmax.f32 %v9289_v57, 0.0  ;;  %v7733_v32 = vpop.f32.mrf.mxu0  ;;  %v10776_v40 = vld [vmem:[#allocation15_spill] sm:$0xff] }
 0x336   :  { %v2143_v55 = vadd.f32 %v9245_v47, %v2120_v53  ;;  %v2047_v50 = vpop.f32.mrf.mxu1  ;;  %v1418_v53 = vadd.f32 %v10777_v2, %v10776_v40  ;;  %v1654_v63 = vadd.f32 %v9195_v12, %v1426_v60  ;;  %v1879_v12 = vadd.f32 %v7732_v14, %v1653_v25  ;;  %v10782_v60 = vld [vmem:[#allocation19_spill] sm:$0xff] }
 0x337   :  { %v10678_v26 = vmax.f32 %v9300_v7, 0.0  ;;  %v2121_v15 = vmul.f32 %v9218_v36, %v2098_v34  ;;  %v2141_v23 = vadd.f32 %v9245_v47, %v2118_v56  ;;  %v2096_v29 = vadd.f32 %v2047_v50, %v1870_v4 }
 0x338   :  { %v9313_v16 = vadd.f32 %v2143_v55, %v9213_v17  ;;  %v7752_v37 = vpop.f32.mrf.mxu1  ;;  %v9329_v17 = vpack.c.bf16 %v10680_v52, %v10679_v51  ;;  %v1652_v55 = vadd.f32 %v10782_v60, %v1418_v53 }
 0x339   :  { %v2144_v18 = vadd.f32 %v9245_v47, %v2121_v15  ;;  %v2101_v48 = vadd.f32 %v7752_v37, %v1875_v24  ;;  %v9322_v45 = vpack.c.bf16 %v10678_v26, %v10681_v21  ;;  %v2119_v28 = vmul.f32 %v9218_v36, %v2096_v29  ;;  %v1853_v15 = vpop.f32.mrf.mxu0 }
 0x33a   :  { %10772 = vst [vmem:[#allocation6_spill] sm:$0xff] %v9313_v16  ;;  %v2060_v31 = vpop.f32.mrf.mxu1  ;;  %v9344_v35 = vadd.f32 %v2141_v23, %v9222_v22  ;;  %v10775_v22 = vld [vmem:[#allocation12_spill] sm:$0xff]  ;;  %v10675_v23 = vmax.f32 %v9313_v16, 0.0 }
 0x33b   :  { %v9336_v27 = vadd.f32 %v2144_v18, %v9226_v38  ;;  %v2124_v13 = vmul.f32 %v9218_v36, %v2101_v48  ;;  %v2099_v6 = vadd.f32 %v2060_v31, %v1873_v43  ;;  %7766 = vmatprep.mubr.msk.bf16.mxu0 %vm1178_vm3, %v9322_v45  ;;  %7790 = vmatprep.mubr.msk.bf16.mxu1 %vm1178_vm3, %v9322_v45  ;;  %v10783_v48 = vld [vmem:[#allocation5_spill] sm:$0xff] }
 0x33c   :  { %10774 = vst [vmem:[#allocation13_spill] sm:$0xff] %v9344_v35  ;;  %v2142_v39 = vadd.f32 %v9245_v47, %v2119_v28  ;;  %v7753_v30 = vpop.f32.mrf.mxu1  ;;  %7767 = vmatmul.mubr.msk.bf16.vlgmr.msra.gmra.mxu0 %vm1178_vm3, %v9329_v17  ;;  %7791 = vmatmul.mubr.msk.bf16.vlgmr.msra.gmra.mxu1 %vm1178_vm3, %v9329_v17  ;;  %v1874_v38 = vadd.f32 %v1837_v62, %v1648_v1  ;;  %v10677_v50 = vmax.f32 %v9344_v35, 0.0 }
 0x33d   :  { %10773 = vst [vmem:[#allocation7_spill] sm:$0xff] %v9336_v27  ;;  %v2147_v54 = vadd.f32 %v9245_v47, %v2124_v13  ;;  %v2122_v59 = vmul.f32 %v9218_v36, %v2099_v6  ;;  %v2102_v61 = vadd.f32 %v7753_v30, %v1876_v33  ;;  %7807 = vmatpush3.bf16.msra.mxu0 %v10775_v22  ;;  %v10676_v4 = vmax.f32 %v9336_v27, 0.0  ;;  %v8307_v13 = vld [vmem:[%s10750_s26 + $0x40] sm:$0xff]  }
 0x33e   :  { %v9360_v11 = vadd.f32 %v2142_v39, %v10778_v5  ;;  %v2063_v62 = vpop.f32.mrf.mxu1  ;;  %7808 = vmatprep.subr.bf16.mxu0 %v8305_v9  ;;  %v1877_v1 = vadd.f32 %v1850_v20, %v1651_v49  ;;  %v1880_v18 = vadd.f32 %v7733_v32, %v1654_v63  ;;  %v1878_v6 = vadd.f32 %v1853_v15, %v1652_v55  ;;  %v10787_v32 = vld [vmem:[#allocation8_spill] sm:$0xff]  ;;  %v10788_v5 = vld [vmem:[#allocation9_spill] sm:$0xff]  ;;  %v10791_v55 = vld [vmem:[#allocation11_spill] sm:$0xff] }
 0x33f   :  { %v9366_v56 = vadd.f32 %v2147_v54, %v10780_v58  ;;  %v2145_v34 = vadd.f32 %v9245_v47, %v2122_v59  ;;  %v2125_v46 = vmul.f32 %v9218_v36, %v2102_v61  ;;  %v2100_v19 = vadd.f32 %v2063_v62, %v1874_v38 }
 0x340   :  { %10779 = vst [vmem:[#allocation16_spill] sm:$0xff] %v9360_v11  ;;  %v10674_v24 = vmax.f32 %v9360_v11, 0.0  ;;  %v7756_v0 = vpop.f32.mrf.mxu1  ;;  %v239_v54 = vadd.f32 %v10787_v32, %v9193_v44  ;;  %v231_v62 = vadd.f32 %v9193_v44, %v10788_v5 }
 0x341   :  { %10781 = vst [vmem:[#allocation17_spill] sm:$0xff] %v9366_v56  ;;  %v2148_v29 = vadd.f32 %v9245_v47, %v2125_v46  ;;  %v2123_v37 = vmul.f32 %v9218_v36, %v2100_v19  ;;  %7809 = vmatpush3.bf16.msra.mxu0 %v8305_v9  ;;  %v9377_v43 = vadd.f32 %v2145_v34, %v10783_v48  ;;  %v10672_v58 = vmax.f32 %v9366_v56, 0.0  ;;  %v10790_v46 = vld [vmem:[#allocation10_spill] sm:$0xff] }
 0x342   :  { %v2105_v14 = vadd.f32 %v7756_v0, %v1879_v12  ;;  %v2076_v25 = vpop.f32.mrf.mxu1  ;;  %v2187_v28 = vpack.c.bf16 %v10674_v24, %v10677_v50  ;;  %7810 = vmatprep.subr.bf16.mxu0 %v8306_v8  ;;  %v2188_v9 = vpack.c.bf16 %v10676_v4, %v10675_v23  ;;  %v242_v19 = vadd.f32 %v10790_v46, %v9193_v44 }
 0x343   :  { %10784 = vst [vmem:[#allocation18_spill] sm:$0xff] %v9377_v43  ;;  %v9384_v20 = vadd.f32 %v2148_v29, %v9254_v10  ;;  %v2146_v31 = vadd.f32 %v9245_v47, %v2123_v37  ;;  %v2103_v33 = vadd.f32 %v2076_v25, %v1877_v1  ;;  %v10671_v59 = vmax.f32 %v9377_v43, 0.0 }
 0x344   :  { %v2128_v39 = vmul.f32 %v9218_v36, %v2105_v14  ;;  %7770 = vmatprep.mubr.msk.bf16.mxu0 %vm1178_vm3, %v2187_v28  ;;  %7794 = vmatprep.mubr.msk.bf16.mxu1 %vm1178_vm3, %v2187_v28  ;;  %v7757_v10 = vpop.f32.mrf.mxu1  ;;  %v234_v0 = vadd.f32 %v9193_v44, %v10791_v55 }
 0x345   :  { %10785 = vst [vmem:[#allocation12_spill] sm:$0xff] %v9384_v20  ;;  %v9398_v30 = vadd.f32 %v2146_v31, %v9262_v41  ;;  %v2126_v38 = vmul.f32 %v9218_v36, %v2103_v33  ;;  %v2106_v49 = vadd.f32 %v7757_v10, %v1880_v18  ;;  %7771 = vmatmul.mubr.msk.bf16.gmra.mxu0 %vm1178_vm3, %v2188_v9  ;;  %v10673_v61 = vmax.f32 %v9384_v20, 0.0  ;;  %v8310_v31 = vld [vmem:[%s10645_s11 + $0x4] ss:$12 sps:$4 sm:$0xff]  }
 0x346   :  { %7795 = vmatmul.mubr.msk.bf16.gmra.mxu1 %vm1178_vm3, %v2188_v9  ;;  %v2151_v22 = vadd.f32 %v9245_v47, %v2128_v39  ;;  %v2079_v40 = vpop.f32.mrf.mxu1  ;;  %7811 = vmatpush3.bf16.msra.mxu0 %v8306_v8 }
 0x347   :  { %10786 = vst [vmem:[#allocation15_spill] sm:$0xff] %v9398_v30  ;;  %v10670_v41 = vmax.f32 %v9398_v30, 0.0  ;;  %v2149_v2 = vadd.f32 %v9245_v47, %v2126_v38  ;;  %v2129_v53 = vmul.f32 %v9218_v36, %v2106_v49  ;;  %v2104_v63 = vadd.f32 %v2079_v40, %v1878_v6  ;;  %7812 = vmatprep.subr.bf16.mxu0 %v8307_v13 }
 0x348   :  { %v9414_v34 = vadd.f32 %v2151_v22, %v239_v54  ;;  %v2190_v1 = vpack.c.bf16 %v10673_v61, %v10672_v58 }
 0x349   :  { %v2152_v8 = vadd.f32 %v9245_v47, %v2129_v53  ;;  %v2127_v12 = vmul.f32 %v9218_v36, %v2104_v63  ;;  %v2189_v60 = vpack.c.bf16 %v10670_v41, %v10671_v59  ;;  %v9430_v15 = vadd.f32 %v2149_v2, %v231_v62 }
 0x34a   :  { %10789 = vst [vmem:[#allocation14_spill] sm:$0xff] %v9414_v34  ;;  %7813 = vmatpush3.bf16.msra.mxu0 %v8307_v13  ;;  %v10667_v14 = vmax.f32 %v9414_v34, 0.0 }
 0x34b   :  { %10792 = vst [vmem:[#allocation3_spill] sm:$0xff] %v9430_v15  ;;  %v9432_v29 = vadd.f32 %v2152_v8, %v242_v19  ;;  %v2150_v36 = vadd.f32 %v9245_v47, %v2127_v12  ;;  %7774 = vmatprep.mubr.msk.bf16.mxu0 %vm1178_vm3, %v2189_v60  ;;  %7798 = vmatprep.mubr.msk.bf16.mxu1 %vm1178_vm3, %v2189_v60  ;;  %v10668_v44 = vmax.f32 %v9430_v15, 0.0 }
 0x34d   :  { %10793 = vst [vmem:[#allocation4_spill] sm:$0xff] %v9432_v29  ;;  %v9437_v37 = vadd.f32 %v2150_v36, %v234_v0  ;;  %7775 = vmatmul.mubr.msk.bf16.gmra.mxu0 %vm1178_vm3, %v2190_v1  ;;  %v10669_v18 = vmax.f32 %v9432_v29, 0.0 }
 0x34e   :  { %7799 = vmatmul.mubr.msk.bf16.gmra.mxu1 %vm1178_vm3, %v2190_v1 }
 0x34f   :  { %10794 = vst [vmem:[#allocation19_spill] sm:$0xff] %v9437_v37  ;;  %v10666_v48 = vmax.f32 %v9437_v37, 0.0  ;;  %v2192_v25 = vpack.c.bf16 %v10669_v18, %v10667_v14 }
 0x351   :  { %v2191_v47 = vpack.c.bf16 %v10666_v48, %v10668_v44 }
 0x353   :  { %7778 = vmatprep.mubr.msk.bf16.mxu0 %vm1178_vm3, %v2191_v47  ;;  %7802 = vmatprep.mubr.msk.bf16.mxu1 %vm1178_vm3, %v2191_v47 }
 0x355   :  { %7779 = vmatmul.mubr.msk.bf16.gmra.mxu0 %vm1178_vm3, %v2192_v25 }
 0x356   :  { %7803 = vmatmul.mubr.msk.bf16.gmra.mxu1 %vm1178_vm3, %v2192_v25  ;;  %7814 = vmatprep.mubr.msk.bf16.mxu0 %vm1178_vm3, %v9322_v45  ;;  %v8323_v45 = vld [vmem:[%s10645_s11 + $0x8] ss:$12 sps:$4 sm:$0xff]  }
 0x357   :  { %2822 = vmatprep.mubr.bf16.mxu1 %v8310_v31 }
 0x35d   :  { %7815 = vmatmul.mubr.msk.bf16.vlgmr.msra.gmra.mxu0 %vm1178_vm3, %v9329_v17 }
 0x35e   :  { %7818 = vmatprep.mubr.msk.bf16.mxu0 %vm1178_vm3, %v2187_v28 }
 0x365   :  { %7819 = vmatmul.mubr.msk.bf16.gmra.mxu0 %vm1178_vm3, %v2188_v9 }
 0x366   :  { %7822 = vmatprep.mubr.msk.bf16.mxu0 %vm1178_vm3, %v2189_v60 }
 0x36d   :  { %7823 = vmatmul.mubr.msk.bf16.gmra.mxu0 %vm1178_vm3, %v2190_v1 }
 0x36e   :  { %7826 = vmatprep.mubr.msk.bf16.mxu0 %vm1178_vm3, %v2191_v47 }
 0x375   :  { %7827 = vmatmul.mubr.msk.bf16.gmra.mxu0 %vm1178_vm3, %v2192_v25 }
 0x376   :  { %7846 = vmatprep.mubr.bf16.mxu0 %v8323_v45 }
 0x3fc   :  { %v9473_v17 = vpop.f32.mrf.mxu0  ;;  %v9475_v28 = vpop.f32.mrf.mxu1 }
 0x3fe   :  { %v9477_v33 = vpop.f32.mrf.mxu0  ;;  %v9479_v9 = vpop.f32.mrf.mxu1 }
 0x400   :  { %v9481_v13 = vpop.f32.mrf.mxu0  ;;  %v9483_v6 = vpop.f32.mrf.mxu1 }
 0x402   :  { %v9485_v39 = vpop.f32.mrf.mxu0  ;;  %v9487_v10 = vpop.f32.mrf.mxu1 }
 0x405   :  { %v7772_v38 = vpop.f32.mrf.mxu0 }
 0x406   :  { %v7796_v49 = vpop.f32.mrf.mxu1 }
 0x407   :  { %v2299_v32 = vpop.f32.mrf.mxu0 }
 0x408   :  { %v2437_v54 = vpop.f32.mrf.mxu1 }
 0x409   :  { %v7773_v22 = vpop.f32.mrf.mxu0 }
 0x40a   :  { %v7797_v40 = vpop.f32.mrf.mxu1 }
 0x40b   :  { %v2302_v2 = vpop.f32.mrf.mxu0 }
 0x40c   :  { %v2440_v53 = vpop.f32.mrf.mxu1 }
 0x40d   :  { %v7776_v63 = vpop.f32.mrf.mxu0 }
 0x40e   :  { %v7800_v5 = vpop.f32.mrf.mxu1 }
 0x40f   :  { %v2315_v62 = vpop.f32.mrf.mxu0 }
 0x410   :  { %v2453_v46 = vpop.f32.mrf.mxu1 }
 0x411   :  { %v7777_v19 = vpop.f32.mrf.mxu0 }
 0x412   :  { %v7801_v8 = vpop.f32.mrf.mxu1  ;;  %v2351_v24 = vpack.c.bf16 %v7777_v19, %v7776_v63  ;;  %v2485_v63 = vpack.c.bf16 %v9483_v6, %v9475_v28  ;;  %v8308_v28 = vld [vmem:[%s10645_s11] ss:$12 sps:$4 sm:$0xff]  }
 0x413   :  { %v2318_v12 = vpop.f32.mrf.mxu0  ;;  %v2489_v58 = vpack.c.bf16 %v7801_v8, %v7800_v5  ;;  %v2486_v5 = vpack.c.bf16 %v2440_v53, %v2437_v54  ;;  %v8319_v19 = vld [vmem:[%s10645_s11 + $0x4c] ss:$12 sps:$4 sm:$0xff]  }
 0x414   :  { %v2456_v60 = vpop.f32.mrf.mxu1 }
 0x415   :  { %v7780_v55 = vpop.f32.mrf.mxu0 }
 0x416   :  { %v7804_v0 = vpop.f32.mrf.mxu1 }
 0x417   :  { %v2331_v1 = vpop.f32.mrf.mxu0 }
 0x418   :  { %v2469_v36 = vpop.f32.mrf.mxu1 }
 0x419   :  { %v7781_v47 = vpop.f32.mrf.mxu0 }
 0x41a   :  { %v7805_v25 = vpop.f32.mrf.mxu1  ;;  %v2353_v31 = vpack.c.bf16 %v7781_v47, %v7780_v55  ;;  %v2488_v55 = vpack.c.bf16 %v2456_v60, %v2453_v46  ;;  %v2487_v47 = vpack.c.bf16 %v7797_v40, %v7796_v49 }
 0x41b   :  { %v2491_v45 = vpack.c.bf16 %v7805_v25, %v7804_v0  ;;  %v2334_v48 = vpop.f32.mrf.mxu0 }
 0x41c   :  { %v2472_v14 = vpop.f32.mrf.mxu1  ;;  %v2352_v41 = vpack.c.bf16 %v2334_v48, %v2331_v1  ;;  %v8317_v1 = vld [vmem:[%s10645_s11 + $0x48] ss:$12 sps:$4 sm:$0xff]  }
 0x41d   :  { %v2490_v44 = vpack.c.bf16 %v2472_v14, %v2469_v36  ;;  %7218 = vmatprep.subr.bf16.mxu1 %v2491_v45  ;;  %v9489_v18 = vpop.f32.mrf.mxu0  ;;  %v2350_v14 = vpack.c.bf16 %v2318_v12, %v2315_v62  ;;  %v8314_v62 = vld [vmem:[%s10645_s11 + $0x30] ss:$12 sps:$4 sm:$0xff]  }
 0x41e   :  { %7219 = vmatpush3.bf16.msra.mxu1 %v2353_v31  ;;  %v8322_v31 = vld [vmem:[%s10645_s11 + $0x64] ss:$12 sps:$4 sm:$0xff]  }
 0x41f   :  { %7220 = vmatprep.subr.bf16.mxu1 %v2490_v44  ;;  %v9491_v59 = vpop.f32.mrf.mxu0  ;;  %v2349_v44 = vpack.c.bf16 %v7773_v22, %v7772_v38  ;;  %v2484_v38 = vpack.c.bf16 %v9487_v10, %v9479_v9  ;;  %v8316_v10 = vld [vmem:[%s10645_s11 + $0x34] ss:$12 sps:$4 sm:$0xff]  }
 0x421   :  { %v9493_v61 = vpop.f32.mrf.mxu0 }
 0x422   :  { %7221 = vmatpush3.bf16.msra.mxu1 %v2352_v41  ;;  %v2348_v41 = vpack.c.bf16 %v2302_v2, %v2299_v32  ;;  %v2346_v32 = vpack.c.bf16 %v9485_v39, %v9477_v33  ;;  %v8311_v39 = vld [vmem:[%s10645_s11 + $0x18] ss:$12 sps:$4 sm:$0xff]   ;;  %v2623_v60 = vpack.c.bf16 %v9493_v61, %v9489_v18  ;;  %v8320_v61 = vld [vmem:[%s10645_s11 + $0x60] ss:$12 sps:$4 sm:$0xff]  }
 0x423   :  { %7222 = vmatprep.subr.bf16.mxu1 %v2489_v58  ;;  %v9495_v23 = vpop.f32.mrf.mxu0  ;;  %v8324_v18 = vld [vmem:[%s10645_s11 + $0x20] ss:$12 sps:$4 sm:$0xff]  }
 0x424   :  { %v2622_v45 = vpack.c.bf16 %v9495_v23, %v9491_v59  ;;  %v8328_v23 = vld [vmem:[%s10645_s11 + $0x38] ss:$12 sps:$4 sm:$0xff]  }
 0x425   :  { %v7820_v0 = vpop.f32.mrf.mxu0  ;;  %v8325_v59 = vld [vmem:[%s10645_s11 + $0x78] ss:$12 sps:$4 sm:$0xff]  }
 0x426   :  { %7223 = vmatpush3.bf16.msra.mxu1 %v2351_v24  ;;  %v2347_v24 = vpack.c.bf16 %v9481_v13, %v9473_v17  ;;  %v8313_v17 = vld [vmem:[%s10645_s11 + $0x1c] ss:$12 sps:$4 sm:$0xff]  }
 0x427   :  { %7224 = vmatprep.subr.bf16.mxu1 %v2488_v55  ;;  %v2575_v36 = vpop.f32.mrf.mxu0  ;;  %v8327_v55 = vld [vmem:[%s10645_s11 + $0x7c] ss:$12 sps:$4 sm:$0xff]  }
 0x429   :  { %v7821_v25 = vpop.f32.mrf.mxu0 }
 0x42a   :  { %7225 = vmatpush3.bf16.msra.mxu1 %v2350_v14  ;;  %v2625_v53 = vpack.c.bf16 %v7821_v25, %v7820_v0  ;;  %v8329_v0 = vld [vmem:[%s10645_s11 + $0x50] ss:$12 sps:$4 sm:$0xff]   ;;  %v8332_v14 = vld [vmem:[%s10645_s11 + $0x94] ss:$12 sps:$4 sm:$0xff]  }
 0x42b   :  { %7226 = vmatprep.subr.bf16.mxu1 %v2487_v47  ;;  %v2578_v48 = vpop.f32.mrf.mxu0  ;;  %v8330_v47 = vld [vmem:[%s10645_s11 + $0x90] ss:$12 sps:$4 sm:$0xff]   ;;  %v8334_v25 = vld [vmem:[%s10645_s11 + $0x80] ss:$12 sps:$4 sm:$0xff]  }
 0x42c   :  { %v2624_v12 = vpack.c.bf16 %v2578_v48, %v2575_v36  ;;  %v8333_v36 = vld [vmem:[%s10645_s11 + $0x68] ss:$12 sps:$4 sm:$0xff]   ;;  %v8338_v48 = vld [vmem:[%s10645_s11 + $0x98] ss:$12 sps:$4 sm:$0xff]  }
 0x42d   :  { %v7824_v8 = vpop.f32.mrf.mxu0 }
 0x42e   :  { %7227 = vmatpush3.bf16.msra.mxu1 %v2349_v44  ;;  %v8337_v44 = vld [vmem:[%s10645_s11 + $0xac] ss:$12 sps:$4 sm:$0xff]  }
 0x42f   :  { %7228 = vmatprep.subr.bf16.mxu1 %v2486_v5  ;;  %v2591_v58 = vpop.f32.mrf.mxu0  ;;  %v8335_v5 = vld [vmem:[%s10645_s11 + $0xa8] ss:$12 sps:$4 sm:$0xff]  }
 0x431   :  { %v7825_v46 = vpop.f32.mrf.mxu0 }
 0x432   :  { %7229 = vmatpush3.bf16.msra.mxu1 %v2348_v41  ;;  %v2627_v33 = vpack.c.bf16 %v7825_v46, %v7824_v8  ;;  %v8339_v8 = vld [vmem:[%s10645_s11 + $0xb0] ss:$12 sps:$4 sm:$0xff]   ;;  %v8345_v46 = vld [vmem:[%s10646_s14 + $0x8] sm:$0xff]  }
 0x433   :  { %7230 = vmatprep.subr.bf16.mxu1 %v2485_v63  ;;  %v2594_v49 = vpop.f32.mrf.mxu0  ;;  %v8340_v41 = vld [vmem:[%s10646_s14 + $0x18] sm:$0xff]   ;;  %v8343_v63 = vld [vmem:[%s10646_s14 + $0x10] sm:$0xff]  }
 0x434   :  { %v2626_v2 = vpack.c.bf16 %v2594_v49, %v2591_v58  ;;  %v8341_v58 = vld [vmem:[%s10646_s14 + $0x38] sm:$0xff]   ;;  %v8346_v49 = vld [vmem:[%s10646_s14] sm:$0xff]  }
 0x435   :  { %v7828_v22 = vpop.f32.mrf.mxu0 }
 0x436   :  { %7231 = vmatpush3.bf16.msra.mxu1 %v2347_v24  ;;  %v8342_v24 = vld [vmem:[%s10646_s14 + $0x30] sm:$0xff]  }
 0x437   :  { %7232 = vmatprep.subr.bf16.mxu1 %v2484_v38  ;;  %v2607_v54 = vpop.f32.mrf.mxu0  ;;  %v8344_v38 = vld [vmem:[%s10646_s14 + $0x28] sm:$0xff]  }
 0x439   :  { %v7829_v6 = vpop.f32.mrf.mxu0 }
 0x43a   :  { %7233 = vmatpush3.bf16.msra.mxu1 %v2346_v32  ;;  %v2629_v13 = vpack.c.bf16 %v7829_v6, %v7828_v22  ;;  %v8348_v22 = vld [vmem:[#allocation2] sm:$0xff]   ;;  %v8349_v32 = vld [vmem:[#allocation2 + $0x8] sm:$0xff]   ;;  %v8357_v6 = vld [vmem:[%s10646_s14 + $0x70] sm:$0xff]  }
 0x43b   :  { %v2610_v40 = vpop.f32.mrf.mxu0  ;;  %7886 = vmatprep.subr.bf16.mxu1 %v8340_v41 }
 0x43c   :  { %v2628_v9 = vpack.c.bf16 %v2610_v40, %v2607_v54  ;;  %7830 = vmatprep.subr.bf16.mxu0 %v2629_v13  ;;  %v8347_v54 = vld [vmem:[%s10646_s14 + $0x20] sm:$0xff]  }
 0x43d   :  { %2823 = vmatmul.mubr.bf16.vlgmr.msra.gmra.mxu1 %v8308_v28  ;;  %7831 = vmatpush3.bf16.msra.mxu0 %v2629_v13  ;;  %v8356_v28 = vld [vmem:[%s10646_s14 + $0x78] sm:$0xff]   ;;  %v8361_v13 = vld [vmem:[%s10646_s14 + $0x68] sm:$0xff]   ;;  %v8363_v40 = vld [vmem:[%s10646_s14 + $0x60] sm:$0xff]  }
 0x43e   :  { %2830 = vmatprep.mubr.bf16.mxu1 %v8313_v17  ;;  %7832 = vmatprep.subr.bf16.mxu0 %v2628_v9  ;;  %v9611_v17 = vld [vmem:[%s10646_s14 + $0x58] sm:$0xff]  }
 0x43f   :  { %7887 = vmatpush3.bf16.msra.mxu1 %v8340_v41 }
 0x440   :  { %7888 = vmatprep.subr.bf16.mxu1 %v8343_v63 }
 0x441   :  { %7833 = vmatpush3.bf16.msra.mxu0 %v2628_v9 }
 0x442   :  { %7834 = vmatprep.subr.bf16.mxu0 %v2627_v33 }
 0x443   :  { %7889 = vmatpush3.bf16.msra.mxu1 %v8343_v63 }
 0x444   :  { %7890 = vmatprep.subr.bf16.mxu1 %v8345_v46 }
 0x445   :  { %2831 = vmatmul.mubr.bf16.gmra.mxu1 %v8311_v39  ;;  %7835 = vmatpush3.bf16.msra.mxu0 %v2627_v33 }
 0x446   :  { %2838 = vmatprep.mubr.bf16.mxu1 %v8316_v10  ;;  %7836 = vmatprep.subr.bf16.mxu0 %v2626_v2 }
 0x447   :  { %7891 = vmatpush3.bf16.msra.mxu1 %v8345_v46 }
 0x448   :  { %7892 = vmatprep.subr.bf16.mxu1 %v8346_v49 }
 0x449   :  { %7837 = vmatpush3.bf16.msra.mxu0 %v2626_v2 }
 0x44a   :  { %7838 = vmatprep.subr.bf16.mxu0 %v2625_v53 }
 0x44b   :  { %7893 = vmatpush3.bf16.msra.mxu1 %v8346_v49 }
 0x44c   :  { %7934 = vmatprep.subr.bf16.mxu1 %v8356_v28 }
 0x44d   :  { %2839 = vmatmul.mubr.bf16.gmra.mxu1 %v8314_v62  ;;  %7839 = vmatpush3.bf16.msra.mxu0 %v2625_v53 }
 0x44e   :  { %2846 = vmatprep.mubr.bf16.mxu1 %v8319_v19  ;;  %7840 = vmatprep.subr.bf16.mxu0 %v2624_v12 }
 0x451   :  { %7841 = vmatpush3.bf16.msra.mxu0 %v2624_v12 }
 0x452   :  { %7842 = vmatprep.subr.bf16.mxu0 %v2623_v60 }
 0x455   :  { %2847 = vmatmul.mubr.bf16.gmra.mxu1 %v8317_v1  ;;  %7843 = vmatpush3.bf16.msra.mxu0 %v2623_v60 }
 0x456   :  { %2854 = vmatprep.mubr.bf16.mxu1 %v8322_v31  ;;  %7844 = vmatprep.subr.bf16.mxu0 %v2622_v45 }
 0x459   :  { %7845 = vmatpush3.bf16.msra.mxu0 %v2622_v45 }
 0x45a   :  { %7862 = vmatprep.subr.bf16.mxu0 %v8341_v58 }
 0x45c   :  { %7847 = vmatmul.mubr.bf16.vlgmr.msra.gmra.mxu0 %v8324_v18 }
 0x45d   :  { %2855 = vmatmul.mubr.bf16.gmra.mxu1 %v8320_v61  ;;  %7850 = vmatprep.mubr.bf16.mxu0 %v8328_v23 }
 0x45e   :  { %2862 = vmatprep.mubr.bf16.mxu1 %v8327_v55  ;;  %7863 = vmatpush3.bf16.msra.mxu0 %v8341_v58  ;;  %v3007_v58 = vld [vmem:[%s10648_s13] sm:$0xff] }
 0x45f   :  { %7864 = vmatprep.subr.bf16.mxu0 %v8342_v24 }
 0x462   :  { %7865 = vmatpush3.bf16.msra.mxu0 %v8342_v24 }
 0x463   :  { %7866 = vmatprep.subr.bf16.mxu0 %v8344_v38 }
 0x464   :  { %7851 = vmatmul.mubr.bf16.gmra.mxu0 %v8329_v0 }
 0x465   :  { %2863 = vmatmul.mubr.bf16.gmra.mxu1 %v8325_v59  ;;  %7854 = vmatprep.mubr.bf16.mxu0 %v8333_v36 }
 0x466   :  { %2870 = vmatprep.mubr.bf16.mxu1 %v8332_v14  ;;  %7867 = vmatpush3.bf16.msra.mxu0 %v8344_v38  ;;  %v9625_v14 = vld [vmem:[%s10647_s12] ss:$0 sm:$0xff] }
 0x467   :  { %7868 = vmatprep.subr.bf16.mxu0 %v8347_v54 }
 0x46a   :  { %7869 = vmatpush3.bf16.msra.mxu0 %v8347_v54 }
 0x46b   :  { %7910 = vmatprep.subr.bf16.mxu0 %v9611_v17 }
 0x46c   :  { %7855 = vmatmul.mubr.bf16.gmra.mxu0 %v8334_v25  ;;  %v3009_v25 = vld [vmem:[%s10648_s13 + $0x10] sm:$0xff] }
 0x46d   :  { %2871 = vmatmul.mubr.bf16.gmra.mxu1 %v8330_v47  ;;  %7858 = vmatprep.mubr.bf16.mxu0 %v8338_v48 }
 0x46e   :  { %2878 = vmatprep.mubr.bf16.mxu1 %v8337_v44 }
 0x474   :  { %7859 = vmatmul.mubr.bf16.gmra.mxu0 %v8339_v8 }
 0x475   :  { %2879 = vmatmul.mubr.bf16.gmra.mxu1 %v8335_v5  ;;  %7870 = vmatprep.mubr.msk.bf16.mxu0 %vm1178_vm3, %v8349_v32 }
 0x476   :  { %7894 = vmatprep.mubr.msk.bf16.mxu1 %vm1178_vm3, %v8348_v22 }
 0x47d   :  { %7895 = vmatmul.mubr.msk.bf16.vlgmr.msra.gmra.mxu1 %vm1178_vm3, %v8349_v32  ;;  %v3010_v32 = vld [vmem:[%s10648_s13 + $0x18] sm:$0xff] }
 0x47e   :  { %7935 = vmatpush3.bf16.msra.mxu1 %v8356_v28 }
 0x47f   :  { %7936 = vmatprep.subr.bf16.mxu1 %v8357_v6 }
 0x482   :  { %7937 = vmatpush3.bf16.msra.mxu1 %v8357_v6 }
 0x483   :  { %7938 = vmatprep.subr.bf16.mxu1 %v8361_v13 }
 0x486   :  { %7939 = vmatpush3.bf16.msra.mxu1 %v8361_v13 }
 0x487   :  { %7940 = vmatprep.subr.bf16.mxu1 %v8363_v40 }
 0x48a   :  { %7941 = vmatpush3.bf16.msra.mxu1 %v8363_v40 }
 0x4fd   :  { %v7234_v9 = vpop.f32.mrf.mxu1 }
 0x4ff   :  { %v7235_v33 = vpop.f32.mrf.mxu1 }
 0x500   :  { %v7236_v36 = vadd.f32 %v7235_v33, %v7234_v9 }
 0x501   :  { %v7237_v39 = vpop.f32.mrf.mxu1 }
 0x503   :  { %v7238_v10 = vpop.f32.mrf.mxu1 }
 0x504   :  { %v7239_v22 = vadd.f32 %v7238_v10, %v7237_v39  ;;  %v3008_v39 = vld [vmem:[%s10648_s13 + $0x8] sm:$0xff] }
 0x505   :  { %v7240_v2 = vpop.f32.mrf.mxu1 }
 0x507   :  { %v7241_v53 = vpop.f32.mrf.mxu1 }
 0x508   :  { %v7242_v23 = vadd.f32 %v7241_v53, %v7240_v2 }
 0x509   :  { %v7243_v62 = vpop.f32.mrf.mxu1 }
 0x50b   :  { %v7244_v19 = vpop.f32.mrf.mxu1 }
 0x50c   :  { %v7245_v5 = vadd.f32 %v7244_v19, %v7243_v62 }
 0x50d   :  { %v7246_v12 = vpop.f32.mrf.mxu1 }
 0x50f   :  { %v7247_v60 = vpop.f32.mrf.mxu1 }
 0x511   :  { %v7249_v1 = vpop.f32.mrf.mxu1 }
 0x513   :  { %v7250_v31 = vpop.f32.mrf.mxu1 }
 0x515   :  { %v7252_v45 = vpop.f32.mrf.mxu1 }
 0x517   :  { %v7253_v61 = vpop.f32.mrf.mxu1 }
 0x518   :  { %v7254_v6 = vadd.f32 %v7253_v61, %v7252_v45  ;;  %v3013_v45 = vld [vmem:[%s10648_s13 + $0x30] sm:$0xff] }
 0x519   :  { %v7255_v18 = vpop.f32.mrf.mxu1 }
 0x51b   :  { %v7256_v55 = vpop.f32.mrf.mxu1 }
 0x51c   :  { %v7848_v0 = vpop.f32.mrf.mxu0 }
 0x51d   :  { %v9620_v59 = vpop.f32.mrf.mxu1  ;;  %v2930_v47 = vadd.f32 %v7848_v0, %v7242_v23  ;;  %v7248_v0 = vadd.f32 %v7247_v60, %v7246_v12 }
 0x51e   :  { %v2921_v48 = vpop.f32.mrf.mxu0 }
 0x51f   :  { %v9630_v44 = vpop.f32.mrf.mxu1  ;;  %v2993_v8 = vmul.f32 %v9625_v14, %v2930_v47  ;;  %v2922_v41 = vadd.f32 %v7236_v36, %v2921_v48 }
 0x520   :  { %v7849_v46 = vpop.f32.mrf.mxu0 }
 0x521   :  { %v9636_v63 = vpop.f32.mrf.mxu1  ;;  %v3025_v24 = vadd.f32 %v3009_v25, %v2993_v8  ;;  %v2991_v49 = vmul.f32 %v9625_v14, %v2922_v41  ;;  %v2933_v38 = vadd.f32 %v7849_v46, %v7245_v5  ;;  %v7257_v25 = vadd.f32 %v7256_v55, %v7255_v18  ;;  %v3011_v18 = vld [vmem:[%s10648_s13 + $0x20] sm:$0xff] }
 0x522   :  { %v2924_v28 = vpop.f32.mrf.mxu0  ;;  %v7251_v41 = vadd.f32 %v7250_v31, %v7249_v1  ;;  %v3014_v1 = vld [vmem:[%s10648_s13 + $0x38] sm:$0xff] }
 0x523   :  { %v9642_v54 = vpop.f32.mrf.mxu1  ;;  %v3041_v13 = vmax.f32 %v3025_v24, 0.0  ;;  %v3023_v40 = vadd.f32 %v3007_v58, %v2991_v49  ;;  %v2994_v9 = vmul.f32 %v9625_v14, %v2933_v38  ;;  %v2925_v33 = vadd.f32 %v7239_v22, %v2924_v28 }
 0x524   :  { %v7852_v53 = vpop.f32.mrf.mxu0 }
 0x525   :  { %v7264_v2 = vpop.f32.mrf.mxu1  ;;  %v6976_v62 = vpack.c.bf16 %v3041_v13, %v3041_v13  ;;  %v3039_v19 = vmax.f32 %v3023_v40, 0.0  ;;  %v3026_v23 = vadd.f32 %v3010_v32, %v2994_v9  ;;  %v2946_v10 = vadd.f32 %v7852_v53, %v7254_v6 }
 0x526   :  { %v2992_v36 = vmul.f32 %v9625_v14, %v2925_v33  ;;  %v2937_v47 = vpop.f32.mrf.mxu0 }
 0x527   :  { %v7265_v61 = vpop.f32.mrf.mxu1  ;;  %3121 = vst.msk [vmem:[#allocation2 + $0x18] sm:$0xf] %vm78_vm2, %v6976_v62  ;;  %v6974_v48 = vpack.c.bf16 %v3039_v19, %v3039_v19  ;;  %v3042_v5 = vmax.f32 %v3026_v23, 0.0  ;;  %v2997_v8 = vmul.f32 %v9625_v14, %v2946_v10  ;;  %v2938_v46 = vadd.f32 %v7248_v0, %v2937_v47 }
 0x528   :  { %v3024_v58 = vadd.f32 %v3008_v39, %v2992_v36  ;;  %v7853_v12 = vpop.f32.mrf.mxu0  ;;  %v7266_v38 = vadd.f32 %v7265_v61, %v7264_v2  ;;  %v3012_v2 = vld [vmem:[%s10648_s13 + $0x28] sm:$0xff]  ;;  %v7260_v0 = vadd.f32 %v9630_v44, %v9620_v59 }
 0x529   :  { %v7267_v24 = vpop.f32.mrf.mxu1  ;;  %3119 = vst.msk [vmem:[#allocation2 + $0x10] sm:$0xf] %vm78_vm2, %v6974_v48  ;;  %v6977_v60 = vpack.c.bf16 %v3042_v5, %v3042_v5  ;;  %v3029_v49 = vadd.f32 %v3013_v45, %v2997_v8  ;;  %v2949_v55 = vadd.f32 %v7853_v12, %v7257_v25  ;;  %v2995_v32 = vmul.f32 %v9625_v14, %v2938_v46  ;;  %v3017_v45 = vld [vmem:[%s10648_s13 + $0x50] sm:$0xff] }
 0x52a   :  { %v3040_v22 = vmax.f32 %v3024_v58, 0.0  ;;  %v2940_v28 = vpop.f32.mrf.mxu0 }
 0x52b   :  { %v7268_v31 = vpop.f32.mrf.mxu1  ;;  %3122 = vst.msk [vmem:[#allocation2 + $0x1c] sm:$0xf] %vm78_vm2, %v6977_v60  ;;  %v3045_v6 = vmax.f32 %v3029_v49, 0.0  ;;  %v2998_v13 = vmul.f32 %v9625_v14, %v2949_v55  ;;  %v2941_v40 = vadd.f32 %v7251_v41, %v2940_v28  ;;  %v3027_v33 = vadd.f32 %v3011_v18, %v2995_v32  ;;  %v3015_v49 = vld [vmem:[%s10648_s13 + $0x40] sm:$0xff]  ;;  %v3018_v55 = vld [vmem:[%s10648_s13 + $0x58] sm:$0xff] }
 0x52c   :  { %v6975_v9 = vpack.c.bf16 %v3040_v22, %v3040_v22  ;;  %v7856_v62 = vpop.f32.mrf.mxu0  ;;  %v7269_v48 = vadd.f32 %v7268_v31, %v7267_v24  ;;  %v7263_v18 = vadd.f32 %v9642_v54, %v9636_v63  ;;  %v3016_v63 = vld [vmem:[%s10648_s13 + $0x48] sm:$0xff] }
 0x52d   :  { %v7270_v53 = vpop.f32.mrf.mxu1  ;;  %v6980_v19 = vpack.c.bf16 %v3045_v6, %v3045_v6  ;;  %v3030_v23 = vadd.f32 %v3014_v1, %v2998_v13  ;;  %v2996_v39 = vmul.f32 %v9625_v14, %v2941_v40  ;;  %v2962_v10 = vadd.f32 %v7856_v62, %v7266_v38 }
 0x52e   :  { %3120 = vst.msk [vmem:[#allocation2 + $0x14] sm:$0xf] %vm78_vm2, %v6975_v9  ;;  %v3043_v36 = vmax.f32 %v3027_v33, 0.0  ;;  %v2953_v47 = vpop.f32.mrf.mxu0  ;;  %v8354_v9 = vld [vmem:[%s10646_s14 + $0x50] sm:$0xff]  }
 0x52f   :  { %v7271_v61 = vpop.f32.mrf.mxu1  ;;  %3125 = vst.msk [vmem:[#allocation2 + $0x28] sm:$0xf] %vm78_vm2, %v6980_v19  ;;  %v3046_v25 = vmax.f32 %v3030_v23, 0.0  ;;  %v3028_v5 = vadd.f32 %v3012_v2, %v2996_v39  ;;  %v3001_v8 = vmul.f32 %v9625_v14, %v2962_v10  ;;  %v2954_v58 = vadd.f32 %v7260_v0, %v2953_v47 }
 0x530   :  { %v6978_v41 = vpack.c.bf16 %v3043_v36, %v3043_v36  ;;  %v7857_v59 = vpop.f32.mrf.mxu0  ;;  %v7272_v2 = vadd.f32 %v7271_v61, %v7270_v53  ;;  %v3021_v53 = vld [vmem:[%s10648_s13 + $0x70] sm:$0xff]  ;;  %v3019_v61 = vld [vmem:[%s10648_s13 + $0x60] sm:$0xff] }
 0x531   :  { %v7273_v46 = vpop.f32.mrf.mxu1  ;;  %v6981_v44 = vpack.c.bf16 %v3046_v25, %v3046_v25  ;;  %v3044_v12 = vmax.f32 %v3028_v5, 0.0  ;;  %v3033_v60 = vadd.f32 %v3017_v45, %v3001_v8  ;;  %v2965_v38 = vadd.f32 %v7857_v59, %v7269_v48 }
 0x532   :  { %3123 = vst.msk [vmem:[#allocation2 + $0x20] sm:$0xf] %vm78_vm2, %v6978_v41  ;;  %v2999_v24 = vmul.f32 %v9625_v14, %v2954_v58  ;;  %v2956_v32 = vpop.f32.mrf.mxu0  ;;  %v8352_v36 = vld [vmem:[#allocation2 + $0x18] sm:$0xff]  }
 0x533   :  { %v7274_v22 = vpop.f32.mrf.mxu1  ;;  %3126 = vst.msk [vmem:[#allocation2 + $0x2c] sm:$0xf] %vm78_vm2, %v6981_v44  ;;  %v6979_v1 = vpack.c.bf16 %v3044_v12, %v3044_v12  ;;  %v3049_v31 = vmax.f32 %v3033_v60, 0.0  ;;  %v3002_v28 = vmul.f32 %v9625_v14, %v2965_v38  ;;  %v2957_v13 = vadd.f32 %v7263_v18, %v2956_v32  ;;  %v8359_v18 = vld [vmem:[%s10646_s14 + $0x48] sm:$0xff]  }
 0x534   :  { %v3031_v6 = vadd.f32 %v3015_v49, %v2999_v24  ;;  %v7860_v40 = vpop.f32.mrf.mxu0  ;;  %v7275_v59 = vadd.f32 %v7274_v22, %v7273_v46 }
 0x535   :  { %v7276_v54 = vpop.f32.mrf.mxu1  ;;  %3124 = vst.msk [vmem:[#allocation2 + $0x24] sm:$0xf] %vm78_vm2, %v6979_v1  ;;  %v6984_v33 = vpack.c.bf16 %v3049_v31, %v3049_v31  ;;  %v3034_v62 = vadd.f32 %v3018_v55, %v3002_v28  ;;  %v8350_v19 = vld [vmem:[#allocation2 + $0x10] sm:$0xff]   ;;  %v3000_v39 = vmul.f32 %v9625_v14, %v2957_v13  ;;  %v3022_v1 = vld [vmem:[%s10648_s13 + $0x78] sm:$0xff] }
 0x536   :  { %v3047_v23 = vmax.f32 %v3031_v6, 0.0  ;;  %v2969_v0 = vpop.f32.mrf.mxu0  ;;  %7871 = vmatmul.mubr.msk.bf16.vlgmr.msra.gmra.mxu0 %vm1178_vm3, %v8350_v19  ;;  %7898 = vmatprep.mubr.msk.bf16.mxu1 %vm1178_vm3, %v8350_v19 }
 0x537   :  { %v7277_v10 = vpop.f32.mrf.mxu1  ;;  %3129 = vst.msk [vmem:[#allocation2 + $0x38] sm:$0xf] %vm78_vm2, %v6984_v33  ;;  %v3050_v45 = vmax.f32 %v3034_v62, 0.0  ;;  %v2970_v25 = vadd.f32 %v7272_v2, %v2969_v0  ;;  %v3032_v5 = vadd.f32 %v3016_v63, %v3000_v39  ;;  %7874 = vmatprep.mubr.msk.bf16.mxu0 %vm1178_vm3, %v8352_v36  ;;  %7899 = vmatmul.mubr.msk.bf16.gmra.mxu1 %vm1178_vm3, %v8352_v36 }
 0x538   :  { %v7278_v47 = vadd.f32 %v7277_v10, %v7276_v54  ;;  %v6982_v48 = vpack.c.bf16 %v3047_v23, %v3047_v23  ;;  %v7861_v41 = vpop.f32.mrf.mxu0  ;;  %7911 = vmatpush3.bf16.msra.mxu0 %v9611_v17  ;;  %v3020_v17 = vld [vmem:[%s10648_s13 + $0x68] sm:$0xff]  ;;  %v8370_v10 = vld [vmem:[%s10646_s14 + $0x98] sm:$0xff]  }
 0x539   :  { %v7279_v8 = vpop.f32.mrf.mxu1  ;;  %v6985_v58 = vpack.c.bf16 %v3050_v45, %v3050_v45  ;;  %v3003_v12 = vmul.f32 %v9625_v14, %v2970_v25  ;;  %v3048_v60 = vmax.f32 %v3032_v5, 0.0  ;;  %7912 = vmatprep.subr.bf16.mxu0 %v8354_v9  ;;  %v8362_v25 = vld [vmem:[#allocation2 + $0x18] sm:$0xff]   ;;  %v8366_v5 = vld [vmem:[#allocation2 + $0x10] sm:$0xff]  }
 0x53a   :  { %v2978_v44 = vadd.f32 %v7860_v40, %v7278_v47  ;;  %3127 = vst.msk [vmem:[#allocation2 + $0x30] sm:$0xf] %vm78_vm2, %v6982_v48  ;;  %v2972_v38 = vpop.f32.mrf.mxu0  ;;  %v8355_v54 = vld [vmem:[#allocation2 + $0x28] sm:$0xff]   ;;  %v8365_v40 = vld [vmem:[%s10646_s14 + $0x40] sm:$0xff]  }
 0x53b   :  { %v7280_v49 = vpop.f32.mrf.mxu1  ;;  %3130 = vst.msk [vmem:[#allocation2 + $0x3c] sm:$0xf] %vm78_vm2, %v6985_v58  ;;  %v3035_v46 = vadd.f32 %v3019_v61, %v3003_v12  ;;  %v2973_v22 = vadd.f32 %v7275_v59, %v2972_v38  ;;  %v6983_v32 = vpack.c.bf16 %v3048_v60, %v3048_v60  ;;  %v8368_v61 = vld [vmem:[#allocation2 + $0x28] sm:$0xff]   ;;  %v8375_v59 = vld [vmem:[%s10646_s14 + $0x90] sm:$0xff]  }
 0x53c   :  { %v3005_v24 = vmul.f32 %v9625_v14, %v2978_v44  ;;  %v7281_v55 = vadd.f32 %v7280_v49, %v7279_v8  ;;  %v8353_v31 = vld [vmem:[#allocation2 + $0x20] sm:$0xff]   ;;  %7913 = vmatpush3.bf16.msra.mxu0 %v8354_v9  ;;  %v8369_v8 = vld [vmem:[#allocation2 + $0x18] sm:$0xff]   ;;  %v8380_v12 = vld [vmem:[%s10646_s14 + $0x88] sm:$0xff]  }
 0x53d   :  { %v3051_v6 = vmax.f32 %v3035_v46, 0.0  ;;  %v3004_v63 = vmul.f32 %v9625_v14, %v2973_v22  ;;  %3128 = vst.msk [vmem:[#allocation2 + $0x34] sm:$0xf] %vm78_vm2, %v6983_v32  ;;  %7902 = vmatprep.mubr.msk.bf16.mxu1 %vm1178_vm3, %v8353_v31  ;;  %7914 = vmatprep.subr.bf16.mxu0 %v8359_v18  ;;  %v8374_v60 = vld [vmem:[#allocation2 + $0x28] sm:$0xff]   ;;  %v8385_v46 = vld [vmem:[#allocation2 + $0x50] sm:$0xff]   ;;  %v8384_v32 = vld [vmem:[#allocation2 + $0x20] sm:$0xff]  }
 0x53e   :  { %v3037_v28 = vadd.f32 %v3021_v53, %v3005_v24  ;;  %v2981_v13 = vadd.f32 %v7861_v41, %v7281_v55  ;;  %7875 = vmatmul.mubr.msk.bf16.gmra.mxu0 %vm1178_vm3, %v8353_v31  ;;  %v8367_v53 = vld [vmem:[#allocation2 + $0x20] sm:$0xff]  }
 0x53f   :  { %v6986_v2 = vpack.c.bf16 %v3051_v6, %v3051_v6  ;;  %v3036_v19 = vadd.f32 %v3020_v17, %v3004_v63  ;;  %7878 = vmatprep.mubr.msk.bf16.mxu0 %vm1178_vm3, %v8355_v54  ;;  %7903 = vmatmul.mubr.msk.bf16.gmra.mxu1 %vm1178_vm3, %v8355_v54  ;;  %v8371_v41 = vld [vmem:[#allocation2 + $0x20] sm:$0xff]   ;;  %v8392_v54 = vld [vmem:[#allocation2 + $0x58] sm:$0xff]  }
 0x540   :  { %v3053_v33 = vmax.f32 %v3037_v28, 0.0  ;;  %v3006_v62 = vmul.f32 %v9625_v14, %v2981_v13  ;;  %7915 = vmatpush3.bf16.msra.mxu0 %v8359_v18  ;;  %v8383_v18 = vld [vmem:[%s10646_s14 + $0x80] sm:$0xff]   ;;  %v8391_v13 = vld [vmem:[#allocation2 + $0x50] sm:$0xff]  }
 0x541   :  { %3131 = vst.msk [vmem:[#allocation2 + $0x40] sm:$0xf] %vm78_vm2, %v6986_v2  ;;  %v3052_v39 = vmax.f32 %v3036_v19, 0.0  ;;  %7916 = vmatprep.subr.bf16.mxu0 %v8365_v40  ;;  %v8395_v2 = vld [vmem:[%s10649_s17 + $0x10] sm:$0xff]   ;;  %v8397_v19 = vld [vmem:[%s10649_s17 + $0x8] sm:$0xff]  }
 0x542   :  { %v6988_v9 = vpack.c.bf16 %v3053_v33, %v3053_v33  ;;  %v3038_v23 = vadd.f32 %v3022_v1, %v3006_v62  ;;  %v8360_v47 = vld [vmem:[#allocation2 + $0x38] sm:$0xff]   ;;  %v8386_v1 = vld [vmem:[#allocation2 + $0x28] sm:$0xff]   ;;  %v8396_v62 = vld [vmem:[%s10649_s17 + $0x30] sm:$0xff]  }
 0x543   :  { %v6987_v0 = vpack.c.bf16 %v3052_v39, %v3052_v39  ;;  %v8373_v44 = vld [vmem:[#allocation2 + $0x38] sm:$0xff]   ;;  %v8400_v39 = vld [vmem:[%s10649_s17 + $0x20] sm:$0xff]  }
 0x544   :  { %3133 = vst.msk [vmem:[#allocation2 + $0x48] sm:$0xf] %vm78_vm2, %v6988_v9  ;;  %v3054_v14 = vmax.f32 %v3038_v23, 0.0  ;;  %v8358_v45 = vld [vmem:[#allocation2 + $0x30] sm:$0xff]   ;;  %7917 = vmatpush3.bf16.msra.mxu0 %v8365_v40  ;;  %v8379_v55 = vld [vmem:[#allocation2 + $0x38] sm:$0xff]   ;;  %v8398_v9 = vld [vmem:[%s10649_s17 + $0x28] sm:$0xff]  }
 0x545   :  { %3132 = vst.msk [vmem:[#allocation2 + $0x44] sm:$0xf] %vm78_vm2, %v6987_v0  ;;  %7958 = vmatprep.subr.bf16.mxu0 %v8370_v10  ;;  %7906 = vmatprep.mubr.msk.bf16.mxu1 %vm1178_vm3, %v8358_v45  ;;  %v8372_v58 = vld [vmem:[#allocation2 + $0x30] sm:$0xff]   ;;  %v8388_v28 = vld [vmem:[#allocation2 + $0x38] sm:$0xff]   ;;  %v8399_v23 = vld [vmem:[%s10649_s17] sm:$0xff]  }
 0x546   :  { %v6989_v36 = vpack.c.bf16 %v3054_v14, %v3054_v14  ;;  %7879 = vmatmul.mubr.msk.bf16.gmra.mxu0 %vm1178_vm3, %v8358_v45  ;;  %v8376_v49 = vld [vmem:[#allocation2 + $0x30] sm:$0xff]   ;;  %v8393_v40 = vld [vmem:[%s10649_s17 + $0x18] sm:$0xff]   ;;  %v7896_v14 = vpop.f32.mrf.mxu1 }
 0x547   :  { %7882 = vmatprep.mubr.msk.bf16.mxu0 %vm1178_vm3, %v8360_v47  ;;  %7907 = vmatmul.mubr.msk.bf16.gmra.mxu1 %vm1178_vm3, %v8360_v47  ;;  %v8387_v31 = vld [vmem:[#allocation2 + $0x30] sm:$0xff]   ;;  %v8394_v33 = vld [vmem:[%s10649_s17 + $0x38] sm:$0xff]  }
 0x548   :  { %3134 = vst.msk [vmem:[#allocation2 + $0x4c] sm:$0xf] %vm78_vm2, %v6989_v36  ;;  %7942 = vmatprep.mubr.msk.bf16.mxu1 %vm1178_vm3, %v8362_v25  ;;  %7982 = vmatprep.subr.bf16.mxu1 %v8393_v40  ;;  %v3421_v0 = vpop.f32.mrf.mxu1 }
 0x54a   :  { %v7897_v36 = vpop.f32.mrf.mxu1 }
 0x54c   :  { %v8364_v48 = vld [vmem:[#allocation2 + $0x40] sm:$0xff]   ;;  %v3424_v45 = vpop.f32.mrf.mxu1 }
 0x54d   :  { %v8377_v38 = vld [vmem:[#allocation2 + $0x40] sm:$0xff]  }
 0x54e   :  { %7883 = vmatmul.mubr.msk.bf16.gmra.mxu0 %vm1178_vm3, %v8364_v48  ;;  %v8381_v22 = vld [vmem:[#allocation2 + $0x40] sm:$0xff]  }
 0x54f   :  { %7918 = vmatprep.mubr.msk.bf16.mxu0 %vm1178_vm3, %v8366_v5  ;;  %7943 = vmatmul.mubr.msk.bf16.vlgmr.msra.gmra.mxu1 %vm1178_vm3, %v8367_v53  ;;  %v8378_v24 = vld [vmem:[#allocation2 + $0x48] sm:$0xff]   ;;  %v8389_v6 = vld [vmem:[#allocation2 + $0x40] sm:$0xff]  }
 0x550   :  { %7946 = vmatprep.mubr.msk.bf16.mxu1 %vm1178_vm3, %v8368_v61  ;;  %v8382_v17 = vld [vmem:[#allocation2 + $0x48] sm:$0xff]   ;;  %7983 = vmatpush3.bf16.msra.mxu1 %v8393_v40 }
 0x551   :  { %v8390_v63 = vld [vmem:[#allocation2 + $0x48] sm:$0xff]   ;;  %7984 = vmatprep.subr.bf16.mxu1 %v8395_v2 }
 0x554   :  { %7985 = vmatpush3.bf16.msra.mxu1 %v8395_v2 }
 0x555   :  { %7986 = vmatprep.subr.bf16.mxu1 %v8397_v19 }
 0x556   :  { %7919 = vmatmul.mubr.msk.bf16.vlgmr.msra.gmra.mxu0 %vm1178_vm3, %v8369_v8 }
 0x557   :  { %7922 = vmatprep.mubr.msk.bf16.mxu0 %vm1178_vm3, %v8371_v41  ;;  %7947 = vmatmul.mubr.msk.bf16.gmra.mxu1 %vm1178_vm3, %v8372_v58 }
 0x558   :  { %7959 = vmatpush3.bf16.msra.mxu0 %v8370_v10  ;;  %7950 = vmatprep.mubr.msk.bf16.mxu1 %vm1178_vm3, %v8373_v44  ;;  %v9803_v10 = vld [vmem:[%s10649_s17 + $0x58] sm:$0xff]  }
 0x559   :  { %7960 = vmatprep.subr.bf16.mxu0 %v8375_v59  ;;  %7987 = vmatpush3.bf16.msra.mxu1 %v8397_v19  ;;  %10795 = vst [vmem:[#allocation5_spill] sm:$0xff] %v9803_v10 }
 0x55a   :  { %7988 = vmatprep.subr.bf16.mxu1 %v8399_v23 }
 0x55c   :  { %7961 = vmatpush3.bf16.msra.mxu0 %v8375_v59 }
 0x55d   :  { %7962 = vmatprep.subr.bf16.mxu0 %v8380_v12  ;;  %7989 = vmatpush3.bf16.msra.mxu1 %v8399_v23 }
 0x55e   :  { %7923 = vmatmul.mubr.msk.bf16.gmra.mxu0 %vm1178_vm3, %v8374_v60  ;;  %8030 = vmatprep.subr.bf16.mxu1 %v9803_v10 }
 0x55f   :  { %7926 = vmatprep.mubr.msk.bf16.mxu0 %vm1178_vm3, %v8376_v49  ;;  %7951 = vmatmul.mubr.msk.bf16.gmra.mxu1 %vm1178_vm3, %v8377_v38 }
 0x560   :  { %7954 = vmatprep.mubr.msk.bf16.mxu1 %vm1178_vm3, %v8378_v24  ;;  %7963 = vmatpush3.bf16.msra.mxu0 %v8380_v12 }
 0x561   :  { %7964 = vmatprep.subr.bf16.mxu0 %v8383_v18 }
 0x564   :  { %7965 = vmatpush3.bf16.msra.mxu0 %v8383_v18 }
 0x565   :  { %8006 = vmatprep.subr.bf16.mxu0 %v8394_v33 }
 0x566   :  { %7927 = vmatmul.mubr.msk.bf16.gmra.mxu0 %vm1178_vm3, %v8379_v55 }
 0x567   :  { %7930 = vmatprep.mubr.msk.bf16.mxu0 %vm1178_vm3, %v8381_v22  ;;  %7955 = vmatmul.mubr.msk.bf16.gmra.mxu1 %vm1178_vm3, %v8385_v46 }
 0x56e   :  { %7931 = vmatmul.mubr.msk.bf16.gmra.mxu0 %vm1178_vm3, %v8382_v17 }
 0x56f   :  { %7966 = vmatprep.mubr.msk.bf16.mxu0 %vm1178_vm3, %v8384_v32 }
 0x576   :  { %7967 = vmatmul.mubr.msk.bf16.vlgmr.msra.gmra.mxu0 %vm1178_vm3, %v8386_v1 }
 0x577   :  { %7970 = vmatprep.mubr.msk.bf16.mxu0 %vm1178_vm3, %v8387_v31  ;;  %8007 = vmatpush3.bf16.msra.mxu0 %v8394_v33 }
 0x578   :  { %8008 = vmatprep.subr.bf16.mxu0 %v8396_v62 }
 0x57b   :  { %8009 = vmatpush3.bf16.msra.mxu0 %v8396_v62 }
 0x57c   :  { %8010 = vmatprep.subr.bf16.mxu0 %v8398_v9 }
 0x57e   :  { %7971 = vmatmul.mubr.msk.bf16.gmra.mxu0 %vm1178_vm3, %v8388_v28 }
 0x57f   :  { %7974 = vmatprep.mubr.msk.bf16.mxu0 %vm1178_vm3, %v8389_v6  ;;  %8011 = vmatpush3.bf16.msra.mxu0 %v8398_v9 }
 0x580   :  { %8012 = vmatprep.subr.bf16.mxu0 %v8400_v39 }
 0x583   :  { %8013 = vmatpush3.bf16.msra.mxu0 %v8400_v39 }
 0x586   :  { %7975 = vmatmul.mubr.msk.bf16.gmra.mxu0 %vm1178_vm3, %v8390_v63 }
 0x587   :  { %7978 = vmatprep.mubr.msk.bf16.mxu0 %vm1178_vm3, %v8391_v13 }
 0x58e   :  { %7979 = vmatmul.mubr.msk.bf16.gmra.mxu0 %vm1178_vm3, %v8392_v54 }
 0x5f6   :  { %v7872_v47 = vpop.f32.mrf.mxu0 }
 0x5f7   :  { %v9806_v25 = vpop.f32.mrf.mxu1  ;;  %v3430_v30 = vadd.f32 %v7896_v14, %v7872_v47 }
 0x5f8   :  { %v3292_v48 = vpop.f32.mrf.mxu0 }
 0x5f9   :  { %v9808_v5 = vpop.f32.mrf.mxu1  ;;  %v3422_v20 = vadd.f32 %v3421_v0, %v3292_v48  ;;  %v9867_v0 = vld [vmem:[%s10650_s15] ss:$0 sm:$0xff] }
 0x5fa   :  { %v7873_v53 = vpop.f32.mrf.mxu0 }
 0x5fb   :  { %v9810_v61 = vpop.f32.mrf.mxu1 }
 0x5fc   :  { %v3295_v8 = vpop.f32.mrf.mxu0 }
 0x5fd   :  { %v9812_v41 = vpop.f32.mrf.mxu1 }
 0x5fe   :  { %v7876_v58 = vpop.f32.mrf.mxu0 }
 0x5ff   :  { %v9814_v59 = vpop.f32.mrf.mxu1 }
 0x600   :  { %v3308_v44 = vpop.f32.mrf.mxu0 }
 0x601   :  { %v9816_v12 = vpop.f32.mrf.mxu1  ;;  %v3438_v47 = vadd.f32 %v9808_v5, %v3308_v44 }
 0x602   :  { %v7877_v60 = vpop.f32.mrf.mxu0 }
 0x603   :  { %v9818_v49 = vpop.f32.mrf.mxu1 }
 0x604   :  { %v9820_v38 = vpop.f32.mrf.mxu0 }
 0x605   :  { %v9822_v18 = vpop.f32.mrf.mxu1 }
 0x606   :  { %v9824_v24 = vpop.f32.mrf.mxu0 }
 0x607   :  { %v9826_v46 = vpop.f32.mrf.mxu1  ;;  %v3462_v44 = vadd.f32 %v9814_v59, %v9824_v24 }
 0x608   :  { %v9828_v55 = vpop.f32.mrf.mxu0 }
 0x609   :  { %v9832_v17 = vpop.f32.mrf.mxu1 }
 0x60a   :  { %v9830_v22 = vpop.f32.mrf.mxu0 }
 0x60b   :  { %v9838_v31 = vpop.f32.mrf.mxu1 }
 0x60c   :  { %v9834_v32 = vpop.f32.mrf.mxu0  ;;  %10796 = vst [vmem:[#allocation8_spill] sm:$0xff] %v9838_v31 }
 0x60d   :  { %v9844_v13 = vpop.f32.mrf.mxu1 }
 0x60e   :  { %v9836_v1 = vpop.f32.mrf.mxu0  ;;  %10798 = vst [vmem:[#allocation10_spill] sm:$0xff] %v9844_v13 }
 0x60f   :  { %v7944_v40 = vpop.f32.mrf.mxu1 }
 0x610   :  { %v9840_v28 = vpop.f32.mrf.mxu0 }
 0x611   :  { %v3857_v62 = vpop.f32.mrf.mxu1 }
 0x612   :  { %v9842_v6 = vpop.f32.mrf.mxu0 }
 0x613   :  { %10797 = vst [vmem:[#allocation9_spill] sm:$0xff] %v9842_v6  ;;  %v7945_v23 = vpop.f32.mrf.mxu1  ;;  %v3425_v6 = vadd.f32 %v3424_v45, %v3295_v8  ;;  %v3449_v45 = vadd.f32 %v9810_v61, %v7877_v60 }
 0x614   :  { %v9846_v63 = vpop.f32.mrf.mxu0 }
 0x615   :  { %10799 = vst [vmem:[#allocation11_spill] sm:$0xff] %v9846_v63  ;;  %v3860_v50 = vpop.f32.mrf.mxu1  ;;  %v3433_v63 = vadd.f32 %v7897_v36, %v7873_v53  ;;  %v3446_v36 = vadd.f32 %v9806_v25, %v7876_v58 }
 0x616   :  { %v7920_v54 = vpop.f32.mrf.mxu0 }
 0x617   :  { %v7948_v52 = vpop.f32.mrf.mxu1  ;;  %v3696_v11 = vadd.f32 %v7920_v54, %v3430_v30 }
 0x618   :  { %v3631_v33 = vpop.f32.mrf.mxu0 }
 0x619   :  { %v3873_v34 = vpop.f32.mrf.mxu1  ;;  %v3694_v10 = vadd.f32 %v3631_v33, %v3422_v20  ;;  %v3922_v35 = vadd.f32 %v7944_v40, %v3696_v11  ;;  %v3454_v33 = vadd.f32 %v9816_v12, %v9828_v55 }
 0x61a   :  { %v7921_v2 = vpop.f32.mrf.mxu0 }
 0x61b   :  { %v7949_v43 = vpop.f32.mrf.mxu1  ;;  %v3697_v27 = vadd.f32 %v7921_v2, %v3433_v63  ;;  %v3920_v30 = vadd.f32 %v3857_v62, %v3694_v10  ;;  %v9876_v63 = vld [vmem:[%s10651_s16] ss:$0 sm:$0xff]  ;;  %v3465_v2 = vadd.f32 %v9818_v49, %v9830_v22  ;;  %v10803_v49 = vmax.f32 %v9287_v3, 0.0 }
 0x61c   :  { %v3634_v19 = vpop.f32.mrf.mxu0 }
 0x61d   :  { %v9860_v16 = vpop.f32.mrf.mxu1  ;;  %v3923_v53 = vadd.f32 %v7945_v23, %v3697_v27  ;;  %v3441_v27 = vadd.f32 %v9812_v41, %v9820_v38 }
 0x61e   :  { %v7924_v9 = vpop.f32.mrf.mxu0 }
 0x61f   :  { %v3700_v11 = vadd.f32 %v7924_v9, %v3446_v36 }
 0x620   :  { %v3647_v39 = vpop.f32.mrf.mxu0 }
 0x622   :  { %v7925_v4 = vpop.f32.mrf.mxu0 }
 0x623   :  { %v3701_v5 = vadd.f32 %v7925_v4, %v3449_v45  ;;  %v3457_v4 = vadd.f32 %v9822_v18, %v9834_v32 }
 0x624   :  { %v3650_v26 = vpop.f32.mrf.mxu0 }
 0x625   :  { %v3927_v55 = vadd.f32 %v7949_v43, %v3701_v5  ;;  %v10805_v43 = vmax.f32 %v9268_v42, 0.0 }
 0x626   :  { %v7928_v51 = vpop.f32.mrf.mxu0 }
 0x627   :  { %v3704_v9 = vadd.f32 %v7928_v51, %v3462_v44 }
 0x628   :  { %v9848_v21 = vpop.f32.mrf.mxu0 }
 0x629   :  { %v3702_v51 = vadd.f32 %v9848_v21, %v3454_v33 }
 0x62a   :  { %v9850_v37 = vpop.f32.mrf.mxu0 }
 0x62b   :  { %10800 = vst [vmem:[#allocation20_spill] sm:$0xff] %v9850_v37  ;;  %v3695_v37 = vadd.f32 %v3634_v19, %v3425_v6  ;;  %v3699_v19 = vadd.f32 %v3650_v26, %v3441_v27  ;;  %v3470_v26 = vadd.f32 %v9832_v17, %v9840_v28 }
 0x62c   :  { %v9852_v15 = vpop.f32.mrf.mxu0 }
 0x62d   :  { %10801 = vst [vmem:[#allocation21_spill] sm:$0xff] %v9852_v15  ;;  %v3921_v58 = vadd.f32 %v3860_v50, %v3695_v37  ;;  %v3926_v37 = vadd.f32 %v7948_v52, %v3700_v11  ;;  %v10804_v52 = vmax.f32 %v9289_v57, 0.0  ;;  %v10806_v57 = vmax.f32 %v9300_v7, 0.0 }
 0x62e   :  { %v9854_v29 = vpop.f32.mrf.mxu0  ;;  %v3925_v21 = vadd.f32 %v9860_v16, %v3699_v19 }
 0x62f   :  { %10802 = vst [vmem:[#allocation22_spill] sm:$0xff] %v9854_v29  ;;  %v7952_v29 = vpop.f32.mrf.mxu1 }
 0x630   :  { %v9856_v56 = vpop.f32.mrf.mxu0  ;;  %v3930_v28 = vadd.f32 %v7952_v29, %v3704_v9  ;;  %v10817_v9 = vld [vmem:[#allocation8_spill] sm:$0xff] }
 0x632   :  { %v9858_v13 = vpop.f32.mrf.mxu0 }
 0x634   :  { %v9862_v31 = vpop.f32.mrf.mxu0 }
 0x636   :  { %v7968_v15 = vpop.f32.mrf.mxu0  ;;  %v10809_v44 = vld [vmem:[#allocation22_spill] sm:$0xff] }
 0x637   :  { %v4148_v14 = vadd.f32 %v7968_v15, %v3922_v35  ;;  %v3698_v35 = vadd.f32 %v3647_v39, %v3438_v47  ;;  %v3889_v15 = vpop.f32.mrf.mxu1 }
 0x638   :  { %v4083_v20 = vpop.f32.mrf.mxu0  ;;  %v3928_v27 = vadd.f32 %v3889_v15, %v3702_v51 }
 0x639   :  { %v4146_v48 = vadd.f32 %v4083_v20, %v3920_v30  ;;  %v4171_v8 = vmul.f32 %v9867_v0, %v4148_v14  ;;  %v7953_v38 = vpop.f32.mrf.mxu1  ;;  %v3924_v62 = vadd.f32 %v3873_v34, %v3698_v35  ;;  %v3478_v14 = vadd.f32 %v9826_v46, %v9836_v1  ;;  %v10807_v1 = vld [vmem:[#allocation20_spill] sm:$0xff] }
 0x63a   :  { %v7969_v6 = vpop.f32.mrf.mxu0 }
 0x63b   :  { %v4169_v10 = vmul.f32 %v9867_v0, %v4146_v48  ;;  %v4149_v25 = vadd.f32 %v7969_v6, %v3923_v53  ;;  %v4194_v50 = vadd.f32 %v9876_v63, %v4171_v8  ;;  %v3892_v30 = vpop.f32.mrf.mxu1  ;;  %v3705_v48 = vadd.f32 %v10807_v1, %v3465_v2  ;;  %v10808_v6 = vld [vmem:[#allocation21_spill] sm:$0xff]  ;;  %v10824_v1 = vld [vmem:[#allocation16_spill] sm:$0xff] }
 0x63c   :  { %v4086_v61 = vpop.f32.mrf.mxu0  ;;  %v3703_v35 = vadd.f32 %v10808_v6, %v3457_v4  ;;  %v8402_v2 = vld [vmem:[%s10649_s17 + $0x50] sm:$0xff]  }
 0x63d   :  { %v4192_v60 = vadd.f32 %v9876_v63, %v4169_v10  ;;  %v4172_v54 = vmul.f32 %v9867_v0, %v4149_v25  ;;  %v4147_v40 = vadd.f32 %v4086_v61, %v3921_v58  ;;  %v9910_v3 = vadd.f32 %v4194_v50, %v10805_v43  ;;  %v7956_v53 = vpop.f32.mrf.mxu1 }
 0x63e   :  { %v7972_v41 = vpop.f32.mrf.mxu0  ;;  %v3931_v33 = vadd.f32 %v7953_v38, %v3705_v48  ;;  %v10816_v38 = vld [vmem:[#allocation9_spill] sm:$0xff]  ;;  %v10825_v48 = vmax.f32 %v10824_v1, 0.0 }
 0x63f   :  { %v4195_v59 = vadd.f32 %v9876_v63, %v4172_v54  ;;  %v4170_v24 = vmul.f32 %v9867_v0, %v4147_v40  ;;  %v4152_v23 = vadd.f32 %v7972_v41, %v3926_v37  ;;  %v9896_v22 = vadd.f32 %v4192_v60, %v10803_v49  ;;  %v3905_v50 = vpop.f32.mrf.mxu1  ;;  %v10810_v37 = vld [vmem:[#allocation13_spill] sm:$0xff] }
 0x640   :  { %v4099_v12 = vpop.f32.mrf.mxu0  ;;  %v10710_v10 = vmax.f32 %v9910_v3, 0.0  ;;  %v3708_v60 = vadd.f32 %v10809_v44, %v3478_v14  ;;  %v10811_v41 = vmax.f32 %v10810_v37, 0.0 }
 0x641   :  { %v9900_v39 = vadd.f32 %v4195_v59, %v10804_v52  ;;  %v4193_v18 = vadd.f32 %v9876_v63, %v4170_v24  ;;  %v4150_v32 = vadd.f32 %v4099_v12, %v3924_v62  ;;  %v4175_v20 = vmul.f32 %v9867_v0, %v4152_v23  ;;  %v10813_v59 = vld [vmem:[#allocation7_spill] sm:$0xff] }
 0x642   :  { %v7973_v34 = vpop.f32.mrf.mxu0  ;;  %v10709_v45 = vmax.f32 %v9896_v22, 0.0  ;;  %v10814_v24 = vmax.f32 %v10813_v59, 0.0  ;;  %v3481_v23 = vadd.f32 %v10817_v9, %v10816_v38  ;;  %v3706_v52 = vadd.f32 %v9856_v56, %v3470_v26  ;;  %v8403_v56 = vld [vmem:[%s10649_s17 + $0x48] sm:$0xff]  }
 0x643   :  { %v9914_v36 = vadd.f32 %v4193_v18, %v10806_v57  ;;  %v4173_v47 = vmul.f32 %v9867_v0, %v4150_v32  ;;  %v4153_v46 = vadd.f32 %v7973_v34, %v3927_v55  ;;  %v10708_v17 = vmax.f32 %v9900_v39, 0.0  ;;  %v10818_v18 = vld [vmem:[#allocation6_spill] sm:$0xff]  ;;  %v10821_v34 = vld [vmem:[#allocation5_spill] sm:$0xff]  ;;  %v10822_v57 = vld [vmem:[#allocation11_spill] sm:$0xff] }
 0x644   :  { %v4102_v42 = vpop.f32.mrf.mxu0  ;;  %v4198_v16 = vadd.f32 %v9876_v63, %v4175_v20  ;;  %v10819_v32 = vmax.f32 %v10818_v18, 0.0  ;;  %v10823_v20 = vld [vmem:[#allocation10_spill] sm:$0xff]  ;;  %v3709_v26 = vadd.f32 %v9858_v13, %v3481_v23 }
 0x645   :  { %v10707_v7 = vmax.f32 %v9914_v36, 0.0  ;;  %v4196_v11 = vadd.f32 %v9876_v63, %v4173_v47  ;;  %v4176_v8 = vmul.f32 %v9867_v0, %v4153_v46  ;;  %v4151_v25 = vadd.f32 %v4102_v42, %v3925_v21  ;;  %v10833_v23 = vld [vmem:[#allocation18_spill] sm:$0xff] }
 0x646   :  { %v7976_v58 = vpop.f32.mrf.mxu0  ;;  %v9940_v54 = vpack.c.bf16 %v10708_v17, %v10710_v10  ;;  %v9969_v14 = vadd.f32 %v4198_v16, %v10819_v32  ;;  %v3473_v47 = vadd.f32 %v10823_v20, %v10822_v57  ;;  %v3934_v46 = vadd.f32 %v7956_v53, %v3708_v60 }
 0x647   :  { %v4199_v29 = vadd.f32 %v9876_v63, %v4176_v8  ;;  %v4156_v5 = vadd.f32 %v7976_v58, %v3930_v28  ;;  %v9933_v61 = vpack.c.bf16 %v10707_v7, %v10709_v45  ;;  %v4174_v15 = vmul.f32 %v9867_v0, %v4151_v25 }
 0x648   :  { %v4115_v40 = vpop.f32.mrf.mxu0  ;;  %v9948_v4 = vadd.f32 %v4196_v11, %v10811_v41  ;;  %10820 = vst [vmem:[#allocation22_spill] sm:$0xff] %v9969_v14  ;;  %v3929_v42 = vadd.f32 %v3892_v30, %v3703_v35  ;;  %v7957_v11 = vpop.f32.mrf.mxu1  ;;  %v3932_v16 = vadd.f32 %v3905_v50, %v3706_v52  ;;  %v3707_v44 = vadd.f32 %v9862_v31, %v3473_v47  ;;  %v10827_v41 = vld [vmem:[#allocation12_spill] sm:$0xff] }
 0x649   :  { %v9952_v62 = vadd.f32 %v4199_v29, %v10814_v24  ;;  %v4154_v19 = vadd.f32 %v4115_v40, %v3928_v27  ;;  %7990 = vmatprep.mubr.msk.bf16.mxu1 %vm1178_vm3, %v9933_v61  ;;  %8014 = vmatprep.mubr.msk.bf16.mxu0 %vm1178_vm3, %v9933_v61  ;;  %v4197_v12 = vadd.f32 %v9876_v63, %v4174_v15  ;;  %v10706_v29 = vmax.f32 %v9969_v14, 0.0  ;;  %v8404_v24 = vld [vmem:[%s10649_s17 + $0x40] sm:$0xff]  }
 0x64a   :  { %10812 = vst [vmem:[#allocation20_spill] sm:$0xff] %v9948_v4  ;;  %v4179_v55 = vmul.f32 %v9867_v0, %v4156_v5  ;;  %v7977_v49 = vpop.f32.mrf.mxu0  ;;  %7991 = vmatmul.mubr.msk.bf16.vlgmr.msra.gmra.mxu1 %vm1178_vm3, %v9940_v54  ;;  %8015 = vmatmul.mubr.msk.bf16.vlgmr.msra.gmra.mxu0 %vm1178_vm3, %v9940_v54  ;;  %v10705_v8 = vmax.f32 %v9948_v4, 0.0  ;;  %v3908_v37 = vpop.f32.mrf.mxu1 }
 0x64b   :  { %10815 = vst [vmem:[#allocation21_spill] sm:$0xff] %v9952_v62  ;;  %v4177_v51 = vmul.f32 %v9867_v0, %v4154_v19  ;;  %v4157_v43 = vadd.f32 %v7977_v49, %v3931_v33  ;;  %8031 = vmatpush3.bf16.msra.mxu1 %v10821_v34  ;;  %v9977_v21 = vadd.f32 %v4197_v12, %v10825_v48  ;;  %v10704_v6 = vmax.f32 %v9952_v62, 0.0  ;;  %v10830_v19 = vld [vmem:[#allocation17_spill] sm:$0xff]  ;;  %v10836_v34 = vld [vmem:[#allocation15_spill] sm:$0xff] }
 0x64c   :  { %v4118_v28 = vpop.f32.mrf.mxu0  ;;  %8032 = vmatprep.subr.bf16.mxu1 %v8402_v2  ;;  %v4202_v58 = vadd.f32 %v9876_v63, %v4179_v55  ;;  %v3935_v33 = vadd.f32 %v7957_v11, %v3709_v26  ;;  %v10831_v38 = vmax.f32 %v10830_v19, 0.0  ;;  %v10834_v12 = vmax.f32 %v10833_v23, 0.0 }
 0x64d   :  { %10826 = vst [vmem:[#allocation13_spill] sm:$0xff] %v9977_v21  ;;  %v4180_v53 = vmul.f32 %v9867_v0, %v4157_v43  ;;  %v10703_v25 = vmax.f32 %v9977_v21, 0.0  ;;  %v4200_v30 = vadd.f32 %v9876_v63, %v4177_v51  ;;  %v4155_v35 = vadd.f32 %v4118_v28, %v3929_v42 }
 0x64e   :  { %v7980_v27 = vpop.f32.mrf.mxu0  ;;  %v4243_v50 = vpack.c.bf16 %v10704_v6, %v10706_v29  ;;  %v10010_v9 = vadd.f32 %v4202_v58, %v10831_v38  ;;  %v3933_v43 = vadd.f32 %v3908_v37, %v3707_v44  ;;  %v10837_v57 = vmax.f32 %v10836_v34, 0.0 }
 0x64f   :  { %v4203_v13 = vadd.f32 %v9876_v63, %v4180_v53  ;;  %v4160_v5 = vadd.f32 %v7980_v27, %v3934_v46  ;;  %8033 = vmatpush3.bf16.msra.mxu1 %v8402_v2  ;;  %v4178_v60 = vmul.f32 %v9867_v0, %v4155_v35  ;;  %v4242_v40 = vpack.c.bf16 %v10703_v25, %v10705_v8  ;;  %v10839_v27 = vld [vmem:[#allocation4_spill] sm:$0xff] }
 0x650   :  { %v4131_v15 = vpop.f32.mrf.mxu0  ;;  %8034 = vmatprep.subr.bf16.mxu1 %v8403_v56  ;;  %v10828_v2 = vmax.f32 %v10827_v41, 0.0  ;;  %10832 = vst [vmem:[#allocation9_spill] sm:$0xff] %v10010_v9  ;;  %v10014_v55 = vadd.f32 %v4200_v30, %v10834_v12  ;;  %v10702_v11 = vmax.f32 %v10010_v9, 0.0  ;;  %v10848_v41 = vld [vmem:[#allocation19_spill] sm:$0xff] }
 0x651   :  { %v4158_v31 = vadd.f32 %v4131_v15, %v3932_v16  ;;  %v4201_v49 = vadd.f32 %v9876_v63, %v4178_v60  ;;  %7994 = vmatprep.mubr.msk.bf16.mxu1 %vm1178_vm3, %v4242_v40  ;;  %8018 = vmatprep.mubr.msk.bf16.mxu0 %vm1178_vm3, %v4242_v40  ;;  %v4183_v18 = vmul.f32 %v9867_v0, %v4160_v5  ;;  %v10840_v16 = vmax.f32 %v10839_v27, 0.0  ;;  %v10842_v5 = vld [vmem:[#allocation3_spill] sm:$0xff]  ;;  %v10845_v15 = vld [vmem:[#allocation14_spill] sm:$0xff] }
 0x652   :  { %v10003_v59 = vadd.f32 %v4203_v13, %v10828_v2  ;;  %10835 = vst [vmem:[#allocation8_spill] sm:$0xff] %v10014_v55  ;;  %v7981_v52 = vpop.f32.mrf.mxu0  ;;  %7995 = vmatmul.mubr.msk.bf16.gmra.mxu1 %vm1178_vm3, %v4243_v50  ;;  %8019 = vmatmul.mubr.msk.bf16.gmra.mxu0 %vm1178_vm3, %v4243_v50  ;;  %v10701_v48 = vmax.f32 %v10014_v55, 0.0  ;;  %v10843_v44 = vmax.f32 %v10842_v5, 0.0  ;;  %v10849_v2 = vmax.f32 %v10848_v41, 0.0 }
 0x653   :  { %v4181_v32 = vmul.f32 %v9867_v0, %v4158_v31  ;;  %v4161_v51 = vadd.f32 %v7981_v52, %v3935_v33  ;;  %v10025_v20 = vadd.f32 %v4201_v49, %v10837_v57  ;;  %8035 = vmatpush3.bf16.msra.mxu1 %v8403_v56  ;;  %v4206_v53 = vadd.f32 %v9876_v63, %v4183_v18  ;;  %v8407_v49 = vld [vmem:[%s10652_s18 + $0x4] ss:$12 sps:$4 sm:$0xff]  }
 0x654   :  { %10829 = vst [vmem:[#allocation7_spill] sm:$0xff] %v10003_v59  ;;  %v4134_v47 = vpop.f32.mrf.mxu0  ;;  %v10700_v46 = vmax.f32 %v10003_v59, 0.0  ;;  %8036 = vmatprep.subr.bf16.mxu1 %v8404_v24  ;;  %v10846_v33 = vmax.f32 %v10845_v15, 0.0 }
 0x655   :  { %10838 = vst [vmem:[#allocation6_spill] sm:$0xff] %v10025_v20  ;;  %v4184_v1 = vmul.f32 %v9867_v0, %v4161_v51  ;;  %v10699_v42 = vmax.f32 %v10025_v20, 0.0  ;;  %v4204_v28 = vadd.f32 %v9876_v63, %v4181_v32  ;;  %v4159_v26 = vadd.f32 %v4134_v47, %v3933_v43 }
 0x656   :  { %v4245_v35 = vpack.c.bf16 %v10700_v46, %v10702_v11  ;;  %v10057_v37 = vadd.f32 %v4206_v53, %v10846_v33 }
 0x657   :  { %v4207_v58 = vadd.f32 %v9876_v63, %v4184_v1  ;;  %v4182_v56 = vmul.f32 %v9867_v0, %v4159_v26  ;;  %v4244_v30 = vpack.c.bf16 %v10699_v42, %v10701_v48  ;;  %8037 = vmatpush3.bf16.msra.mxu1 %v8404_v24  ;;  %v10050_v60 = vadd.f32 %v4204_v28, %v10843_v44 }
 0x658   :  { %10847 = vst [vmem:[#allocation10_spill] sm:$0xff] %v10057_v37  ;;  %v10698_v38 = vmax.f32 %v10057_v37, 0.0 }
 0x659   :  { %v10046_v13 = vadd.f32 %v4207_v58, %v10840_v16  ;;  %10844 = vst [vmem:[#allocation11_spill] sm:$0xff] %v10050_v60  ;;  %v4205_v0 = vadd.f32 %v9876_v63, %v4182_v56  ;;  %7998 = vmatprep.mubr.msk.bf16.mxu1 %vm1178_vm3, %v4244_v30  ;;  %8022 = vmatprep.mubr.msk.bf16.mxu0 %vm1178_vm3, %v4244_v30  ;;  %v10697_v63 = vmax.f32 %v10050_v60, 0.0 }
 0x65a   :  { %7999 = vmatmul.mubr.msk.bf16.gmra.mxu1 %vm1178_vm3, %v4245_v35  ;;  %8023 = vmatmul.mubr.msk.bf16.gmra.mxu0 %vm1178_vm3, %v4245_v35 }
 0x65b   :  { %10841 = vst [vmem:[#allocation5_spill] sm:$0xff] %v10046_v13  ;;  %v10063_v31 = vadd.f32 %v4205_v0, %v10849_v2  ;;  %v10696_v24 = vmax.f32 %v10046_v13, 0.0 }
 0x65d   :  { %10850 = vst [vmem:[#allocation16_spill] sm:$0xff] %v10063_v31  ;;  %v10695_v19 = vmax.f32 %v10063_v31, 0.0  ;;  %v4247_v12 = vpack.c.bf16 %v10696_v24, %v10698_v38 }
 0x65f   :  { %v4246_v23 = vpack.c.bf16 %v10695_v19, %v10697_v63 }
 0x661   :  { %8002 = vmatprep.mubr.msk.bf16.mxu1 %vm1178_vm3, %v4246_v23  ;;  %8026 = vmatprep.mubr.msk.bf16.mxu0 %vm1178_vm3, %v4246_v23 }
 0x662   :  { %8003 = vmatmul.mubr.msk.bf16.gmra.mxu1 %vm1178_vm3, %v4247_v12  ;;  %8027 = vmatmul.mubr.msk.bf16.gmra.mxu0 %vm1178_vm3, %v4247_v12 }
 0x663   :  { %8038 = vmatprep.mubr.msk.bf16.mxu1 %vm1178_vm3, %v9933_v61  ;;  %4877 = vmatprep.mubr.bf16.mxu0 %v8407_v49  ;;  %v8420_v61 = vld [vmem:[%s10652_s18 + $0x8] ss:$12 sps:$4 sm:$0xff]  }
 0x66a   :  { %8039 = vmatmul.mubr.msk.bf16.vlgmr.msra.gmra.mxu1 %vm1178_vm3, %v9940_v54 }
 0x66b   :  { %8042 = vmatprep.mubr.msk.bf16.mxu1 %vm1178_vm3, %v4242_v40 }
 0x672   :  { %8043 = vmatmul.mubr.msk.bf16.gmra.mxu1 %vm1178_vm3, %v4243_v50 }
 0x673   :  { %8046 = vmatprep.mubr.msk.bf16.mxu1 %vm1178_vm3, %v4244_v30 }
 0x67a   :  { %8047 = vmatmul.mubr.msk.bf16.gmra.mxu1 %vm1178_vm3, %v4245_v35 }
 0x67b   :  { %8050 = vmatprep.mubr.msk.bf16.mxu1 %vm1178_vm3, %v4246_v23 }
 0x682   :  { %8051 = vmatmul.mubr.msk.bf16.gmra.mxu1 %vm1178_vm3, %v4247_v12 }
 0x683   :  { %8070 = vmatprep.mubr.bf16.mxu1 %v8420_v61 }
 0x70a   :  { %v10097_v54 = vpop.f32.mrf.mxu1  ;;  %v10099_v40 = vpop.f32.mrf.mxu0 }
 0x70c   :  { %v10101_v50 = vpop.f32.mrf.mxu1  ;;  %v10103_v52 = vpop.f32.mrf.mxu0 }
 0x70e   :  { %v10105_v18 = vpop.f32.mrf.mxu1  ;;  %v10107_v32 = vpop.f32.mrf.mxu0 }
 0x710   :  { %v10109_v51 = vpop.f32.mrf.mxu1  ;;  %v10111_v43 = vpop.f32.mrf.mxu0 }
 0x712   :  { %v7996_v34 = vpop.f32.mrf.mxu1  ;;  %v8020_v57 = vpop.f32.mrf.mxu0 }
 0x714   :  { %v4354_v47 = vpop.f32.mrf.mxu1  ;;  %v4492_v1 = vpop.f32.mrf.mxu0 }
 0x716   :  { %v7997_v28 = vpop.f32.mrf.mxu1  ;;  %v8021_v26 = vpop.f32.mrf.mxu0 }
 0x718   :  { %v4357_v53 = vpop.f32.mrf.mxu1  ;;  %v4495_v58 = vpop.f32.mrf.mxu0 }
 0x71a   :  { %v8000_v56 = vpop.f32.mrf.mxu1  ;;  %v8024_v30 = vpop.f32.mrf.mxu0 }
 0x71c   :  { %v4370_v35 = vpop.f32.mrf.mxu1  ;;  %v4508_v27 = vpop.f32.mrf.mxu0 }
 0x71e   :  { %v8001_v16 = vpop.f32.mrf.mxu1  ;;  %v8025_v5 = vpop.f32.mrf.mxu0 }
 0x71f   :  { %v4544_v48 = vpack.c.bf16 %v8025_v5, %v8024_v30  ;;  %v4406_v25 = vpack.c.bf16 %v8001_v16, %v8000_v56  ;;  %v4541_v30 = vpack.c.bf16 %v4495_v58, %v4492_v1  ;;  %v4540_v56 = vpack.c.bf16 %v10107_v32, %v10099_v40  ;;  %v8405_v40 = vld [vmem:[%s10652_s18] ss:$12 sps:$4 sm:$0xff]  }
 0x720   :  { %v4373_v44 = vpop.f32.mrf.mxu1  ;;  %v4511_v0 = vpop.f32.mrf.mxu0  ;;  %v8416_v16 = vld [vmem:[%s10652_s18 + $0x4c] ss:$12 sps:$4 sm:$0xff]  }
 0x722   :  { %v8004_v15 = vpop.f32.mrf.mxu1  ;;  %v8028_v33 = vpop.f32.mrf.mxu0 }
 0x724   :  { %v4386_v41 = vpop.f32.mrf.mxu1  ;;  %v4524_v2 = vpop.f32.mrf.mxu0 }
 0x726   :  { %v8005_v23 = vpop.f32.mrf.mxu1  ;;  %v8029_v12 = vpop.f32.mrf.mxu0 }
 0x727   :  { %v4408_v49 = vpack.c.bf16 %v8005_v23, %v8004_v15  ;;  %v4546_v61 = vpack.c.bf16 %v8029_v12, %v8028_v33  ;;  %v4543_v15 = vpack.c.bf16 %v4511_v0, %v4508_v27  ;;  %v4542_v23 = vpack.c.bf16 %v8021_v26, %v8020_v57 }
 0x728   :  { %v4389_v19 = vpop.f32.mrf.mxu1  ;;  %v4527_v24 = vpop.f32.mrf.mxu0 }
 0x729   :  { %v4545_v63 = vpack.c.bf16 %v4527_v24, %v4524_v2  ;;  %7394 = vmatprep.subr.bf16.mxu0 %v4546_v61  ;;  %v4407_v42 = vpack.c.bf16 %v4389_v19, %v4386_v41  ;;  %v4405_v24 = vpack.c.bf16 %v4373_v44, %v4370_v35  ;;  %v8411_v35 = vld [vmem:[%s10652_s18 + $0x30] ss:$12 sps:$4 sm:$0xff]   ;;  %v8414_v41 = vld [vmem:[%s10652_s18 + $0x48] ss:$12 sps:$4 sm:$0xff]  }
 0x72a   :  { %v10113_v38 = vpop.f32.mrf.mxu1  ;;  %7395 = vmatpush3.bf16.msra.mxu0 %v4408_v49  ;;  %v8419_v49 = vld [vmem:[%s10652_s18 + $0x64] ss:$12 sps:$4 sm:$0xff]  }
 0x72b   :  { %7396 = vmatprep.subr.bf16.mxu0 %v4545_v63  ;;  %v4404_v63 = vpack.c.bf16 %v7997_v28, %v7996_v34  ;;  %v4539_v34 = vpack.c.bf16 %v10111_v43, %v10103_v52  ;;  %v8413_v43 = vld [vmem:[%s10652_s18 + $0x34] ss:$12 sps:$4 sm:$0xff]  }
 0x72c   :  { %v10115_v46 = vpop.f32.mrf.mxu1 }
 0x72e   :  { %v10117_v11 = vpop.f32.mrf.mxu1  ;;  %7397 = vmatpush3.bf16.msra.mxu0 %v4407_v42 }
 0x72f   :  { %7398 = vmatprep.subr.bf16.mxu0 %v4544_v48  ;;  %v4403_v48 = vpack.c.bf16 %v4357_v53, %v4354_v47  ;;  %v4401_v47 = vpack.c.bf16 %v10109_v51, %v10101_v50  ;;  %v8408_v51 = vld [vmem:[%s10652_s18 + $0x18] ss:$12 sps:$4 sm:$0xff]   ;;  %v4678_v0 = vpack.c.bf16 %v10117_v11, %v10113_v38  ;;  %v8417_v11 = vld [vmem:[%s10652_s18 + $0x60] ss:$12 sps:$4 sm:$0xff]  }
 0x730   :  { %v10119_v6 = vpop.f32.mrf.mxu1  ;;  %v8421_v38 = vld [vmem:[%s10652_s18 + $0x20] ss:$12 sps:$4 sm:$0xff]  }
 0x731   :  { %v4677_v61 = vpack.c.bf16 %v10119_v6, %v10115_v46  ;;  %v8425_v6 = vld [vmem:[%s10652_s18 + $0x38] ss:$12 sps:$4 sm:$0xff]  }
 0x732   :  { %v8044_v33 = vpop.f32.mrf.mxu1  ;;  %7399 = vmatpush3.bf16.msra.mxu0 %v4406_v25  ;;  %v4402_v25 = vpack.c.bf16 %v10105_v18, %v10097_v54  ;;  %v8410_v54 = vld [vmem:[%s10652_s18 + $0x1c] ss:$12 sps:$4 sm:$0xff]   ;;  %v8422_v46 = vld [vmem:[%s10652_s18 + $0x78] ss:$12 sps:$4 sm:$0xff]  }
 0x733   :  { %7400 = vmatprep.subr.bf16.mxu0 %v4543_v15  ;;  %v8424_v15 = vld [vmem:[%s10652_s18 + $0x7c] ss:$12 sps:$4 sm:$0xff]  }
 0x734   :  { %v4630_v2 = vpop.f32.mrf.mxu1 }
 0x736   :  { %v8045_v12 = vpop.f32.mrf.mxu1  ;;  %7401 = vmatpush3.bf16.msra.mxu0 %v4405_v24  ;;  %v8429_v24 = vld [vmem:[%s10652_s18 + $0x94] ss:$12 sps:$4 sm:$0xff]  }
 0x737   :  { %7402 = vmatprep.subr.bf16.mxu0 %v4542_v23  ;;  %v4680_v58 = vpack.c.bf16 %v8045_v12, %v8044_v33  ;;  %v8426_v33 = vld [vmem:[%s10652_s18 + $0x50] ss:$12 sps:$4 sm:$0xff]   ;;  %v8431_v12 = vld [vmem:[%s10652_s18 + $0x80] ss:$12 sps:$4 sm:$0xff]  }
 0x738   :  { %v4633_v19 = vpop.f32.mrf.mxu1  ;;  %v8427_v23 = vld [vmem:[%s10652_s18 + $0x90] ss:$12 sps:$4 sm:$0xff]  }
 0x739   :  { %v4679_v44 = vpack.c.bf16 %v4633_v19, %v4630_v2  ;;  %v8430_v2 = vld [vmem:[%s10652_s18 + $0x68] ss:$12 sps:$4 sm:$0xff]   ;;  %v8435_v19 = vld [vmem:[%s10652_s18 + $0x98] ss:$12 sps:$4 sm:$0xff]  }
 0x73a   :  { %v8048_v5 = vpop.f32.mrf.mxu1  ;;  %7403 = vmatpush3.bf16.msra.mxu0 %v4404_v63  ;;  %v8434_v63 = vld [vmem:[%s10652_s18 + $0xac] ss:$12 sps:$4 sm:$0xff]  }
 0x73b   :  { %7404 = vmatprep.subr.bf16.mxu0 %v4541_v30  ;;  %v8432_v30 = vld [vmem:[%s10652_s18 + $0xa8] ss:$12 sps:$4 sm:$0xff]  }
 0x73c   :  { %v4646_v42 = vpop.f32.mrf.mxu1 }
 0x73e   :  { %v8049_v27 = vpop.f32.mrf.mxu1  ;;  %7405 = vmatpush3.bf16.msra.mxu0 %v4403_v48  ;;  %v8437_v48 = vld [vmem:[%s10653_s21 + $0x18] sm:$0xff]  }
 0x73f   :  { %7406 = vmatprep.subr.bf16.mxu0 %v4540_v56  ;;  %v4682_v50 = vpack.c.bf16 %v8049_v27, %v8048_v5  ;;  %v8436_v5 = vld [vmem:[%s10652_s18 + $0xb0] ss:$12 sps:$4 sm:$0xff]  }
 0x740   :  { %v4649_v57 = vpop.f32.mrf.mxu1  ;;  %v8440_v56 = vld [vmem:[%s10653_s21 + $0x10] sm:$0xff]  }
 0x741   :  { %v4681_v53 = vpack.c.bf16 %v4649_v57, %v4646_v42  ;;  %v8438_v42 = vld [vmem:[%s10653_s21 + $0x38] sm:$0xff]   ;;  %v8439_v27 = vld [vmem:[%s10653_s21 + $0x30] sm:$0xff]   ;;  %v8443_v57 = vld [vmem:[%s10653_s21] sm:$0xff]  }
 0x742   :  { %v8052_v28 = vpop.f32.mrf.mxu1  ;;  %7407 = vmatpush3.bf16.msra.mxu0 %v4402_v25  ;;  %v8442_v25 = vld [vmem:[%s10653_s21 + $0x8] sm:$0xff]  }
 0x743   :  { %7408 = vmatprep.subr.bf16.mxu0 %v4539_v34  ;;  %v8441_v34 = vld [vmem:[%s10653_s21 + $0x28] sm:$0xff]  }
 0x744   :  { %v4662_v1 = vpop.f32.mrf.mxu1 }
 0x746   :  { %v8053_v32 = vpop.f32.mrf.mxu1  ;;  %7409 = vmatpush3.bf16.msra.mxu0 %v4401_v47  ;;  %v8446_v47 = vld [vmem:[#allocation2 + $0x8] sm:$0xff]  }
 0x747   :  { %v4684_v18 = vpack.c.bf16 %v8053_v32, %v8052_v28  ;;  %8110 = vmatprep.subr.bf16.mxu0 %v8437_v48  ;;  %v8445_v28 = vld [vmem:[#allocation2] sm:$0xff]   ;;  %v10232_v32 = vld [vmem:[%s10653_s21 + $0x58] sm:$0xff]  }
 0x748   :  { %v4665_v26 = vpop.f32.mrf.mxu1 }
 0x749   :  { %v4683_v52 = vpack.c.bf16 %v4665_v26, %v4662_v1  ;;  %4878 = vmatmul.mubr.bf16.vlgmr.msra.gmra.mxu0 %v8405_v40  ;;  %8054 = vmatprep.subr.bf16.mxu1 %v4684_v18  ;;  %v8444_v1 = vld [vmem:[%s10653_s21 + $0x20] sm:$0xff]   ;;  %v8453_v40 = vld [vmem:[%s10653_s21 + $0x78] sm:$0xff]  }
 0x74a   :  { %8055 = vmatpush3.bf16.msra.mxu1 %v4684_v18  ;;  %4885 = vmatprep.mubr.bf16.mxu0 %v8410_v54  ;;  %v8454_v54 = vld [vmem:[%s10653_s21 + $0x70] sm:$0xff]   ;;  %v8458_v18 = vld [vmem:[%s10653_s21 + $0x68] sm:$0xff]   ;;  %v8460_v26 = vld [vmem:[%s10653_s21 + $0x60] sm:$0xff]  }
 0x74b   :  { %8056 = vmatprep.subr.bf16.mxu1 %v4683_v52  ;;  %8111 = vmatpush3.bf16.msra.mxu0 %v8437_v48 }
 0x74c   :  { %8112 = vmatprep.subr.bf16.mxu0 %v8440_v56 }
 0x74e   :  { %8057 = vmatpush3.bf16.msra.mxu1 %v4683_v52 }
 0x74f   :  { %8058 = vmatprep.subr.bf16.mxu1 %v4682_v50  ;;  %8113 = vmatpush3.bf16.msra.mxu0 %v8440_v56 }
 0x750   :  { %8114 = vmatprep.subr.bf16.mxu0 %v8442_v25 }
 0x751   :  { %4886 = vmatmul.mubr.bf16.gmra.mxu0 %v8408_v51 }
 0x752   :  { %8059 = vmatpush3.bf16.msra.mxu1 %v4682_v50  ;;  %4893 = vmatprep.mubr.bf16.mxu0 %v8413_v43 }
 0x753   :  { %8060 = vmatprep.subr.bf16.mxu1 %v4681_v53  ;;  %8115 = vmatpush3.bf16.msra.mxu0 %v8442_v25 }
 0x754   :  { %8116 = vmatprep.subr.bf16.mxu0 %v8443_v57 }
 0x756   :  { %8061 = vmatpush3.bf16.msra.mxu1 %v4681_v53 }
 0x757   :  { %8062 = vmatprep.subr.bf16.mxu1 %v4680_v58  ;;  %8117 = vmatpush3.bf16.msra.mxu0 %v8443_v57 }
 0x758   :  { %8158 = vmatprep.subr.bf16.mxu0 %v8453_v40 }
 0x759   :  { %4894 = vmatmul.mubr.bf16.gmra.mxu0 %v8411_v35 }
 0x75a   :  { %8063 = vmatpush3.bf16.msra.mxu1 %v4680_v58  ;;  %4901 = vmatprep.mubr.bf16.mxu0 %v8416_v16 }
 0x75b   :  { %8064 = vmatprep.subr.bf16.mxu1 %v4679_v44 }
 0x75e   :  { %8065 = vmatpush3.bf16.msra.mxu1 %v4679_v44 }
 0x75f   :  { %8066 = vmatprep.subr.bf16.mxu1 %v4678_v0 }
 0x761   :  { %4902 = vmatmul.mubr.bf16.gmra.mxu0 %v8414_v41 }
 0x762   :  { %8067 = vmatpush3.bf16.msra.mxu1 %v4678_v0  ;;  %4909 = vmatprep.mubr.bf16.mxu0 %v8419_v49 }
 0x763   :  { %8068 = vmatprep.subr.bf16.mxu1 %v4677_v61 }
 0x766   :  { %8069 = vmatpush3.bf16.msra.mxu1 %v4677_v61 }
 0x767   :  { %8086 = vmatprep.subr.bf16.mxu1 %v8438_v42 }
 0x769   :  { %4910 = vmatmul.mubr.bf16.gmra.mxu0 %v8417_v11  ;;  %8071 = vmatmul.mubr.bf16.vlgmr.msra.gmra.mxu1 %v8421_v38 }
 0x76a   :  { %4917 = vmatprep.mubr.bf16.mxu0 %v8424_v15  ;;  %8074 = vmatprep.mubr.bf16.mxu1 %v8425_v6 }
 0x76b   :  { %8087 = vmatpush3.bf16.msra.mxu1 %v8438_v42  ;;  %v5062_v42 = vld [vmem:[%s10655_s20] sm:$0xff] }
 0x76c   :  { %8088 = vmatprep.subr.bf16.mxu1 %v8439_v27 }
 0x76f   :  { %8089 = vmatpush3.bf16.msra.mxu1 %v8439_v27 }
 0x770   :  { %8090 = vmatprep.subr.bf16.mxu1 %v8441_v34 }
 0x771   :  { %4918 = vmatmul.mubr.bf16.gmra.mxu0 %v8422_v46  ;;  %8075 = vmatmul.mubr.bf16.gmra.mxu1 %v8426_v33 }
 0x772   :  { %4925 = vmatprep.mubr.bf16.mxu0 %v8429_v24  ;;  %8078 = vmatprep.mubr.bf16.mxu1 %v8430_v2  ;;  %v10249_v24 = vld [vmem:[%s10654_s19] ss:$0 sm:$0xff] }
 0x773   :  { %8091 = vmatpush3.bf16.msra.mxu1 %v8441_v34 }
 0x774   :  { %8092 = vmatprep.subr.bf16.mxu1 %v8444_v1 }
 0x777   :  { %8093 = vmatpush3.bf16.msra.mxu1 %v8444_v1 }
 0x778   :  { %8134 = vmatprep.subr.bf16.mxu1 %v10232_v32 }
 0x779   :  { %4926 = vmatmul.mubr.bf16.gmra.mxu0 %v8427_v23  ;;  %8079 = vmatmul.mubr.bf16.gmra.mxu1 %v8431_v12  ;;  %v5064_v12 = vld [vmem:[%s10655_s20 + $0x10] sm:$0xff] }
 0x77a   :  { %4933 = vmatprep.mubr.bf16.mxu0 %v8434_v63  ;;  %8082 = vmatprep.mubr.bf16.mxu1 %v8435_v19 }
 0x781   :  { %4934 = vmatmul.mubr.bf16.gmra.mxu0 %v8432_v30  ;;  %8083 = vmatmul.mubr.bf16.gmra.mxu1 %v8436_v5 }
 0x782   :  { %8118 = vmatprep.mubr.msk.bf16.mxu0 %vm1178_vm3, %v8445_v28  ;;  %8094 = vmatprep.mubr.msk.bf16.mxu1 %vm1178_vm3, %v8446_v47 }
 0x789   :  { %8119 = vmatmul.mubr.msk.bf16.vlgmr.msra.gmra.mxu0 %vm1178_vm3, %v8446_v47  ;;  %v5065_v47 = vld [vmem:[%s10655_s20 + $0x18] sm:$0xff] }
 0x78a   :  { %8159 = vmatpush3.bf16.msra.mxu0 %v8453_v40 }
 0x78b   :  { %8160 = vmatprep.subr.bf16.mxu0 %v8454_v54 }
 0x78e   :  { %8161 = vmatpush3.bf16.msra.mxu0 %v8454_v54 }
 0x78f   :  { %8162 = vmatprep.subr.bf16.mxu0 %v8458_v18 }
 0x792   :  { %8163 = vmatpush3.bf16.msra.mxu0 %v8458_v18 }
 0x793   :  { %8164 = vmatprep.subr.bf16.mxu0 %v8460_v26 }
 0x796   :  { %8165 = vmatpush3.bf16.msra.mxu0 %v8460_v26 }
 0x809   :  { %v7410_v52 = vpop.f32.mrf.mxu0 }
 0x80b   :  { %v7411_v50 = vpop.f32.mrf.mxu0 }
 0x80c   :  { %v7412_v2 = vadd.f32 %v7411_v50, %v7410_v52 }
 0x80d   :  { %v7413_v51 = vpop.f32.mrf.mxu0 }
 0x80f   :  { %v7414_v43 = vpop.f32.mrf.mxu0 }
 0x810   :  { %v7415_v28 = vadd.f32 %v7414_v43, %v7413_v51  ;;  %v5063_v51 = vld [vmem:[%s10655_s20 + $0x8] sm:$0xff] }
 0x811   :  { %v7416_v53 = vpop.f32.mrf.mxu0 }
 0x813   :  { %v7417_v58 = vpop.f32.mrf.mxu0 }
 0x814   :  { %v7418_v6 = vadd.f32 %v7417_v58, %v7416_v53 }
 0x815   :  { %v7419_v35 = vpop.f32.mrf.mxu0 }
 0x817   :  { %v7420_v16 = vpop.f32.mrf.mxu0 }
 0x818   :  { %v7421_v30 = vadd.f32 %v7420_v16, %v7419_v35 }
 0x819   :  { %v7422_v44 = vpop.f32.mrf.mxu0 }
 0x81b   :  { %v7423_v0 = vpop.f32.mrf.mxu0 }
 0x81d   :  { %v7425_v41 = vpop.f32.mrf.mxu0 }
 0x81f   :  { %v7426_v49 = vpop.f32.mrf.mxu0 }
 0x821   :  { %v7428_v61 = vpop.f32.mrf.mxu0 }
 0x823   :  { %v7429_v11 = vpop.f32.mrf.mxu0 }
 0x824   :  { %v7430_v54 = vadd.f32 %v7429_v11, %v7428_v61  ;;  %v5068_v61 = vld [vmem:[%s10655_s20 + $0x30] sm:$0xff] }
 0x825   :  { %v7431_v38 = vpop.f32.mrf.mxu0 }
 0x827   :  { %v7432_v15 = vpop.f32.mrf.mxu0 }
 0x829   :  { %v10244_v46 = vpop.f32.mrf.mxu0  ;;  %v8072_v33 = vpop.f32.mrf.mxu1 }
 0x82a   :  { %v4985_v23 = vadd.f32 %v8072_v33, %v7418_v6  ;;  %v7424_v33 = vadd.f32 %v7423_v0, %v7422_v44 }
 0x82b   :  { %v10254_v63 = vpop.f32.mrf.mxu0  ;;  %v4976_v19 = vpop.f32.mrf.mxu1 }
 0x82c   :  { %v5048_v5 = vmul.f32 %v10249_v24, %v4985_v23  ;;  %v4977_v48 = vadd.f32 %v7412_v2, %v4976_v19 }
 0x82d   :  { %v10260_v56 = vpop.f32.mrf.mxu0  ;;  %v8073_v27 = vpop.f32.mrf.mxu1 }
 0x82e   :  { %v5080_v25 = vadd.f32 %v5064_v12, %v5048_v5  ;;  %v5046_v57 = vmul.f32 %v10249_v24, %v4977_v48  ;;  %v4988_v34 = vadd.f32 %v8073_v27, %v7421_v30  ;;  %v7433_v12 = vadd.f32 %v7432_v15, %v7431_v38  ;;  %v5066_v38 = vld [vmem:[%s10655_s20 + $0x20] sm:$0xff] }
 0x82f   :  { %v10266_v1 = vpop.f32.mrf.mxu0  ;;  %v4979_v40 = vpop.f32.mrf.mxu1  ;;  %v7427_v48 = vadd.f32 %v7426_v49, %v7425_v41  ;;  %v5069_v41 = vld [vmem:[%s10655_s20 + $0x38] sm:$0xff] }
 0x830   :  { %v5096_v18 = vmax.f32 %v5080_v25, 0.0  ;;  %v5078_v26 = vadd.f32 %v5062_v42, %v5046_v57  ;;  %v5049_v52 = vmul.f32 %v10249_v24, %v4988_v34  ;;  %v4980_v50 = vadd.f32 %v7415_v28, %v4979_v40 }
 0x831   :  { %v7440_v53 = vpop.f32.mrf.mxu0  ;;  %v8076_v58 = vpop.f32.mrf.mxu1 }
 0x832   :  { %v6992_v35 = vpack.c.bf16 %v5096_v18, %v5096_v18  ;;  %v5094_v16 = vmax.f32 %v5078_v26, 0.0  ;;  %v5081_v6 = vadd.f32 %v5065_v47, %v5049_v52  ;;  %v5001_v43 = vadd.f32 %v8076_v58, %v7430_v54 }
 0x833   :  { %v5047_v2 = vmul.f32 %v10249_v24, %v4980_v50  ;;  %v7441_v11 = vpop.f32.mrf.mxu0  ;;  %v4992_v23 = vpop.f32.mrf.mxu1 }
 0x834   :  { %5176 = vst.msk [vmem:[#allocation2 + $0x18] sm:$0xf] %vm78_vm2, %v6992_v35  ;;  %v6990_v19 = vpack.c.bf16 %v5094_v16, %v5094_v16  ;;  %v5097_v30 = vmax.f32 %v5081_v6, 0.0  ;;  %v5052_v5 = vmul.f32 %v10249_v24, %v5001_v43  ;;  %v4993_v27 = vadd.f32 %v7424_v33, %v4992_v23 }
 0x835   :  { %v5079_v42 = vadd.f32 %v5063_v51, %v5047_v2  ;;  %v7443_v25 = vpop.f32.mrf.mxu0  ;;  %v8077_v44 = vpop.f32.mrf.mxu1  ;;  %v7442_v34 = vadd.f32 %v7441_v11, %v7440_v53  ;;  %v5067_v53 = vld [vmem:[%s10655_s20 + $0x28] sm:$0xff]  ;;  %v7436_v33 = vadd.f32 %v10254_v63, %v10244_v46 }
 0x836   :  { %5174 = vst.msk [vmem:[#allocation2 + $0x10] sm:$0xf] %vm78_vm2, %v6990_v19  ;;  %v6993_v0 = vpack.c.bf16 %v5097_v30, %v5097_v30  ;;  %v5084_v57 = vadd.f32 %v5068_v61, %v5052_v5  ;;  %v5004_v15 = vadd.f32 %v8077_v44, %v7433_v12  ;;  %v5050_v47 = vmul.f32 %v10249_v24, %v4993_v27  ;;  %v5072_v61 = vld [vmem:[%s10655_s20 + $0x50] sm:$0xff] }
 0x837   :  { %v5095_v28 = vmax.f32 %v5079_v42, 0.0  ;;  %v7444_v49 = vpop.f32.mrf.mxu0  ;;  %v4995_v40 = vpop.f32.mrf.mxu1 }
 0x838   :  { %5177 = vst.msk [vmem:[#allocation2 + $0x1c] sm:$0xf] %vm78_vm2, %v6993_v0  ;;  %v5100_v54 = vmax.f32 %v5084_v57, 0.0  ;;  %v5053_v18 = vmul.f32 %v10249_v24, %v5004_v15  ;;  %v4996_v26 = vadd.f32 %v7427_v48, %v4995_v40  ;;  %v5082_v50 = vadd.f32 %v5066_v38, %v5050_v47  ;;  %v5070_v57 = vld [vmem:[%s10655_s20 + $0x40] sm:$0xff]  ;;  %v5073_v15 = vld [vmem:[%s10655_s20 + $0x58] sm:$0xff] }
 0x839   :  { %v6991_v52 = vpack.c.bf16 %v5095_v28, %v5095_v28  ;;  %v7446_v58 = vpop.f32.mrf.mxu0  ;;  %v8080_v35 = vpop.f32.mrf.mxu1  ;;  %v7445_v19 = vadd.f32 %v7444_v49, %v7443_v25  ;;  %v7439_v38 = vadd.f32 %v10266_v1, %v10260_v56  ;;  %v5071_v56 = vld [vmem:[%s10655_s20 + $0x48] sm:$0xff] }
 0x83a   :  { %v6996_v16 = vpack.c.bf16 %v5100_v54, %v5100_v54  ;;  %v5085_v6 = vadd.f32 %v5069_v41, %v5053_v18  ;;  %v5051_v51 = vmul.f32 %v10249_v24, %v4996_v26  ;;  %v5017_v43 = vadd.f32 %v8080_v35, %v7442_v34 }
 0x83b   :  { %5175 = vst.msk [vmem:[#allocation2 + $0x14] sm:$0xf] %vm78_vm2, %v6991_v52  ;;  %v5098_v2 = vmax.f32 %v5082_v50, 0.0  ;;  %v7447_v11 = vpop.f32.mrf.mxu0  ;;  %v5008_v23 = vpop.f32.mrf.mxu1  ;;  %v8451_v52 = vld [vmem:[%s10653_s21 + $0x50] sm:$0xff]  }
 0x83c   :  { %5180 = vst.msk [vmem:[#allocation2 + $0x28] sm:$0xf] %vm78_vm2, %v6996_v16  ;;  %v5101_v12 = vmax.f32 %v5085_v6, 0.0  ;;  %v5083_v30 = vadd.f32 %v5067_v53, %v5051_v51  ;;  %v5056_v5 = vmul.f32 %v10249_v24, %v5017_v43  ;;  %v5009_v42 = vadd.f32 %v7436_v33, %v5008_v23 }
 0x83d   :  { %v6994_v48 = vpack.c.bf16 %v5098_v2, %v5098_v2  ;;  %v7449_v27 = vpop.f32.mrf.mxu0  ;;  %v8081_v46 = vpop.f32.mrf.mxu1  ;;  %v7448_v53 = vadd.f32 %v7447_v11, %v7446_v58  ;;  %v5076_v58 = vld [vmem:[%s10655_s20 + $0x70] sm:$0xff]  ;;  %v5074_v11 = vld [vmem:[%s10655_s20 + $0x60] sm:$0xff] }
 0x83e   :  { %v6997_v63 = vpack.c.bf16 %v5101_v12, %v5101_v12  ;;  %v5099_v44 = vmax.f32 %v5083_v30, 0.0  ;;  %v5088_v0 = vadd.f32 %v5072_v61, %v5056_v5  ;;  %v5020_v34 = vadd.f32 %v8081_v46, %v7445_v19 }
 0x83f   :  { %5178 = vst.msk [vmem:[#allocation2 + $0x20] sm:$0xf] %vm78_vm2, %v6994_v48  ;;  %v5054_v25 = vmul.f32 %v10249_v24, %v5009_v42  ;;  %v7450_v28 = vpop.f32.mrf.mxu0  ;;  %v5011_v47 = vpop.f32.mrf.mxu1  ;;  %v8449_v2 = vld [vmem:[#allocation2 + $0x18] sm:$0xff]  }
 0x840   :  { %5181 = vst.msk [vmem:[#allocation2 + $0x2c] sm:$0xf] %vm78_vm2, %v6997_v63  ;;  %v6995_v41 = vpack.c.bf16 %v5099_v44, %v5099_v44  ;;  %v5104_v49 = vmax.f32 %v5088_v0, 0.0  ;;  %v5057_v40 = vmul.f32 %v10249_v24, %v5020_v34  ;;  %v5012_v18 = vadd.f32 %v7439_v38, %v5011_v47  ;;  %v8456_v38 = vld [vmem:[%s10653_s21 + $0x48] sm:$0xff]  }
 0x841   :  { %v5086_v54 = vadd.f32 %v5070_v57, %v5054_v25  ;;  %v7452_v1 = vpop.f32.mrf.mxu0  ;;  %v8084_v26 = vpop.f32.mrf.mxu1  ;;  %v7451_v46 = vadd.f32 %v7450_v28, %v7449_v27 }
 0x842   :  { %5179 = vst.msk [vmem:[#allocation2 + $0x24] sm:$0xf] %vm78_vm2, %v6995_v41  ;;  %v7000_v50 = vpack.c.bf16 %v5104_v49, %v5104_v49  ;;  %v5089_v35 = vadd.f32 %v5073_v15, %v5057_v40  ;;  %v8447_v16 = vld [vmem:[#allocation2 + $0x10] sm:$0xff]   ;;  %v5055_v51 = vmul.f32 %v10249_v24, %v5012_v18  ;;  %v5077_v41 = vld [vmem:[%s10655_s20 + $0x78] sm:$0xff] }
 0x843   :  { %v5102_v6 = vmax.f32 %v5086_v54, 0.0  ;;  %v7453_v43 = vpop.f32.mrf.mxu0  ;;  %v5024_v33 = vpop.f32.mrf.mxu1  ;;  %8095 = vmatmul.mubr.msk.bf16.vlgmr.msra.gmra.mxu1 %vm1178_vm3, %v8447_v16  ;;  %8122 = vmatprep.mubr.msk.bf16.mxu0 %vm1178_vm3, %v8447_v16 }
 0x844   :  { %5184 = vst.msk [vmem:[#allocation2 + $0x38] sm:$0xf] %vm78_vm2, %v7000_v50  ;;  %v5105_v61 = vmax.f32 %v5089_v35, 0.0  ;;  %v7454_v23 = vadd.f32 %v7453_v43, %v7452_v1  ;;  %v5025_v12 = vadd.f32 %v7448_v53, %v5024_v33  ;;  %v5087_v30 = vadd.f32 %v5071_v56, %v5055_v51  ;;  %8098 = vmatprep.mubr.msk.bf16.mxu1 %vm1178_vm3, %v8449_v2  ;;  %v8467_v43 = vld [vmem:[%s10653_s21 + $0x98] sm:$0xff]  }
 0x845   :  { %v6998_v19 = vpack.c.bf16 %v5102_v6, %v5102_v6  ;;  %v7455_v5 = vpop.f32.mrf.mxu0  ;;  %v8085_v48 = vpop.f32.mrf.mxu1  ;;  %8123 = vmatmul.mubr.msk.bf16.gmra.mxu0 %vm1178_vm3, %v8449_v2  ;;  %8135 = vmatpush3.bf16.msra.mxu1 %v10232_v32  ;;  %v5075_v32 = vld [vmem:[%s10655_s20 + $0x68] sm:$0xff] }
 0x846   :  { %v7001_v42 = vpack.c.bf16 %v5105_v61, %v5105_v61  ;;  %v5033_v63 = vadd.f32 %v8084_v26, %v7454_v23  ;;  %v5058_v44 = vmul.f32 %v10249_v24, %v5025_v12  ;;  %v5103_v0 = vmax.f32 %v5087_v30, 0.0  ;;  %8136 = vmatprep.subr.bf16.mxu1 %v8451_v52  ;;  %v8462_v26 = vld [vmem:[%s10653_s21 + $0x40] sm:$0xff]   ;;  %v8459_v12 = vld [vmem:[#allocation2 + $0x18] sm:$0xff]   ;;  %v8463_v30 = vld [vmem:[#allocation2 + $0x10] sm:$0xff]  }
 0x847   :  { %5182 = vst.msk [vmem:[#allocation2 + $0x30] sm:$0xf] %vm78_vm2, %v6998_v19  ;;  %v7456_v57 = vpop.f32.mrf.mxu0  ;;  %v5027_v34 = vpop.f32.mrf.mxu1  ;;  %v8452_v1 = vld [vmem:[#allocation2 + $0x28] sm:$0xff]  }
 0x848   :  { %5185 = vst.msk [vmem:[#allocation2 + $0x3c] sm:$0xf] %vm78_vm2, %v7001_v42  ;;  %v5060_v25 = vmul.f32 %v10249_v24, %v5033_v63  ;;  %v5090_v27 = vadd.f32 %v5074_v11, %v5058_v44  ;;  %v7457_v15 = vadd.f32 %v7456_v57, %v7455_v5  ;;  %v5028_v28 = vadd.f32 %v7451_v46, %v5027_v34  ;;  %v8465_v11 = vld [vmem:[#allocation2 + $0x28] sm:$0xff]   ;;  %v8466_v5 = vld [vmem:[#allocation2 + $0x18] sm:$0xff]   ;;  %v8472_v46 = vld [vmem:[%s10653_s21 + $0x90] sm:$0xff]  }
 0x849   :  { %v6999_v47 = vpack.c.bf16 %v5103_v0, %v5103_v0  ;;  %v8450_v49 = vld [vmem:[#allocation2 + $0x20] sm:$0xff]   ;;  %8137 = vmatpush3.bf16.msra.mxu1 %v8451_v52  ;;  %v8477_v44 = vld [vmem:[%s10653_s21 + $0x88] sm:$0xff]  }
 0x84a   :  { %v5092_v40 = vadd.f32 %v5076_v58, %v5060_v25  ;;  %v5106_v54 = vmax.f32 %v5090_v27, 0.0  ;;  %v5036_v18 = vadd.f32 %v8085_v48, %v7457_v15  ;;  %v5059_v56 = vmul.f32 %v10249_v24, %v5028_v28  ;;  %8126 = vmatprep.mubr.msk.bf16.mxu0 %vm1178_vm3, %v8450_v49  ;;  %8138 = vmatprep.subr.bf16.mxu1 %v8456_v38  ;;  %v8464_v58 = vld [vmem:[#allocation2 + $0x20] sm:$0xff]   ;;  %v8471_v0 = vld [vmem:[#allocation2 + $0x28] sm:$0xff]   ;;  %v8482_v27 = vld [vmem:[#allocation2 + $0x50] sm:$0xff]  }
 0x84b   :  { %5183 = vst.msk [vmem:[#allocation2 + $0x34] sm:$0xf] %vm78_vm2, %v6999_v47  ;;  %8099 = vmatmul.mubr.msk.bf16.gmra.mxu1 %vm1178_vm3, %v8450_v49  ;;  %v8468_v48 = vld [vmem:[#allocation2 + $0x20] sm:$0xff]  }
 0x84c   :  { %v5108_v50 = vmax.f32 %v5092_v40, 0.0  ;;  %v7002_v53 = vpack.c.bf16 %v5106_v54, %v5106_v54  ;;  %v5061_v35 = vmul.f32 %v10249_v24, %v5036_v18  ;;  %v5091_v16 = vadd.f32 %v5075_v32, %v5059_v56  ;;  %8102 = vmatprep.mubr.msk.bf16.mxu1 %vm1178_vm3, %v8452_v1  ;;  %v8481_v47 = vld [vmem:[#allocation2 + $0x20] sm:$0xff]   ;;  %v8488_v18 = vld [vmem:[#allocation2 + $0x50] sm:$0xff]  }
 0x84d   :  { %8127 = vmatmul.mubr.msk.bf16.gmra.mxu0 %vm1178_vm3, %v8452_v1  ;;  %8139 = vmatpush3.bf16.msra.mxu1 %v8456_v38  ;;  %v8480_v38 = vld [vmem:[%s10653_s21 + $0x80] sm:$0xff]   ;;  %v8489_v1 = vld [vmem:[#allocation2 + $0x58] sm:$0xff]  }
 0x84e   :  { %v7004_v52 = vpack.c.bf16 %v5108_v50, %v5108_v50  ;;  %5186 = vst.msk [vmem:[#allocation2 + $0x40] sm:$0xf] %vm78_vm2, %v7002_v53  ;;  %v5093_v6 = vadd.f32 %v5077_v41, %v5061_v35  ;;  %v5107_v51 = vmax.f32 %v5091_v16, 0.0  ;;  %8140 = vmatprep.subr.bf16.mxu1 %v8462_v26  ;;  %v8483_v41 = vld [vmem:[#allocation2 + $0x28] sm:$0xff]  }
 0x84f   :  { %v8457_v23 = vld [vmem:[#allocation2 + $0x38] sm:$0xff]  }
 0x850   :  { %5188 = vst.msk [vmem:[#allocation2 + $0x48] sm:$0xf] %vm78_vm2, %v7004_v52  ;;  %v5109_v24 = vmax.f32 %v5093_v6, 0.0  ;;  %v7003_v33 = vpack.c.bf16 %v5107_v51, %v5107_v51  ;;  %v8470_v63 = vld [vmem:[#allocation2 + $0x38] sm:$0xff]  }
 0x851   :  { %8141 = vmatpush3.bf16.msra.mxu1 %v8462_v26  ;;  %v8476_v15 = vld [vmem:[#allocation2 + $0x38] sm:$0xff]   ;;  %v8120_v26 = vpop.f32.mrf.mxu0 }
 0x852   :  { %v7005_v2 = vpack.c.bf16 %v5109_v24, %v5109_v24  ;;  %5187 = vst.msk [vmem:[#allocation2 + $0x44] sm:$0xf] %vm78_vm2, %v7003_v33  ;;  %v8455_v61 = vld [vmem:[#allocation2 + $0x30] sm:$0xff]   ;;  %8182 = vmatprep.subr.bf16.mxu1 %v8467_v43  ;;  %v8485_v40 = vld [vmem:[#allocation2 + $0x38] sm:$0xff]  }
 0x853   :  { %8103 = vmatmul.mubr.msk.bf16.gmra.mxu1 %vm1178_vm3, %v8455_v61  ;;  %8130 = vmatprep.mubr.msk.bf16.mxu0 %vm1178_vm3, %v8455_v61  ;;  %v8469_v42 = vld [vmem:[#allocation2 + $0x30] sm:$0xff]   ;;  %v5476_v50 = vpop.f32.mrf.mxu0 }
 0x854   :  { %5189 = vst.msk [vmem:[#allocation2 + $0x4c] sm:$0xf] %vm78_vm2, %v7005_v2  ;;  %8106 = vmatprep.mubr.msk.bf16.mxu1 %vm1178_vm3, %v8457_v23  ;;  %v8473_v57 = vld [vmem:[#allocation2 + $0x30] sm:$0xff]  }
 0x855   :  { %8131 = vmatmul.mubr.msk.bf16.gmra.mxu0 %vm1178_vm3, %v8457_v23  ;;  %v8484_v49 = vld [vmem:[#allocation2 + $0x30] sm:$0xff]   ;;  %v8121_v53 = vpop.f32.mrf.mxu0 }
 0x856   :  { %8166 = vmatprep.mubr.msk.bf16.mxu0 %vm1178_vm3, %v8459_v12 }
 0x857   :  { %v5479_v35 = vpop.f32.mrf.mxu0 }
 0x859   :  { %v8461_v19 = vld [vmem:[#allocation2 + $0x40] sm:$0xff]  }
 0x85a   :  { %v8474_v34 = vld [vmem:[#allocation2 + $0x40] sm:$0xff]  }
 0x85b   :  { %8107 = vmatmul.mubr.msk.bf16.gmra.mxu1 %vm1178_vm3, %v8461_v19  ;;  %v8475_v25 = vld [vmem:[#allocation2 + $0x48] sm:$0xff]   ;;  %v8478_v28 = vld [vmem:[#allocation2 + $0x40] sm:$0xff]  }
 0x85c   :  { %8142 = vmatprep.mubr.msk.bf16.mxu1 %vm1178_vm3, %v8463_v30  ;;  %v8479_v32 = vld [vmem:[#allocation2 + $0x48] sm:$0xff]   ;;  %v8486_v54 = vld [vmem:[#allocation2 + $0x40] sm:$0xff]  }
 0x85d   :  { %8167 = vmatmul.mubr.msk.bf16.vlgmr.msra.gmra.mxu0 %vm1178_vm3, %v8464_v58  ;;  %v8487_v56 = vld [vmem:[#allocation2 + $0x48] sm:$0xff]  }
 0x85e   :  { %8170 = vmatprep.mubr.msk.bf16.mxu0 %vm1178_vm3, %v8465_v11 }
 0x863   :  { %8143 = vmatmul.mubr.msk.bf16.vlgmr.msra.gmra.mxu1 %vm1178_vm3, %v8466_v5 }
 0x864   :  { %8146 = vmatprep.mubr.msk.bf16.mxu1 %vm1178_vm3, %v8468_v48  ;;  %8183 = vmatpush3.bf16.msra.mxu1 %v8467_v43 }
 0x865   :  { %8171 = vmatmul.mubr.msk.bf16.gmra.mxu0 %vm1178_vm3, %v8469_v42  ;;  %8184 = vmatprep.subr.bf16.mxu1 %v8472_v46 }
 0x866   :  { %8174 = vmatprep.mubr.msk.bf16.mxu0 %vm1178_vm3, %v8470_v63 }
 0x868   :  { %8185 = vmatpush3.bf16.msra.mxu1 %v8472_v46 }
 0x869   :  { %8186 = vmatprep.subr.bf16.mxu1 %v8477_v44 }
 0x86b   :  { %8147 = vmatmul.mubr.msk.bf16.gmra.mxu1 %vm1178_vm3, %v8471_v0 }
 0x86c   :  { %8150 = vmatprep.mubr.msk.bf16.mxu1 %vm1178_vm3, %v8473_v57  ;;  %8187 = vmatpush3.bf16.msra.mxu1 %v8477_v44 }
 0x86d   :  { %8175 = vmatmul.mubr.msk.bf16.gmra.mxu0 %vm1178_vm3, %v8474_v34  ;;  %8188 = vmatprep.subr.bf16.mxu1 %v8480_v38 }
 0x86e   :  { %8178 = vmatprep.mubr.msk.bf16.mxu0 %vm1178_vm3, %v8475_v25 }
 0x870   :  { %8189 = vmatpush3.bf16.msra.mxu1 %v8480_v38 }
 0x873   :  { %8151 = vmatmul.mubr.msk.bf16.gmra.mxu1 %vm1178_vm3, %v8476_v15 }
 0x874   :  { %8154 = vmatprep.mubr.msk.bf16.mxu1 %vm1178_vm3, %v8478_v28 }
 0x875   :  { %8179 = vmatmul.mubr.msk.bf16.gmra.mxu0 %vm1178_vm3, %v8482_v27 }
 0x87b   :  { %8155 = vmatmul.mubr.msk.bf16.gmra.mxu1 %vm1178_vm3, %v8479_v32 }
 0x87c   :  { %8190 = vmatprep.mubr.msk.bf16.mxu1 %vm1178_vm3, %v8481_v47 }
 0x883   :  { %8191 = vmatmul.mubr.msk.bf16.vlgmr.msra.gmra.mxu1 %vm1178_vm3, %v8483_v41 }
 0x884   :  { %8194 = vmatprep.mubr.msk.bf16.mxu1 %vm1178_vm3, %v8484_v49 }
 0x88b   :  { %8195 = vmatmul.mubr.msk.bf16.gmra.mxu1 %vm1178_vm3, %v8485_v40 }
 0x88c   :  { %8198 = vmatprep.mubr.msk.bf16.mxu1 %vm1178_vm3, %v8486_v54 }
 0x893   :  { %8199 = vmatmul.mubr.msk.bf16.gmra.mxu1 %vm1178_vm3, %v8487_v56 }
 0x894   :  { %8202 = vmatprep.mubr.msk.bf16.mxu1 %vm1178_vm3, %v8488_v18 }
 0x89b   :  { %8203 = vmatmul.mubr.msk.bf16.gmra.mxu1 %vm1178_vm3, %v8489_v1 }
 0x903   :  { %v8096_v16 = vpop.f32.mrf.mxu1 }
 0x904   :  { %v5485_v20 = vadd.f32 %v8120_v26, %v8096_v16  ;;  %v10465_v26 = vld [vmem:[%s10656_s22] ss:$0 sm:$0xff] }
 0x905   :  { %v10400_v52 = vpop.f32.mrf.mxu0  ;;  %v5347_v6 = vpop.f32.mrf.mxu1 }
 0x906   :  { %v5477_v55 = vadd.f32 %v5476_v50, %v5347_v6 }
 0x907   :  { %v10402_v51 = vpop.f32.mrf.mxu0  ;;  %v8097_v43 = vpop.f32.mrf.mxu1 }
 0x909   :  { %v10404_v24 = vpop.f32.mrf.mxu0  ;;  %v5350_v33 = vpop.f32.mrf.mxu1 }
 0x90a   :  { %v5480_v62 = vadd.f32 %v5479_v35, %v5350_v33 }
 0x90b   :  { %v10406_v2 = vpop.f32.mrf.mxu0  ;;  %v8100_v61 = vpop.f32.mrf.mxu1 }
 0x90c   :  { %v5501_v6 = vadd.f32 %v10400_v52, %v8100_v61 }
 0x90d   :  { %v10408_v23 = vpop.f32.mrf.mxu0  ;;  %v5363_v12 = vpop.f32.mrf.mxu1 }
 0x90f   :  { %v10410_v19 = vpop.f32.mrf.mxu0  ;;  %v10412_v30 = vpop.f32.mrf.mxu1 }
 0x911   :  { %v10414_v58 = vpop.f32.mrf.mxu0  ;;  %v10416_v11 = vpop.f32.mrf.mxu1 }
 0x913   :  { %v10418_v5 = vpop.f32.mrf.mxu0  ;;  %v10420_v48 = vpop.f32.mrf.mxu1 }
 0x915   :  { %v10422_v42 = vpop.f32.mrf.mxu0  ;;  %v10424_v46 = vpop.f32.mrf.mxu1 }
 0x917   :  { %v10426_v63 = vpop.f32.mrf.mxu0  ;;  %v10428_v44 = vpop.f32.mrf.mxu1 }
 0x918   :  { %10851 = vst [vmem:[#allocation12_spill] sm:$0xff] %v10426_v63 }
 0x919   :  { %v10430_v0 = vpop.f32.mrf.mxu1  ;;  %v10432_v57 = vpop.f32.mrf.mxu0 }
 0x91a   :  { %10852 = vst [vmem:[#allocation17_spill] sm:$0xff] %v10432_v57  ;;  %v5488_v57 = vadd.f32 %v8121_v53, %v8097_v43  ;;  %v10472_v53 = vld [vmem:[%s10657_s23] ss:$0 sm:$0xff] }
 0x91b   :  { %v10434_v34 = vpop.f32.mrf.mxu1  ;;  %v10438_v25 = vpop.f32.mrf.mxu0 }
 0x91c   :  { %10853 = vst [vmem:[#allocation18_spill] sm:$0xff] %v10438_v25 }
 0x91d   :  { %v10436_v38 = vpop.f32.mrf.mxu1  ;;  %v8168_v28 = vpop.f32.mrf.mxu0 }
 0x91f   :  { %v10440_v27 = vpop.f32.mrf.mxu1  ;;  %v5912_v41 = vpop.f32.mrf.mxu0 }
 0x920   :  { %10854 = vst [vmem:[#allocation15_spill] sm:$0xff] %v10440_v27 }
 0x921   :  { %v10442_v15 = vpop.f32.mrf.mxu1  ;;  %v8169_v54 = vpop.f32.mrf.mxu0 }
 0x922   :  { %10855 = vst [vmem:[#allocation4_spill] sm:$0xff] %v10442_v15 }
 0x923   :  { %v8144_v32 = vpop.f32.mrf.mxu1  ;;  %v5915_v1 = vpop.f32.mrf.mxu0 }
 0x924   :  { %v5751_v9 = vadd.f32 %v8144_v32, %v5485_v20 }
 0x925   :  { %v5686_v47 = vpop.f32.mrf.mxu1  ;;  %v8172_v7 = vpop.f32.mrf.mxu0 }
 0x926   :  { %v5749_v27 = vadd.f32 %v5686_v47, %v5477_v55  ;;  %v5493_v55 = vadd.f32 %v10402_v51, %v5363_v12 }
 0x927   :  { %v8145_v49 = vpop.f32.mrf.mxu1  ;;  %v5928_v10 = vpop.f32.mrf.mxu0 }
 0x928   :  { %v5752_v4 = vadd.f32 %v8145_v49, %v5488_v57  ;;  %v5975_v16 = vadd.f32 %v5912_v41, %v5749_v27 }
 0x929   :  { %v5689_v40 = vpop.f32.mrf.mxu1  ;;  %v8173_v60 = vpop.f32.mrf.mxu0 }
 0x92a   :  { %v5750_v20 = vadd.f32 %v5689_v40, %v5480_v62  ;;  %v5978_v57 = vadd.f32 %v8169_v54, %v5752_v4  ;;  %v5504_v62 = vadd.f32 %v10404_v24, %v10412_v30  ;;  %v10857_v4 = vmax.f32 %v9910_v3, 0.0 }
 0x92b   :  { %v8148_v18 = vpop.f32.mrf.mxu1  ;;  %v10454_v25 = vpop.f32.mrf.mxu0  ;;  %v5517_v54 = vadd.f32 %v10408_v23, %v10420_v48 }
 0x92c   :  { %v5976_v27 = vadd.f32 %v5915_v1, %v5750_v20 }
 0x92d   :  { %v5702_v56 = vpop.f32.mrf.mxu1  ;;  %v10460_v14 = vpop.f32.mrf.mxu0 }
 0x92f   :  { %v8149_v8 = vpop.f32.mrf.mxu1 }
 0x930   :  { %v5756_v32 = vadd.f32 %v8149_v8, %v5504_v62  ;;  %v10858_v8 = vmax.f32 %v9896_v22, 0.0  ;;  %v10859_v22 = vmax.f32 %v9900_v39, 0.0  ;;  %v10860_v62 = vmax.f32 %v9914_v36, 0.0 }
 0x931   :  { %v5705_v29 = vpop.f32.mrf.mxu1 }
 0x933   :  { %v8152_v17 = vpop.f32.mrf.mxu1 }
 0x935   :  { %v10444_v45 = vpop.f32.mrf.mxu1 }
 0x937   :  { %v10446_v31 = vpop.f32.mrf.mxu1 }
 0x939   :  { %v10448_v13 = vpop.f32.mrf.mxu1 }
 0x93a   :  { %10856 = vst [vmem:[#allocation3_spill] sm:$0xff] %v10448_v13  ;;  %v5977_v13 = vadd.f32 %v8168_v28, %v5751_v9  ;;  %v10474_v9 = vpop.f32.mrf.mxu0  ;;  %v5496_v28 = vadd.f32 %v10406_v2, %v10416_v11 }
 0x93b   :  { %v10450_v37 = vpop.f32.mrf.mxu1 }
 0x93c   :  { %v8177_v41 = vpop.f32.mrf.mxu0 }
 0x93d   :  { %v10452_v59 = vpop.f32.mrf.mxu1 }
 0x93e   :  { %v5947_v23 = vpop.f32.mrf.mxu0 }
 0x93f   :  { %v10456_v15 = vpop.f32.mrf.mxu1 }
 0x941   :  { %v10458_v21 = vpop.f32.mrf.mxu1 }
 0x943   :  { %v8192_v63 = vpop.f32.mrf.mxu1 }
 0x944   :  { %v6203_v50 = vadd.f32 %v8192_v63, %v5977_v13  ;;  %v5755_v13 = vadd.f32 %v8148_v18, %v5501_v6  ;;  %v5753_v63 = vadd.f32 %v5702_v56, %v5493_v55  ;;  %v5754_v18 = vadd.f32 %v5705_v29, %v5496_v28  ;;  %v10862_v28 = vld [vmem:[#allocation3_spill] sm:$0xff] }
 0x945   :  { %v6138_v35 = vpop.f32.mrf.mxu1  ;;  %v5759_v6 = vadd.f32 %v8152_v17, %v5517_v54  ;;  %v5512_v17 = vadd.f32 %v10418_v5, %v10430_v0 }
 0x946   :  { %v6226_v43 = vmul.f32 %v10465_v26, %v6203_v50  ;;  %v6201_v33 = vadd.f32 %v6138_v35, %v5975_v16  ;;  %v5981_v56 = vadd.f32 %v8172_v7, %v5755_v13  ;;  %v5979_v20 = vadd.f32 %v5928_v10, %v5753_v63 }
 0x947   :  { %v8193_v52 = vpop.f32.mrf.mxu1  ;;  %v5509_v16 = vadd.f32 %v10410_v19, %v10424_v46  ;;  %v5520_v19 = vadd.f32 %v10414_v58, %v10428_v44 }
 0x948   :  { %v6249_v51 = vadd.f32 %v10472_v53, %v6226_v43  ;;  %v6224_v61 = vmul.f32 %v10465_v26, %v6201_v33  ;;  %v6204_v12 = vadd.f32 %v8193_v52, %v5978_v57  ;;  %v5982_v43 = vadd.f32 %v8173_v60, %v5756_v32  ;;  %v8180_v57 = vpop.f32.mrf.mxu0 }
 0x949   :  { %v6141_v47 = vpop.f32.mrf.mxu1  ;;  %v5980_v33 = vadd.f32 %v10454_v25, %v5754_v18  ;;  %v5757_v5 = vadd.f32 %v10444_v45, %v5509_v16  ;;  %v5760_v0 = vadd.f32 %v10446_v31, %v5520_v19  ;;  %v5985_v52 = vadd.f32 %v10460_v14, %v5759_v6  ;;  %v10861_v31 = vld [vmem:[#allocation12_spill] sm:$0xff]  ;;  %v10863_v14 = vld [vmem:[#allocation22_spill] sm:$0xff]  ;;  %v10872_v19 = vld [vmem:[#allocation17_spill] sm:$0xff] }
 0x94a   :  { %v6265_v49 = vadd.f32 %v6249_v51, %v10857_v4  ;;  %v6247_v24 = vadd.f32 %v10472_v53, %v6224_v61  ;;  %v6227_v30 = vmul.f32 %v10465_v26, %v6204_v12  ;;  %v6202_v40 = vadd.f32 %v6141_v47, %v5976_v27 }
 0x94b   :  { %v8196_v1 = vpop.f32.mrf.mxu1  ;;  %v5533_v45 = vadd.f32 %v10422_v42, %v10434_v34  ;;  %v5525_v27 = vadd.f32 %v10861_v31, %v10436_v38  ;;  %v5758_v32 = vadd.f32 %v10862_v28, %v5512_v17  ;;  %v10864_v47 = vmax.f32 %v10863_v14, 0.0  ;;  %v10877_v28 = vld [vmem:[#allocation8_spill] sm:$0xff] }
 0x94c   :  { %v6281_v50 = vmax.f32 %v6265_v49, 0.0  ;;  %v6263_v2 = vadd.f32 %v6247_v24, %v10858_v8  ;;  %v6250_v11 = vadd.f32 %v10472_v53, %v6227_v30  ;;  %v6225_v3 = vmul.f32 %v10465_v26, %v6202_v40  ;;  %v5960_v24 = vpop.f32.mrf.mxu0  ;;  %v10865_v30 = vld [vmem:[#allocation20_spill] sm:$0xff] }
 0x94d   :  { %v6207_v55 = vadd.f32 %v8196_v1, %v5981_v56  ;;  %v6154_v35 = vpop.f32.mrf.mxu1  ;;  %v10866_v40 = vmax.f32 %v10865_v30, 0.0  ;;  %v5763_v18 = vadd.f32 %v10450_v37, %v5533_v45  ;;  %v5983_v1 = vadd.f32 %v10474_v9, %v5757_v5 }
 0x94e   :  { %6297 = vst.msk [vmem:[%s10658_s24 + $0x10] sm:$0xff] %vm1178_vm3, %v6281_v50  ;;  %v6279_v7 = vmax.f32 %v6263_v2, 0.0  ;;  %v6266_v10 = vadd.f32 %v6250_v11, %v10859_v22  ;;  %v6248_v29 = vadd.f32 %v10472_v53, %v6225_v3  ;;  %v6205_v48 = vadd.f32 %v6154_v35, %v5979_v20  ;;  %v10867_v2 = vld [vmem:[#allocation21_spill] sm:$0xff] }
 0x94f   :  { %v6230_v60 = vmul.f32 %v10465_v26, %v6207_v55  ;;  %v8197_v46 = vpop.f32.mrf.mxu1  ;;  %v5986_v50 = vadd.f32 %v8177_v41, %v5760_v0  ;;  %v10868_v11 = vmax.f32 %v10867_v2, 0.0  ;;  %v5761_v55 = vadd.f32 %v10452_v59, %v5525_v27 }
 0x950   :  { %6295 = vst.msk [vmem:[%s10658_s24] sm:$0xff] %vm1178_vm3, %v6279_v7  ;;  %v6282_v39 = vmax.f32 %v6266_v10, 0.0  ;;  %v6264_v13 = vadd.f32 %v6248_v29, %v10860_v62  ;;  %v6228_v58 = vmul.f32 %v10465_v26, %v6205_v48  ;;  %v6208_v44 = vadd.f32 %v8197_v46, %v5982_v43  ;;  %v8181_v43 = vpop.f32.mrf.mxu0  ;;  %v10869_v7 = vld [vmem:[#allocation13_spill] sm:$0xff]  ;;  %v10871_v48 = vld [vmem:[#allocation15_spill] sm:$0xff]  ;;  %v10874_v46 = vld [vmem:[#allocation18_spill] sm:$0xff] }
 0x951   :  { %v6253_v63 = vadd.f32 %v10472_v53, %v6230_v60  ;;  %v6157_v25 = vpop.f32.mrf.mxu1  ;;  %v5984_v9 = vadd.f32 %v5947_v23, %v5758_v32  ;;  %v10870_v22 = vmax.f32 %v10869_v7, 0.0  ;;  %v5536_v17 = vadd.f32 %v10872_v19, %v10871_v48  ;;  %v10873_v60 = vld [vmem:[#allocation4_spill] sm:$0xff]  ;;  %v10887_v48 = vld [vmem:[#allocation5_spill] sm:$0xff] }
 0x952   :  { %6298 = vst.msk [vmem:[%s10658_s24 + $0x18] sm:$0xff] %vm1178_vm3, %v6282_v39  ;;  %v6280_v51 = vmax.f32 %v6264_v13, 0.0  ;;  %v6251_v36 = vadd.f32 %v10472_v53, %v6228_v58  ;;  %v6231_v61 = vmul.f32 %v10465_v26, %v6208_v44  ;;  %v6206_v12 = vadd.f32 %v6157_v25, %v5980_v33  ;;  %v10875_v58 = vld [vmem:[#allocation9_spill] sm:$0xff] }
 0x953   :  { %v6269_v4 = vadd.f32 %v6253_v63, %v10864_v47  ;;  %v8200_v49 = vpop.f32.mrf.mxu1  ;;  %v5528_v33 = vadd.f32 %v10874_v46, %v10873_v60  ;;  %v5989_v23 = vadd.f32 %v8180_v57, %v5763_v18  ;;  %v10876_v44 = vmax.f32 %v10875_v58, 0.0  ;;  %v10881_v18 = vld [vmem:[#allocation6_spill] sm:$0xff]  ;;  %v10889_v60 = vld [vmem:[#allocation16_spill] sm:$0xff] }
 0x954   :  { %6296 = vst.msk [vmem:[%s10658_s24 + $0x8] sm:$0xff] %vm1178_vm3, %v6280_v51  ;;  %v6267_v54 = vadd.f32 %v6251_v36, %v10866_v40  ;;  %v6254_v42 = vadd.f32 %v10472_v53, %v6231_v61  ;;  %v6229_v34 = vmul.f32 %v10465_v26, %v6206_v12  ;;  %v6211_v38 = vadd.f32 %v8200_v49, %v5985_v52  ;;  %v5963_v61 = vpop.f32.mrf.mxu0 }
 0x955   :  { %v6285_v56 = vmax.f32 %v6269_v4, 0.0  ;;  %v6170_v20 = vpop.f32.mrf.mxu1  ;;  %v5764_v25 = vadd.f32 %v10456_v15, %v5536_v17  ;;  %v5987_v52 = vadd.f32 %v5960_v24, %v5761_v55  ;;  %v5762_v57 = vadd.f32 %v10458_v21, %v5528_v33  ;;  %v10879_v21 = vld [vmem:[#allocation7_spill] sm:$0xff] }
 0x956   :  { %v6283_v8 = vmax.f32 %v6267_v54, 0.0  ;;  %v6270_v3 = vadd.f32 %v6254_v42, %v10868_v11  ;;  %v6252_v16 = vadd.f32 %v10472_v53, %v6229_v34  ;;  %v6234_v6 = vmul.f32 %v10465_v26, %v6211_v38 }
 0x957   :  { %6301 = vst.msk [vmem:[%s10658_s24 + $0x30] sm:$0xff] %vm1178_vm3, %v6285_v56  ;;  %v6209_v37 = vadd.f32 %v6170_v20, %v5983_v1  ;;  %v8201_v35 = vpop.f32.mrf.mxu1  ;;  %v10878_v15 = vmax.f32 %v10877_v28, 0.0  ;;  %v10880_v47 = vmax.f32 %v10879_v21, 0.0  ;;  %v5990_v40 = vadd.f32 %v8181_v43, %v5764_v25  ;;  %v10885_v43 = vld [vmem:[#allocation11_spill] sm:$0xff] }
 0x958   :  { %6299 = vst.msk [vmem:[%s10658_s24 + $0x20] sm:$0xff] %vm1178_vm3, %v6283_v8  ;;  %v6286_v41 = vmax.f32 %v6270_v3, 0.0  ;;  %v6268_v10 = vadd.f32 %v6252_v16, %v10870_v22  ;;  %v6257_v59 = vadd.f32 %v10472_v53, %v6234_v6  ;;  %v6212_v29 = vadd.f32 %v8201_v35, %v5986_v50  ;;  %v10883_v3 = vld [vmem:[#allocation10_spill] sm:$0xff] }
 0x959   :  { %v6232_v39 = vmul.f32 %v10465_v26, %v6209_v37  ;;  %v6173_v62 = vpop.f32.mrf.mxu1  ;;  %v5988_v54 = vadd.f32 %v5963_v61, %v5762_v57  ;;  %v10882_v56 = vmax.f32 %v10881_v18, 0.0  ;;  %v10884_v16 = vmax.f32 %v10883_v3, 0.0 }
 0x95a   :  { %6302 = vst.msk [vmem:[%s10658_s24 + $0x38] sm:$0xff] %vm1178_vm3, %v6286_v41  ;;  %v6284_v13 = vmax.f32 %v6268_v10, 0.0  ;;  %v6273_v5 = vadd.f32 %v6257_v59, %v10876_v44  ;;  %v6235_v0 = vmul.f32 %v10465_v26, %v6212_v29  ;;  %v6210_v63 = vadd.f32 %v6173_v62, %v5984_v9 }
 0x95b   :  { %v6255_v51 = vadd.f32 %v10472_v53, %v6232_v39  ;;  %v8204_v36 = vpop.f32.mrf.mxu1  ;;  %v10886_v41 = vmax.f32 %v10885_v43, 0.0  ;;  %v10888_v19 = vmax.f32 %v10887_v48, 0.0 }
 0x95c   :  { %6300 = vst.msk [vmem:[%s10658_s24 + $0x28] sm:$0xff] %vm1178_vm3, %v6284_v13  ;;  %v6289_v12 = vmax.f32 %v6273_v5, 0.0  ;;  %v6258_v45 = vadd.f32 %v10472_v53, %v6235_v0  ;;  %v6233_v31 = vmul.f32 %v10465_v26, %v6210_v63  ;;  %v6215_v27 = vadd.f32 %v8204_v36, %v5989_v23 }
 0x95d   :  { %v6271_v32 = vadd.f32 %v6255_v51, %v10878_v15  ;;  %v6186_v14 = vpop.f32.mrf.mxu1 }
 0x95e   :  { %6305 = vst.msk [vmem:[%s10658_s24 + $0x50] sm:$0xff] %vm1178_vm3, %v6289_v12  ;;  %v6274_v4 = vadd.f32 %v6258_v45, %v10880_v47  ;;  %v6256_v49 = vadd.f32 %v10472_v53, %v6233_v31  ;;  %v6238_v24 = vmul.f32 %v10465_v26, %v6215_v27  ;;  %v6213_v30 = vadd.f32 %v6186_v14, %v5987_v52 }
 0x95f   :  { %v6287_v42 = vmax.f32 %v6271_v32, 0.0  ;;  %v8205_v34 = vpop.f32.mrf.mxu1 }
 0x960   :  { %v6290_v38 = vmax.f32 %v6274_v4, 0.0  ;;  %v6272_v1 = vadd.f32 %v6256_v49, %v10882_v56  ;;  %v6261_v20 = vadd.f32 %v10472_v53, %v6238_v24  ;;  %v6236_v50 = vmul.f32 %v10465_v26, %v6213_v30 }
 0x961   :  { %6303 = vst.msk [vmem:[%s10658_s24 + $0x40] sm:$0xff] %vm1178_vm3, %v6287_v42  ;;  %v6216_v8 = vadd.f32 %v8205_v34, %v5990_v40  ;;  %v6189_v2 = vpop.f32.mrf.mxu1 }
 0x962   :  { %6306 = vst.msk [vmem:[%s10658_s24 + $0x58] sm:$0xff] %vm1178_vm3, %v6290_v38  ;;  %v6288_v11 = vmax.f32 %v6272_v1, 0.0  ;;  %v6277_v6 = vadd.f32 %v6261_v20, %v10884_v16  ;;  %v6259_v55 = vadd.f32 %v10472_v53, %v6236_v50  ;;  %v6214_v37 = vadd.f32 %v6189_v2, %v5988_v54 }
 0x963   :  { %v6239_v35 = vmul.f32 %v10465_v26, %v6216_v8 }
 0x964   :  { %6304 = vst.msk [vmem:[%s10658_s24 + $0x48] sm:$0xff] %vm1178_vm3, %v6288_v11  ;;  %v6293_v9 = vmax.f32 %v6277_v6, 0.0  ;;  %v6275_v7 = vadd.f32 %v6259_v55, %v10886_v41  ;;  %v6237_v22 = vmul.f32 %v10465_v26, %v6214_v37  ;;  %v10890_v26 = vmax.f32 %v10889_v60, 0.0 }
 0x965   :  { %v6262_v10 = vadd.f32 %v10472_v53, %v6239_v35 }
 0x966   :  { %6309 = vst.msk [vmem:[%s10658_s24 + $0x70] sm:$0xff] %vm1178_vm3, %v6293_v9  ;;  %v6291_v59 = vmax.f32 %v6275_v7, 0.0  ;;  %v6260_v29 = vadd.f32 %v10472_v53, %v6237_v22 }
 0x967   :  { %v6278_v17 = vadd.f32 %v6262_v10, %v10888_v19 }
 0x968   :  { %6307 = vst.msk [vmem:[%s10658_s24 + $0x60] sm:$0xff] %vm1178_vm3, %v6291_v59  ;;  %v6276_v46 = vadd.f32 %v6260_v29, %v10890_v26 }
 0x969   :  { %v6294_v33 = vmax.f32 %v6278_v17, 0.0 }
 0x96a   :  { %v6292_v23 = vmax.f32 %v6276_v46, 0.0 }
 0x96b   :  { %6310 = vst.msk [vmem:[%s10658_s24 + $0x78] sm:$0xff] %vm1178_vm3, %v6294_v33 }
 0x96c   :  { %6308 = vst.msk [vmem:[%s10658_s24 + $0x68] sm:$0xff] %vm1178_vm3, %v6292_v23 }

</bundles_post_ra>
